<compile_context>
chip_gen: v6e
topology: v6e:2x2x1
jax: 0.10.0
libtpu: 0.0.40
codegen_flags: <defaults>
</compile_context>

<pallas_src>
import jax
import jax.numpy as jnp
from jax.experimental import pallas as pl
from jax.experimental.pallas import tpu as pltpu

# ---- small, self-consistent config (args.*) ---------------------------------
B = 2                # batch
T = 8                # sequence length (meta and main)
META_INPUT_DIM = 4   # args.meta_input_dim
META_DIM = 16        # args.meta_dim
MAIN_INPUT_DIM = 8   # args.main_input_dim
MAIN_DIM = 64        # args.main_dim  (output_layer is Linear(64, 1))
Z_DIM = 8            # args.z_dim
# cell = "GRU", bidirectional = True, use_attention = True


# =============================== fused kernel ================================

def hyper_rnn_kernel(meta_x_ref, main_x_ref,
                     wxf_ref, whf_ref, bxf_ref, bhf_ref,
                     wxb_ref, whb_ref, bxb_ref, bhb_ref,
                     wmbf_ref, wmbb_ref, bmb_ref,
                     wbrf_ref, wbrb_ref, bbr_ref,
                     wx_ref, wh_ref, bx_ref, bh_ref,
                     wq_ref, wz_ref, bz_ref, wdxh_ref,
                     wo_ref, bo_ref,
                     out_ref, zs_ref):
    f32 = jnp.float32
    M = META_DIM
    H = MAIN_DIM

    def mm(a, b):
        return jnp.dot(a, b, preferred_element_type=f32)

    # ---- hoisted, batched input projections (one matmul per weight) ---------
    gi_f_all = mm(meta_x_ref[...], wxf_ref[...]) + bxf_ref[...]   # (T*B, 3M)
    gi_b_all = mm(meta_x_ref[...], wxb_ref[...]) + bxb_ref[...]   # (T*B, 3M)
    xw_all = mm(main_x_ref[...], wx_ref[...])                     # (T*B, 3H)

    whf = whf_ref[...]
    bhf = bhf_ref[...]
    whb = whb_ref[...]
    bhb = bhb_ref[...]

    # ---- MetaRnnNet: 1-layer bidirectional GRU (fully unrolled, T=8) --------
    def gru_dir(gi_all, wh, bh, reverse):
        h = jnp.zeros((B, M), f32)
        outs = [None] * T
        steps = range(T - 1, -1, -1) if reverse else range(T)
        for t in steps:
            gi = gi_all[t * B:(t + 1) * B, :]
            gh = mm(h, wh) + bh
            r = jax.nn.sigmoid(gi[:, :M] + gh[:, :M])
            u = jax.nn.sigmoid(gi[:, M:2 * M] + gh[:, M:2 * M])
            n = jnp.tanh(gi[:, 2 * M:] + r * gh[:, 2 * M:])
            h = (1.0 - u) * n + u * h
            outs[t] = h
        return outs, h

    out_f, h_f = gru_dir(gi_f_all, whf, bhf, reverse=False)
    out_b, h_b = gru_dir(gi_b_all, whb, bhb, reverse=True)

    # meta_bridge(concat([fwd, bwd])) per timestep, with the (2M, M) weight
    # pre-split into halves so no lane concatenation is needed.
    bmb = bmb_ref[...]
    wmbf = wmbf_ref[...]
    wmbb = wmbb_ref[...]
    bridged = [mm(out_f[t], wmbf) + mm(out_b[t], wmbb) + bmb       # (B, M)
               for t in range(T)]

    # bridge(concat([h_f, h_b])) -> initial main hidden state
    h = mm(h_f, wbrf_ref[...]) + mm(h_b, wbrb_ref[...]) + bbr_ref[...]  # (B, H)

    # ---- MainRNN: attention-driven hyper-GRU (fully unrolled, T=8) ----------
    wh = wh_ref[...]
    bx = bx_ref[...]
    bh = bh_ref[...]
    wq = wq_ref[...]
    wz = wz_ref[...]
    bz = bz_ref[...]
    wdxh = wdxh_ref[...]

    for t in range(T):
        # attention over bridged meta outputs (query = current hidden state)
        q = mm(h, wq)                                              # (B, M)
        sc = [jnp.sum(q * bridged[s], axis=-1, keepdims=True)      # (B, 1)
              for s in range(T)]
        mx = sc[0]
        for s in range(1, T):
            mx = jnp.maximum(mx, sc[s])
        e = [jnp.exp(sc[s] - mx) for s in range(T)]
        denom = e[0]
        for s in range(1, T):
            denom = denom + e[s]
        inv = pl.reciprocal(denom, approx=True)                    # (B, 1)
        ctx = (e[0] * inv) * bridged[0]
        for s in range(1, T):
            ctx = ctx + (e[s] * inv) * bridged[s]                  # (B, M)

        # hyper embedding z_t and multiplicative gate modulation
        z = jnp.tanh(mm(ctx, wz) + bz)                             # (B, Z)
        dxh = mm(z, wdxh)                                          # (B, 6H)
        dx = dxh[:, :3 * H]
        dh = dxh[:, 3 * H:]

        gi = xw_all[t * B:(t + 1) * B, :] * (1.0 + dx) + bx        # (B, 3H)
        gh = mm(h, wh) * (1.0 + dh) + bh                           # (B, 3H)

        r = jax.nn.sigmoid(gi[:, :H] + gh[:, :H])
        u = jax.nn.sigmoid(gi[:, H:2 * H] + gh[:, H:2 * H])
        n = jnp.tanh(gi[:, 2 * H:] + r * gh[:, 2 * H:])
        h = (1.0 - u) * n + u * h

        zs_ref[t] = z                                              # (B, Z)

    # output_layer on the last main hidden state
    out_ref[...] = mm(h, wo_ref[...]) + bo_ref[...]                # (B, 1)


# ============================== model forward =================================

def hyper_rnn_forward(params, meta_inputs, main_inputs):
    """meta_inputs: (B, T, meta_input_dim); main_inputs: (B, T, main_input_dim)."""
    Bn, Tn, Dm = meta_inputs.shape
    Dmain = main_inputs.shape[-1]

    # time-major flatten: row t*B + b holds (b, t, :)
    meta_x = jnp.transpose(meta_inputs, (1, 0, 2)).reshape(Tn * Bn, Dm)
    main_x = jnp.transpose(main_inputs, (1, 0, 2)).reshape(Tn * Bn, Dmain)

    flat = (meta_x, main_x,
            params['wxf'], params['whf'], params['bxf'], params['bhf'],
            params['wxb'], params['whb'], params['bxb'], params['bhb'],
            params['wmbf'], params['wmbb'], params['bmb'],
            params['wbrf'], params['wbrb'], params['bbr'],
            params['wx'], params['wh'], params['bx'], params['bh'],
            params['wq'], params['wz'], params['bz'], params['wdxh'],
            params['wo'], params['bo'])

    outputs, zs = pl.pallas_call(
        hyper_rnn_kernel,
        out_shape=(jax.ShapeDtypeStruct((Bn, 1), jnp.float32),
                   jax.ShapeDtypeStruct((Tn, Bn, Z_DIM), jnp.float32)),
        compiler_params=pltpu.CompilerParams(vmem_limit_bytes=32 * 1024 * 1024),
    )(*flat)
    return outputs, zs                                            # zs: (T, B, Z)


# ============================== parameter init ================================

def init_params(key):
    keys = iter(jax.random.split(key, 40))

    def u(shape, fan_in):
        s = float(fan_in) ** -0.5
        return jax.random.uniform(next(keys), shape, jnp.float32, -s, s)

    M, H, Z = META_DIM, MAIN_DIM, Z_DIM
    return {
        # meta bidirectional GRU
        'wxf': u((META_INPUT_DIM, 3 * M), META_INPUT_DIM),
        'whf': u((M, 3 * M), M),
        'bxf': u((1, 3 * M), M),
        'bhf': u((1, 3 * M), M),
        'wxb': u((META_INPUT_DIM, 3 * M), META_INPUT_DIM),
        'whb': u((M, 3 * M), M),
        'bxb': u((1, 3 * M), M),
        'bhb': u((1, 3 * M), M),
        # meta_bridge: Linear(2M, M), weight split into fwd/bwd halves
        'wmbf': u((M, M), 2 * M),
        'wmbb': u((M, M), 2 * M),
        'bmb': u((1, M), 2 * M),
        # bridge: Linear(2M, main_dim), weight split into fwd/bwd halves
        'wbrf': u((M, H), 2 * M),
        'wbrb': u((M, H), 2 * M),
        'bbr': u((1, H), 2 * M),
        # main hyper-GRU
        'wx': u((MAIN_INPUT_DIM, 3 * H), MAIN_INPUT_DIM),
        'wh': u((H, 3 * H), H),
        'bx': u((1, 3 * H), H),
        'bh': u((1, 3 * H), H),
        'wq': u((H, M), H),
        'wz': u((M, Z), M),
        'bz': u((1, Z), M),
        'wdxh': u((Z, 6 * H), Z),        # fused [wdx | wdh]
        # output layer Linear(64, 1)
        'wo': u((H, 1), H),
        'bo': u((1, 1), H),
    }


# ==================================== main ====================================

if __name__ == "__main__":
    key = jax.random.PRNGKey(0)
    k_meta, k_main, k_params = jax.random.split(key, 3)

    meta_inputs = jax.random.normal(k_meta, (B, T, META_INPUT_DIM), jnp.float32)
    main_inputs = jax.random.normal(k_main, (B, T, MAIN_INPUT_DIM), jnp.float32)
    params = init_params(k_params)

    fwd = jax.jit(hyper_rnn_forward)
    outputs, zs = fwd(params, meta_inputs, main_inputs)
    jax.block_until_ready((outputs, zs))

    assert outputs.shape == (B, 1), outputs.shape
    assert zs.shape == (T, B, Z_DIM), zs.shape
    assert bool(jnp.all(jnp.isfinite(outputs))) and bool(jnp.all(jnp.isfinite(zs)))
    print("KERNEL_OK")
</pallas_src>

<mosaic_0001>
module attributes {stable_mosaic.version = 11 : i64} {
  func.func @hyper_rnn_kernel(%arg0: memref<16x4xf32, #tpu.memory_space<vmem>>, %arg1: memref<16x8xf32, #tpu.memory_space<vmem>>, %arg2: memref<4x48xf32, #tpu.memory_space<vmem>>, %arg3: memref<16x48xf32, #tpu.memory_space<vmem>>, %arg4: memref<1x48xf32, #tpu.memory_space<vmem>>, %arg5: memref<1x48xf32, #tpu.memory_space<vmem>>, %arg6: memref<4x48xf32, #tpu.memory_space<vmem>>, %arg7: memref<16x48xf32, #tpu.memory_space<vmem>>, %arg8: memref<1x48xf32, #tpu.memory_space<vmem>>, %arg9: memref<1x48xf32, #tpu.memory_space<vmem>>, %arg10: memref<16x16xf32, #tpu.memory_space<vmem>>, %arg11: memref<16x16xf32, #tpu.memory_space<vmem>>, %arg12: memref<1x16xf32, #tpu.memory_space<vmem>>, %arg13: memref<16x64xf32, #tpu.memory_space<vmem>>, %arg14: memref<16x64xf32, #tpu.memory_space<vmem>>, %arg15: memref<1x64xf32, #tpu.memory_space<vmem>>, %arg16: memref<8x192xf32, #tpu.memory_space<vmem>>, %arg17: memref<64x192xf32, #tpu.memory_space<vmem>>, %arg18: memref<1x192xf32, #tpu.memory_space<vmem>>, %arg19: memref<1x192xf32, #tpu.memory_space<vmem>>, %arg20: memref<64x16xf32, #tpu.memory_space<vmem>>, %arg21: memref<16x8xf32, #tpu.memory_space<vmem>>, %arg22: memref<1x8xf32, #tpu.memory_space<vmem>>, %arg23: memref<8x384xf32, #tpu.memory_space<vmem>>, %arg24: memref<64x1xf32, #tpu.memory_space<vmem>>, %arg25: memref<1x1xf32, #tpu.memory_space<vmem>>, %arg26: memref<2x1xf32, #tpu.memory_space<vmem>>, %arg27: memref<8x2x8xf32, #tpu.memory_space<vmem>>) attributes {dimension_semantics = [], scalar_prefetch = 0 : i64, scratch_operands = 0 : i64, tpu.core_type = #tpu.core_type<tc>} {
    %c0 = arith.constant 0 : index
    %c0_0 = arith.constant 0 : index
    %0 = vector.load %arg0[%c0, %c0_0] : memref<16x4xf32, #tpu.memory_space<vmem>>, vector<16x4xf32>
    %c0_1 = arith.constant 0 : index
    %c0_2 = arith.constant 0 : index
    %1 = vector.load %arg2[%c0_1, %c0_2] : memref<4x48xf32, #tpu.memory_space<vmem>>, vector<4x48xf32>
    %cst = arith.constant dense<0.000000e+00> : vector<16x48xf32>
    %2 = tpu.matmul %0, %1, %cst {dimension_numbers = #tpu.dot_dimension_numbers<[1], [0], [0], [1], [0, 0, 1, 1], [], []>} : vector<16x4xf32>, vector<4x48xf32>, vector<16x48xf32> -> vector<16x48xf32>
    %c0_3 = arith.constant 0 : index
    %c0_4 = arith.constant 0 : index
    %3 = vector.load %arg4[%c0_3, %c0_4] : memref<1x48xf32, #tpu.memory_space<vmem>>, vector<1x48xf32>
    %4 = vector.broadcast %3 : vector<1x48xf32> to vector<16x48xf32>
    %5 = arith.addf %2, %4 : vector<16x48xf32>
    %c0_5 = arith.constant 0 : index
    %c0_6 = arith.constant 0 : index
    %6 = vector.load %arg0[%c0_5, %c0_6] : memref<16x4xf32, #tpu.memory_space<vmem>>, vector<16x4xf32>
    %c0_7 = arith.constant 0 : index
    %c0_8 = arith.constant 0 : index
    %7 = vector.load %arg6[%c0_7, %c0_8] : memref<4x48xf32, #tpu.memory_space<vmem>>, vector<4x48xf32>
    %cst_9 = arith.constant dense<0.000000e+00> : vector<16x48xf32>
    %8 = tpu.matmul %6, %7, %cst_9 {dimension_numbers = #tpu.dot_dimension_numbers<[1], [0], [0], [1], [0, 0, 1, 1], [], []>} : vector<16x4xf32>, vector<4x48xf32>, vector<16x48xf32> -> vector<16x48xf32>
    %c0_10 = arith.constant 0 : index
    %c0_11 = arith.constant 0 : index
    %9 = vector.load %arg8[%c0_10, %c0_11] : memref<1x48xf32, #tpu.memory_space<vmem>>, vector<1x48xf32>
    %10 = vector.broadcast %9 : vector<1x48xf32> to vector<16x48xf32>
    %11 = arith.addf %8, %10 : vector<16x48xf32>
    %c0_12 = arith.constant 0 : index
    %c0_13 = arith.constant 0 : index
    %12 = vector.load %arg1[%c0_12, %c0_13] : memref<16x8xf32, #tpu.memory_space<vmem>>, vector<16x8xf32>
    %c0_14 = arith.constant 0 : index
    %c0_15 = arith.constant 0 : index
    %13 = vector.load %arg16[%c0_14, %c0_15] : memref<8x192xf32, #tpu.memory_space<vmem>>, vector<8x192xf32>
    %cst_16 = arith.constant dense<0.000000e+00> : vector<16x192xf32>
    %14 = tpu.matmul %12, %13, %cst_16 {dimension_numbers = #tpu.dot_dimension_numbers<[1], [0], [0], [1], [0, 0, 1, 1], [], []>} : vector<16x8xf32>, vector<8x192xf32>, vector<16x192xf32> -> vector<16x192xf32>
    %c0_17 = arith.constant 0 : index
    %c0_18 = arith.constant 0 : index
    %15 = vector.load %arg3[%c0_17, %c0_18] : memref<16x48xf32, #tpu.memory_space<vmem>>, vector<16x48xf32>
    %c0_19 = arith.constant 0 : index
    %c0_20 = arith.constant 0 : index
    %16 = vector.load %arg5[%c0_19, %c0_20] : memref<1x48xf32, #tpu.memory_space<vmem>>, vector<1x48xf32>
    %c0_21 = arith.constant 0 : index
    %c0_22 = arith.constant 0 : index
    %17 = vector.load %arg7[%c0_21, %c0_22] : memref<16x48xf32, #tpu.memory_space<vmem>>, vector<16x48xf32>
    %c0_23 = arith.constant 0 : index
    %c0_24 = arith.constant 0 : index
    %18 = vector.load %arg9[%c0_23, %c0_24] : memref<1x48xf32, #tpu.memory_space<vmem>>, vector<1x48xf32>
    %cst_25 = arith.constant 0.000000e+00 : f32
    %19 = vector.broadcast %cst_25 : f32 to vector<2x16xf32>
    %20 = vector.extract_strided_slice %5 {offsets = [0, 0], sizes = [2, 48], strides = [1, 1]} : vector<16x48xf32> to vector<2x48xf32>
    %cst_26 = arith.constant dense<0.000000e+00> : vector<2x48xf32>
    %21 = tpu.matmul %19, %15, %cst_26 {dimension_numbers = #tpu.dot_dimension_numbers<[1], [0], [0], [1], [0, 0, 1, 1], [], []>} : vector<2x16xf32>, vector<16x48xf32>, vector<2x48xf32> -> vector<2x48xf32>
    %22 = vector.broadcast %16 : vector<1x48xf32> to vector<2x48xf32>
    %23 = arith.addf %21, %22 : vector<2x48xf32>
    %24 = vector.extract_strided_slice %20 {offsets = [0, 0], sizes = [2, 16], strides = [1, 1]} : vector<2x48xf32> to vector<2x16xf32>
    %25 = vector.extract_strided_slice %23 {offsets = [0, 0], sizes = [2, 16], strides = [1, 1]} : vector<2x48xf32> to vector<2x16xf32>
    %26 = arith.addf %24, %25 : vector<2x16xf32>
    %27 = arith.negf %26 : vector<2x16xf32>
    %28 = math.exp %27 : vector<2x16xf32>
    %cst_27 = arith.constant 1.000000e+00 : f32
    %29 = vector.broadcast %cst_27 : f32 to vector<2x16xf32>
    %30 = arith.addf %29, %28 : vector<2x16xf32>
    %31 = arith.divf %29, %30 : vector<2x16xf32>
    %32 = vector.extract_strided_slice %20 {offsets = [0, 16], sizes = [2, 16], strides = [1, 1]} : vector<2x48xf32> to vector<2x16xf32>
    %33 = vector.extract_strided_slice %23 {offsets = [0, 16], sizes = [2, 16], strides = [1, 1]} : vector<2x48xf32> to vector<2x16xf32>
    %34 = arith.addf %32, %33 : vector<2x16xf32>
    %35 = arith.negf %34 : vector<2x16xf32>
    %36 = math.exp %35 : vector<2x16xf32>
    %cst_28 = arith.constant 1.000000e+00 : f32
    %37 = vector.broadcast %cst_28 : f32 to vector<2x16xf32>
    %38 = arith.addf %37, %36 : vector<2x16xf32>
    %39 = arith.divf %37, %38 : vector<2x16xf32>
    %40 = vector.extract_strided_slice %20 {offsets = [0, 32], sizes = [2, 16], strides = [1, 1]} : vector<2x48xf32> to vector<2x16xf32>
    %41 = vector.extract_strided_slice %23 {offsets = [0, 32], sizes = [2, 16], strides = [1, 1]} : vector<2x48xf32> to vector<2x16xf32>
    %42 = arith.mulf %31, %41 : vector<2x16xf32>
    %43 = arith.addf %40, %42 : vector<2x16xf32>
    %44 = math.tanh %43 : vector<2x16xf32>
    %cst_29 = arith.constant 1.000000e+00 : f32
    %45 = vector.broadcast %cst_29 : f32 to vector<2x16xf32>
    %46 = arith.subf %45, %39 : vector<2x16xf32>
    %47 = arith.mulf %46, %44 : vector<2x16xf32>
    %48 = arith.mulf %39, %19 : vector<2x16xf32>
    %49 = arith.addf %47, %48 : vector<2x16xf32>
    %50 = vector.extract_strided_slice %5 {offsets = [2, 0], sizes = [2, 48], strides = [1, 1]} : vector<16x48xf32> to vector<2x48xf32>
    %cst_30 = arith.constant dense<0.000000e+00> : vector<2x48xf32>
    %51 = tpu.matmul %49, %15, %cst_30 {dimension_numbers = #tpu.dot_dimension_numbers<[1], [0], [0], [1], [0, 0, 1, 1], [], []>} : vector<2x16xf32>, vector<16x48xf32>, vector<2x48xf32> -> vector<2x48xf32>
    %52 = vector.broadcast %16 : vector<1x48xf32> to vector<2x48xf32>
    %53 = arith.addf %51, %52 : vector<2x48xf32>
    %54 = vector.extract_strided_slice %50 {offsets = [0, 0], sizes = [2, 16], strides = [1, 1]} : vector<2x48xf32> to vector<2x16xf32>
    %55 = vector.extract_strided_slice %53 {offsets = [0, 0], sizes = [2, 16], strides = [1, 1]} : vector<2x48xf32> to vector<2x16xf32>
    %56 = arith.addf %54, %55 : vector<2x16xf32>
    %57 = arith.negf %56 : vector<2x16xf32>
    %58 = math.exp %57 : vector<2x16xf32>
    %cst_31 = arith.constant 1.000000e+00 : f32
    %59 = vector.broadcast %cst_31 : f32 to vector<2x16xf32>
    %60 = arith.addf %59, %58 : vector<2x16xf32>
    %61 = arith.divf %59, %60 : vector<2x16xf32>
    %62 = vector.extract_strided_slice %50 {offsets = [0, 16], sizes = [2, 16], strides = [1, 1]} : vector<2x48xf32> to vector<2x16xf32>
    %63 = vector.extract_strided_slice %53 {offsets = [0, 16], sizes = [2, 16], strides = [1, 1]} : vector<2x48xf32> to vector<2x16xf32>
    %64 = arith.addf %62, %63 : vector<2x16xf32>
    %65 = arith.negf %64 : vector<2x16xf32>
    %66 = math.exp %65 : vector<2x16xf32>
    %cst_32 = arith.constant 1.000000e+00 : f32
    %67 = vector.broadcast %cst_32 : f32 to vector<2x16xf32>
    %68 = arith.addf %67, %66 : vector<2x16xf32>
    %69 = arith.divf %67, %68 : vector<2x16xf32>
    %70 = vector.extract_strided_slice %50 {offsets = [0, 32], sizes = [2, 16], strides = [1, 1]} : vector<2x48xf32> to vector<2x16xf32>
    %71 = vector.extract_strided_slice %53 {offsets = [0, 32], sizes = [2, 16], strides = [1, 1]} : vector<2x48xf32> to vector<2x16xf32>
    %72 = arith.mulf %61, %71 : vector<2x16xf32>
    %73 = arith.addf %70, %72 : vector<2x16xf32>
    %74 = math.tanh %73 : vector<2x16xf32>
    %cst_33 = arith.constant 1.000000e+00 : f32
    %75 = vector.broadcast %cst_33 : f32 to vector<2x16xf32>
    %76 = arith.subf %75, %69 : vector<2x16xf32>
    %77 = arith.mulf %76, %74 : vector<2x16xf32>
    %78 = arith.mulf %69, %49 : vector<2x16xf32>
    %79 = arith.addf %77, %78 : vector<2x16xf32>
    %80 = vector.extract_strided_slice %5 {offsets = [4, 0], sizes = [2, 48], strides = [1, 1]} : vector<16x48xf32> to vector<2x48xf32>
    %cst_34 = arith.constant dense<0.000000e+00> : vector<2x48xf32>
    %81 = tpu.matmul %79, %15, %cst_34 {dimension_numbers = #tpu.dot_dimension_numbers<[1], [0], [0], [1], [0, 0, 1, 1], [], []>} : vector<2x16xf32>, vector<16x48xf32>, vector<2x48xf32> -> vector<2x48xf32>
    %82 = vector.broadcast %16 : vector<1x48xf32> to vector<2x48xf32>
    %83 = arith.addf %81, %82 : vector<2x48xf32>
    %84 = vector.extract_strided_slice %80 {offsets = [0, 0], sizes = [2, 16], strides = [1, 1]} : vector<2x48xf32> to vector<2x16xf32>
    %85 = vector.extract_strided_slice %83 {offsets = [0, 0], sizes = [2, 16], strides = [1, 1]} : vector<2x48xf32> to vector<2x16xf32>
    %86 = arith.addf %84, %85 : vector<2x16xf32>
    %87 = arith.negf %86 : vector<2x16xf32>
    %88 = math.exp %87 : vector<2x16xf32>
    %cst_35 = arith.constant 1.000000e+00 : f32
    %89 = vector.broadcast %cst_35 : f32 to vector<2x16xf32>
    %90 = arith.addf %89, %88 : vector<2x16xf32>
    %91 = arith.divf %89, %90 : vector<2x16xf32>
    %92 = vector.extract_strided_slice %80 {offsets = [0, 16], sizes = [2, 16], strides = [1, 1]} : vector<2x48xf32> to vector<2x16xf32>
    %93 = vector.extract_strided_slice %83 {offsets = [0, 16], sizes = [2, 16], strides = [1, 1]} : vector<2x48xf32> to vector<2x16xf32>
    %94 = arith.addf %92, %93 : vector<2x16xf32>
    %95 = arith.negf %94 : vector<2x16xf32>
    %96 = math.exp %95 : vector<2x16xf32>
    %cst_36 = arith.constant 1.000000e+00 : f32
    %97 = vector.broadcast %cst_36 : f32 to vector<2x16xf32>
    %98 = arith.addf %97, %96 : vector<2x16xf32>
    %99 = arith.divf %97, %98 : vector<2x16xf32>
    %100 = vector.extract_strided_slice %80 {offsets = [0, 32], sizes = [2, 16], strides = [1, 1]} : vector<2x48xf32> to vector<2x16xf32>
    %101 = vector.extract_strided_slice %83 {offsets = [0, 32], sizes = [2, 16], strides = [1, 1]} : vector<2x48xf32> to vector<2x16xf32>
    %102 = arith.mulf %91, %101 : vector<2x16xf32>
    %103 = arith.addf %100, %102 : vector<2x16xf32>
    %104 = math.tanh %103 : vector<2x16xf32>
    %cst_37 = arith.constant 1.000000e+00 : f32
    %105 = vector.broadcast %cst_37 : f32 to vector<2x16xf32>
    %106 = arith.subf %105, %99 : vector<2x16xf32>
    %107 = arith.mulf %106, %104 : vector<2x16xf32>
    %108 = arith.mulf %99, %79 : vector<2x16xf32>
    %109 = arith.addf %107, %108 : vector<2x16xf32>
    %110 = vector.extract_strided_slice %5 {offsets = [6, 0], sizes = [2, 48], strides = [1, 1]} : vector<16x48xf32> to vector<2x48xf32>
    %cst_38 = arith.constant dense<0.000000e+00> : vector<2x48xf32>
    %111 = tpu.matmul %109, %15, %cst_38 {dimension_numbers = #tpu.dot_dimension_numbers<[1], [0], [0], [1], [0, 0, 1, 1], [], []>} : vector<2x16xf32>, vector<16x48xf32>, vector<2x48xf32> -> vector<2x48xf32>
    %112 = vector.broadcast %16 : vector<1x48xf32> to vector<2x48xf32>
    %113 = arith.addf %111, %112 : vector<2x48xf32>
    %114 = vector.extract_strided_slice %110 {offsets = [0, 0], sizes = [2, 16], strides = [1, 1]} : vector<2x48xf32> to vector<2x16xf32>
    %115 = vector.extract_strided_slice %113 {offsets = [0, 0], sizes = [2, 16], strides = [1, 1]} : vector<2x48xf32> to vector<2x16xf32>
    %116 = arith.addf %114, %115 : vector<2x16xf32>
    %117 = arith.negf %116 : vector<2x16xf32>
    %118 = math.exp %117 : vector<2x16xf32>
    %cst_39 = arith.constant 1.000000e+00 : f32
    %119 = vector.broadcast %cst_39 : f32 to vector<2x16xf32>
    %120 = arith.addf %119, %118 : vector<2x16xf32>
    %121 = arith.divf %119, %120 : vector<2x16xf32>
    %122 = vector.extract_strided_slice %110 {offsets = [0, 16], sizes = [2, 16], strides = [1, 1]} : vector<2x48xf32> to vector<2x16xf32>
    %123 = vector.extract_strided_slice %113 {offsets = [0, 16], sizes = [2, 16], strides = [1, 1]} : vector<2x48xf32> to vector<2x16xf32>
    %124 = arith.addf %122, %123 : vector<2x16xf32>
    %125 = arith.negf %124 : vector<2x16xf32>
    %126 = math.exp %125 : vector<2x16xf32>
    %cst_40 = arith.constant 1.000000e+00 : f32
    %127 = vector.broadcast %cst_40 : f32 to vector<2x16xf32>
    %128 = arith.addf %127, %126 : vector<2x16xf32>
    %129 = arith.divf %127, %128 : vector<2x16xf32>
    %130 = vector.extract_strided_slice %110 {offsets = [0, 32], sizes = [2, 16], strides = [1, 1]} : vector<2x48xf32> to vector<2x16xf32>
    %131 = vector.extract_strided_slice %113 {offsets = [0, 32], sizes = [2, 16], strides = [1, 1]} : vector<2x48xf32> to vector<2x16xf32>
    %132 = arith.mulf %121, %131 : vector<2x16xf32>
    %133 = arith.addf %130, %132 : vector<2x16xf32>
    %134 = math.tanh %133 : vector<2x16xf32>
    %cst_41 = arith.constant 1.000000e+00 : f32
    %135 = vector.broadcast %cst_41 : f32 to vector<2x16xf32>
    %136 = arith.subf %135, %129 : vector<2x16xf32>
    %137 = arith.mulf %136, %134 : vector<2x16xf32>
    %138 = arith.mulf %129, %109 : vector<2x16xf32>
    %139 = arith.addf %137, %138 : vector<2x16xf32>
    %140 = vector.extract_strided_slice %5 {offsets = [8, 0], sizes = [2, 48], strides = [1, 1]} : vector<16x48xf32> to vector<2x48xf32>
    %cst_42 = arith.constant dense<0.000000e+00> : vector<2x48xf32>
    %141 = tpu.matmul %139, %15, %cst_42 {dimension_numbers = #tpu.dot_dimension_numbers<[1], [0], [0], [1], [0, 0, 1, 1], [], []>} : vector<2x16xf32>, vector<16x48xf32>, vector<2x48xf32> -> vector<2x48xf32>
    %142 = vector.broadcast %16 : vector<1x48xf32> to vector<2x48xf32>
    %143 = arith.addf %141, %142 : vector<2x48xf32>
    %144 = vector.extract_strided_slice %140 {offsets = [0, 0], sizes = [2, 16], strides = [1, 1]} : vector<2x48xf32> to vector<2x16xf32>
    %145 = vector.extract_strided_slice %143 {offsets = [0, 0], sizes = [2, 16], strides = [1, 1]} : vector<2x48xf32> to vector<2x16xf32>
    %146 = arith.addf %144, %145 : vector<2x16xf32>
    %147 = arith.negf %146 : vector<2x16xf32>
    %148 = math.exp %147 : vector<2x16xf32>
    %cst_43 = arith.constant 1.000000e+00 : f32
    %149 = vector.broadcast %cst_43 : f32 to vector<2x16xf32>
    %150 = arith.addf %149, %148 : vector<2x16xf32>
    %151 = arith.divf %149, %150 : vector<2x16xf32>
    %152 = vector.extract_strided_slice %140 {offsets = [0, 16], sizes = [2, 16], strides = [1, 1]} : vector<2x48xf32> to vector<2x16xf32>
    %153 = vector.extract_strided_slice %143 {offsets = [0, 16], sizes = [2, 16], strides = [1, 1]} : vector<2x48xf32> to vector<2x16xf32>
    %154 = arith.addf %152, %153 : vector<2x16xf32>
    %155 = arith.negf %154 : vector<2x16xf32>
    %156 = math.exp %155 : vector<2x16xf32>
    %cst_44 = arith.constant 1.000000e+00 : f32
    %157 = vector.broadcast %cst_44 : f32 to vector<2x16xf32>
    %158 = arith.addf %157, %156 : vector<2x16xf32>
    %159 = arith.divf %157, %158 : vector<2x16xf32>
    %160 = vector.extract_strided_slice %140 {offsets = [0, 32], sizes = [2, 16], strides = [1, 1]} : vector<2x48xf32> to vector<2x16xf32>
    %161 = vector.extract_strided_slice %143 {offsets = [0, 32], sizes = [2, 16], strides = [1, 1]} : vector<2x48xf32> to vector<2x16xf32>
    %162 = arith.mulf %151, %161 : vector<2x16xf32>
    %163 = arith.addf %160, %162 : vector<2x16xf32>
    %164 = math.tanh %163 : vector<2x16xf32>
    %cst_45 = arith.constant 1.000000e+00 : f32
    %165 = vector.broadcast %cst_45 : f32 to vector<2x16xf32>
    %166 = arith.subf %165, %159 : vector<2x16xf32>
    %167 = arith.mulf %166, %164 : vector<2x16xf32>
    %168 = arith.mulf %159, %139 : vector<2x16xf32>
    %169 = arith.addf %167, %168 : vector<2x16xf32>
    %170 = vector.extract_strided_slice %5 {offsets = [10, 0], sizes = [2, 48], strides = [1, 1]} : vector<16x48xf32> to vector<2x48xf32>
    %cst_46 = arith.constant dense<0.000000e+00> : vector<2x48xf32>
    %171 = tpu.matmul %169, %15, %cst_46 {dimension_numbers = #tpu.dot_dimension_numbers<[1], [0], [0], [1], [0, 0, 1, 1], [], []>} : vector<2x16xf32>, vector<16x48xf32>, vector<2x48xf32> -> vector<2x48xf32>
    %172 = vector.broadcast %16 : vector<1x48xf32> to vector<2x48xf32>
    %173 = arith.addf %171, %172 : vector<2x48xf32>
    %174 = vector.extract_strided_slice %170 {offsets = [0, 0], sizes = [2, 16], strides = [1, 1]} : vector<2x48xf32> to vector<2x16xf32>
    %175 = vector.extract_strided_slice %173 {offsets = [0, 0], sizes = [2, 16], strides = [1, 1]} : vector<2x48xf32> to vector<2x16xf32>
    %176 = arith.addf %174, %175 : vector<2x16xf32>
    %177 = arith.negf %176 : vector<2x16xf32>
    %178 = math.exp %177 : vector<2x16xf32>
    %cst_47 = arith.constant 1.000000e+00 : f32
    %179 = vector.broadcast %cst_47 : f32 to vector<2x16xf32>
    %180 = arith.addf %179, %178 : vector<2x16xf32>
    %181 = arith.divf %179, %180 : vector<2x16xf32>
    %182 = vector.extract_strided_slice %170 {offsets = [0, 16], sizes = [2, 16], strides = [1, 1]} : vector<2x48xf32> to vector<2x16xf32>
    %183 = vector.extract_strided_slice %173 {offsets = [0, 16], sizes = [2, 16], strides = [1, 1]} : vector<2x48xf32> to vector<2x16xf32>
    %184 = arith.addf %182, %183 : vector<2x16xf32>
    %185 = arith.negf %184 : vector<2x16xf32>
    %186 = math.exp %185 : vector<2x16xf32>
    %cst_48 = arith.constant 1.000000e+00 : f32
    %187 = vector.broadcast %cst_48 : f32 to vector<2x16xf32>
    %188 = arith.addf %187, %186 : vector<2x16xf32>
    %189 = arith.divf %187, %188 : vector<2x16xf32>
    %190 = vector.extract_strided_slice %170 {offsets = [0, 32], sizes = [2, 16], strides = [1, 1]} : vector<2x48xf32> to vector<2x16xf32>
    %191 = vector.extract_strided_slice %173 {offsets = [0, 32], sizes = [2, 16], strides = [1, 1]} : vector<2x48xf32> to vector<2x16xf32>
    %192 = arith.mulf %181, %191 : vector<2x16xf32>
    %193 = arith.addf %190, %192 : vector<2x16xf32>
    %194 = math.tanh %193 : vector<2x16xf32>
    %cst_49 = arith.constant 1.000000e+00 : f32
    %195 = vector.broadcast %cst_49 : f32 to vector<2x16xf32>
    %196 = arith.subf %195, %189 : vector<2x16xf32>
    %197 = arith.mulf %196, %194 : vector<2x16xf32>
    %198 = arith.mulf %189, %169 : vector<2x16xf32>
    %199 = arith.addf %197, %198 : vector<2x16xf32>
    %200 = vector.extract_strided_slice %5 {offsets = [12, 0], sizes = [2, 48], strides = [1, 1]} : vector<16x48xf32> to vector<2x48xf32>
    %cst_50 = arith.constant dense<0.000000e+00> : vector<2x48xf32>
    %201 = tpu.matmul %199, %15, %cst_50 {dimension_numbers = #tpu.dot_dimension_numbers<[1], [0], [0], [1], [0, 0, 1, 1], [], []>} : vector<2x16xf32>, vector<16x48xf32>, vector<2x48xf32> -> vector<2x48xf32>
    %202 = vector.broadcast %16 : vector<1x48xf32> to vector<2x48xf32>
    %203 = arith.addf %201, %202 : vector<2x48xf32>
    %204 = vector.extract_strided_slice %200 {offsets = [0, 0], sizes = [2, 16], strides = [1, 1]} : vector<2x48xf32> to vector<2x16xf32>
    %205 = vector.extract_strided_slice %203 {offsets = [0, 0], sizes = [2, 16], strides = [1, 1]} : vector<2x48xf32> to vector<2x16xf32>
    %206 = arith.addf %204, %205 : vector<2x16xf32>
    %207 = arith.negf %206 : vector<2x16xf32>
    %208 = math.exp %207 : vector<2x16xf32>
    %cst_51 = arith.constant 1.000000e+00 : f32
    %209 = vector.broadcast %cst_51 : f32 to vector<2x16xf32>
    %210 = arith.addf %209, %208 : vector<2x16xf32>
    %211 = arith.divf %209, %210 : vector<2x16xf32>
    %212 = vector.extract_strided_slice %200 {offsets = [0, 16], sizes = [2, 16], strides = [1, 1]} : vector<2x48xf32> to vector<2x16xf32>
    %213 = vector.extract_strided_slice %203 {offsets = [0, 16], sizes = [2, 16], strides = [1, 1]} : vector<2x48xf32> to vector<2x16xf32>
    %214 = arith.addf %212, %213 : vector<2x16xf32>
    %215 = arith.negf %214 : vector<2x16xf32>
    %216 = math.exp %215 : vector<2x16xf32>
    %cst_52 = arith.constant 1.000000e+00 : f32
    %217 = vector.broadcast %cst_52 : f32 to vector<2x16xf32>
    %218 = arith.addf %217, %216 : vector<2x16xf32>
    %219 = arith.divf %217, %218 : vector<2x16xf32>
    %220 = vector.extract_strided_slice %200 {offsets = [0, 32], sizes = [2, 16], strides = [1, 1]} : vector<2x48xf32> to vector<2x16xf32>
    %221 = vector.extract_strided_slice %203 {offsets = [0, 32], sizes = [2, 16], strides = [1, 1]} : vector<2x48xf32> to vector<2x16xf32>
    %222 = arith.mulf %211, %221 : vector<2x16xf32>
    %223 = arith.addf %220, %222 : vector<2x16xf32>
    %224 = math.tanh %223 : vector<2x16xf32>
    %cst_53 = arith.constant 1.000000e+00 : f32
    %225 = vector.broadcast %cst_53 : f32 to vector<2x16xf32>
    %226 = arith.subf %225, %219 : vector<2x16xf32>
    %227 = arith.mulf %226, %224 : vector<2x16xf32>
    %228 = arith.mulf %219, %199 : vector<2x16xf32>
    %229 = arith.addf %227, %228 : vector<2x16xf32>
    %230 = vector.extract_strided_slice %5 {offsets = [14, 0], sizes = [2, 48], strides = [1, 1]} : vector<16x48xf32> to vector<2x48xf32>
    %cst_54 = arith.constant dense<0.000000e+00> : vector<2x48xf32>
    %231 = tpu.matmul %229, %15, %cst_54 {dimension_numbers = #tpu.dot_dimension_numbers<[1], [0], [0], [1], [0, 0, 1, 1], [], []>} : vector<2x16xf32>, vector<16x48xf32>, vector<2x48xf32> -> vector<2x48xf32>
    %232 = vector.broadcast %16 : vector<1x48xf32> to vector<2x48xf32>
    %233 = arith.addf %231, %232 : vector<2x48xf32>
    %234 = vector.extract_strided_slice %230 {offsets = [0, 0], sizes = [2, 16], strides = [1, 1]} : vector<2x48xf32> to vector<2x16xf32>
    %235 = vector.extract_strided_slice %233 {offsets = [0, 0], sizes = [2, 16], strides = [1, 1]} : vector<2x48xf32> to vector<2x16xf32>
    %236 = arith.addf %234, %235 : vector<2x16xf32>
    %237 = arith.negf %236 : vector<2x16xf32>
    %238 = math.exp %237 : vector<2x16xf32>
    %cst_55 = arith.constant 1.000000e+00 : f32
    %239 = vector.broadcast %cst_55 : f32 to vector<2x16xf32>
    %240 = arith.addf %239, %238 : vector<2x16xf32>
    %241 = arith.divf %239, %240 : vector<2x16xf32>
    %242 = vector.extract_strided_slice %230 {offsets = [0, 16], sizes = [2, 16], strides = [1, 1]} : vector<2x48xf32> to vector<2x16xf32>
    %243 = vector.extract_strided_slice %233 {offsets = [0, 16], sizes = [2, 16], strides = [1, 1]} : vector<2x48xf32> to vector<2x16xf32>
    %244 = arith.addf %242, %243 : vector<2x16xf32>
    %245 = arith.negf %244 : vector<2x16xf32>
    %246 = math.exp %245 : vector<2x16xf32>
    %cst_56 = arith.constant 1.000000e+00 : f32
    %247 = vector.broadcast %cst_56 : f32 to vector<2x16xf32>
    %248 = arith.addf %247, %246 : vector<2x16xf32>
    %249 = arith.divf %247, %248 : vector<2x16xf32>
    %250 = vector.extract_strided_slice %230 {offsets = [0, 32], sizes = [2, 16], strides = [1, 1]} : vector<2x48xf32> to vector<2x16xf32>
    %251 = vector.extract_strided_slice %233 {offsets = [0, 32], sizes = [2, 16], strides = [1, 1]} : vector<2x48xf32> to vector<2x16xf32>
    %252 = arith.mulf %241, %251 : vector<2x16xf32>
    %253 = arith.addf %250, %252 : vector<2x16xf32>
    %254 = math.tanh %253 : vector<2x16xf32>
    %cst_57 = arith.constant 1.000000e+00 : f32
    %255 = vector.broadcast %cst_57 : f32 to vector<2x16xf32>
    %256 = arith.subf %255, %249 : vector<2x16xf32>
    %257 = arith.mulf %256, %254 : vector<2x16xf32>
    %258 = arith.mulf %249, %229 : vector<2x16xf32>
    %259 = arith.addf %257, %258 : vector<2x16xf32>
    %cst_58 = arith.constant 0.000000e+00 : f32
    %260 = vector.broadcast %cst_58 : f32 to vector<2x16xf32>
    %261 = vector.extract_strided_slice %11 {offsets = [14, 0], sizes = [2, 48], strides = [1, 1]} : vector<16x48xf32> to vector<2x48xf32>
    %cst_59 = arith.constant dense<0.000000e+00> : vector<2x48xf32>
    %262 = tpu.matmul %260, %17, %cst_59 {dimension_numbers = #tpu.dot_dimension_numbers<[1], [0], [0], [1], [0, 0, 1, 1], [], []>} : vector<2x16xf32>, vector<16x48xf32>, vector<2x48xf32> -> vector<2x48xf32>
    %263 = vector.broadcast %18 : vector<1x48xf32> to vector<2x48xf32>
    %264 = arith.addf %262, %263 : vector<2x48xf32>
    %265 = vector.extract_strided_slice %261 {offsets = [0, 0], sizes = [2, 16], strides = [1, 1]} : vector<2x48xf32> to vector<2x16xf32>
    %266 = vector.extract_strided_slice %264 {offsets = [0, 0], sizes = [2, 16], strides = [1, 1]} : vector<2x48xf32> to vector<2x16xf32>
    %267 = arith.addf %265, %266 : vector<2x16xf32>
    %268 = arith.negf %267 : vector<2x16xf32>
    %269 = math.exp %268 : vector<2x16xf32>
    %cst_60 = arith.constant 1.000000e+00 : f32
    %270 = vector.broadcast %cst_60 : f32 to vector<2x16xf32>
    %271 = arith.addf %270, %269 : vector<2x16xf32>
    %272 = arith.divf %270, %271 : vector<2x16xf32>
    %273 = vector.extract_strided_slice %261 {offsets = [0, 16], sizes = [2, 16], strides = [1, 1]} : vector<2x48xf32> to vector<2x16xf32>
    %274 = vector.extract_strided_slice %264 {offsets = [0, 16], sizes = [2, 16], strides = [1, 1]} : vector<2x48xf32> to vector<2x16xf32>
    %275 = arith.addf %273, %274 : vector<2x16xf32>
    %276 = arith.negf %275 : vector<2x16xf32>
    %277 = math.exp %276 : vector<2x16xf32>
    %cst_61 = arith.constant 1.000000e+00 : f32
    %278 = vector.broadcast %cst_61 : f32 to vector<2x16xf32>
    %279 = arith.addf %278, %277 : vector<2x16xf32>
    %280 = arith.divf %278, %279 : vector<2x16xf32>
    %281 = vector.extract_strided_slice %261 {offsets = [0, 32], sizes = [2, 16], strides = [1, 1]} : vector<2x48xf32> to vector<2x16xf32>
    %282 = vector.extract_strided_slice %264 {offsets = [0, 32], sizes = [2, 16], strides = [1, 1]} : vector<2x48xf32> to vector<2x16xf32>
    %283 = arith.mulf %272, %282 : vector<2x16xf32>
    %284 = arith.addf %281, %283 : vector<2x16xf32>
    %285 = math.tanh %284 : vector<2x16xf32>
    %cst_62 = arith.constant 1.000000e+00 : f32
    %286 = vector.broadcast %cst_62 : f32 to vector<2x16xf32>
    %287 = arith.subf %286, %280 : vector<2x16xf32>
    %288 = arith.mulf %287, %285 : vector<2x16xf32>
    %289 = arith.mulf %280, %260 : vector<2x16xf32>
    %290 = arith.addf %288, %289 : vector<2x16xf32>
    %291 = vector.extract_strided_slice %11 {offsets = [12, 0], sizes = [2, 48], strides = [1, 1]} : vector<16x48xf32> to vector<2x48xf32>
    %cst_63 = arith.constant dense<0.000000e+00> : vector<2x48xf32>
    %292 = tpu.matmul %290, %17, %cst_63 {dimension_numbers = #tpu.dot_dimension_numbers<[1], [0], [0], [1], [0, 0, 1, 1], [], []>} : vector<2x16xf32>, vector<16x48xf32>, vector<2x48xf32> -> vector<2x48xf32>
    %293 = vector.broadcast %18 : vector<1x48xf32> to vector<2x48xf32>
    %294 = arith.addf %292, %293 : vector<2x48xf32>
    %295 = vector.extract_strided_slice %291 {offsets = [0, 0], sizes = [2, 16], strides = [1, 1]} : vector<2x48xf32> to vector<2x16xf32>
    %296 = vector.extract_strided_slice %294 {offsets = [0, 0], sizes = [2, 16], strides = [1, 1]} : vector<2x48xf32> to vector<2x16xf32>
    %297 = arith.addf %295, %296 : vector<2x16xf32>
    %298 = arith.negf %297 : vector<2x16xf32>
    %299 = math.exp %298 : vector<2x16xf32>
    %cst_64 = arith.constant 1.000000e+00 : f32
    %300 = vector.broadcast %cst_64 : f32 to vector<2x16xf32>
    %301 = arith.addf %300, %299 : vector<2x16xf32>
    %302 = arith.divf %300, %301 : vector<2x16xf32>
    %303 = vector.extract_strided_slice %291 {offsets = [0, 16], sizes = [2, 16], strides = [1, 1]} : vector<2x48xf32> to vector<2x16xf32>
    %304 = vector.extract_strided_slice %294 {offsets = [0, 16], sizes = [2, 16], strides = [1, 1]} : vector<2x48xf32> to vector<2x16xf32>
    %305 = arith.addf %303, %304 : vector<2x16xf32>
    %306 = arith.negf %305 : vector<2x16xf32>
    %307 = math.exp %306 : vector<2x16xf32>
    %cst_65 = arith.constant 1.000000e+00 : f32
    %308 = vector.broadcast %cst_65 : f32 to vector<2x16xf32>
    %309 = arith.addf %308, %307 : vector<2x16xf32>
    %310 = arith.divf %308, %309 : vector<2x16xf32>
    %311 = vector.extract_strided_slice %291 {offsets = [0, 32], sizes = [2, 16], strides = [1, 1]} : vector<2x48xf32> to vector<2x16xf32>
    %312 = vector.extract_strided_slice %294 {offsets = [0, 32], sizes = [2, 16], strides = [1, 1]} : vector<2x48xf32> to vector<2x16xf32>
    %313 = arith.mulf %302, %312 : vector<2x16xf32>
    %314 = arith.addf %311, %313 : vector<2x16xf32>
    %315 = math.tanh %314 : vector<2x16xf32>
    %cst_66 = arith.constant 1.000000e+00 : f32
    %316 = vector.broadcast %cst_66 : f32 to vector<2x16xf32>
    %317 = arith.subf %316, %310 : vector<2x16xf32>
    %318 = arith.mulf %317, %315 : vector<2x16xf32>
    %319 = arith.mulf %310, %290 : vector<2x16xf32>
    %320 = arith.addf %318, %319 : vector<2x16xf32>
    %321 = vector.extract_strided_slice %11 {offsets = [10, 0], sizes = [2, 48], strides = [1, 1]} : vector<16x48xf32> to vector<2x48xf32>
    %cst_67 = arith.constant dense<0.000000e+00> : vector<2x48xf32>
    %322 = tpu.matmul %320, %17, %cst_67 {dimension_numbers = #tpu.dot_dimension_numbers<[1], [0], [0], [1], [0, 0, 1, 1], [], []>} : vector<2x16xf32>, vector<16x48xf32>, vector<2x48xf32> -> vector<2x48xf32>
    %323 = vector.broadcast %18 : vector<1x48xf32> to vector<2x48xf32>
    %324 = arith.addf %322, %323 : vector<2x48xf32>
    %325 = vector.extract_strided_slice %321 {offsets = [0, 0], sizes = [2, 16], strides = [1, 1]} : vector<2x48xf32> to vector<2x16xf32>
    %326 = vector.extract_strided_slice %324 {offsets = [0, 0], sizes = [2, 16], strides = [1, 1]} : vector<2x48xf32> to vector<2x16xf32>
    %327 = arith.addf %325, %326 : vector<2x16xf32>
    %328 = arith.negf %327 : vector<2x16xf32>
    %329 = math.exp %328 : vector<2x16xf32>
    %cst_68 = arith.constant 1.000000e+00 : f32
    %330 = vector.broadcast %cst_68 : f32 to vector<2x16xf32>
    %331 = arith.addf %330, %329 : vector<2x16xf32>
    %332 = arith.divf %330, %331 : vector<2x16xf32>
    %333 = vector.extract_strided_slice %321 {offsets = [0, 16], sizes = [2, 16], strides = [1, 1]} : vector<2x48xf32> to vector<2x16xf32>
    %334 = vector.extract_strided_slice %324 {offsets = [0, 16], sizes = [2, 16], strides = [1, 1]} : vector<2x48xf32> to vector<2x16xf32>
    %335 = arith.addf %333, %334 : vector<2x16xf32>
    %336 = arith.negf %335 : vector<2x16xf32>
    %337 = math.exp %336 : vector<2x16xf32>
    %cst_69 = arith.constant 1.000000e+00 : f32
    %338 = vector.broadcast %cst_69 : f32 to vector<2x16xf32>
    %339 = arith.addf %338, %337 : vector<2x16xf32>
    %340 = arith.divf %338, %339 : vector<2x16xf32>
    %341 = vector.extract_strided_slice %321 {offsets = [0, 32], sizes = [2, 16], strides = [1, 1]} : vector<2x48xf32> to vector<2x16xf32>
    %342 = vector.extract_strided_slice %324 {offsets = [0, 32], sizes = [2, 16], strides = [1, 1]} : vector<2x48xf32> to vector<2x16xf32>
    %343 = arith.mulf %332, %342 : vector<2x16xf32>
    %344 = arith.addf %341, %343 : vector<2x16xf32>
    %345 = math.tanh %344 : vector<2x16xf32>
    %cst_70 = arith.constant 1.000000e+00 : f32
    %346 = vector.broadcast %cst_70 : f32 to vector<2x16xf32>
    %347 = arith.subf %346, %340 : vector<2x16xf32>
    %348 = arith.mulf %347, %345 : vector<2x16xf32>
    %349 = arith.mulf %340, %320 : vector<2x16xf32>
    %350 = arith.addf %348, %349 : vector<2x16xf32>
    %351 = vector.extract_strided_slice %11 {offsets = [8, 0], sizes = [2, 48], strides = [1, 1]} : vector<16x48xf32> to vector<2x48xf32>
    %cst_71 = arith.constant dense<0.000000e+00> : vector<2x48xf32>
    %352 = tpu.matmul %350, %17, %cst_71 {dimension_numbers = #tpu.dot_dimension_numbers<[1], [0], [0], [1], [0, 0, 1, 1], [], []>} : vector<2x16xf32>, vector<16x48xf32>, vector<2x48xf32> -> vector<2x48xf32>
    %353 = vector.broadcast %18 : vector<1x48xf32> to vector<2x48xf32>
    %354 = arith.addf %352, %353 : vector<2x48xf32>
    %355 = vector.extract_strided_slice %351 {offsets = [0, 0], sizes = [2, 16], strides = [1, 1]} : vector<2x48xf32> to vector<2x16xf32>
    %356 = vector.extract_strided_slice %354 {offsets = [0, 0], sizes = [2, 16], strides = [1, 1]} : vector<2x48xf32> to vector<2x16xf32>
    %357 = arith.addf %355, %356 : vector<2x16xf32>
    %358 = arith.negf %357 : vector<2x16xf32>
    %359 = math.exp %358 : vector<2x16xf32>
    %cst_72 = arith.constant 1.000000e+00 : f32
    %360 = vector.broadcast %cst_72 : f32 to vector<2x16xf32>
    %361 = arith.addf %360, %359 : vector<2x16xf32>
    %362 = arith.divf %360, %361 : vector<2x16xf32>
    %363 = vector.extract_strided_slice %351 {offsets = [0, 16], sizes = [2, 16], strides = [1, 1]} : vector<2x48xf32> to vector<2x16xf32>
    %364 = vector.extract_strided_slice %354 {offsets = [0, 16], sizes = [2, 16], strides = [1, 1]} : vector<2x48xf32> to vector<2x16xf32>
    %365 = arith.addf %363, %364 : vector<2x16xf32>
    %366 = arith.negf %365 : vector<2x16xf32>
    %367 = math.exp %366 : vector<2x16xf32>
    %cst_73 = arith.constant 1.000000e+00 : f32
    %368 = vector.broadcast %cst_73 : f32 to vector<2x16xf32>
    %369 = arith.addf %368, %367 : vector<2x16xf32>
    %370 = arith.divf %368, %369 : vector<2x16xf32>
    %371 = vector.extract_strided_slice %351 {offsets = [0, 32], sizes = [2, 16], strides = [1, 1]} : vector<2x48xf32> to vector<2x16xf32>
    %372 = vector.extract_strided_slice %354 {offsets = [0, 32], sizes = [2, 16], strides = [1, 1]} : vector<2x48xf32> to vector<2x16xf32>
    %373 = arith.mulf %362, %372 : vector<2x16xf32>
    %374 = arith.addf %371, %373 : vector<2x16xf32>
    %375 = math.tanh %374 : vector<2x16xf32>
    %cst_74 = arith.constant 1.000000e+00 : f32
    %376 = vector.broadcast %cst_74 : f32 to vector<2x16xf32>
    %377 = arith.subf %376, %370 : vector<2x16xf32>
    %378 = arith.mulf %377, %375 : vector<2x16xf32>
    %379 = arith.mulf %370, %350 : vector<2x16xf32>
    %380 = arith.addf %378, %379 : vector<2x16xf32>
    %381 = vector.extract_strided_slice %11 {offsets = [6, 0], sizes = [2, 48], strides = [1, 1]} : vector<16x48xf32> to vector<2x48xf32>
    %cst_75 = arith.constant dense<0.000000e+00> : vector<2x48xf32>
    %382 = tpu.matmul %380, %17, %cst_75 {dimension_numbers = #tpu.dot_dimension_numbers<[1], [0], [0], [1], [0, 0, 1, 1], [], []>} : vector<2x16xf32>, vector<16x48xf32>, vector<2x48xf32> -> vector<2x48xf32>
    %383 = vector.broadcast %18 : vector<1x48xf32> to vector<2x48xf32>
    %384 = arith.addf %382, %383 : vector<2x48xf32>
    %385 = vector.extract_strided_slice %381 {offsets = [0, 0], sizes = [2, 16], strides = [1, 1]} : vector<2x48xf32> to vector<2x16xf32>
    %386 = vector.extract_strided_slice %384 {offsets = [0, 0], sizes = [2, 16], strides = [1, 1]} : vector<2x48xf32> to vector<2x16xf32>
    %387 = arith.addf %385, %386 : vector<2x16xf32>
    %388 = arith.negf %387 : vector<2x16xf32>
    %389 = math.exp %388 : vector<2x16xf32>
    %cst_76 = arith.constant 1.000000e+00 : f32
    %390 = vector.broadcast %cst_76 : f32 to vector<2x16xf32>
    %391 = arith.addf %390, %389 : vector<2x16xf32>
    %392 = arith.divf %390, %391 : vector<2x16xf32>
    %393 = vector.extract_strided_slice %381 {offsets = [0, 16], sizes = [2, 16], strides = [1, 1]} : vector<2x48xf32> to vector<2x16xf32>
    %394 = vector.extract_strided_slice %384 {offsets = [0, 16], sizes = [2, 16], strides = [1, 1]} : vector<2x48xf32> to vector<2x16xf32>
    %395 = arith.addf %393, %394 : vector<2x16xf32>
    %396 = arith.negf %395 : vector<2x16xf32>
    %397 = math.exp %396 : vector<2x16xf32>
    %cst_77 = arith.constant 1.000000e+00 : f32
    %398 = vector.broadcast %cst_77 : f32 to vector<2x16xf32>
    %399 = arith.addf %398, %397 : vector<2x16xf32>
    %400 = arith.divf %398, %399 : vector<2x16xf32>
    %401 = vector.extract_strided_slice %381 {offsets = [0, 32], sizes = [2, 16], strides = [1, 1]} : vector<2x48xf32> to vector<2x16xf32>
    %402 = vector.extract_strided_slice %384 {offsets = [0, 32], sizes = [2, 16], strides = [1, 1]} : vector<2x48xf32> to vector<2x16xf32>
    %403 = arith.mulf %392, %402 : vector<2x16xf32>
    %404 = arith.addf %401, %403 : vector<2x16xf32>
    %405 = math.tanh %404 : vector<2x16xf32>
    %cst_78 = arith.constant 1.000000e+00 : f32
    %406 = vector.broadcast %cst_78 : f32 to vector<2x16xf32>
    %407 = arith.subf %406, %400 : vector<2x16xf32>
    %408 = arith.mulf %407, %405 : vector<2x16xf32>
    %409 = arith.mulf %400, %380 : vector<2x16xf32>
    %410 = arith.addf %408, %409 : vector<2x16xf32>
    %411 = vector.extract_strided_slice %11 {offsets = [4, 0], sizes = [2, 48], strides = [1, 1]} : vector<16x48xf32> to vector<2x48xf32>
    %cst_79 = arith.constant dense<0.000000e+00> : vector<2x48xf32>
    %412 = tpu.matmul %410, %17, %cst_79 {dimension_numbers = #tpu.dot_dimension_numbers<[1], [0], [0], [1], [0, 0, 1, 1], [], []>} : vector<2x16xf32>, vector<16x48xf32>, vector<2x48xf32> -> vector<2x48xf32>
    %413 = vector.broadcast %18 : vector<1x48xf32> to vector<2x48xf32>
    %414 = arith.addf %412, %413 : vector<2x48xf32>
    %415 = vector.extract_strided_slice %411 {offsets = [0, 0], sizes = [2, 16], strides = [1, 1]} : vector<2x48xf32> to vector<2x16xf32>
    %416 = vector.extract_strided_slice %414 {offsets = [0, 0], sizes = [2, 16], strides = [1, 1]} : vector<2x48xf32> to vector<2x16xf32>
    %417 = arith.addf %415, %416 : vector<2x16xf32>
    %418 = arith.negf %417 : vector<2x16xf32>
    %419 = math.exp %418 : vector<2x16xf32>
    %cst_80 = arith.constant 1.000000e+00 : f32
    %420 = vector.broadcast %cst_80 : f32 to vector<2x16xf32>
    %421 = arith.addf %420, %419 : vector<2x16xf32>
    %422 = arith.divf %420, %421 : vector<2x16xf32>
    %423 = vector.extract_strided_slice %411 {offsets = [0, 16], sizes = [2, 16], strides = [1, 1]} : vector<2x48xf32> to vector<2x16xf32>
    %424 = vector.extract_strided_slice %414 {offsets = [0, 16], sizes = [2, 16], strides = [1, 1]} : vector<2x48xf32> to vector<2x16xf32>
    %425 = arith.addf %423, %424 : vector<2x16xf32>
    %426 = arith.negf %425 : vector<2x16xf32>
    %427 = math.exp %426 : vector<2x16xf32>
    %cst_81 = arith.constant 1.000000e+00 : f32
    %428 = vector.broadcast %cst_81 : f32 to vector<2x16xf32>
    %429 = arith.addf %428, %427 : vector<2x16xf32>
    %430 = arith.divf %428, %429 : vector<2x16xf32>
    %431 = vector.extract_strided_slice %411 {offsets = [0, 32], sizes = [2, 16], strides = [1, 1]} : vector<2x48xf32> to vector<2x16xf32>
    %432 = vector.extract_strided_slice %414 {offsets = [0, 32], sizes = [2, 16], strides = [1, 1]} : vector<2x48xf32> to vector<2x16xf32>
    %433 = arith.mulf %422, %432 : vector<2x16xf32>
    %434 = arith.addf %431, %433 : vector<2x16xf32>
    %435 = math.tanh %434 : vector<2x16xf32>
    %cst_82 = arith.constant 1.000000e+00 : f32
    %436 = vector.broadcast %cst_82 : f32 to vector<2x16xf32>
    %437 = arith.subf %436, %430 : vector<2x16xf32>
    %438 = arith.mulf %437, %435 : vector<2x16xf32>
    %439 = arith.mulf %430, %410 : vector<2x16xf32>
    %440 = arith.addf %438, %439 : vector<2x16xf32>
    %441 = vector.extract_strided_slice %11 {offsets = [2, 0], sizes = [2, 48], strides = [1, 1]} : vector<16x48xf32> to vector<2x48xf32>
    %cst_83 = arith.constant dense<0.000000e+00> : vector<2x48xf32>
    %442 = tpu.matmul %440, %17, %cst_83 {dimension_numbers = #tpu.dot_dimension_numbers<[1], [0], [0], [1], [0, 0, 1, 1], [], []>} : vector<2x16xf32>, vector<16x48xf32>, vector<2x48xf32> -> vector<2x48xf32>
    %443 = vector.broadcast %18 : vector<1x48xf32> to vector<2x48xf32>
    %444 = arith.addf %442, %443 : vector<2x48xf32>
    %445 = vector.extract_strided_slice %441 {offsets = [0, 0], sizes = [2, 16], strides = [1, 1]} : vector<2x48xf32> to vector<2x16xf32>
    %446 = vector.extract_strided_slice %444 {offsets = [0, 0], sizes = [2, 16], strides = [1, 1]} : vector<2x48xf32> to vector<2x16xf32>
    %447 = arith.addf %445, %446 : vector<2x16xf32>
    %448 = arith.negf %447 : vector<2x16xf32>
    %449 = math.exp %448 : vector<2x16xf32>
    %cst_84 = arith.constant 1.000000e+00 : f32
    %450 = vector.broadcast %cst_84 : f32 to vector<2x16xf32>
    %451 = arith.addf %450, %449 : vector<2x16xf32>
    %452 = arith.divf %450, %451 : vector<2x16xf32>
    %453 = vector.extract_strided_slice %441 {offsets = [0, 16], sizes = [2, 16], strides = [1, 1]} : vector<2x48xf32> to vector<2x16xf32>
    %454 = vector.extract_strided_slice %444 {offsets = [0, 16], sizes = [2, 16], strides = [1, 1]} : vector<2x48xf32> to vector<2x16xf32>
    %455 = arith.addf %453, %454 : vector<2x16xf32>
    %456 = arith.negf %455 : vector<2x16xf32>
    %457 = math.exp %456 : vector<2x16xf32>
    %cst_85 = arith.constant 1.000000e+00 : f32
    %458 = vector.broadcast %cst_85 : f32 to vector<2x16xf32>
    %459 = arith.addf %458, %457 : vector<2x16xf32>
    %460 = arith.divf %458, %459 : vector<2x16xf32>
    %461 = vector.extract_strided_slice %441 {offsets = [0, 32], sizes = [2, 16], strides = [1, 1]} : vector<2x48xf32> to vector<2x16xf32>
    %462 = vector.extract_strided_slice %444 {offsets = [0, 32], sizes = [2, 16], strides = [1, 1]} : vector<2x48xf32> to vector<2x16xf32>
    %463 = arith.mulf %452, %462 : vector<2x16xf32>
    %464 = arith.addf %461, %463 : vector<2x16xf32>
    %465 = math.tanh %464 : vector<2x16xf32>
    %cst_86 = arith.constant 1.000000e+00 : f32
    %466 = vector.broadcast %cst_86 : f32 to vector<2x16xf32>
    %467 = arith.subf %466, %460 : vector<2x16xf32>
    %468 = arith.mulf %467, %465 : vector<2x16xf32>
    %469 = arith.mulf %460, %440 : vector<2x16xf32>
    %470 = arith.addf %468, %469 : vector<2x16xf32>
    %471 = vector.extract_strided_slice %11 {offsets = [0, 0], sizes = [2, 48], strides = [1, 1]} : vector<16x48xf32> to vector<2x48xf32>
    %cst_87 = arith.constant dense<0.000000e+00> : vector<2x48xf32>
    %472 = tpu.matmul %470, %17, %cst_87 {dimension_numbers = #tpu.dot_dimension_numbers<[1], [0], [0], [1], [0, 0, 1, 1], [], []>} : vector<2x16xf32>, vector<16x48xf32>, vector<2x48xf32> -> vector<2x48xf32>
    %473 = vector.broadcast %18 : vector<1x48xf32> to vector<2x48xf32>
    %474 = arith.addf %472, %473 : vector<2x48xf32>
    %475 = vector.extract_strided_slice %471 {offsets = [0, 0], sizes = [2, 16], strides = [1, 1]} : vector<2x48xf32> to vector<2x16xf32>
    %476 = vector.extract_strided_slice %474 {offsets = [0, 0], sizes = [2, 16], strides = [1, 1]} : vector<2x48xf32> to vector<2x16xf32>
    %477 = arith.addf %475, %476 : vector<2x16xf32>
    %478 = arith.negf %477 : vector<2x16xf32>
    %479 = math.exp %478 : vector<2x16xf32>
    %cst_88 = arith.constant 1.000000e+00 : f32
    %480 = vector.broadcast %cst_88 : f32 to vector<2x16xf32>
    %481 = arith.addf %480, %479 : vector<2x16xf32>
    %482 = arith.divf %480, %481 : vector<2x16xf32>
    %483 = vector.extract_strided_slice %471 {offsets = [0, 16], sizes = [2, 16], strides = [1, 1]} : vector<2x48xf32> to vector<2x16xf32>
    %484 = vector.extract_strided_slice %474 {offsets = [0, 16], sizes = [2, 16], strides = [1, 1]} : vector<2x48xf32> to vector<2x16xf32>
    %485 = arith.addf %483, %484 : vector<2x16xf32>
    %486 = arith.negf %485 : vector<2x16xf32>
    %487 = math.exp %486 : vector<2x16xf32>
    %cst_89 = arith.constant 1.000000e+00 : f32
    %488 = vector.broadcast %cst_89 : f32 to vector<2x16xf32>
    %489 = arith.addf %488, %487 : vector<2x16xf32>
    %490 = arith.divf %488, %489 : vector<2x16xf32>
    %491 = vector.extract_strided_slice %471 {offsets = [0, 32], sizes = [2, 16], strides = [1, 1]} : vector<2x48xf32> to vector<2x16xf32>
    %492 = vector.extract_strided_slice %474 {offsets = [0, 32], sizes = [2, 16], strides = [1, 1]} : vector<2x48xf32> to vector<2x16xf32>
    %493 = arith.mulf %482, %492 : vector<2x16xf32>
    %494 = arith.addf %491, %493 : vector<2x16xf32>
    %495 = math.tanh %494 : vector<2x16xf32>
    %cst_90 = arith.constant 1.000000e+00 : f32
    %496 = vector.broadcast %cst_90 : f32 to vector<2x16xf32>
    %497 = arith.subf %496, %490 : vector<2x16xf32>
    %498 = arith.mulf %497, %495 : vector<2x16xf32>
    %499 = arith.mulf %490, %470 : vector<2x16xf32>
    %500 = arith.addf %498, %499 : vector<2x16xf32>
    %c0_91 = arith.constant 0 : index
    %c0_92 = arith.constant 0 : index
    %501 = vector.load %arg12[%c0_91, %c0_92] : memref<1x16xf32, #tpu.memory_space<vmem>>, vector<1x16xf32>
    %c0_93 = arith.constant 0 : index
    %c0_94 = arith.constant 0 : index
    %502 = vector.load %arg10[%c0_93, %c0_94] : memref<16x16xf32, #tpu.memory_space<vmem>>, vector<16x16xf32>
    %c0_95 = arith.constant 0 : index
    %c0_96 = arith.constant 0 : index
    %503 = vector.load %arg11[%c0_95, %c0_96] : memref<16x16xf32, #tpu.memory_space<vmem>>, vector<16x16xf32>
    %cst_97 = arith.constant dense<0.000000e+00> : vector<2x16xf32>
    %504 = tpu.matmul %49, %502, %cst_97 {dimension_numbers = #tpu.dot_dimension_numbers<[1], [0], [0], [1], [0, 0, 1, 1], [], []>} : vector<2x16xf32>, vector<16x16xf32>, vector<2x16xf32> -> vector<2x16xf32>
    %cst_98 = arith.constant dense<0.000000e+00> : vector<2x16xf32>
    %505 = tpu.matmul %500, %503, %cst_98 {dimension_numbers = #tpu.dot_dimension_numbers<[1], [0], [0], [1], [0, 0, 1, 1], [], []>} : vector<2x16xf32>, vector<16x16xf32>, vector<2x16xf32> -> vector<2x16xf32>
    %506 = arith.addf %504, %505 : vector<2x16xf32>
    %507 = vector.broadcast %501 : vector<1x16xf32> to vector<2x16xf32>
    %508 = arith.addf %506, %507 : vector<2x16xf32>
    %cst_99 = arith.constant dense<0.000000e+00> : vector<2x16xf32>
    %509 = tpu.matmul %79, %502, %cst_99 {dimension_numbers = #tpu.dot_dimension_numbers<[1], [0], [0], [1], [0, 0, 1, 1], [], []>} : vector<2x16xf32>, vector<16x16xf32>, vector<2x16xf32> -> vector<2x16xf32>
    %cst_100 = arith.constant dense<0.000000e+00> : vector<2x16xf32>
    %510 = tpu.matmul %470, %503, %cst_100 {dimension_numbers = #tpu.dot_dimension_numbers<[1], [0], [0], [1], [0, 0, 1, 1], [], []>} : vector<2x16xf32>, vector<16x16xf32>, vector<2x16xf32> -> vector<2x16xf32>
    %511 = arith.addf %509, %510 : vector<2x16xf32>
    %512 = vector.broadcast %501 : vector<1x16xf32> to vector<2x16xf32>
    %513 = arith.addf %511, %512 : vector<2x16xf32>
    %cst_101 = arith.constant dense<0.000000e+00> : vector<2x16xf32>
    %514 = tpu.matmul %109, %502, %cst_101 {dimension_numbers = #tpu.dot_dimension_numbers<[1], [0], [0], [1], [0, 0, 1, 1], [], []>} : vector<2x16xf32>, vector<16x16xf32>, vector<2x16xf32> -> vector<2x16xf32>
    %cst_102 = arith.constant dense<0.000000e+00> : vector<2x16xf32>
    %515 = tpu.matmul %440, %503, %cst_102 {dimension_numbers = #tpu.dot_dimension_numbers<[1], [0], [0], [1], [0, 0, 1, 1], [], []>} : vector<2x16xf32>, vector<16x16xf32>, vector<2x16xf32> -> vector<2x16xf32>
    %516 = arith.addf %514, %515 : vector<2x16xf32>
    %517 = vector.broadcast %501 : vector<1x16xf32> to vector<2x16xf32>
    %518 = arith.addf %516, %517 : vector<2x16xf32>
    %cst_103 = arith.constant dense<0.000000e+00> : vector<2x16xf32>
    %519 = tpu.matmul %139, %502, %cst_103 {dimension_numbers = #tpu.dot_dimension_numbers<[1], [0], [0], [1], [0, 0, 1, 1], [], []>} : vector<2x16xf32>, vector<16x16xf32>, vector<2x16xf32> -> vector<2x16xf32>
    %cst_104 = arith.constant dense<0.000000e+00> : vector<2x16xf32>
    %520 = tpu.matmul %410, %503, %cst_104 {dimension_numbers = #tpu.dot_dimension_numbers<[1], [0], [0], [1], [0, 0, 1, 1], [], []>} : vector<2x16xf32>, vector<16x16xf32>, vector<2x16xf32> -> vector<2x16xf32>
    %521 = arith.addf %519, %520 : vector<2x16xf32>
    %522 = vector.broadcast %501 : vector<1x16xf32> to vector<2x16xf32>
    %523 = arith.addf %521, %522 : vector<2x16xf32>
    %cst_105 = arith.constant dense<0.000000e+00> : vector<2x16xf32>
    %524 = tpu.matmul %169, %502, %cst_105 {dimension_numbers = #tpu.dot_dimension_numbers<[1], [0], [0], [1], [0, 0, 1, 1], [], []>} : vector<2x16xf32>, vector<16x16xf32>, vector<2x16xf32> -> vector<2x16xf32>
    %cst_106 = arith.constant dense<0.000000e+00> : vector<2x16xf32>
    %525 = tpu.matmul %380, %503, %cst_106 {dimension_numbers = #tpu.dot_dimension_numbers<[1], [0], [0], [1], [0, 0, 1, 1], [], []>} : vector<2x16xf32>, vector<16x16xf32>, vector<2x16xf32> -> vector<2x16xf32>
    %526 = arith.addf %524, %525 : vector<2x16xf32>
    %527 = vector.broadcast %501 : vector<1x16xf32> to vector<2x16xf32>
    %528 = arith.addf %526, %527 : vector<2x16xf32>
    %cst_107 = arith.constant dense<0.000000e+00> : vector<2x16xf32>
    %529 = tpu.matmul %199, %502, %cst_107 {dimension_numbers = #tpu.dot_dimension_numbers<[1], [0], [0], [1], [0, 0, 1, 1], [], []>} : vector<2x16xf32>, vector<16x16xf32>, vector<2x16xf32> -> vector<2x16xf32>
    %cst_108 = arith.constant dense<0.000000e+00> : vector<2x16xf32>
    %530 = tpu.matmul %350, %503, %cst_108 {dimension_numbers = #tpu.dot_dimension_numbers<[1], [0], [0], [1], [0, 0, 1, 1], [], []>} : vector<2x16xf32>, vector<16x16xf32>, vector<2x16xf32> -> vector<2x16xf32>
    %531 = arith.addf %529, %530 : vector<2x16xf32>
    %532 = vector.broadcast %501 : vector<1x16xf32> to vector<2x16xf32>
    %533 = arith.addf %531, %532 : vector<2x16xf32>
    %cst_109 = arith.constant dense<0.000000e+00> : vector<2x16xf32>
    %534 = tpu.matmul %229, %502, %cst_109 {dimension_numbers = #tpu.dot_dimension_numbers<[1], [0], [0], [1], [0, 0, 1, 1], [], []>} : vector<2x16xf32>, vector<16x16xf32>, vector<2x16xf32> -> vector<2x16xf32>
    %cst_110 = arith.constant dense<0.000000e+00> : vector<2x16xf32>
    %535 = tpu.matmul %320, %503, %cst_110 {dimension_numbers = #tpu.dot_dimension_numbers<[1], [0], [0], [1], [0, 0, 1, 1], [], []>} : vector<2x16xf32>, vector<16x16xf32>, vector<2x16xf32> -> vector<2x16xf32>
    %536 = arith.addf %534, %535 : vector<2x16xf32>
    %537 = vector.broadcast %501 : vector<1x16xf32> to vector<2x16xf32>
    %538 = arith.addf %536, %537 : vector<2x16xf32>
    %cst_111 = arith.constant dense<0.000000e+00> : vector<2x16xf32>
    %539 = tpu.matmul %259, %502, %cst_111 {dimension_numbers = #tpu.dot_dimension_numbers<[1], [0], [0], [1], [0, 0, 1, 1], [], []>} : vector<2x16xf32>, vector<16x16xf32>, vector<2x16xf32> -> vector<2x16xf32>
    %cst_112 = arith.constant dense<0.000000e+00> : vector<2x16xf32>
    %540 = tpu.matmul %290, %503, %cst_112 {dimension_numbers = #tpu.dot_dimension_numbers<[1], [0], [0], [1], [0, 0, 1, 1], [], []>} : vector<2x16xf32>, vector<16x16xf32>, vector<2x16xf32> -> vector<2x16xf32>
    %541 = arith.addf %539, %540 : vector<2x16xf32>
    %542 = vector.broadcast %501 : vector<1x16xf32> to vector<2x16xf32>
    %543 = arith.addf %541, %542 : vector<2x16xf32>
    %c0_113 = arith.constant 0 : index
    %c0_114 = arith.constant 0 : index
    %544 = vector.load %arg13[%c0_113, %c0_114] : memref<16x64xf32, #tpu.memory_space<vmem>>, vector<16x64xf32>
    %cst_115 = arith.constant dense<0.000000e+00> : vector<2x64xf32>
    %545 = tpu.matmul %259, %544, %cst_115 {dimension_numbers = #tpu.dot_dimension_numbers<[1], [0], [0], [1], [0, 0, 1, 1], [], []>} : vector<2x16xf32>, vector<16x64xf32>, vector<2x64xf32> -> vector<2x64xf32>
    %c0_116 = arith.constant 0 : index
    %c0_117 = arith.constant 0 : index
    %546 = vector.load %arg14[%c0_116, %c0_117] : memref<16x64xf32, #tpu.memory_space<vmem>>, vector<16x64xf32>
    %cst_118 = arith.constant dense<0.000000e+00> : vector<2x64xf32>
    %547 = tpu.matmul %500, %546, %cst_118 {dimension_numbers = #tpu.dot_dimension_numbers<[1], [0], [0], [1], [0, 0, 1, 1], [], []>} : vector<2x16xf32>, vector<16x64xf32>, vector<2x64xf32> -> vector<2x64xf32>
    %548 = arith.addf %545, %547 : vector<2x64xf32>
    %c0_119 = arith.constant 0 : index
    %c0_120 = arith.constant 0 : index
    %549 = vector.load %arg15[%c0_119, %c0_120] : memref<1x64xf32, #tpu.memory_space<vmem>>, vector<1x64xf32>
    %550 = vector.broadcast %549 : vector<1x64xf32> to vector<2x64xf32>
    %551 = arith.addf %548, %550 : vector<2x64xf32>
    %c0_121 = arith.constant 0 : index
    %c0_122 = arith.constant 0 : index
    %552 = vector.load %arg17[%c0_121, %c0_122] : memref<64x192xf32, #tpu.memory_space<vmem>>, vector<64x192xf32>
    %c0_123 = arith.constant 0 : index
    %c0_124 = arith.constant 0 : index
    %553 = vector.load %arg18[%c0_123, %c0_124] : memref<1x192xf32, #tpu.memory_space<vmem>>, vector<1x192xf32>
    %c0_125 = arith.constant 0 : index
    %c0_126 = arith.constant 0 : index
    %554 = vector.load %arg19[%c0_125, %c0_126] : memref<1x192xf32, #tpu.memory_space<vmem>>, vector<1x192xf32>
    %c0_127 = arith.constant 0 : index
    %c0_128 = arith.constant 0 : index
    %555 = vector.load %arg20[%c0_127, %c0_128] : memref<64x16xf32, #tpu.memory_space<vmem>>, vector<64x16xf32>
    %c0_129 = arith.constant 0 : index
    %c0_130 = arith.constant 0 : index
    %556 = vector.load %arg21[%c0_129, %c0_130] : memref<16x8xf32, #tpu.memory_space<vmem>>, vector<16x8xf32>
    %c0_131 = arith.constant 0 : index
    %c0_132 = arith.constant 0 : index
    %557 = vector.load %arg22[%c0_131, %c0_132] : memref<1x8xf32, #tpu.memory_space<vmem>>, vector<1x8xf32>
    %c0_133 = arith.constant 0 : index
    %c0_134 = arith.constant 0 : index
    %558 = vector.load %arg23[%c0_133, %c0_134] : memref<8x384xf32, #tpu.memory_space<vmem>>, vector<8x384xf32>
    %cst_135 = arith.constant dense<0.000000e+00> : vector<2x16xf32>
    %559 = tpu.matmul %551, %555, %cst_135 {dimension_numbers = #tpu.dot_dimension_numbers<[1], [0], [0], [1], [0, 0, 1, 1], [], []>} : vector<2x64xf32>, vector<64x16xf32>, vector<2x16xf32> -> vector<2x16xf32>
    %560 = arith.mulf %559, %508 : vector<2x16xf32>
    %cst_136 = arith.constant dense<0.000000e+00> : vector<2xf32>
    %561 = vector.multi_reduction <add>, %560, %cst_136 [1] : vector<2x16xf32> to vector<2xf32>
    %562 = vector.shape_cast %561 : vector<2xf32> to vector<2x1xf32>
    %563 = arith.mulf %559, %513 : vector<2x16xf32>
    %cst_137 = arith.constant dense<0.000000e+00> : vector<2xf32>
    %564 = vector.multi_reduction <add>, %563, %cst_137 [1] : vector<2x16xf32> to vector<2xf32>
    %565 = vector.shape_cast %564 : vector<2xf32> to vector<2x1xf32>
    %566 = arith.mulf %559, %518 : vector<2x16xf32>
    %cst_138 = arith.constant dense<0.000000e+00> : vector<2xf32>
    %567 = vector.multi_reduction <add>, %566, %cst_138 [1] : vector<2x16xf32> to vector<2xf32>
    %568 = vector.shape_cast %567 : vector<2xf32> to vector<2x1xf32>
    %569 = arith.mulf %559, %523 : vector<2x16xf32>
    %cst_139 = arith.constant dense<0.000000e+00> : vector<2xf32>
    %570 = vector.multi_reduction <add>, %569, %cst_139 [1] : vector<2x16xf32> to vector<2xf32>
    %571 = vector.shape_cast %570 : vector<2xf32> to vector<2x1xf32>
    %572 = arith.mulf %559, %528 : vector<2x16xf32>
    %cst_140 = arith.constant dense<0.000000e+00> : vector<2xf32>
    %573 = vector.multi_reduction <add>, %572, %cst_140 [1] : vector<2x16xf32> to vector<2xf32>
    %574 = vector.shape_cast %573 : vector<2xf32> to vector<2x1xf32>
    %575 = arith.mulf %559, %533 : vector<2x16xf32>
    %cst_141 = arith.constant dense<0.000000e+00> : vector<2xf32>
    %576 = vector.multi_reduction <add>, %575, %cst_141 [1] : vector<2x16xf32> to vector<2xf32>
    %577 = vector.shape_cast %576 : vector<2xf32> to vector<2x1xf32>
    %578 = arith.mulf %559, %538 : vector<2x16xf32>
    %cst_142 = arith.constant dense<0.000000e+00> : vector<2xf32>
    %579 = vector.multi_reduction <add>, %578, %cst_142 [1] : vector<2x16xf32> to vector<2xf32>
    %580 = vector.shape_cast %579 : vector<2xf32> to vector<2x1xf32>
    %581 = arith.mulf %559, %543 : vector<2x16xf32>
    %cst_143 = arith.constant dense<0.000000e+00> : vector<2xf32>
    %582 = vector.multi_reduction <add>, %581, %cst_143 [1] : vector<2x16xf32> to vector<2xf32>
    %583 = vector.shape_cast %582 : vector<2xf32> to vector<2x1xf32>
    %584 = arith.maximumf %562, %565 : vector<2x1xf32>
    %585 = arith.maximumf %584, %568 : vector<2x1xf32>
    %586 = arith.maximumf %585, %571 : vector<2x1xf32>
    %587 = arith.maximumf %586, %574 : vector<2x1xf32>
    %588 = arith.maximumf %587, %577 : vector<2x1xf32>
    %589 = arith.maximumf %588, %580 : vector<2x1xf32>
    %590 = arith.maximumf %589, %583 : vector<2x1xf32>
    %591 = arith.subf %562, %590 : vector<2x1xf32>
    %592 = math.exp %591 : vector<2x1xf32>
    %593 = arith.subf %565, %590 : vector<2x1xf32>
    %594 = math.exp %593 : vector<2x1xf32>
    %595 = arith.subf %568, %590 : vector<2x1xf32>
    %596 = math.exp %595 : vector<2x1xf32>
    %597 = arith.subf %571, %590 : vector<2x1xf32>
    %598 = math.exp %597 : vector<2x1xf32>
    %599 = arith.subf %574, %590 : vector<2x1xf32>
    %600 = math.exp %599 : vector<2x1xf32>
    %601 = arith.subf %577, %590 : vector<2x1xf32>
    %602 = math.exp %601 : vector<2x1xf32>
    %603 = arith.subf %580, %590 : vector<2x1xf32>
    %604 = math.exp %603 : vector<2x1xf32>
    %605 = arith.subf %583, %590 : vector<2x1xf32>
    %606 = math.exp %605 : vector<2x1xf32>
    %607 = arith.addf %592, %594 : vector<2x1xf32>
    %608 = arith.addf %607, %596 : vector<2x1xf32>
    %609 = arith.addf %608, %598 : vector<2x1xf32>
    %610 = arith.addf %609, %600 : vector<2x1xf32>
    %611 = arith.addf %610, %602 : vector<2x1xf32>
    %612 = arith.addf %611, %604 : vector<2x1xf32>
    %613 = arith.addf %612, %606 : vector<2x1xf32>
    %614 = tpu.reciprocal %613 {approx = true} : vector<2x1xf32> -> vector<2x1xf32>
    %615 = arith.mulf %592, %614 : vector<2x1xf32>
    %616 = vector.broadcast %615 : vector<2x1xf32> to vector<2x16xf32>
    %617 = arith.mulf %616, %508 : vector<2x16xf32>
    %618 = arith.mulf %594, %614 : vector<2x1xf32>
    %619 = vector.broadcast %618 : vector<2x1xf32> to vector<2x16xf32>
    %620 = arith.mulf %619, %513 : vector<2x16xf32>
    %621 = arith.addf %617, %620 : vector<2x16xf32>
    %622 = arith.mulf %596, %614 : vector<2x1xf32>
    %623 = vector.broadcast %622 : vector<2x1xf32> to vector<2x16xf32>
    %624 = arith.mulf %623, %518 : vector<2x16xf32>
    %625 = arith.addf %621, %624 : vector<2x16xf32>
    %626 = arith.mulf %598, %614 : vector<2x1xf32>
    %627 = vector.broadcast %626 : vector<2x1xf32> to vector<2x16xf32>
    %628 = arith.mulf %627, %523 : vector<2x16xf32>
    %629 = arith.addf %625, %628 : vector<2x16xf32>
    %630 = arith.mulf %600, %614 : vector<2x1xf32>
    %631 = vector.broadcast %630 : vector<2x1xf32> to vector<2x16xf32>
    %632 = arith.mulf %631, %528 : vector<2x16xf32>
    %633 = arith.addf %629, %632 : vector<2x16xf32>
    %634 = arith.mulf %602, %614 : vector<2x1xf32>
    %635 = vector.broadcast %634 : vector<2x1xf32> to vector<2x16xf32>
    %636 = arith.mulf %635, %533 : vector<2x16xf32>
    %637 = arith.addf %633, %636 : vector<2x16xf32>
    %638 = arith.mulf %604, %614 : vector<2x1xf32>
    %639 = vector.broadcast %638 : vector<2x1xf32> to vector<2x16xf32>
    %640 = arith.mulf %639, %538 : vector<2x16xf32>
    %641 = arith.addf %637, %640 : vector<2x16xf32>
    %642 = arith.mulf %606, %614 : vector<2x1xf32>
    %643 = vector.broadcast %642 : vector<2x1xf32> to vector<2x16xf32>
    %644 = arith.mulf %643, %543 : vector<2x16xf32>
    %645 = arith.addf %641, %644 : vector<2x16xf32>
    %cst_144 = arith.constant dense<0.000000e+00> : vector<2x8xf32>
    %646 = tpu.matmul %645, %556, %cst_144 {dimension_numbers = #tpu.dot_dimension_numbers<[1], [0], [0], [1], [0, 0, 1, 1], [], []>} : vector<2x16xf32>, vector<16x8xf32>, vector<2x8xf32> -> vector<2x8xf32>
    %647 = vector.broadcast %557 : vector<1x8xf32> to vector<2x8xf32>
    %648 = arith.addf %646, %647 : vector<2x8xf32>
    %649 = math.tanh %648 : vector<2x8xf32>
    %cst_145 = arith.constant dense<0.000000e+00> : vector<2x384xf32>
    %650 = tpu.matmul %649, %558, %cst_145 {dimension_numbers = #tpu.dot_dimension_numbers<[1], [0], [0], [1], [0, 0, 1, 1], [], []>} : vector<2x8xf32>, vector<8x384xf32>, vector<2x384xf32> -> vector<2x384xf32>
    %651 = vector.extract_strided_slice %650 {offsets = [0, 0], sizes = [2, 192], strides = [1, 1]} : vector<2x384xf32> to vector<2x192xf32>
    %652 = vector.extract_strided_slice %650 {offsets = [0, 192], sizes = [2, 192], strides = [1, 1]} : vector<2x384xf32> to vector<2x192xf32>
    %653 = vector.extract_strided_slice %14 {offsets = [0, 0], sizes = [2, 192], strides = [1, 1]} : vector<16x192xf32> to vector<2x192xf32>
    %cst_146 = arith.constant 1.000000e+00 : f32
    %654 = vector.broadcast %cst_146 : f32 to vector<2x192xf32>
    %655 = arith.addf %654, %651 : vector<2x192xf32>
    %656 = arith.mulf %653, %655 : vector<2x192xf32>
    %657 = vector.broadcast %553 : vector<1x192xf32> to vector<2x192xf32>
    %658 = arith.addf %656, %657 : vector<2x192xf32>
    %cst_147 = arith.constant dense<0.000000e+00> : vector<2x192xf32>
    %659 = tpu.matmul %551, %552, %cst_147 {dimension_numbers = #tpu.dot_dimension_numbers<[1], [0], [0], [1], [0, 0, 1, 1], [], []>} : vector<2x64xf32>, vector<64x192xf32>, vector<2x192xf32> -> vector<2x192xf32>
    %cst_148 = arith.constant 1.000000e+00 : f32
    %660 = vector.broadcast %cst_148 : f32 to vector<2x192xf32>
    %661 = arith.addf %660, %652 : vector<2x192xf32>
    %662 = arith.mulf %659, %661 : vector<2x192xf32>
    %663 = vector.broadcast %554 : vector<1x192xf32> to vector<2x192xf32>
    %664 = arith.addf %662, %663 : vector<2x192xf32>
    %665 = vector.extract_strided_slice %658 {offsets = [0, 0], sizes = [2, 64], strides = [1, 1]} : vector<2x192xf32> to vector<2x64xf32>
    %666 = vector.extract_strided_slice %664 {offsets = [0, 0], sizes = [2, 64], strides = [1, 1]} : vector<2x192xf32> to vector<2x64xf32>
    %667 = arith.addf %665, %666 : vector<2x64xf32>
    %668 = arith.negf %667 : vector<2x64xf32>
    %669 = math.exp %668 : vector<2x64xf32>
    %cst_149 = arith.constant 1.000000e+00 : f32
    %670 = vector.broadcast %cst_149 : f32 to vector<2x64xf32>
    %671 = arith.addf %670, %669 : vector<2x64xf32>
    %672 = arith.divf %670, %671 : vector<2x64xf32>
    %673 = vector.extract_strided_slice %658 {offsets = [0, 64], sizes = [2, 64], strides = [1, 1]} : vector<2x192xf32> to vector<2x64xf32>
    %674 = vector.extract_strided_slice %664 {offsets = [0, 64], sizes = [2, 64], strides = [1, 1]} : vector<2x192xf32> to vector<2x64xf32>
    %675 = arith.addf %673, %674 : vector<2x64xf32>
    %676 = arith.negf %675 : vector<2x64xf32>
    %677 = math.exp %676 : vector<2x64xf32>
    %cst_150 = arith.constant 1.000000e+00 : f32
    %678 = vector.broadcast %cst_150 : f32 to vector<2x64xf32>
    %679 = arith.addf %678, %677 : vector<2x64xf32>
    %680 = arith.divf %678, %679 : vector<2x64xf32>
    %681 = vector.extract_strided_slice %658 {offsets = [0, 128], sizes = [2, 64], strides = [1, 1]} : vector<2x192xf32> to vector<2x64xf32>
    %682 = vector.extract_strided_slice %664 {offsets = [0, 128], sizes = [2, 64], strides = [1, 1]} : vector<2x192xf32> to vector<2x64xf32>
    %683 = arith.mulf %672, %682 : vector<2x64xf32>
    %684 = arith.addf %681, %683 : vector<2x64xf32>
    %685 = math.tanh %684 : vector<2x64xf32>
    %cst_151 = arith.constant 1.000000e+00 : f32
    %686 = vector.broadcast %cst_151 : f32 to vector<2x64xf32>
    %687 = arith.subf %686, %680 : vector<2x64xf32>
    %688 = arith.mulf %687, %685 : vector<2x64xf32>
    %689 = arith.mulf %680, %551 : vector<2x64xf32>
    %690 = arith.addf %688, %689 : vector<2x64xf32>
    %c0_152 = arith.constant 0 : index
    %c0_153 = arith.constant 0 : index
    %c0_154 = arith.constant 0 : index
    %691 = vector.load %arg27[%c0_152, %c0_153, %c0_154] : memref<8x2x8xf32, #tpu.memory_space<vmem>>, vector<1x2x8xf32>
    %692 = vector.shape_cast %691 : vector<1x2x8xf32> to vector<2x8xf32>
    %693 = vector.shape_cast %649 : vector<2x8xf32> to vector<1x2x8xf32>
    tpu.vector_store %arg27[%c0_152, %c0_153, %c0_154], %693 {strides = array<i32>} : memref<8x2x8xf32, #tpu.memory_space<vmem>>, vector<1x2x8xf32>,
    %cst_155 = arith.constant dense<0.000000e+00> : vector<2x16xf32>
    %694 = tpu.matmul %690, %555, %cst_155 {dimension_numbers = #tpu.dot_dimension_numbers<[1], [0], [0], [1], [0, 0, 1, 1], [], []>} : vector<2x64xf32>, vector<64x16xf32>, vector<2x16xf32> -> vector<2x16xf32>
    %695 = arith.mulf %694, %508 : vector<2x16xf32>
    %cst_156 = arith.constant dense<0.000000e+00> : vector<2xf32>
    %696 = vector.multi_reduction <add>, %695, %cst_156 [1] : vector<2x16xf32> to vector<2xf32>
    %697 = vector.shape_cast %696 : vector<2xf32> to vector<2x1xf32>
    %698 = arith.mulf %694, %513 : vector<2x16xf32>
    %cst_157 = arith.constant dense<0.000000e+00> : vector<2xf32>
    %699 = vector.multi_reduction <add>, %698, %cst_157 [1] : vector<2x16xf32> to vector<2xf32>
    %700 = vector.shape_cast %699 : vector<2xf32> to vector<2x1xf32>
    %701 = arith.mulf %694, %518 : vector<2x16xf32>
    %cst_158 = arith.constant dense<0.000000e+00> : vector<2xf32>
    %702 = vector.multi_reduction <add>, %701, %cst_158 [1] : vector<2x16xf32> to vector<2xf32>
    %703 = vector.shape_cast %702 : vector<2xf32> to vector<2x1xf32>
    %704 = arith.mulf %694, %523 : vector<2x16xf32>
    %cst_159 = arith.constant dense<0.000000e+00> : vector<2xf32>
    %705 = vector.multi_reduction <add>, %704, %cst_159 [1] : vector<2x16xf32> to vector<2xf32>
    %706 = vector.shape_cast %705 : vector<2xf32> to vector<2x1xf32>
    %707 = arith.mulf %694, %528 : vector<2x16xf32>
    %cst_160 = arith.constant dense<0.000000e+00> : vector<2xf32>
    %708 = vector.multi_reduction <add>, %707, %cst_160 [1] : vector<2x16xf32> to vector<2xf32>
    %709 = vector.shape_cast %708 : vector<2xf32> to vector<2x1xf32>
    %710 = arith.mulf %694, %533 : vector<2x16xf32>
    %cst_161 = arith.constant dense<0.000000e+00> : vector<2xf32>
    %711 = vector.multi_reduction <add>, %710, %cst_161 [1] : vector<2x16xf32> to vector<2xf32>
    %712 = vector.shape_cast %711 : vector<2xf32> to vector<2x1xf32>
    %713 = arith.mulf %694, %538 : vector<2x16xf32>
    %cst_162 = arith.constant dense<0.000000e+00> : vector<2xf32>
    %714 = vector.multi_reduction <add>, %713, %cst_162 [1] : vector<2x16xf32> to vector<2xf32>
    %715 = vector.shape_cast %714 : vector<2xf32> to vector<2x1xf32>
    %716 = arith.mulf %694, %543 : vector<2x16xf32>
    %cst_163 = arith.constant dense<0.000000e+00> : vector<2xf32>
    %717 = vector.multi_reduction <add>, %716, %cst_163 [1] : vector<2x16xf32> to vector<2xf32>
    %718 = vector.shape_cast %717 : vector<2xf32> to vector<2x1xf32>
    %719 = arith.maximumf %697, %700 : vector<2x1xf32>
    %720 = arith.maximumf %719, %703 : vector<2x1xf32>
    %721 = arith.maximumf %720, %706 : vector<2x1xf32>
    %722 = arith.maximumf %721, %709 : vector<2x1xf32>
    %723 = arith.maximumf %722, %712 : vector<2x1xf32>
    %724 = arith.maximumf %723, %715 : vector<2x1xf32>
    %725 = arith.maximumf %724, %718 : vector<2x1xf32>
    %726 = arith.subf %697, %725 : vector<2x1xf32>
    %727 = math.exp %726 : vector<2x1xf32>
    %728 = arith.subf %700, %725 : vector<2x1xf32>
    %729 = math.exp %728 : vector<2x1xf32>
    %730 = arith.subf %703, %725 : vector<2x1xf32>
    %731 = math.exp %730 : vector<2x1xf32>
    %732 = arith.subf %706, %725 : vector<2x1xf32>
    %733 = math.exp %732 : vector<2x1xf32>
    %734 = arith.subf %709, %725 : vector<2x1xf32>
    %735 = math.exp %734 : vector<2x1xf32>
    %736 = arith.subf %712, %725 : vector<2x1xf32>
    %737 = math.exp %736 : vector<2x1xf32>
    %738 = arith.subf %715, %725 : vector<2x1xf32>
    %739 = math.exp %738 : vector<2x1xf32>
    %740 = arith.subf %718, %725 : vector<2x1xf32>
    %741 = math.exp %740 : vector<2x1xf32>
    %742 = arith.addf %727, %729 : vector<2x1xf32>
    %743 = arith.addf %742, %731 : vector<2x1xf32>
    %744 = arith.addf %743, %733 : vector<2x1xf32>
    %745 = arith.addf %744, %735 : vector<2x1xf32>
    %746 = arith.addf %745, %737 : vector<2x1xf32>
    %747 = arith.addf %746, %739 : vector<2x1xf32>
    %748 = arith.addf %747, %741 : vector<2x1xf32>
    %749 = tpu.reciprocal %748 {approx = true} : vector<2x1xf32> -> vector<2x1xf32>
    %750 = arith.mulf %727, %749 : vector<2x1xf32>
    %751 = vector.broadcast %750 : vector<2x1xf32> to vector<2x16xf32>
    %752 = arith.mulf %751, %508 : vector<2x16xf32>
    %753 = arith.mulf %729, %749 : vector<2x1xf32>
    %754 = vector.broadcast %753 : vector<2x1xf32> to vector<2x16xf32>
    %755 = arith.mulf %754, %513 : vector<2x16xf32>
    %756 = arith.addf %752, %755 : vector<2x16xf32>
    %757 = arith.mulf %731, %749 : vector<2x1xf32>
    %758 = vector.broadcast %757 : vector<2x1xf32> to vector<2x16xf32>
    %759 = arith.mulf %758, %518 : vector<2x16xf32>
    %760 = arith.addf %756, %759 : vector<2x16xf32>
    %761 = arith.mulf %733, %749 : vector<2x1xf32>
    %762 = vector.broadcast %761 : vector<2x1xf32> to vector<2x16xf32>
    %763 = arith.mulf %762, %523 : vector<2x16xf32>
    %764 = arith.addf %760, %763 : vector<2x16xf32>
    %765 = arith.mulf %735, %749 : vector<2x1xf32>
    %766 = vector.broadcast %765 : vector<2x1xf32> to vector<2x16xf32>
    %767 = arith.mulf %766, %528 : vector<2x16xf32>
    %768 = arith.addf %764, %767 : vector<2x16xf32>
    %769 = arith.mulf %737, %749 : vector<2x1xf32>
    %770 = vector.broadcast %769 : vector<2x1xf32> to vector<2x16xf32>
    %771 = arith.mulf %770, %533 : vector<2x16xf32>
    %772 = arith.addf %768, %771 : vector<2x16xf32>
    %773 = arith.mulf %739, %749 : vector<2x1xf32>
    %774 = vector.broadcast %773 : vector<2x1xf32> to vector<2x16xf32>
    %775 = arith.mulf %774, %538 : vector<2x16xf32>
    %776 = arith.addf %772, %775 : vector<2x16xf32>
    %777 = arith.mulf %741, %749 : vector<2x1xf32>
    %778 = vector.broadcast %777 : vector<2x1xf32> to vector<2x16xf32>
    %779 = arith.mulf %778, %543 : vector<2x16xf32>
    %780 = arith.addf %776, %779 : vector<2x16xf32>
    %cst_164 = arith.constant dense<0.000000e+00> : vector<2x8xf32>
    %781 = tpu.matmul %780, %556, %cst_164 {dimension_numbers = #tpu.dot_dimension_numbers<[1], [0], [0], [1], [0, 0, 1, 1], [], []>} : vector<2x16xf32>, vector<16x8xf32>, vector<2x8xf32> -> vector<2x8xf32>
    %782 = vector.broadcast %557 : vector<1x8xf32> to vector<2x8xf32>
    %783 = arith.addf %781, %782 : vector<2x8xf32>
    %784 = math.tanh %783 : vector<2x8xf32>
    %cst_165 = arith.constant dense<0.000000e+00> : vector<2x384xf32>
    %785 = tpu.matmul %784, %558, %cst_165 {dimension_numbers = #tpu.dot_dimension_numbers<[1], [0], [0], [1], [0, 0, 1, 1], [], []>} : vector<2x8xf32>, vector<8x384xf32>, vector<2x384xf32> -> vector<2x384xf32>
    %786 = vector.extract_strided_slice %785 {offsets = [0, 0], sizes = [2, 192], strides = [1, 1]} : vector<2x384xf32> to vector<2x192xf32>
    %787 = vector.extract_strided_slice %785 {offsets = [0, 192], sizes = [2, 192], strides = [1, 1]} : vector<2x384xf32> to vector<2x192xf32>
    %788 = vector.extract_strided_slice %14 {offsets = [2, 0], sizes = [2, 192], strides = [1, 1]} : vector<16x192xf32> to vector<2x192xf32>
    %cst_166 = arith.constant 1.000000e+00 : f32
    %789 = vector.broadcast %cst_166 : f32 to vector<2x192xf32>
    %790 = arith.addf %789, %786 : vector<2x192xf32>
    %791 = arith.mulf %788, %790 : vector<2x192xf32>
    %792 = vector.broadcast %553 : vector<1x192xf32> to vector<2x192xf32>
    %793 = arith.addf %791, %792 : vector<2x192xf32>
    %cst_167 = arith.constant dense<0.000000e+00> : vector<2x192xf32>
    %794 = tpu.matmul %690, %552, %cst_167 {dimension_numbers = #tpu.dot_dimension_numbers<[1], [0], [0], [1], [0, 0, 1, 1], [], []>} : vector<2x64xf32>, vector<64x192xf32>, vector<2x192xf32> -> vector<2x192xf32>
    %cst_168 = arith.constant 1.000000e+00 : f32
    %795 = vector.broadcast %cst_168 : f32 to vector<2x192xf32>
    %796 = arith.addf %795, %787 : vector<2x192xf32>
    %797 = arith.mulf %794, %796 : vector<2x192xf32>
    %798 = vector.broadcast %554 : vector<1x192xf32> to vector<2x192xf32>
    %799 = arith.addf %797, %798 : vector<2x192xf32>
    %800 = vector.extract_strided_slice %793 {offsets = [0, 0], sizes = [2, 64], strides = [1, 1]} : vector<2x192xf32> to vector<2x64xf32>
    %801 = vector.extract_strided_slice %799 {offsets = [0, 0], sizes = [2, 64], strides = [1, 1]} : vector<2x192xf32> to vector<2x64xf32>
    %802 = arith.addf %800, %801 : vector<2x64xf32>
    %803 = arith.negf %802 : vector<2x64xf32>
    %804 = math.exp %803 : vector<2x64xf32>
    %cst_169 = arith.constant 1.000000e+00 : f32
    %805 = vector.broadcast %cst_169 : f32 to vector<2x64xf32>
    %806 = arith.addf %805, %804 : vector<2x64xf32>
    %807 = arith.divf %805, %806 : vector<2x64xf32>
    %808 = vector.extract_strided_slice %793 {offsets = [0, 64], sizes = [2, 64], strides = [1, 1]} : vector<2x192xf32> to vector<2x64xf32>
    %809 = vector.extract_strided_slice %799 {offsets = [0, 64], sizes = [2, 64], strides = [1, 1]} : vector<2x192xf32> to vector<2x64xf32>
    %810 = arith.addf %808, %809 : vector<2x64xf32>
    %811 = arith.negf %810 : vector<2x64xf32>
    %812 = math.exp %811 : vector<2x64xf32>
    %cst_170 = arith.constant 1.000000e+00 : f32
    %813 = vector.broadcast %cst_170 : f32 to vector<2x64xf32>
    %814 = arith.addf %813, %812 : vector<2x64xf32>
    %815 = arith.divf %813, %814 : vector<2x64xf32>
    %816 = vector.extract_strided_slice %793 {offsets = [0, 128], sizes = [2, 64], strides = [1, 1]} : vector<2x192xf32> to vector<2x64xf32>
    %817 = vector.extract_strided_slice %799 {offsets = [0, 128], sizes = [2, 64], strides = [1, 1]} : vector<2x192xf32> to vector<2x64xf32>
    %818 = arith.mulf %807, %817 : vector<2x64xf32>
    %819 = arith.addf %816, %818 : vector<2x64xf32>
    %820 = math.tanh %819 : vector<2x64xf32>
    %cst_171 = arith.constant 1.000000e+00 : f32
    %821 = vector.broadcast %cst_171 : f32 to vector<2x64xf32>
    %822 = arith.subf %821, %815 : vector<2x64xf32>
    %823 = arith.mulf %822, %820 : vector<2x64xf32>
    %824 = arith.mulf %815, %690 : vector<2x64xf32>
    %825 = arith.addf %823, %824 : vector<2x64xf32>
    %c1 = arith.constant 1 : index
    %c0_172 = arith.constant 0 : index
    %c0_173 = arith.constant 0 : index
    %826 = vector.load %arg27[%c1, %c0_172, %c0_173] : memref<8x2x8xf32, #tpu.memory_space<vmem>>, vector<1x2x8xf32>
    %827 = vector.shape_cast %826 : vector<1x2x8xf32> to vector<2x8xf32>
    %828 = vector.shape_cast %784 : vector<2x8xf32> to vector<1x2x8xf32>
    tpu.vector_store %arg27[%c1, %c0_172, %c0_173], %828 {strides = array<i32>} : memref<8x2x8xf32, #tpu.memory_space<vmem>>, vector<1x2x8xf32>,
    %cst_174 = arith.constant dense<0.000000e+00> : vector<2x16xf32>
    %829 = tpu.matmul %825, %555, %cst_174 {dimension_numbers = #tpu.dot_dimension_numbers<[1], [0], [0], [1], [0, 0, 1, 1], [], []>} : vector<2x64xf32>, vector<64x16xf32>, vector<2x16xf32> -> vector<2x16xf32>
    %830 = arith.mulf %829, %508 : vector<2x16xf32>
    %cst_175 = arith.constant dense<0.000000e+00> : vector<2xf32>
    %831 = vector.multi_reduction <add>, %830, %cst_175 [1] : vector<2x16xf32> to vector<2xf32>
    %832 = vector.shape_cast %831 : vector<2xf32> to vector<2x1xf32>
    %833 = arith.mulf %829, %513 : vector<2x16xf32>
    %cst_176 = arith.constant dense<0.000000e+00> : vector<2xf32>
    %834 = vector.multi_reduction <add>, %833, %cst_176 [1] : vector<2x16xf32> to vector<2xf32>
    %835 = vector.shape_cast %834 : vector<2xf32> to vector<2x1xf32>
    %836 = arith.mulf %829, %518 : vector<2x16xf32>
    %cst_177 = arith.constant dense<0.000000e+00> : vector<2xf32>
    %837 = vector.multi_reduction <add>, %836, %cst_177 [1] : vector<2x16xf32> to vector<2xf32>
    %838 = vector.shape_cast %837 : vector<2xf32> to vector<2x1xf32>
    %839 = arith.mulf %829, %523 : vector<2x16xf32>
    %cst_178 = arith.constant dense<0.000000e+00> : vector<2xf32>
    %840 = vector.multi_reduction <add>, %839, %cst_178 [1] : vector<2x16xf32> to vector<2xf32>
    %841 = vector.shape_cast %840 : vector<2xf32> to vector<2x1xf32>
    %842 = arith.mulf %829, %528 : vector<2x16xf32>
    %cst_179 = arith.constant dense<0.000000e+00> : vector<2xf32>
    %843 = vector.multi_reduction <add>, %842, %cst_179 [1] : vector<2x16xf32> to vector<2xf32>
    %844 = vector.shape_cast %843 : vector<2xf32> to vector<2x1xf32>
    %845 = arith.mulf %829, %533 : vector<2x16xf32>
    %cst_180 = arith.constant dense<0.000000e+00> : vector<2xf32>
    %846 = vector.multi_reduction <add>, %845, %cst_180 [1] : vector<2x16xf32> to vector<2xf32>
    %847 = vector.shape_cast %846 : vector<2xf32> to vector<2x1xf32>
    %848 = arith.mulf %829, %538 : vector<2x16xf32>
    %cst_181 = arith.constant dense<0.000000e+00> : vector<2xf32>
    %849 = vector.multi_reduction <add>, %848, %cst_181 [1] : vector<2x16xf32> to vector<2xf32>
    %850 = vector.shape_cast %849 : vector<2xf32> to vector<2x1xf32>
    %851 = arith.mulf %829, %543 : vector<2x16xf32>
    %cst_182 = arith.constant dense<0.000000e+00> : vector<2xf32>
    %852 = vector.multi_reduction <add>, %851, %cst_182 [1] : vector<2x16xf32> to vector<2xf32>
    %853 = vector.shape_cast %852 : vector<2xf32> to vector<2x1xf32>
    %854 = arith.maximumf %832, %835 : vector<2x1xf32>
    %855 = arith.maximumf %854, %838 : vector<2x1xf32>
    %856 = arith.maximumf %855, %841 : vector<2x1xf32>
    %857 = arith.maximumf %856, %844 : vector<2x1xf32>
    %858 = arith.maximumf %857, %847 : vector<2x1xf32>
    %859 = arith.maximumf %858, %850 : vector<2x1xf32>
    %860 = arith.maximumf %859, %853 : vector<2x1xf32>
    %861 = arith.subf %832, %860 : vector<2x1xf32>
    %862 = math.exp %861 : vector<2x1xf32>
    %863 = arith.subf %835, %860 : vector<2x1xf32>
    %864 = math.exp %863 : vector<2x1xf32>
    %865 = arith.subf %838, %860 : vector<2x1xf32>
    %866 = math.exp %865 : vector<2x1xf32>
    %867 = arith.subf %841, %860 : vector<2x1xf32>
    %868 = math.exp %867 : vector<2x1xf32>
    %869 = arith.subf %844, %860 : vector<2x1xf32>
    %870 = math.exp %869 : vector<2x1xf32>
    %871 = arith.subf %847, %860 : vector<2x1xf32>
    %872 = math.exp %871 : vector<2x1xf32>
    %873 = arith.subf %850, %860 : vector<2x1xf32>
    %874 = math.exp %873 : vector<2x1xf32>
    %875 = arith.subf %853, %860 : vector<2x1xf32>
    %876 = math.exp %875 : vector<2x1xf32>
    %877 = arith.addf %862, %864 : vector<2x1xf32>
    %878 = arith.addf %877, %866 : vector<2x1xf32>
    %879 = arith.addf %878, %868 : vector<2x1xf32>
    %880 = arith.addf %879, %870 : vector<2x1xf32>
    %881 = arith.addf %880, %872 : vector<2x1xf32>
    %882 = arith.addf %881, %874 : vector<2x1xf32>
    %883 = arith.addf %882, %876 : vector<2x1xf32>
    %884 = tpu.reciprocal %883 {approx = true} : vector<2x1xf32> -> vector<2x1xf32>
    %885 = arith.mulf %862, %884 : vector<2x1xf32>
    %886 = vector.broadcast %885 : vector<2x1xf32> to vector<2x16xf32>
    %887 = arith.mulf %886, %508 : vector<2x16xf32>
    %888 = arith.mulf %864, %884 : vector<2x1xf32>
    %889 = vector.broadcast %888 : vector<2x1xf32> to vector<2x16xf32>
    %890 = arith.mulf %889, %513 : vector<2x16xf32>
    %891 = arith.addf %887, %890 : vector<2x16xf32>
    %892 = arith.mulf %866, %884 : vector<2x1xf32>
    %893 = vector.broadcast %892 : vector<2x1xf32> to vector<2x16xf32>
    %894 = arith.mulf %893, %518 : vector<2x16xf32>
    %895 = arith.addf %891, %894 : vector<2x16xf32>
    %896 = arith.mulf %868, %884 : vector<2x1xf32>
    %897 = vector.broadcast %896 : vector<2x1xf32> to vector<2x16xf32>
    %898 = arith.mulf %897, %523 : vector<2x16xf32>
    %899 = arith.addf %895, %898 : vector<2x16xf32>
    %900 = arith.mulf %870, %884 : vector<2x1xf32>
    %901 = vector.broadcast %900 : vector<2x1xf32> to vector<2x16xf32>
    %902 = arith.mulf %901, %528 : vector<2x16xf32>
    %903 = arith.addf %899, %902 : vector<2x16xf32>
    %904 = arith.mulf %872, %884 : vector<2x1xf32>
    %905 = vector.broadcast %904 : vector<2x1xf32> to vector<2x16xf32>
    %906 = arith.mulf %905, %533 : vector<2x16xf32>
    %907 = arith.addf %903, %906 : vector<2x16xf32>
    %908 = arith.mulf %874, %884 : vector<2x1xf32>
    %909 = vector.broadcast %908 : vector<2x1xf32> to vector<2x16xf32>
    %910 = arith.mulf %909, %538 : vector<2x16xf32>
    %911 = arith.addf %907, %910 : vector<2x16xf32>
    %912 = arith.mulf %876, %884 : vector<2x1xf32>
    %913 = vector.broadcast %912 : vector<2x1xf32> to vector<2x16xf32>
    %914 = arith.mulf %913, %543 : vector<2x16xf32>
    %915 = arith.addf %911, %914 : vector<2x16xf32>
    %cst_183 = arith.constant dense<0.000000e+00> : vector<2x8xf32>
    %916 = tpu.matmul %915, %556, %cst_183 {dimension_numbers = #tpu.dot_dimension_numbers<[1], [0], [0], [1], [0, 0, 1, 1], [], []>} : vector<2x16xf32>, vector<16x8xf32>, vector<2x8xf32> -> vector<2x8xf32>
    %917 = vector.broadcast %557 : vector<1x8xf32> to vector<2x8xf32>
    %918 = arith.addf %916, %917 : vector<2x8xf32>
    %919 = math.tanh %918 : vector<2x8xf32>
    %cst_184 = arith.constant dense<0.000000e+00> : vector<2x384xf32>
    %920 = tpu.matmul %919, %558, %cst_184 {dimension_numbers = #tpu.dot_dimension_numbers<[1], [0], [0], [1], [0, 0, 1, 1], [], []>} : vector<2x8xf32>, vector<8x384xf32>, vector<2x384xf32> -> vector<2x384xf32>
    %921 = vector.extract_strided_slice %920 {offsets = [0, 0], sizes = [2, 192], strides = [1, 1]} : vector<2x384xf32> to vector<2x192xf32>
    %922 = vector.extract_strided_slice %920 {offsets = [0, 192], sizes = [2, 192], strides = [1, 1]} : vector<2x384xf32> to vector<2x192xf32>
    %923 = vector.extract_strided_slice %14 {offsets = [4, 0], sizes = [2, 192], strides = [1, 1]} : vector<16x192xf32> to vector<2x192xf32>
    %cst_185 = arith.constant 1.000000e+00 : f32
    %924 = vector.broadcast %cst_185 : f32 to vector<2x192xf32>
    %925 = arith.addf %924, %921 : vector<2x192xf32>
    %926 = arith.mulf %923, %925 : vector<2x192xf32>
    %927 = vector.broadcast %553 : vector<1x192xf32> to vector<2x192xf32>
    %928 = arith.addf %926, %927 : vector<2x192xf32>
    %cst_186 = arith.constant dense<0.000000e+00> : vector<2x192xf32>
    %929 = tpu.matmul %825, %552, %cst_186 {dimension_numbers = #tpu.dot_dimension_numbers<[1], [0], [0], [1], [0, 0, 1, 1], [], []>} : vector<2x64xf32>, vector<64x192xf32>, vector<2x192xf32> -> vector<2x192xf32>
    %cst_187 = arith.constant 1.000000e+00 : f32
    %930 = vector.broadcast %cst_187 : f32 to vector<2x192xf32>
    %931 = arith.addf %930, %922 : vector<2x192xf32>
    %932 = arith.mulf %929, %931 : vector<2x192xf32>
    %933 = vector.broadcast %554 : vector<1x192xf32> to vector<2x192xf32>
    %934 = arith.addf %932, %933 : vector<2x192xf32>
    %935 = vector.extract_strided_slice %928 {offsets = [0, 0], sizes = [2, 64], strides = [1, 1]} : vector<2x192xf32> to vector<2x64xf32>
    %936 = vector.extract_strided_slice %934 {offsets = [0, 0], sizes = [2, 64], strides = [1, 1]} : vector<2x192xf32> to vector<2x64xf32>
    %937 = arith.addf %935, %936 : vector<2x64xf32>
    %938 = arith.negf %937 : vector<2x64xf32>
    %939 = math.exp %938 : vector<2x64xf32>
    %cst_188 = arith.constant 1.000000e+00 : f32
    %940 = vector.broadcast %cst_188 : f32 to vector<2x64xf32>
    %941 = arith.addf %940, %939 : vector<2x64xf32>
    %942 = arith.divf %940, %941 : vector<2x64xf32>
    %943 = vector.extract_strided_slice %928 {offsets = [0, 64], sizes = [2, 64], strides = [1, 1]} : vector<2x192xf32> to vector<2x64xf32>
    %944 = vector.extract_strided_slice %934 {offsets = [0, 64], sizes = [2, 64], strides = [1, 1]} : vector<2x192xf32> to vector<2x64xf32>
    %945 = arith.addf %943, %944 : vector<2x64xf32>
    %946 = arith.negf %945 : vector<2x64xf32>
    %947 = math.exp %946 : vector<2x64xf32>
    %cst_189 = arith.constant 1.000000e+00 : f32
    %948 = vector.broadcast %cst_189 : f32 to vector<2x64xf32>
    %949 = arith.addf %948, %947 : vector<2x64xf32>
    %950 = arith.divf %948, %949 : vector<2x64xf32>
    %951 = vector.extract_strided_slice %928 {offsets = [0, 128], sizes = [2, 64], strides = [1, 1]} : vector<2x192xf32> to vector<2x64xf32>
    %952 = vector.extract_strided_slice %934 {offsets = [0, 128], sizes = [2, 64], strides = [1, 1]} : vector<2x192xf32> to vector<2x64xf32>
    %953 = arith.mulf %942, %952 : vector<2x64xf32>
    %954 = arith.addf %951, %953 : vector<2x64xf32>
    %955 = math.tanh %954 : vector<2x64xf32>
    %cst_190 = arith.constant 1.000000e+00 : f32
    %956 = vector.broadcast %cst_190 : f32 to vector<2x64xf32>
    %957 = arith.subf %956, %950 : vector<2x64xf32>
    %958 = arith.mulf %957, %955 : vector<2x64xf32>
    %959 = arith.mulf %950, %825 : vector<2x64xf32>
    %960 = arith.addf %958, %959 : vector<2x64xf32>
    %c2 = arith.constant 2 : index
    %c0_191 = arith.constant 0 : index
    %c0_192 = arith.constant 0 : index
    %961 = vector.load %arg27[%c2, %c0_191, %c0_192] : memref<8x2x8xf32, #tpu.memory_space<vmem>>, vector<1x2x8xf32>
    %962 = vector.shape_cast %961 : vector<1x2x8xf32> to vector<2x8xf32>
    %963 = vector.shape_cast %919 : vector<2x8xf32> to vector<1x2x8xf32>
    tpu.vector_store %arg27[%c2, %c0_191, %c0_192], %963 {strides = array<i32>} : memref<8x2x8xf32, #tpu.memory_space<vmem>>, vector<1x2x8xf32>,
    %cst_193 = arith.constant dense<0.000000e+00> : vector<2x16xf32>
    %964 = tpu.matmul %960, %555, %cst_193 {dimension_numbers = #tpu.dot_dimension_numbers<[1], [0], [0], [1], [0, 0, 1, 1], [], []>} : vector<2x64xf32>, vector<64x16xf32>, vector<2x16xf32> -> vector<2x16xf32>
    %965 = arith.mulf %964, %508 : vector<2x16xf32>
    %cst_194 = arith.constant dense<0.000000e+00> : vector<2xf32>
    %966 = vector.multi_reduction <add>, %965, %cst_194 [1] : vector<2x16xf32> to vector<2xf32>
    %967 = vector.shape_cast %966 : vector<2xf32> to vector<2x1xf32>
    %968 = arith.mulf %964, %513 : vector<2x16xf32>
    %cst_195 = arith.constant dense<0.000000e+00> : vector<2xf32>
    %969 = vector.multi_reduction <add>, %968, %cst_195 [1] : vector<2x16xf32> to vector<2xf32>
    %970 = vector.shape_cast %969 : vector<2xf32> to vector<2x1xf32>
    %971 = arith.mulf %964, %518 : vector<2x16xf32>
    %cst_196 = arith.constant dense<0.000000e+00> : vector<2xf32>
    %972 = vector.multi_reduction <add>, %971, %cst_196 [1] : vector<2x16xf32> to vector<2xf32>
    %973 = vector.shape_cast %972 : vector<2xf32> to vector<2x1xf32>
    %974 = arith.mulf %964, %523 : vector<2x16xf32>
    %cst_197 = arith.constant dense<0.000000e+00> : vector<2xf32>
    %975 = vector.multi_reduction <add>, %974, %cst_197 [1] : vector<2x16xf32> to vector<2xf32>
    %976 = vector.shape_cast %975 : vector<2xf32> to vector<2x1xf32>
    %977 = arith.mulf %964, %528 : vector<2x16xf32>
    %cst_198 = arith.constant dense<0.000000e+00> : vector<2xf32>
    %978 = vector.multi_reduction <add>, %977, %cst_198 [1] : vector<2x16xf32> to vector<2xf32>
    %979 = vector.shape_cast %978 : vector<2xf32> to vector<2x1xf32>
    %980 = arith.mulf %964, %533 : vector<2x16xf32>
    %cst_199 = arith.constant dense<0.000000e+00> : vector<2xf32>
    %981 = vector.multi_reduction <add>, %980, %cst_199 [1] : vector<2x16xf32> to vector<2xf32>
    %982 = vector.shape_cast %981 : vector<2xf32> to vector<2x1xf32>
    %983 = arith.mulf %964, %538 : vector<2x16xf32>
    %cst_200 = arith.constant dense<0.000000e+00> : vector<2xf32>
    %984 = vector.multi_reduction <add>, %983, %cst_200 [1] : vector<2x16xf32> to vector<2xf32>
    %985 = vector.shape_cast %984 : vector<2xf32> to vector<2x1xf32>
    %986 = arith.mulf %964, %543 : vector<2x16xf32>
    %cst_201 = arith.constant dense<0.000000e+00> : vector<2xf32>
    %987 = vector.multi_reduction <add>, %986, %cst_201 [1] : vector<2x16xf32> to vector<2xf32>
    %988 = vector.shape_cast %987 : vector<2xf32> to vector<2x1xf32>
    %989 = arith.maximumf %967, %970 : vector<2x1xf32>
    %990 = arith.maximumf %989, %973 : vector<2x1xf32>
    %991 = arith.maximumf %990, %976 : vector<2x1xf32>
    %992 = arith.maximumf %991, %979 : vector<2x1xf32>
    %993 = arith.maximumf %992, %982 : vector<2x1xf32>
    %994 = arith.maximumf %993, %985 : vector<2x1xf32>
    %995 = arith.maximumf %994, %988 : vector<2x1xf32>
    %996 = arith.subf %967, %995 : vector<2x1xf32>
    %997 = math.exp %996 : vector<2x1xf32>
    %998 = arith.subf %970, %995 : vector<2x1xf32>
    %999 = math.exp %998 : vector<2x1xf32>
    %1000 = arith.subf %973, %995 : vector<2x1xf32>
    %1001 = math.exp %1000 : vector<2x1xf32>
    %1002 = arith.subf %976, %995 : vector<2x1xf32>
    %1003 = math.exp %1002 : vector<2x1xf32>
    %1004 = arith.subf %979, %995 : vector<2x1xf32>
    %1005 = math.exp %1004 : vector<2x1xf32>
    %1006 = arith.subf %982, %995 : vector<2x1xf32>
    %1007 = math.exp %1006 : vector<2x1xf32>
    %1008 = arith.subf %985, %995 : vector<2x1xf32>
    %1009 = math.exp %1008 : vector<2x1xf32>
    %1010 = arith.subf %988, %995 : vector<2x1xf32>
    %1011 = math.exp %1010 : vector<2x1xf32>
    %1012 = arith.addf %997, %999 : vector<2x1xf32>
    %1013 = arith.addf %1012, %1001 : vector<2x1xf32>
    %1014 = arith.addf %1013, %1003 : vector<2x1xf32>
    %1015 = arith.addf %1014, %1005 : vector<2x1xf32>
    %1016 = arith.addf %1015, %1007 : vector<2x1xf32>
    %1017 = arith.addf %1016, %1009 : vector<2x1xf32>
    %1018 = arith.addf %1017, %1011 : vector<2x1xf32>
    %1019 = tpu.reciprocal %1018 {approx = true} : vector<2x1xf32> -> vector<2x1xf32>
    %1020 = arith.mulf %997, %1019 : vector<2x1xf32>
    %1021 = vector.broadcast %1020 : vector<2x1xf32> to vector<2x16xf32>
    %1022 = arith.mulf %1021, %508 : vector<2x16xf32>
    %1023 = arith.mulf %999, %1019 : vector<2x1xf32>
    %1024 = vector.broadcast %1023 : vector<2x1xf32> to vector<2x16xf32>
    %1025 = arith.mulf %1024, %513 : vector<2x16xf32>
    %1026 = arith.addf %1022, %1025 : vector<2x16xf32>
    %1027 = arith.mulf %1001, %1019 : vector<2x1xf32>
    %1028 = vector.broadcast %1027 : vector<2x1xf32> to vector<2x16xf32>
    %1029 = arith.mulf %1028, %518 : vector<2x16xf32>
    %1030 = arith.addf %1026, %1029 : vector<2x16xf32>
    %1031 = arith.mulf %1003, %1019 : vector<2x1xf32>
    %1032 = vector.broadcast %1031 : vector<2x1xf32> to vector<2x16xf32>
    %1033 = arith.mulf %1032, %523 : vector<2x16xf32>
    %1034 = arith.addf %1030, %1033 : vector<2x16xf32>
    %1035 = arith.mulf %1005, %1019 : vector<2x1xf32>
    %1036 = vector.broadcast %1035 : vector<2x1xf32> to vector<2x16xf32>
    %1037 = arith.mulf %1036, %528 : vector<2x16xf32>
    %1038 = arith.addf %1034, %1037 : vector<2x16xf32>
    %1039 = arith.mulf %1007, %1019 : vector<2x1xf32>
    %1040 = vector.broadcast %1039 : vector<2x1xf32> to vector<2x16xf32>
    %1041 = arith.mulf %1040, %533 : vector<2x16xf32>
    %1042 = arith.addf %1038, %1041 : vector<2x16xf32>
    %1043 = arith.mulf %1009, %1019 : vector<2x1xf32>
    %1044 = vector.broadcast %1043 : vector<2x1xf32> to vector<2x16xf32>
    %1045 = arith.mulf %1044, %538 : vector<2x16xf32>
    %1046 = arith.addf %1042, %1045 : vector<2x16xf32>
    %1047 = arith.mulf %1011, %1019 : vector<2x1xf32>
    %1048 = vector.broadcast %1047 : vector<2x1xf32> to vector<2x16xf32>
    %1049 = arith.mulf %1048, %543 : vector<2x16xf32>
    %1050 = arith.addf %1046, %1049 : vector<2x16xf32>
    %cst_202 = arith.constant dense<0.000000e+00> : vector<2x8xf32>
    %1051 = tpu.matmul %1050, %556, %cst_202 {dimension_numbers = #tpu.dot_dimension_numbers<[1], [0], [0], [1], [0, 0, 1, 1], [], []>} : vector<2x16xf32>, vector<16x8xf32>, vector<2x8xf32> -> vector<2x8xf32>
    %1052 = vector.broadcast %557 : vector<1x8xf32> to vector<2x8xf32>
    %1053 = arith.addf %1051, %1052 : vector<2x8xf32>
    %1054 = math.tanh %1053 : vector<2x8xf32>
    %cst_203 = arith.constant dense<0.000000e+00> : vector<2x384xf32>
    %1055 = tpu.matmul %1054, %558, %cst_203 {dimension_numbers = #tpu.dot_dimension_numbers<[1], [0], [0], [1], [0, 0, 1, 1], [], []>} : vector<2x8xf32>, vector<8x384xf32>, vector<2x384xf32> -> vector<2x384xf32>
    %1056 = vector.extract_strided_slice %1055 {offsets = [0, 0], sizes = [2, 192], strides = [1, 1]} : vector<2x384xf32> to vector<2x192xf32>
    %1057 = vector.extract_strided_slice %1055 {offsets = [0, 192], sizes = [2, 192], strides = [1, 1]} : vector<2x384xf32> to vector<2x192xf32>
    %1058 = vector.extract_strided_slice %14 {offsets = [6, 0], sizes = [2, 192], strides = [1, 1]} : vector<16x192xf32> to vector<2x192xf32>
    %cst_204 = arith.constant 1.000000e+00 : f32
    %1059 = vector.broadcast %cst_204 : f32 to vector<2x192xf32>
    %1060 = arith.addf %1059, %1056 : vector<2x192xf32>
    %1061 = arith.mulf %1058, %1060 : vector<2x192xf32>
    %1062 = vector.broadcast %553 : vector<1x192xf32> to vector<2x192xf32>
    %1063 = arith.addf %1061, %1062 : vector<2x192xf32>
    %cst_205 = arith.constant dense<0.000000e+00> : vector<2x192xf32>
    %1064 = tpu.matmul %960, %552, %cst_205 {dimension_numbers = #tpu.dot_dimension_numbers<[1], [0], [0], [1], [0, 0, 1, 1], [], []>} : vector<2x64xf32>, vector<64x192xf32>, vector<2x192xf32> -> vector<2x192xf32>
    %cst_206 = arith.constant 1.000000e+00 : f32
    %1065 = vector.broadcast %cst_206 : f32 to vector<2x192xf32>
    %1066 = arith.addf %1065, %1057 : vector<2x192xf32>
    %1067 = arith.mulf %1064, %1066 : vector<2x192xf32>
    %1068 = vector.broadcast %554 : vector<1x192xf32> to vector<2x192xf32>
    %1069 = arith.addf %1067, %1068 : vector<2x192xf32>
    %1070 = vector.extract_strided_slice %1063 {offsets = [0, 0], sizes = [2, 64], strides = [1, 1]} : vector<2x192xf32> to vector<2x64xf32>
    %1071 = vector.extract_strided_slice %1069 {offsets = [0, 0], sizes = [2, 64], strides = [1, 1]} : vector<2x192xf32> to vector<2x64xf32>
    %1072 = arith.addf %1070, %1071 : vector<2x64xf32>
    %1073 = arith.negf %1072 : vector<2x64xf32>
    %1074 = math.exp %1073 : vector<2x64xf32>
    %cst_207 = arith.constant 1.000000e+00 : f32
    %1075 = vector.broadcast %cst_207 : f32 to vector<2x64xf32>
    %1076 = arith.addf %1075, %1074 : vector<2x64xf32>
    %1077 = arith.divf %1075, %1076 : vector<2x64xf32>
    %1078 = vector.extract_strided_slice %1063 {offsets = [0, 64], sizes = [2, 64], strides = [1, 1]} : vector<2x192xf32> to vector<2x64xf32>
    %1079 = vector.extract_strided_slice %1069 {offsets = [0, 64], sizes = [2, 64], strides = [1, 1]} : vector<2x192xf32> to vector<2x64xf32>
    %1080 = arith.addf %1078, %1079 : vector<2x64xf32>
    %1081 = arith.negf %1080 : vector<2x64xf32>
    %1082 = math.exp %1081 : vector<2x64xf32>
    %cst_208 = arith.constant 1.000000e+00 : f32
    %1083 = vector.broadcast %cst_208 : f32 to vector<2x64xf32>
    %1084 = arith.addf %1083, %1082 : vector<2x64xf32>
    %1085 = arith.divf %1083, %1084 : vector<2x64xf32>
    %1086 = vector.extract_strided_slice %1063 {offsets = [0, 128], sizes = [2, 64], strides = [1, 1]} : vector<2x192xf32> to vector<2x64xf32>
    %1087 = vector.extract_strided_slice %1069 {offsets = [0, 128], sizes = [2, 64], strides = [1, 1]} : vector<2x192xf32> to vector<2x64xf32>
    %1088 = arith.mulf %1077, %1087 : vector<2x64xf32>
    %1089 = arith.addf %1086, %1088 : vector<2x64xf32>
    %1090 = math.tanh %1089 : vector<2x64xf32>
    %cst_209 = arith.constant 1.000000e+00 : f32
    %1091 = vector.broadcast %cst_209 : f32 to vector<2x64xf32>
    %1092 = arith.subf %1091, %1085 : vector<2x64xf32>
    %1093 = arith.mulf %1092, %1090 : vector<2x64xf32>
    %1094 = arith.mulf %1085, %960 : vector<2x64xf32>
    %1095 = arith.addf %1093, %1094 : vector<2x64xf32>
    %c3 = arith.constant 3 : index
    %c0_210 = arith.constant 0 : index
    %c0_211 = arith.constant 0 : index
    %1096 = vector.load %arg27[%c3, %c0_210, %c0_211] : memref<8x2x8xf32, #tpu.memory_space<vmem>>, vector<1x2x8xf32>
    %1097 = vector.shape_cast %1096 : vector<1x2x8xf32> to vector<2x8xf32>
    %1098 = vector.shape_cast %1054 : vector<2x8xf32> to vector<1x2x8xf32>
    tpu.vector_store %arg27[%c3, %c0_210, %c0_211], %1098 {strides = array<i32>} : memref<8x2x8xf32, #tpu.memory_space<vmem>>, vector<1x2x8xf32>,
    %cst_212 = arith.constant dense<0.000000e+00> : vector<2x16xf32>
    %1099 = tpu.matmul %1095, %555, %cst_212 {dimension_numbers = #tpu.dot_dimension_numbers<[1], [0], [0], [1], [0, 0, 1, 1], [], []>} : vector<2x64xf32>, vector<64x16xf32>, vector<2x16xf32> -> vector<2x16xf32>
    %1100 = arith.mulf %1099, %508 : vector<2x16xf32>
    %cst_213 = arith.constant dense<0.000000e+00> : vector<2xf32>
    %1101 = vector.multi_reduction <add>, %1100, %cst_213 [1] : vector<2x16xf32> to vector<2xf32>
    %1102 = vector.shape_cast %1101 : vector<2xf32> to vector<2x1xf32>
    %1103 = arith.mulf %1099, %513 : vector<2x16xf32>
    %cst_214 = arith.constant dense<0.000000e+00> : vector<2xf32>
    %1104 = vector.multi_reduction <add>, %1103, %cst_214 [1] : vector<2x16xf32> to vector<2xf32>
    %1105 = vector.shape_cast %1104 : vector<2xf32> to vector<2x1xf32>
    %1106 = arith.mulf %1099, %518 : vector<2x16xf32>
    %cst_215 = arith.constant dense<0.000000e+00> : vector<2xf32>
    %1107 = vector.multi_reduction <add>, %1106, %cst_215 [1] : vector<2x16xf32> to vector<2xf32>
    %1108 = vector.shape_cast %1107 : vector<2xf32> to vector<2x1xf32>
    %1109 = arith.mulf %1099, %523 : vector<2x16xf32>
    %cst_216 = arith.constant dense<0.000000e+00> : vector<2xf32>
    %1110 = vector.multi_reduction <add>, %1109, %cst_216 [1] : vector<2x16xf32> to vector<2xf32>
    %1111 = vector.shape_cast %1110 : vector<2xf32> to vector<2x1xf32>
    %1112 = arith.mulf %1099, %528 : vector<2x16xf32>
    %cst_217 = arith.constant dense<0.000000e+00> : vector<2xf32>
    %1113 = vector.multi_reduction <add>, %1112, %cst_217 [1] : vector<2x16xf32> to vector<2xf32>
    %1114 = vector.shape_cast %1113 : vector<2xf32> to vector<2x1xf32>
    %1115 = arith.mulf %1099, %533 : vector<2x16xf32>
    %cst_218 = arith.constant dense<0.000000e+00> : vector<2xf32>
    %1116 = vector.multi_reduction <add>, %1115, %cst_218 [1] : vector<2x16xf32> to vector<2xf32>
    %1117 = vector.shape_cast %1116 : vector<2xf32> to vector<2x1xf32>
    %1118 = arith.mulf %1099, %538 : vector<2x16xf32>
    %cst_219 = arith.constant dense<0.000000e+00> : vector<2xf32>
    %1119 = vector.multi_reduction <add>, %1118, %cst_219 [1] : vector<2x16xf32> to vector<2xf32>
    %1120 = vector.shape_cast %1119 : vector<2xf32> to vector<2x1xf32>
    %1121 = arith.mulf %1099, %543 : vector<2x16xf32>
    %cst_220 = arith.constant dense<0.000000e+00> : vector<2xf32>
    %1122 = vector.multi_reduction <add>, %1121, %cst_220 [1] : vector<2x16xf32> to vector<2xf32>
    %1123 = vector.shape_cast %1122 : vector<2xf32> to vector<2x1xf32>
    %1124 = arith.maximumf %1102, %1105 : vector<2x1xf32>
    %1125 = arith.maximumf %1124, %1108 : vector<2x1xf32>
    %1126 = arith.maximumf %1125, %1111 : vector<2x1xf32>
    %1127 = arith.maximumf %1126, %1114 : vector<2x1xf32>
    %1128 = arith.maximumf %1127, %1117 : vector<2x1xf32>
    %1129 = arith.maximumf %1128, %1120 : vector<2x1xf32>
    %1130 = arith.maximumf %1129, %1123 : vector<2x1xf32>
    %1131 = arith.subf %1102, %1130 : vector<2x1xf32>
    %1132 = math.exp %1131 : vector<2x1xf32>
    %1133 = arith.subf %1105, %1130 : vector<2x1xf32>
    %1134 = math.exp %1133 : vector<2x1xf32>
    %1135 = arith.subf %1108, %1130 : vector<2x1xf32>
    %1136 = math.exp %1135 : vector<2x1xf32>
    %1137 = arith.subf %1111, %1130 : vector<2x1xf32>
    %1138 = math.exp %1137 : vector<2x1xf32>
    %1139 = arith.subf %1114, %1130 : vector<2x1xf32>
    %1140 = math.exp %1139 : vector<2x1xf32>
    %1141 = arith.subf %1117, %1130 : vector<2x1xf32>
    %1142 = math.exp %1141 : vector<2x1xf32>
    %1143 = arith.subf %1120, %1130 : vector<2x1xf32>
    %1144 = math.exp %1143 : vector<2x1xf32>
    %1145 = arith.subf %1123, %1130 : vector<2x1xf32>
    %1146 = math.exp %1145 : vector<2x1xf32>
    %1147 = arith.addf %1132, %1134 : vector<2x1xf32>
    %1148 = arith.addf %1147, %1136 : vector<2x1xf32>
    %1149 = arith.addf %1148, %1138 : vector<2x1xf32>
    %1150 = arith.addf %1149, %1140 : vector<2x1xf32>
    %1151 = arith.addf %1150, %1142 : vector<2x1xf32>
    %1152 = arith.addf %1151, %1144 : vector<2x1xf32>
    %1153 = arith.addf %1152, %1146 : vector<2x1xf32>
    %1154 = tpu.reciprocal %1153 {approx = true} : vector<2x1xf32> -> vector<2x1xf32>
    %1155 = arith.mulf %1132, %1154 : vector<2x1xf32>
    %1156 = vector.broadcast %1155 : vector<2x1xf32> to vector<2x16xf32>
    %1157 = arith.mulf %1156, %508 : vector<2x16xf32>
    %1158 = arith.mulf %1134, %1154 : vector<2x1xf32>
    %1159 = vector.broadcast %1158 : vector<2x1xf32> to vector<2x16xf32>
    %1160 = arith.mulf %1159, %513 : vector<2x16xf32>
    %1161 = arith.addf %1157, %1160 : vector<2x16xf32>
    %1162 = arith.mulf %1136, %1154 : vector<2x1xf32>
    %1163 = vector.broadcast %1162 : vector<2x1xf32> to vector<2x16xf32>
    %1164 = arith.mulf %1163, %518 : vector<2x16xf32>
    %1165 = arith.addf %1161, %1164 : vector<2x16xf32>
    %1166 = arith.mulf %1138, %1154 : vector<2x1xf32>
    %1167 = vector.broadcast %1166 : vector<2x1xf32> to vector<2x16xf32>
    %1168 = arith.mulf %1167, %523 : vector<2x16xf32>
    %1169 = arith.addf %1165, %1168 : vector<2x16xf32>
    %1170 = arith.mulf %1140, %1154 : vector<2x1xf32>
    %1171 = vector.broadcast %1170 : vector<2x1xf32> to vector<2x16xf32>
    %1172 = arith.mulf %1171, %528 : vector<2x16xf32>
    %1173 = arith.addf %1169, %1172 : vector<2x16xf32>
    %1174 = arith.mulf %1142, %1154 : vector<2x1xf32>
    %1175 = vector.broadcast %1174 : vector<2x1xf32> to vector<2x16xf32>
    %1176 = arith.mulf %1175, %533 : vector<2x16xf32>
    %1177 = arith.addf %1173, %1176 : vector<2x16xf32>
    %1178 = arith.mulf %1144, %1154 : vector<2x1xf32>
    %1179 = vector.broadcast %1178 : vector<2x1xf32> to vector<2x16xf32>
    %1180 = arith.mulf %1179, %538 : vector<2x16xf32>
    %1181 = arith.addf %1177, %1180 : vector<2x16xf32>
    %1182 = arith.mulf %1146, %1154 : vector<2x1xf32>
    %1183 = vector.broadcast %1182 : vector<2x1xf32> to vector<2x16xf32>
    %1184 = arith.mulf %1183, %543 : vector<2x16xf32>
    %1185 = arith.addf %1181, %1184 : vector<2x16xf32>
    %cst_221 = arith.constant dense<0.000000e+00> : vector<2x8xf32>
    %1186 = tpu.matmul %1185, %556, %cst_221 {dimension_numbers = #tpu.dot_dimension_numbers<[1], [0], [0], [1], [0, 0, 1, 1], [], []>} : vector<2x16xf32>, vector<16x8xf32>, vector<2x8xf32> -> vector<2x8xf32>
    %1187 = vector.broadcast %557 : vector<1x8xf32> to vector<2x8xf32>
    %1188 = arith.addf %1186, %1187 : vector<2x8xf32>
    %1189 = math.tanh %1188 : vector<2x8xf32>
    %cst_222 = arith.constant dense<0.000000e+00> : vector<2x384xf32>
    %1190 = tpu.matmul %1189, %558, %cst_222 {dimension_numbers = #tpu.dot_dimension_numbers<[1], [0], [0], [1], [0, 0, 1, 1], [], []>} : vector<2x8xf32>, vector<8x384xf32>, vector<2x384xf32> -> vector<2x384xf32>
    %1191 = vector.extract_strided_slice %1190 {offsets = [0, 0], sizes = [2, 192], strides = [1, 1]} : vector<2x384xf32> to vector<2x192xf32>
    %1192 = vector.extract_strided_slice %1190 {offsets = [0, 192], sizes = [2, 192], strides = [1, 1]} : vector<2x384xf32> to vector<2x192xf32>
    %1193 = vector.extract_strided_slice %14 {offsets = [8, 0], sizes = [2, 192], strides = [1, 1]} : vector<16x192xf32> to vector<2x192xf32>
    %cst_223 = arith.constant 1.000000e+00 : f32
    %1194 = vector.broadcast %cst_223 : f32 to vector<2x192xf32>
    %1195 = arith.addf %1194, %1191 : vector<2x192xf32>
    %1196 = arith.mulf %1193, %1195 : vector<2x192xf32>
    %1197 = vector.broadcast %553 : vector<1x192xf32> to vector<2x192xf32>
    %1198 = arith.addf %1196, %1197 : vector<2x192xf32>
    %cst_224 = arith.constant dense<0.000000e+00> : vector<2x192xf32>
    %1199 = tpu.matmul %1095, %552, %cst_224 {dimension_numbers = #tpu.dot_dimension_numbers<[1], [0], [0], [1], [0, 0, 1, 1], [], []>} : vector<2x64xf32>, vector<64x192xf32>, vector<2x192xf32> -> vector<2x192xf32>
    %cst_225 = arith.constant 1.000000e+00 : f32
    %1200 = vector.broadcast %cst_225 : f32 to vector<2x192xf32>
    %1201 = arith.addf %1200, %1192 : vector<2x192xf32>
    %1202 = arith.mulf %1199, %1201 : vector<2x192xf32>
    %1203 = vector.broadcast %554 : vector<1x192xf32> to vector<2x192xf32>
    %1204 = arith.addf %1202, %1203 : vector<2x192xf32>
    %1205 = vector.extract_strided_slice %1198 {offsets = [0, 0], sizes = [2, 64], strides = [1, 1]} : vector<2x192xf32> to vector<2x64xf32>
    %1206 = vector.extract_strided_slice %1204 {offsets = [0, 0], sizes = [2, 64], strides = [1, 1]} : vector<2x192xf32> to vector<2x64xf32>
    %1207 = arith.addf %1205, %1206 : vector<2x64xf32>
    %1208 = arith.negf %1207 : vector<2x64xf32>
    %1209 = math.exp %1208 : vector<2x64xf32>
    %cst_226 = arith.constant 1.000000e+00 : f32
    %1210 = vector.broadcast %cst_226 : f32 to vector<2x64xf32>
    %1211 = arith.addf %1210, %1209 : vector<2x64xf32>
    %1212 = arith.divf %1210, %1211 : vector<2x64xf32>
    %1213 = vector.extract_strided_slice %1198 {offsets = [0, 64], sizes = [2, 64], strides = [1, 1]} : vector<2x192xf32> to vector<2x64xf32>
    %1214 = vector.extract_strided_slice %1204 {offsets = [0, 64], sizes = [2, 64], strides = [1, 1]} : vector<2x192xf32> to vector<2x64xf32>
    %1215 = arith.addf %1213, %1214 : vector<2x64xf32>
    %1216 = arith.negf %1215 : vector<2x64xf32>
    %1217 = math.exp %1216 : vector<2x64xf32>
    %cst_227 = arith.constant 1.000000e+00 : f32
    %1218 = vector.broadcast %cst_227 : f32 to vector<2x64xf32>
    %1219 = arith.addf %1218, %1217 : vector<2x64xf32>
    %1220 = arith.divf %1218, %1219 : vector<2x64xf32>
    %1221 = vector.extract_strided_slice %1198 {offsets = [0, 128], sizes = [2, 64], strides = [1, 1]} : vector<2x192xf32> to vector<2x64xf32>
    %1222 = vector.extract_strided_slice %1204 {offsets = [0, 128], sizes = [2, 64], strides = [1, 1]} : vector<2x192xf32> to vector<2x64xf32>
    %1223 = arith.mulf %1212, %1222 : vector<2x64xf32>
    %1224 = arith.addf %1221, %1223 : vector<2x64xf32>
    %1225 = math.tanh %1224 : vector<2x64xf32>
    %cst_228 = arith.constant 1.000000e+00 : f32
    %1226 = vector.broadcast %cst_228 : f32 to vector<2x64xf32>
    %1227 = arith.subf %1226, %1220 : vector<2x64xf32>
    %1228 = arith.mulf %1227, %1225 : vector<2x64xf32>
    %1229 = arith.mulf %1220, %1095 : vector<2x64xf32>
    %1230 = arith.addf %1228, %1229 : vector<2x64xf32>
    %c4 = arith.constant 4 : index
    %c0_229 = arith.constant 0 : index
    %c0_230 = arith.constant 0 : index
    %1231 = vector.load %arg27[%c4, %c0_229, %c0_230] : memref<8x2x8xf32, #tpu.memory_space<vmem>>, vector<1x2x8xf32>
    %1232 = vector.shape_cast %1231 : vector<1x2x8xf32> to vector<2x8xf32>
    %1233 = vector.shape_cast %1189 : vector<2x8xf32> to vector<1x2x8xf32>
    tpu.vector_store %arg27[%c4, %c0_229, %c0_230], %1233 {strides = array<i32>} : memref<8x2x8xf32, #tpu.memory_space<vmem>>, vector<1x2x8xf32>,
    %cst_231 = arith.constant dense<0.000000e+00> : vector<2x16xf32>
    %1234 = tpu.matmul %1230, %555, %cst_231 {dimension_numbers = #tpu.dot_dimension_numbers<[1], [0], [0], [1], [0, 0, 1, 1], [], []>} : vector<2x64xf32>, vector<64x16xf32>, vector<2x16xf32> -> vector<2x16xf32>
    %1235 = arith.mulf %1234, %508 : vector<2x16xf32>
    %cst_232 = arith.constant dense<0.000000e+00> : vector<2xf32>
    %1236 = vector.multi_reduction <add>, %1235, %cst_232 [1] : vector<2x16xf32> to vector<2xf32>
    %1237 = vector.shape_cast %1236 : vector<2xf32> to vector<2x1xf32>
    %1238 = arith.mulf %1234, %513 : vector<2x16xf32>
    %cst_233 = arith.constant dense<0.000000e+00> : vector<2xf32>
    %1239 = vector.multi_reduction <add>, %1238, %cst_233 [1] : vector<2x16xf32> to vector<2xf32>
    %1240 = vector.shape_cast %1239 : vector<2xf32> to vector<2x1xf32>
    %1241 = arith.mulf %1234, %518 : vector<2x16xf32>
    %cst_234 = arith.constant dense<0.000000e+00> : vector<2xf32>
    %1242 = vector.multi_reduction <add>, %1241, %cst_234 [1] : vector<2x16xf32> to vector<2xf32>
    %1243 = vector.shape_cast %1242 : vector<2xf32> to vector<2x1xf32>
    %1244 = arith.mulf %1234, %523 : vector<2x16xf32>
    %cst_235 = arith.constant dense<0.000000e+00> : vector<2xf32>
    %1245 = vector.multi_reduction <add>, %1244, %cst_235 [1] : vector<2x16xf32> to vector<2xf32>
    %1246 = vector.shape_cast %1245 : vector<2xf32> to vector<2x1xf32>
    %1247 = arith.mulf %1234, %528 : vector<2x16xf32>
    %cst_236 = arith.constant dense<0.000000e+00> : vector<2xf32>
    %1248 = vector.multi_reduction <add>, %1247, %cst_236 [1] : vector<2x16xf32> to vector<2xf32>
    %1249 = vector.shape_cast %1248 : vector<2xf32> to vector<2x1xf32>
    %1250 = arith.mulf %1234, %533 : vector<2x16xf32>
    %cst_237 = arith.constant dense<0.000000e+00> : vector<2xf32>
    %1251 = vector.multi_reduction <add>, %1250, %cst_237 [1] : vector<2x16xf32> to vector<2xf32>
    %1252 = vector.shape_cast %1251 : vector<2xf32> to vector<2x1xf32>
    %1253 = arith.mulf %1234, %538 : vector<2x16xf32>
    %cst_238 = arith.constant dense<0.000000e+00> : vector<2xf32>
    %1254 = vector.multi_reduction <add>, %1253, %cst_238 [1] : vector<2x16xf32> to vector<2xf32>
    %1255 = vector.shape_cast %1254 : vector<2xf32> to vector<2x1xf32>
    %1256 = arith.mulf %1234, %543 : vector<2x16xf32>
    %cst_239 = arith.constant dense<0.000000e+00> : vector<2xf32>
    %1257 = vector.multi_reduction <add>, %1256, %cst_239 [1] : vector<2x16xf32> to vector<2xf32>
    %1258 = vector.shape_cast %1257 : vector<2xf32> to vector<2x1xf32>
    %1259 = arith.maximumf %1237, %1240 : vector<2x1xf32>
    %1260 = arith.maximumf %1259, %1243 : vector<2x1xf32>
    %1261 = arith.maximumf %1260, %1246 : vector<2x1xf32>
    %1262 = arith.maximumf %1261, %1249 : vector<2x1xf32>
    %1263 = arith.maximumf %1262, %1252 : vector<2x1xf32>
    %1264 = arith.maximumf %1263, %1255 : vector<2x1xf32>
    %1265 = arith.maximumf %1264, %1258 : vector<2x1xf32>
    %1266 = arith.subf %1237, %1265 : vector<2x1xf32>
    %1267 = math.exp %1266 : vector<2x1xf32>
    %1268 = arith.subf %1240, %1265 : vector<2x1xf32>
    %1269 = math.exp %1268 : vector<2x1xf32>
    %1270 = arith.subf %1243, %1265 : vector<2x1xf32>
    %1271 = math.exp %1270 : vector<2x1xf32>
    %1272 = arith.subf %1246, %1265 : vector<2x1xf32>
    %1273 = math.exp %1272 : vector<2x1xf32>
    %1274 = arith.subf %1249, %1265 : vector<2x1xf32>
    %1275 = math.exp %1274 : vector<2x1xf32>
    %1276 = arith.subf %1252, %1265 : vector<2x1xf32>
    %1277 = math.exp %1276 : vector<2x1xf32>
    %1278 = arith.subf %1255, %1265 : vector<2x1xf32>
    %1279 = math.exp %1278 : vector<2x1xf32>
    %1280 = arith.subf %1258, %1265 : vector<2x1xf32>
    %1281 = math.exp %1280 : vector<2x1xf32>
    %1282 = arith.addf %1267, %1269 : vector<2x1xf32>
    %1283 = arith.addf %1282, %1271 : vector<2x1xf32>
    %1284 = arith.addf %1283, %1273 : vector<2x1xf32>
    %1285 = arith.addf %1284, %1275 : vector<2x1xf32>
    %1286 = arith.addf %1285, %1277 : vector<2x1xf32>
    %1287 = arith.addf %1286, %1279 : vector<2x1xf32>
    %1288 = arith.addf %1287, %1281 : vector<2x1xf32>
    %1289 = tpu.reciprocal %1288 {approx = true} : vector<2x1xf32> -> vector<2x1xf32>
    %1290 = arith.mulf %1267, %1289 : vector<2x1xf32>
    %1291 = vector.broadcast %1290 : vector<2x1xf32> to vector<2x16xf32>
    %1292 = arith.mulf %1291, %508 : vector<2x16xf32>
    %1293 = arith.mulf %1269, %1289 : vector<2x1xf32>
    %1294 = vector.broadcast %1293 : vector<2x1xf32> to vector<2x16xf32>
    %1295 = arith.mulf %1294, %513 : vector<2x16xf32>
    %1296 = arith.addf %1292, %1295 : vector<2x16xf32>
    %1297 = arith.mulf %1271, %1289 : vector<2x1xf32>
    %1298 = vector.broadcast %1297 : vector<2x1xf32> to vector<2x16xf32>
    %1299 = arith.mulf %1298, %518 : vector<2x16xf32>
    %1300 = arith.addf %1296, %1299 : vector<2x16xf32>
    %1301 = arith.mulf %1273, %1289 : vector<2x1xf32>
    %1302 = vector.broadcast %1301 : vector<2x1xf32> to vector<2x16xf32>
    %1303 = arith.mulf %1302, %523 : vector<2x16xf32>
    %1304 = arith.addf %1300, %1303 : vector<2x16xf32>
    %1305 = arith.mulf %1275, %1289 : vector<2x1xf32>
    %1306 = vector.broadcast %1305 : vector<2x1xf32> to vector<2x16xf32>
    %1307 = arith.mulf %1306, %528 : vector<2x16xf32>
    %1308 = arith.addf %1304, %1307 : vector<2x16xf32>
    %1309 = arith.mulf %1277, %1289 : vector<2x1xf32>
    %1310 = vector.broadcast %1309 : vector<2x1xf32> to vector<2x16xf32>
    %1311 = arith.mulf %1310, %533 : vector<2x16xf32>
    %1312 = arith.addf %1308, %1311 : vector<2x16xf32>
    %1313 = arith.mulf %1279, %1289 : vector<2x1xf32>
    %1314 = vector.broadcast %1313 : vector<2x1xf32> to vector<2x16xf32>
    %1315 = arith.mulf %1314, %538 : vector<2x16xf32>
    %1316 = arith.addf %1312, %1315 : vector<2x16xf32>
    %1317 = arith.mulf %1281, %1289 : vector<2x1xf32>
    %1318 = vector.broadcast %1317 : vector<2x1xf32> to vector<2x16xf32>
    %1319 = arith.mulf %1318, %543 : vector<2x16xf32>
    %1320 = arith.addf %1316, %1319 : vector<2x16xf32>
    %cst_240 = arith.constant dense<0.000000e+00> : vector<2x8xf32>
    %1321 = tpu.matmul %1320, %556, %cst_240 {dimension_numbers = #tpu.dot_dimension_numbers<[1], [0], [0], [1], [0, 0, 1, 1], [], []>} : vector<2x16xf32>, vector<16x8xf32>, vector<2x8xf32> -> vector<2x8xf32>
    %1322 = vector.broadcast %557 : vector<1x8xf32> to vector<2x8xf32>
    %1323 = arith.addf %1321, %1322 : vector<2x8xf32>
    %1324 = math.tanh %1323 : vector<2x8xf32>
    %cst_241 = arith.constant dense<0.000000e+00> : vector<2x384xf32>
    %1325 = tpu.matmul %1324, %558, %cst_241 {dimension_numbers = #tpu.dot_dimension_numbers<[1], [0], [0], [1], [0, 0, 1, 1], [], []>} : vector<2x8xf32>, vector<8x384xf32>, vector<2x384xf32> -> vector<2x384xf32>
    %1326 = vector.extract_strided_slice %1325 {offsets = [0, 0], sizes = [2, 192], strides = [1, 1]} : vector<2x384xf32> to vector<2x192xf32>
    %1327 = vector.extract_strided_slice %1325 {offsets = [0, 192], sizes = [2, 192], strides = [1, 1]} : vector<2x384xf32> to vector<2x192xf32>
    %1328 = vector.extract_strided_slice %14 {offsets = [10, 0], sizes = [2, 192], strides = [1, 1]} : vector<16x192xf32> to vector<2x192xf32>
    %cst_242 = arith.constant 1.000000e+00 : f32
    %1329 = vector.broadcast %cst_242 : f32 to vector<2x192xf32>
    %1330 = arith.addf %1329, %1326 : vector<2x192xf32>
    %1331 = arith.mulf %1328, %1330 : vector<2x192xf32>
    %1332 = vector.broadcast %553 : vector<1x192xf32> to vector<2x192xf32>
    %1333 = arith.addf %1331, %1332 : vector<2x192xf32>
    %cst_243 = arith.constant dense<0.000000e+00> : vector<2x192xf32>
    %1334 = tpu.matmul %1230, %552, %cst_243 {dimension_numbers = #tpu.dot_dimension_numbers<[1], [0], [0], [1], [0, 0, 1, 1], [], []>} : vector<2x64xf32>, vector<64x192xf32>, vector<2x192xf32> -> vector<2x192xf32>
    %cst_244 = arith.constant 1.000000e+00 : f32
    %1335 = vector.broadcast %cst_244 : f32 to vector<2x192xf32>
    %1336 = arith.addf %1335, %1327 : vector<2x192xf32>
    %1337 = arith.mulf %1334, %1336 : vector<2x192xf32>
    %1338 = vector.broadcast %554 : vector<1x192xf32> to vector<2x192xf32>
    %1339 = arith.addf %1337, %1338 : vector<2x192xf32>
    %1340 = vector.extract_strided_slice %1333 {offsets = [0, 0], sizes = [2, 64], strides = [1, 1]} : vector<2x192xf32> to vector<2x64xf32>
    %1341 = vector.extract_strided_slice %1339 {offsets = [0, 0], sizes = [2, 64], strides = [1, 1]} : vector<2x192xf32> to vector<2x64xf32>
    %1342 = arith.addf %1340, %1341 : vector<2x64xf32>
    %1343 = arith.negf %1342 : vector<2x64xf32>
    %1344 = math.exp %1343 : vector<2x64xf32>
    %cst_245 = arith.constant 1.000000e+00 : f32
    %1345 = vector.broadcast %cst_245 : f32 to vector<2x64xf32>
    %1346 = arith.addf %1345, %1344 : vector<2x64xf32>
    %1347 = arith.divf %1345, %1346 : vector<2x64xf32>
    %1348 = vector.extract_strided_slice %1333 {offsets = [0, 64], sizes = [2, 64], strides = [1, 1]} : vector<2x192xf32> to vector<2x64xf32>
    %1349 = vector.extract_strided_slice %1339 {offsets = [0, 64], sizes = [2, 64], strides = [1, 1]} : vector<2x192xf32> to vector<2x64xf32>
    %1350 = arith.addf %1348, %1349 : vector<2x64xf32>
    %1351 = arith.negf %1350 : vector<2x64xf32>
    %1352 = math.exp %1351 : vector<2x64xf32>
    %cst_246 = arith.constant 1.000000e+00 : f32
    %1353 = vector.broadcast %cst_246 : f32 to vector<2x64xf32>
    %1354 = arith.addf %1353, %1352 : vector<2x64xf32>
    %1355 = arith.divf %1353, %1354 : vector<2x64xf32>
    %1356 = vector.extract_strided_slice %1333 {offsets = [0, 128], sizes = [2, 64], strides = [1, 1]} : vector<2x192xf32> to vector<2x64xf32>
    %1357 = vector.extract_strided_slice %1339 {offsets = [0, 128], sizes = [2, 64], strides = [1, 1]} : vector<2x192xf32> to vector<2x64xf32>
    %1358 = arith.mulf %1347, %1357 : vector<2x64xf32>
    %1359 = arith.addf %1356, %1358 : vector<2x64xf32>
    %1360 = math.tanh %1359 : vector<2x64xf32>
    %cst_247 = arith.constant 1.000000e+00 : f32
    %1361 = vector.broadcast %cst_247 : f32 to vector<2x64xf32>
    %1362 = arith.subf %1361, %1355 : vector<2x64xf32>
    %1363 = arith.mulf %1362, %1360 : vector<2x64xf32>
    %1364 = arith.mulf %1355, %1230 : vector<2x64xf32>
    %1365 = arith.addf %1363, %1364 : vector<2x64xf32>
    %c5 = arith.constant 5 : index
    %c0_248 = arith.constant 0 : index
    %c0_249 = arith.constant 0 : index
    %1366 = vector.load %arg27[%c5, %c0_248, %c0_249] : memref<8x2x8xf32, #tpu.memory_space<vmem>>, vector<1x2x8xf32>
    %1367 = vector.shape_cast %1366 : vector<1x2x8xf32> to vector<2x8xf32>
    %1368 = vector.shape_cast %1324 : vector<2x8xf32> to vector<1x2x8xf32>
    tpu.vector_store %arg27[%c5, %c0_248, %c0_249], %1368 {strides = array<i32>} : memref<8x2x8xf32, #tpu.memory_space<vmem>>, vector<1x2x8xf32>,
    %cst_250 = arith.constant dense<0.000000e+00> : vector<2x16xf32>
    %1369 = tpu.matmul %1365, %555, %cst_250 {dimension_numbers = #tpu.dot_dimension_numbers<[1], [0], [0], [1], [0, 0, 1, 1], [], []>} : vector<2x64xf32>, vector<64x16xf32>, vector<2x16xf32> -> vector<2x16xf32>
    %1370 = arith.mulf %1369, %508 : vector<2x16xf32>
    %cst_251 = arith.constant dense<0.000000e+00> : vector<2xf32>
    %1371 = vector.multi_reduction <add>, %1370, %cst_251 [1] : vector<2x16xf32> to vector<2xf32>
    %1372 = vector.shape_cast %1371 : vector<2xf32> to vector<2x1xf32>
    %1373 = arith.mulf %1369, %513 : vector<2x16xf32>
    %cst_252 = arith.constant dense<0.000000e+00> : vector<2xf32>
    %1374 = vector.multi_reduction <add>, %1373, %cst_252 [1] : vector<2x16xf32> to vector<2xf32>
    %1375 = vector.shape_cast %1374 : vector<2xf32> to vector<2x1xf32>
    %1376 = arith.mulf %1369, %518 : vector<2x16xf32>
    %cst_253 = arith.constant dense<0.000000e+00> : vector<2xf32>
    %1377 = vector.multi_reduction <add>, %1376, %cst_253 [1] : vector<2x16xf32> to vector<2xf32>
    %1378 = vector.shape_cast %1377 : vector<2xf32> to vector<2x1xf32>
    %1379 = arith.mulf %1369, %523 : vector<2x16xf32>
    %cst_254 = arith.constant dense<0.000000e+00> : vector<2xf32>
    %1380 = vector.multi_reduction <add>, %1379, %cst_254 [1] : vector<2x16xf32> to vector<2xf32>
    %1381 = vector.shape_cast %1380 : vector<2xf32> to vector<2x1xf32>
    %1382 = arith.mulf %1369, %528 : vector<2x16xf32>
    %cst_255 = arith.constant dense<0.000000e+00> : vector<2xf32>
    %1383 = vector.multi_reduction <add>, %1382, %cst_255 [1] : vector<2x16xf32> to vector<2xf32>
    %1384 = vector.shape_cast %1383 : vector<2xf32> to vector<2x1xf32>
    %1385 = arith.mulf %1369, %533 : vector<2x16xf32>
    %cst_256 = arith.constant dense<0.000000e+00> : vector<2xf32>
    %1386 = vector.multi_reduction <add>, %1385, %cst_256 [1] : vector<2x16xf32> to vector<2xf32>
    %1387 = vector.shape_cast %1386 : vector<2xf32> to vector<2x1xf32>
    %1388 = arith.mulf %1369, %538 : vector<2x16xf32>
    %cst_257 = arith.constant dense<0.000000e+00> : vector<2xf32>
    %1389 = vector.multi_reduction <add>, %1388, %cst_257 [1] : vector<2x16xf32> to vector<2xf32>
    %1390 = vector.shape_cast %1389 : vector<2xf32> to vector<2x1xf32>
    %1391 = arith.mulf %1369, %543 : vector<2x16xf32>
    %cst_258 = arith.constant dense<0.000000e+00> : vector<2xf32>
    %1392 = vector.multi_reduction <add>, %1391, %cst_258 [1] : vector<2x16xf32> to vector<2xf32>
    %1393 = vector.shape_cast %1392 : vector<2xf32> to vector<2x1xf32>
    %1394 = arith.maximumf %1372, %1375 : vector<2x1xf32>
    %1395 = arith.maximumf %1394, %1378 : vector<2x1xf32>
    %1396 = arith.maximumf %1395, %1381 : vector<2x1xf32>
    %1397 = arith.maximumf %1396, %1384 : vector<2x1xf32>
    %1398 = arith.maximumf %1397, %1387 : vector<2x1xf32>
    %1399 = arith.maximumf %1398, %1390 : vector<2x1xf32>
    %1400 = arith.maximumf %1399, %1393 : vector<2x1xf32>
    %1401 = arith.subf %1372, %1400 : vector<2x1xf32>
    %1402 = math.exp %1401 : vector<2x1xf32>
    %1403 = arith.subf %1375, %1400 : vector<2x1xf32>
    %1404 = math.exp %1403 : vector<2x1xf32>
    %1405 = arith.subf %1378, %1400 : vector<2x1xf32>
    %1406 = math.exp %1405 : vector<2x1xf32>
    %1407 = arith.subf %1381, %1400 : vector<2x1xf32>
    %1408 = math.exp %1407 : vector<2x1xf32>
    %1409 = arith.subf %1384, %1400 : vector<2x1xf32>
    %1410 = math.exp %1409 : vector<2x1xf32>
    %1411 = arith.subf %1387, %1400 : vector<2x1xf32>
    %1412 = math.exp %1411 : vector<2x1xf32>
    %1413 = arith.subf %1390, %1400 : vector<2x1xf32>
    %1414 = math.exp %1413 : vector<2x1xf32>
    %1415 = arith.subf %1393, %1400 : vector<2x1xf32>
    %1416 = math.exp %1415 : vector<2x1xf32>
    %1417 = arith.addf %1402, %1404 : vector<2x1xf32>
    %1418 = arith.addf %1417, %1406 : vector<2x1xf32>
    %1419 = arith.addf %1418, %1408 : vector<2x1xf32>
    %1420 = arith.addf %1419, %1410 : vector<2x1xf32>
    %1421 = arith.addf %1420, %1412 : vector<2x1xf32>
    %1422 = arith.addf %1421, %1414 : vector<2x1xf32>
    %1423 = arith.addf %1422, %1416 : vector<2x1xf32>
    %1424 = tpu.reciprocal %1423 {approx = true} : vector<2x1xf32> -> vector<2x1xf32>
    %1425 = arith.mulf %1402, %1424 : vector<2x1xf32>
    %1426 = vector.broadcast %1425 : vector<2x1xf32> to vector<2x16xf32>
    %1427 = arith.mulf %1426, %508 : vector<2x16xf32>
    %1428 = arith.mulf %1404, %1424 : vector<2x1xf32>
    %1429 = vector.broadcast %1428 : vector<2x1xf32> to vector<2x16xf32>
    %1430 = arith.mulf %1429, %513 : vector<2x16xf32>
    %1431 = arith.addf %1427, %1430 : vector<2x16xf32>
    %1432 = arith.mulf %1406, %1424 : vector<2x1xf32>
    %1433 = vector.broadcast %1432 : vector<2x1xf32> to vector<2x16xf32>
    %1434 = arith.mulf %1433, %518 : vector<2x16xf32>
    %1435 = arith.addf %1431, %1434 : vector<2x16xf32>
    %1436 = arith.mulf %1408, %1424 : vector<2x1xf32>
    %1437 = vector.broadcast %1436 : vector<2x1xf32> to vector<2x16xf32>
    %1438 = arith.mulf %1437, %523 : vector<2x16xf32>
    %1439 = arith.addf %1435, %1438 : vector<2x16xf32>
    %1440 = arith.mulf %1410, %1424 : vector<2x1xf32>
    %1441 = vector.broadcast %1440 : vector<2x1xf32> to vector<2x16xf32>
    %1442 = arith.mulf %1441, %528 : vector<2x16xf32>
    %1443 = arith.addf %1439, %1442 : vector<2x16xf32>
    %1444 = arith.mulf %1412, %1424 : vector<2x1xf32>
    %1445 = vector.broadcast %1444 : vector<2x1xf32> to vector<2x16xf32>
    %1446 = arith.mulf %1445, %533 : vector<2x16xf32>
    %1447 = arith.addf %1443, %1446 : vector<2x16xf32>
    %1448 = arith.mulf %1414, %1424 : vector<2x1xf32>
    %1449 = vector.broadcast %1448 : vector<2x1xf32> to vector<2x16xf32>
    %1450 = arith.mulf %1449, %538 : vector<2x16xf32>
    %1451 = arith.addf %1447, %1450 : vector<2x16xf32>
    %1452 = arith.mulf %1416, %1424 : vector<2x1xf32>
    %1453 = vector.broadcast %1452 : vector<2x1xf32> to vector<2x16xf32>
    %1454 = arith.mulf %1453, %543 : vector<2x16xf32>
    %1455 = arith.addf %1451, %1454 : vector<2x16xf32>
    %cst_259 = arith.constant dense<0.000000e+00> : vector<2x8xf32>
    %1456 = tpu.matmul %1455, %556, %cst_259 {dimension_numbers = #tpu.dot_dimension_numbers<[1], [0], [0], [1], [0, 0, 1, 1], [], []>} : vector<2x16xf32>, vector<16x8xf32>, vector<2x8xf32> -> vector<2x8xf32>
    %1457 = vector.broadcast %557 : vector<1x8xf32> to vector<2x8xf32>
    %1458 = arith.addf %1456, %1457 : vector<2x8xf32>
    %1459 = math.tanh %1458 : vector<2x8xf32>
    %cst_260 = arith.constant dense<0.000000e+00> : vector<2x384xf32>
    %1460 = tpu.matmul %1459, %558, %cst_260 {dimension_numbers = #tpu.dot_dimension_numbers<[1], [0], [0], [1], [0, 0, 1, 1], [], []>} : vector<2x8xf32>, vector<8x384xf32>, vector<2x384xf32> -> vector<2x384xf32>
    %1461 = vector.extract_strided_slice %1460 {offsets = [0, 0], sizes = [2, 192], strides = [1, 1]} : vector<2x384xf32> to vector<2x192xf32>
    %1462 = vector.extract_strided_slice %1460 {offsets = [0, 192], sizes = [2, 192], strides = [1, 1]} : vector<2x384xf32> to vector<2x192xf32>
    %1463 = vector.extract_strided_slice %14 {offsets = [12, 0], sizes = [2, 192], strides = [1, 1]} : vector<16x192xf32> to vector<2x192xf32>
    %cst_261 = arith.constant 1.000000e+00 : f32
    %1464 = vector.broadcast %cst_261 : f32 to vector<2x192xf32>
    %1465 = arith.addf %1464, %1461 : vector<2x192xf32>
    %1466 = arith.mulf %1463, %1465 : vector<2x192xf32>
    %1467 = vector.broadcast %553 : vector<1x192xf32> to vector<2x192xf32>
    %1468 = arith.addf %1466, %1467 : vector<2x192xf32>
    %cst_262 = arith.constant dense<0.000000e+00> : vector<2x192xf32>
    %1469 = tpu.matmul %1365, %552, %cst_262 {dimension_numbers = #tpu.dot_dimension_numbers<[1], [0], [0], [1], [0, 0, 1, 1], [], []>} : vector<2x64xf32>, vector<64x192xf32>, vector<2x192xf32> -> vector<2x192xf32>
    %cst_263 = arith.constant 1.000000e+00 : f32
    %1470 = vector.broadcast %cst_263 : f32 to vector<2x192xf32>
    %1471 = arith.addf %1470, %1462 : vector<2x192xf32>
    %1472 = arith.mulf %1469, %1471 : vector<2x192xf32>
    %1473 = vector.broadcast %554 : vector<1x192xf32> to vector<2x192xf32>
    %1474 = arith.addf %1472, %1473 : vector<2x192xf32>
    %1475 = vector.extract_strided_slice %1468 {offsets = [0, 0], sizes = [2, 64], strides = [1, 1]} : vector<2x192xf32> to vector<2x64xf32>
    %1476 = vector.extract_strided_slice %1474 {offsets = [0, 0], sizes = [2, 64], strides = [1, 1]} : vector<2x192xf32> to vector<2x64xf32>
    %1477 = arith.addf %1475, %1476 : vector<2x64xf32>
    %1478 = arith.negf %1477 : vector<2x64xf32>
    %1479 = math.exp %1478 : vector<2x64xf32>
    %cst_264 = arith.constant 1.000000e+00 : f32
    %1480 = vector.broadcast %cst_264 : f32 to vector<2x64xf32>
    %1481 = arith.addf %1480, %1479 : vector<2x64xf32>
    %1482 = arith.divf %1480, %1481 : vector<2x64xf32>
    %1483 = vector.extract_strided_slice %1468 {offsets = [0, 64], sizes = [2, 64], strides = [1, 1]} : vector<2x192xf32> to vector<2x64xf32>
    %1484 = vector.extract_strided_slice %1474 {offsets = [0, 64], sizes = [2, 64], strides = [1, 1]} : vector<2x192xf32> to vector<2x64xf32>
    %1485 = arith.addf %1483, %1484 : vector<2x64xf32>
    %1486 = arith.negf %1485 : vector<2x64xf32>
    %1487 = math.exp %1486 : vector<2x64xf32>
    %cst_265 = arith.constant 1.000000e+00 : f32
    %1488 = vector.broadcast %cst_265 : f32 to vector<2x64xf32>
    %1489 = arith.addf %1488, %1487 : vector<2x64xf32>
    %1490 = arith.divf %1488, %1489 : vector<2x64xf32>
    %1491 = vector.extract_strided_slice %1468 {offsets = [0, 128], sizes = [2, 64], strides = [1, 1]} : vector<2x192xf32> to vector<2x64xf32>
    %1492 = vector.extract_strided_slice %1474 {offsets = [0, 128], sizes = [2, 64], strides = [1, 1]} : vector<2x192xf32> to vector<2x64xf32>
    %1493 = arith.mulf %1482, %1492 : vector<2x64xf32>
    %1494 = arith.addf %1491, %1493 : vector<2x64xf32>
    %1495 = math.tanh %1494 : vector<2x64xf32>
    %cst_266 = arith.constant 1.000000e+00 : f32
    %1496 = vector.broadcast %cst_266 : f32 to vector<2x64xf32>
    %1497 = arith.subf %1496, %1490 : vector<2x64xf32>
    %1498 = arith.mulf %1497, %1495 : vector<2x64xf32>
    %1499 = arith.mulf %1490, %1365 : vector<2x64xf32>
    %1500 = arith.addf %1498, %1499 : vector<2x64xf32>
    %c6 = arith.constant 6 : index
    %c0_267 = arith.constant 0 : index
    %c0_268 = arith.constant 0 : index
    %1501 = vector.load %arg27[%c6, %c0_267, %c0_268] : memref<8x2x8xf32, #tpu.memory_space<vmem>>, vector<1x2x8xf32>
    %1502 = vector.shape_cast %1501 : vector<1x2x8xf32> to vector<2x8xf32>
    %1503 = vector.shape_cast %1459 : vector<2x8xf32> to vector<1x2x8xf32>
    tpu.vector_store %arg27[%c6, %c0_267, %c0_268], %1503 {strides = array<i32>} : memref<8x2x8xf32, #tpu.memory_space<vmem>>, vector<1x2x8xf32>,
    %cst_269 = arith.constant dense<0.000000e+00> : vector<2x16xf32>
    %1504 = tpu.matmul %1500, %555, %cst_269 {dimension_numbers = #tpu.dot_dimension_numbers<[1], [0], [0], [1], [0, 0, 1, 1], [], []>} : vector<2x64xf32>, vector<64x16xf32>, vector<2x16xf32> -> vector<2x16xf32>
    %1505 = arith.mulf %1504, %508 : vector<2x16xf32>
    %cst_270 = arith.constant dense<0.000000e+00> : vector<2xf32>
    %1506 = vector.multi_reduction <add>, %1505, %cst_270 [1] : vector<2x16xf32> to vector<2xf32>
    %1507 = vector.shape_cast %1506 : vector<2xf32> to vector<2x1xf32>
    %1508 = arith.mulf %1504, %513 : vector<2x16xf32>
    %cst_271 = arith.constant dense<0.000000e+00> : vector<2xf32>
    %1509 = vector.multi_reduction <add>, %1508, %cst_271 [1] : vector<2x16xf32> to vector<2xf32>
    %1510 = vector.shape_cast %1509 : vector<2xf32> to vector<2x1xf32>
    %1511 = arith.mulf %1504, %518 : vector<2x16xf32>
    %cst_272 = arith.constant dense<0.000000e+00> : vector<2xf32>
    %1512 = vector.multi_reduction <add>, %1511, %cst_272 [1] : vector<2x16xf32> to vector<2xf32>
    %1513 = vector.shape_cast %1512 : vector<2xf32> to vector<2x1xf32>
    %1514 = arith.mulf %1504, %523 : vector<2x16xf32>
    %cst_273 = arith.constant dense<0.000000e+00> : vector<2xf32>
    %1515 = vector.multi_reduction <add>, %1514, %cst_273 [1] : vector<2x16xf32> to vector<2xf32>
    %1516 = vector.shape_cast %1515 : vector<2xf32> to vector<2x1xf32>
    %1517 = arith.mulf %1504, %528 : vector<2x16xf32>
    %cst_274 = arith.constant dense<0.000000e+00> : vector<2xf32>
    %1518 = vector.multi_reduction <add>, %1517, %cst_274 [1] : vector<2x16xf32> to vector<2xf32>
    %1519 = vector.shape_cast %1518 : vector<2xf32> to vector<2x1xf32>
    %1520 = arith.mulf %1504, %533 : vector<2x16xf32>
    %cst_275 = arith.constant dense<0.000000e+00> : vector<2xf32>
    %1521 = vector.multi_reduction <add>, %1520, %cst_275 [1] : vector<2x16xf32> to vector<2xf32>
    %1522 = vector.shape_cast %1521 : vector<2xf32> to vector<2x1xf32>
    %1523 = arith.mulf %1504, %538 : vector<2x16xf32>
    %cst_276 = arith.constant dense<0.000000e+00> : vector<2xf32>
    %1524 = vector.multi_reduction <add>, %1523, %cst_276 [1] : vector<2x16xf32> to vector<2xf32>
    %1525 = vector.shape_cast %1524 : vector<2xf32> to vector<2x1xf32>
    %1526 = arith.mulf %1504, %543 : vector<2x16xf32>
    %cst_277 = arith.constant dense<0.000000e+00> : vector<2xf32>
    %1527 = vector.multi_reduction <add>, %1526, %cst_277 [1] : vector<2x16xf32> to vector<2xf32>
    %1528 = vector.shape_cast %1527 : vector<2xf32> to vector<2x1xf32>
    %1529 = arith.maximumf %1507, %1510 : vector<2x1xf32>
    %1530 = arith.maximumf %1529, %1513 : vector<2x1xf32>
    %1531 = arith.maximumf %1530, %1516 : vector<2x1xf32>
    %1532 = arith.maximumf %1531, %1519 : vector<2x1xf32>
    %1533 = arith.maximumf %1532, %1522 : vector<2x1xf32>
    %1534 = arith.maximumf %1533, %1525 : vector<2x1xf32>
    %1535 = arith.maximumf %1534, %1528 : vector<2x1xf32>
    %1536 = arith.subf %1507, %1535 : vector<2x1xf32>
    %1537 = math.exp %1536 : vector<2x1xf32>
    %1538 = arith.subf %1510, %1535 : vector<2x1xf32>
    %1539 = math.exp %1538 : vector<2x1xf32>
    %1540 = arith.subf %1513, %1535 : vector<2x1xf32>
    %1541 = math.exp %1540 : vector<2x1xf32>
    %1542 = arith.subf %1516, %1535 : vector<2x1xf32>
    %1543 = math.exp %1542 : vector<2x1xf32>
    %1544 = arith.subf %1519, %1535 : vector<2x1xf32>
    %1545 = math.exp %1544 : vector<2x1xf32>
    %1546 = arith.subf %1522, %1535 : vector<2x1xf32>
    %1547 = math.exp %1546 : vector<2x1xf32>
    %1548 = arith.subf %1525, %1535 : vector<2x1xf32>
    %1549 = math.exp %1548 : vector<2x1xf32>
    %1550 = arith.subf %1528, %1535 : vector<2x1xf32>
    %1551 = math.exp %1550 : vector<2x1xf32>
    %1552 = arith.addf %1537, %1539 : vector<2x1xf32>
    %1553 = arith.addf %1552, %1541 : vector<2x1xf32>
    %1554 = arith.addf %1553, %1543 : vector<2x1xf32>
    %1555 = arith.addf %1554, %1545 : vector<2x1xf32>
    %1556 = arith.addf %1555, %1547 : vector<2x1xf32>
    %1557 = arith.addf %1556, %1549 : vector<2x1xf32>
    %1558 = arith.addf %1557, %1551 : vector<2x1xf32>
    %1559 = tpu.reciprocal %1558 {approx = true} : vector<2x1xf32> -> vector<2x1xf32>
    %1560 = arith.mulf %1537, %1559 : vector<2x1xf32>
    %1561 = vector.broadcast %1560 : vector<2x1xf32> to vector<2x16xf32>
    %1562 = arith.mulf %1561, %508 : vector<2x16xf32>
    %1563 = arith.mulf %1539, %1559 : vector<2x1xf32>
    %1564 = vector.broadcast %1563 : vector<2x1xf32> to vector<2x16xf32>
    %1565 = arith.mulf %1564, %513 : vector<2x16xf32>
    %1566 = arith.addf %1562, %1565 : vector<2x16xf32>
    %1567 = arith.mulf %1541, %1559 : vector<2x1xf32>
    %1568 = vector.broadcast %1567 : vector<2x1xf32> to vector<2x16xf32>
    %1569 = arith.mulf %1568, %518 : vector<2x16xf32>
    %1570 = arith.addf %1566, %1569 : vector<2x16xf32>
    %1571 = arith.mulf %1543, %1559 : vector<2x1xf32>
    %1572 = vector.broadcast %1571 : vector<2x1xf32> to vector<2x16xf32>
    %1573 = arith.mulf %1572, %523 : vector<2x16xf32>
    %1574 = arith.addf %1570, %1573 : vector<2x16xf32>
    %1575 = arith.mulf %1545, %1559 : vector<2x1xf32>
    %1576 = vector.broadcast %1575 : vector<2x1xf32> to vector<2x16xf32>
    %1577 = arith.mulf %1576, %528 : vector<2x16xf32>
    %1578 = arith.addf %1574, %1577 : vector<2x16xf32>
    %1579 = arith.mulf %1547, %1559 : vector<2x1xf32>
    %1580 = vector.broadcast %1579 : vector<2x1xf32> to vector<2x16xf32>
    %1581 = arith.mulf %1580, %533 : vector<2x16xf32>
    %1582 = arith.addf %1578, %1581 : vector<2x16xf32>
    %1583 = arith.mulf %1549, %1559 : vector<2x1xf32>
    %1584 = vector.broadcast %1583 : vector<2x1xf32> to vector<2x16xf32>
    %1585 = arith.mulf %1584, %538 : vector<2x16xf32>
    %1586 = arith.addf %1582, %1585 : vector<2x16xf32>
    %1587 = arith.mulf %1551, %1559 : vector<2x1xf32>
    %1588 = vector.broadcast %1587 : vector<2x1xf32> to vector<2x16xf32>
    %1589 = arith.mulf %1588, %543 : vector<2x16xf32>
    %1590 = arith.addf %1586, %1589 : vector<2x16xf32>
    %cst_278 = arith.constant dense<0.000000e+00> : vector<2x8xf32>
    %1591 = tpu.matmul %1590, %556, %cst_278 {dimension_numbers = #tpu.dot_dimension_numbers<[1], [0], [0], [1], [0, 0, 1, 1], [], []>} : vector<2x16xf32>, vector<16x8xf32>, vector<2x8xf32> -> vector<2x8xf32>
    %1592 = vector.broadcast %557 : vector<1x8xf32> to vector<2x8xf32>
    %1593 = arith.addf %1591, %1592 : vector<2x8xf32>
    %1594 = math.tanh %1593 : vector<2x8xf32>
    %cst_279 = arith.constant dense<0.000000e+00> : vector<2x384xf32>
    %1595 = tpu.matmul %1594, %558, %cst_279 {dimension_numbers = #tpu.dot_dimension_numbers<[1], [0], [0], [1], [0, 0, 1, 1], [], []>} : vector<2x8xf32>, vector<8x384xf32>, vector<2x384xf32> -> vector<2x384xf32>
    %1596 = vector.extract_strided_slice %1595 {offsets = [0, 0], sizes = [2, 192], strides = [1, 1]} : vector<2x384xf32> to vector<2x192xf32>
    %1597 = vector.extract_strided_slice %1595 {offsets = [0, 192], sizes = [2, 192], strides = [1, 1]} : vector<2x384xf32> to vector<2x192xf32>
    %1598 = vector.extract_strided_slice %14 {offsets = [14, 0], sizes = [2, 192], strides = [1, 1]} : vector<16x192xf32> to vector<2x192xf32>
    %cst_280 = arith.constant 1.000000e+00 : f32
    %1599 = vector.broadcast %cst_280 : f32 to vector<2x192xf32>
    %1600 = arith.addf %1599, %1596 : vector<2x192xf32>
    %1601 = arith.mulf %1598, %1600 : vector<2x192xf32>
    %1602 = vector.broadcast %553 : vector<1x192xf32> to vector<2x192xf32>
    %1603 = arith.addf %1601, %1602 : vector<2x192xf32>
    %cst_281 = arith.constant dense<0.000000e+00> : vector<2x192xf32>
    %1604 = tpu.matmul %1500, %552, %cst_281 {dimension_numbers = #tpu.dot_dimension_numbers<[1], [0], [0], [1], [0, 0, 1, 1], [], []>} : vector<2x64xf32>, vector<64x192xf32>, vector<2x192xf32> -> vector<2x192xf32>
    %cst_282 = arith.constant 1.000000e+00 : f32
    %1605 = vector.broadcast %cst_282 : f32 to vector<2x192xf32>
    %1606 = arith.addf %1605, %1597 : vector<2x192xf32>
    %1607 = arith.mulf %1604, %1606 : vector<2x192xf32>
    %1608 = vector.broadcast %554 : vector<1x192xf32> to vector<2x192xf32>
    %1609 = arith.addf %1607, %1608 : vector<2x192xf32>
    %1610 = vector.extract_strided_slice %1603 {offsets = [0, 0], sizes = [2, 64], strides = [1, 1]} : vector<2x192xf32> to vector<2x64xf32>
    %1611 = vector.extract_strided_slice %1609 {offsets = [0, 0], sizes = [2, 64], strides = [1, 1]} : vector<2x192xf32> to vector<2x64xf32>
    %1612 = arith.addf %1610, %1611 : vector<2x64xf32>
    %1613 = arith.negf %1612 : vector<2x64xf32>
    %1614 = math.exp %1613 : vector<2x64xf32>
    %cst_283 = arith.constant 1.000000e+00 : f32
    %1615 = vector.broadcast %cst_283 : f32 to vector<2x64xf32>
    %1616 = arith.addf %1615, %1614 : vector<2x64xf32>
    %1617 = arith.divf %1615, %1616 : vector<2x64xf32>
    %1618 = vector.extract_strided_slice %1603 {offsets = [0, 64], sizes = [2, 64], strides = [1, 1]} : vector<2x192xf32> to vector<2x64xf32>
    %1619 = vector.extract_strided_slice %1609 {offsets = [0, 64], sizes = [2, 64], strides = [1, 1]} : vector<2x192xf32> to vector<2x64xf32>
    %1620 = arith.addf %1618, %1619 : vector<2x64xf32>
    %1621 = arith.negf %1620 : vector<2x64xf32>
    %1622 = math.exp %1621 : vector<2x64xf32>
    %cst_284 = arith.constant 1.000000e+00 : f32
    %1623 = vector.broadcast %cst_284 : f32 to vector<2x64xf32>
    %1624 = arith.addf %1623, %1622 : vector<2x64xf32>
    %1625 = arith.divf %1623, %1624 : vector<2x64xf32>
    %1626 = vector.extract_strided_slice %1603 {offsets = [0, 128], sizes = [2, 64], strides = [1, 1]} : vector<2x192xf32> to vector<2x64xf32>
    %1627 = vector.extract_strided_slice %1609 {offsets = [0, 128], sizes = [2, 64], strides = [1, 1]} : vector<2x192xf32> to vector<2x64xf32>
    %1628 = arith.mulf %1617, %1627 : vector<2x64xf32>
    %1629 = arith.addf %1626, %1628 : vector<2x64xf32>
    %1630 = math.tanh %1629 : vector<2x64xf32>
    %cst_285 = arith.constant 1.000000e+00 : f32
    %1631 = vector.broadcast %cst_285 : f32 to vector<2x64xf32>
    %1632 = arith.subf %1631, %1625 : vector<2x64xf32>
    %1633 = arith.mulf %1632, %1630 : vector<2x64xf32>
    %1634 = arith.mulf %1625, %1500 : vector<2x64xf32>
    %1635 = arith.addf %1633, %1634 : vector<2x64xf32>
    %c7 = arith.constant 7 : index
    %c0_286 = arith.constant 0 : index
    %c0_287 = arith.constant 0 : index
    %1636 = vector.load %arg27[%c7, %c0_286, %c0_287] : memref<8x2x8xf32, #tpu.memory_space<vmem>>, vector<1x2x8xf32>
    %1637 = vector.shape_cast %1636 : vector<1x2x8xf32> to vector<2x8xf32>
    %1638 = vector.shape_cast %1594 : vector<2x8xf32> to vector<1x2x8xf32>
    tpu.vector_store %arg27[%c7, %c0_286, %c0_287], %1638 {strides = array<i32>} : memref<8x2x8xf32, #tpu.memory_space<vmem>>, vector<1x2x8xf32>,
    %c0_288 = arith.constant 0 : index
    %c0_289 = arith.constant 0 : index
    %1639 = vector.load %arg24[%c0_288, %c0_289] : memref<64x1xf32, #tpu.memory_space<vmem>>, vector<64x1xf32>
    %cst_290 = arith.constant dense<0.000000e+00> : vector<2x1xf32>
    %1640 = tpu.matmul %1635, %1639, %cst_290 {dimension_numbers = #tpu.dot_dimension_numbers<[1], [0], [0], [1], [0, 0, 1, 1], [], []>} : vector<2x64xf32>, vector<64x1xf32>, vector<2x1xf32> -> vector<2x1xf32>
    %c0_291 = arith.constant 0 : index
    %c0_292 = arith.constant 0 : index
    %1641 = vector.load %arg25[%c0_291, %c0_292] : memref<1x1xf32, #tpu.memory_space<vmem>>, vector<1x1xf32>
    %1642 = vector.broadcast %1641 : vector<1x1xf32> to vector<2x1xf32>
    %1643 = arith.addf %1640, %1642 : vector<2x1xf32>
    %c0_293 = arith.constant 0 : index
    %c0_294 = arith.constant 0 : index
    %1644 = vector.load %arg26[%c0_293, %c0_294] : memref<2x1xf32, #tpu.memory_space<vmem>>, vector<2x1xf32>
    tpu.vector_store %arg26[%c0_293, %c0_294], %1643 {strides = array<i32>} : memref<2x1xf32, #tpu.memory_space<vmem>>, vector<2x1xf32>,
    return
  }
}

</mosaic_0001>

<bundles_post_ra>
// kernel: hyper_rnn_forward.1
= control target key start
LH: loop header
LB: loop body
LE: loop exit
PB: predicated region body
PF: predicated region fallthrough
CT: control target
= control target key end

     0   :  { %s11303_s0 = inlined_call_operand.vmem [shape: f32[16,4], index: 0, kind: input, shape index: {}]   ;;  %s11304_s1 = inlined_call_operand.vmem [shape: f32[16,8], index: 1, kind: input, shape index: {}]   ;;  %s11305_s2 = inlined_call_operand.hbm [shape: f32[4,48], index: 2, kind: input, shape index: {}]   ;;  %s11306_s3 = inlined_call_operand.vmem [shape: f32[16,48], index: 3, kind: input, shape index: {}]   ;;  %s11307_s4 = inlined_call_operand.hbm [shape: f32[1,48], index: 4, kind: input, shape index: {}]   ;;  %s11308_s5 = inlined_call_operand.hbm [shape: f32[1,48], index: 5, kind: input, shape index: {}]   ;;  %s11309_s6 = inlined_call_operand.hbm [shape: f32[4,48], index: 6, kind: input, shape index: {}]   ;;  %s11310_s7 = inlined_call_operand.vmem [shape: f32[16,48], index: 7, kind: input, shape index: {}]   ;;  %s11311_s8 = inlined_call_operand.hbm [shape: f32[1,48], index: 8, kind: input, shape index: {}]   ;;  %s11312_s9 = inlined_call_operand.hbm [shape: f32[1,48], index: 9, kind: input, shape index: {}]   ;;  %s11313_s10 = inlined_call_operand.vmem [shape: f32[16,16], index: 10, kind: input, shape index: {}]   ;;  %s11314_s11 = inlined_call_operand.vmem [shape: f32[16,16], index: 11, kind: input, shape index: {}]   ;;  %s11315_s12 = inlined_call_operand.hbm [shape: f32[1,16], index: 12, kind: input, shape index: {}]   ;;  %s11316_s13 = inlined_call_operand.hbm [shape: f32[16,64], index: 13, kind: input, shape index: {}]   ;;  %s11317_s14 = inlined_call_operand.hbm [shape: f32[16,64], index: 14, kind: input, shape index: {}]   ;;  %s11318_s15 = inlined_call_operand.hbm [shape: f32[1,64], index: 15, kind: input, shape index: {}]   ;;  %s11319_s16 = inlined_call_operand.vmem [shape: f32[8,192], index: 16, kind: input, shape index: {}]   ;;  %s11320_s17 = inlined_call_operand.vmem [shape: f32[64,192], index: 17, kind: input, shape index: {}]   ;;  %s11321_s18 = inlined_call_operand.hbm [shape: f32[1,192], index: 18, kind: input, shape index: {}]   ;;  %s11322_s19 = inlined_call_operand.hbm [shape: f32[1,192], index: 19, kind: input, shape index: {}]   ;;  %s11323_s20 = inlined_call_operand.vmem [shape: f32[64,16], index: 20, kind: input, shape index: {}]   ;;  %s11324_s21 = inlined_call_operand.vmem [shape: f32[16,8], index: 21, kind: input, shape index: {}]   ;;  %s11325_s22 = inlined_call_operand.hbm [shape: f32[1,8], index: 22, kind: input, shape index: {}]   ;;  %s11326_s23 = inlined_call_operand.vmem [shape: f32[8,384], index: 23, kind: input, shape index: {}]   ;;  %s11327_s24 = inlined_call_operand.vmem [shape: f32[64,1], index: 24, kind: input, shape index: {}]   ;;  %s11328_s25 = inlined_call_operand.<no memory space> [shape: f32[1,1], index: 25, kind: input, shape index: {}]   ;;  %s11329_s26 = inlined_call_operand.vmem [shape: f32[2,1], index: 26, kind: output, shape index: {0}]   ;;  %s11330_s27 = inlined_call_operand.hbm [shape: f32[8,2,8], index: 27, kind: output, shape index: {1}]  }
   0x1   :  { %11358 = sst [smem:[#allocation42_spill]] %s11303_s0  ;;  %v33_v0 = vstv %s11328_s25 }
   0x2   :  { %11359 = sst [smem:[#allocation43_spill]] %s11304_s1  ;;  %34 = vst [vmem:[#allocation2] sm:$0x1] %v33_v0 }
   0x3   :  { %11360 = sst [smem:[#allocation44_spill]] %s11305_s2 }
   0x4   :  { %11361 = sst [smem:[#allocation45_spill]] %s11306_s3 }
   0x5   :  { %11362 = sst [smem:[#allocation46_spill]] %s11307_s4 }
   0x6   :  { %11363 = sst [smem:[#allocation47_spill]] %s11308_s5 }
   0x7   :  { %11364 = sst [smem:[#allocation48_spill]] %s11309_s6 }
   0x8   :  { %11365 = sst [smem:[#allocation49_spill]] %s11310_s7 }
   0x9   :  { %11366 = sst [smem:[#allocation50_spill]] %s11311_s8 }
   0xa   :  { %11367 = sst [smem:[#allocation51_spill]] %s11312_s9 }
   0xb   :  { %11368 = sst [smem:[#allocation52_spill]] %s11313_s10 }
   0xc   :  { %11369 = sst [smem:[#allocation53_spill]] %s11314_s11 }
   0xd   :  { %35 = vsyncpa [#allocation4], 0 }
   0xe   :  { %36 = vsyncpa [#allocation7], 0 }
   0xf   :  { %37 = vsyncpa [#allocation10], 0 }
  0x10   :  { %38 = vsyncpa [#allocation13], 0 }
  0x11   :  { %39 = vsyncpa [#allocation16], 0 }
  0x12   :  { %40 = vsyncpa [#allocation19], 0 }
  0x13   :  { %41 = vsyncpa [#allocation22], 0 }
  0x14   :  { %42 = vsyncpa [#allocation5], 0  ;;  %s9293_s8 = smov [#allocation6]   ;;  %s9294_s9 = smov [#allocation9]  }
  0x15   :  { %s65_s30 = sshll.u32 %s9293_s8, 4  ;;  %s85_s5 = sshll.u32 %s9294_s9, 4  ;;  %s66_s30 = int_to_ptr.vmem [resolvable:$true] %s65_s30  ;;  %s86_s5 = int_to_ptr.vmem [resolvable:$true] %s85_s5 }
  0x16   :  { %s9005_s28 = scalar_lea.vmem %s66_s30, 16  ;;  %s9009_s0 = scalar_lea.vmem %s66_s30, 32 }
  0x17   :  { %p9006_p0 = scmp.ne.s32.totalorder %s66_s30, %s9005_s28  ;;  %p9010_p1 = scmp.lt.s32.totalorder %s66_s30, %s66_s30 }
  0x18   :  { %p9011_p2 = scmp.lt.s32.totalorder %s9009_s0, %s9005_s28 }
  0x1a   :  { %p9012_p3 = por %p9011_p2, %p9010_p1 }
  0x1c   :  { %p9013_p4 = pnand %p9012_p3, %p9006_p0 }
  0x1e   :  { %9016 = shalt.err (!%p9013_p4)
}
  0x1f   :  { %s11370_s29 = sld [smem:[#allocation46_spill]]  ;;  %s9025_s1 = scalar_lea.vmem %s86_s5, 64 }
  0x20   :  { %p9026_p5 = scmp.ne.s32.totalorder %s86_s5, %s9025_s1  ;;  %p9030_p6 = scmp.lt.s32.totalorder %s86_s5, %s86_s5 }
  0x21   :  { %p9031_p7 = scmp.lt.s32.totalorder %s9025_s1, %s9025_s1 }
  0x23   :  { %p9032_p8 = por %p9031_p7, %p9030_p6 }
  0x25   :  { %68 = dma.hbm_to_vmem [thread:$0]  %s11370_s29, 16, %s66_s30, [#allocation7]  }
  0x26   :  { %p9033_p9 = pnand %p9032_p8, %p9026_p5 }
  0x28   :  { %9036 = shalt.err (!%p9033_p9)
}
  0x29   :  { %s11371_s2 = sld [smem:[#allocation48_spill]]  ;;  %s9295_s3 = smov [#allocation12]  }
  0x2a   :  { %s107_s7 = sshll.u32 %s9295_s3, 4  ;;  %s9296_s4 = smov [#allocation15]   ;;  %s108_s7 = int_to_ptr.vmem [resolvable:$true] %s107_s7 }
  0x2b   :  { %s130_s8 = sshll.u32 %s9296_s4, 4  ;;  %s9045_s9 = scalar_lea.vmem %s108_s7, 16  ;;  %s131_s8 = int_to_ptr.vmem [resolvable:$true] %s130_s8 }
  0x2c   :  { %p9046_p10 = scmp.ne.s32.totalorder %s108_s7, %s9045_s9  ;;  %s9049_s30 = scalar_lea.vmem %s108_s7, 32 }
  0x2d   :  { %p9050_p11 = scmp.lt.s32.totalorder %s108_s7, %s108_s7  ;;  %p9051_p12 = scmp.lt.s32.totalorder %s9049_s30, %s9045_s9 }
  0x2f   :  { %88 = dma.hbm_to_vmem [thread:$0]  %s11371_s2, 64, %s86_s5, [#allocation10]  }
  0x30   :  { %p9052_p13 = por %p9051_p12, %p9050_p11 }
  0x32   :  { %p9053_p0 = pnand %p9052_p13, %p9046_p10 }
  0x34   :  { %9056 = shalt.err (!%p9053_p0)
}
  0x35   :  { %s11372_s25 = sld [smem:[#allocation51_spill]]  ;;  %s9065_s10 = scalar_lea.vmem %s131_s8, 256 }
  0x36   :  { %p9066_p1 = scmp.ne.s32.totalorder %s131_s8, %s9065_s10  ;;  %p9070_p2 = scmp.lt.s32.totalorder %s131_s8, %s131_s8 }
  0x37   :  { %p9071_p3 = scmp.lt.s32.totalorder %s9065_s10, %s9065_s10 }
  0x39   :  { %p9072_p4 = por %p9071_p3, %p9070_p2 }
  0x3b   :  { %110 = dma.hbm_to_vmem [thread:$0]  %s11372_s25, 16, %s108_s7, [#allocation13]  }
  0x3c   :  { %p9073_p5 = pnand %p9072_p4, %p9066_p1 }
  0x3e   :  { %9076 = shalt.err (!%p9073_p5)
}
  0x3f   :  { %s9297_s5 = smov 128   ;;  %s9298_s29 = smov 8  }
  0x40   :  { %136 = dma.hbm_to_vmem [thread:$0]  %s11316_s13, 256, %s131_s8, [#allocation16], %s9297_s5, %s9297_s5, %s9298_s29  }
  0x41   :  { %s9299_s11 = smov [#allocation18]   ;;  %s9300_s3 = smov [#allocation21]  }
  0x42   :  { %s155_s2 = sshll.u32 %s9299_s11, 4  ;;  %s179_s7 = sshll.u32 %s9300_s3, 4  ;;  %s156_s2 = int_to_ptr.vmem [resolvable:$true] %s155_s2  ;;  %s180_s7 = int_to_ptr.vmem [resolvable:$true] %s179_s7 }
  0x43   :  { %s9085_s4 = scalar_lea.vmem %s156_s2, 16  ;;  %s9089_s9 = scalar_lea.vmem %s156_s2, 32 }
  0x44   :  { %p9086_p6 = scmp.ne.s32.totalorder %s156_s2, %s9085_s4  ;;  %p9090_p7 = scmp.lt.s32.totalorder %s156_s2, %s156_s2 }
  0x45   :  { %p9091_p8 = scmp.lt.s32.totalorder %s9089_s9, %s9085_s4 }
  0x47   :  { %p9092_p9 = por %p9091_p8, %p9090_p7 }
  0x49   :  { %p9093_p10 = pnand %p9092_p9, %p9086_p6 }
  0x4b   :  { %9096 = shalt.err (!%p9093_p10)
}
  0x4c   :  { %158 = dma.hbm_to_vmem [thread:$0]  %s11318_s15, 16, %s156_s2, [#allocation19]  }
  0x4d   :  { %s9105_s0 = scalar_lea.vmem %s180_s7, 32  ;;  %p9110_p12 = scmp.lt.s32.totalorder %s180_s7, %s180_s7 }
  0x4e   :  { %p9106_p11 = scmp.ne.s32.totalorder %s180_s7, %s9105_s0  ;;  %p9111_p13 = scmp.lt.s32.totalorder %s9105_s0, %s9105_s0 }
  0x50   :  { %p9112_p0 = por %p9111_p13, %p9110_p12 }
  0x52   :  { %p9113_p1 = pnand %p9112_p0, %p9106_p11 }
  0x54   :  { %9116 = shalt.err (!%p9113_p1)
}
  0x55   :  { %182 = dma.hbm_to_vmem [thread:$0]  %s11322_s19, 32, %s180_s7, [#allocation22]  }
  0x56   :  { %s9301_s25 = smov [#allocation3]   ;;  %s9302_s1 = smov [#allocation8]  }
  0x57   :  { %s53_s10 = sshll.u32 %s9301_s25, 4  ;;  %s75_s6 = sshll.u32 %s9302_s1, 4  ;;  %s54_s10 = int_to_ptr.vmem [resolvable:$true] %s53_s10  ;;  %s76_s6 = int_to_ptr.vmem [resolvable:$true] %s75_s6 }
  0x58   :  { %s9125_s11 = scalar_lea.vmem %s54_s10, 64  ;;  %p9130_p3 = scmp.lt.s32.totalorder %s54_s10, %s54_s10 }
  0x59   :  { %p9126_p2 = scmp.ne.s32.totalorder %s54_s10, %s9125_s11  ;;  %p9131_p4 = scmp.lt.s32.totalorder %s9125_s11, %s9125_s11 }
  0x5b   :  { %p9132_p5 = por %p9131_p4, %p9130_p3 }
  0x5d   :  { %p9133_p6 = pnand %p9132_p5, %p9126_p2 }
  0x5f   :  { %9136 = shalt.err (!%p9133_p6)
}
  0x60   :  { %s11373_s3 = sld [smem:[#allocation44_spill]]  ;;  %s9145_s4 = scalar_lea.vmem %s76_s6, 16 }
  0x61   :  { %p9146_p7 = scmp.ne.s32.totalorder %s76_s6, %s9145_s4  ;;  %s9149_s19 = scalar_lea.vmem %s76_s6, 32 }
  0x62   :  { %p9150_p8 = scmp.lt.s32.totalorder %s76_s6, %s76_s6  ;;  %p9151_p9 = scmp.lt.s32.totalorder %s9149_s19, %s9145_s4 }
  0x64   :  { %p9152_p10 = por %p9151_p9, %p9150_p8 }
  0x66   :  { %56 = dma.hbm_to_vmem [thread:$0]  %s11373_s3, 64, %s54_s10, [#allocation4]  }
  0x67   :  { %p9153_p11 = pnand %p9152_p10, %p9146_p7 }
  0x69   :  { %9156 = shalt.err (!%p9153_p11)
}
  0x6a   :  { %s11374_s30 = sld [smem:[#allocation47_spill]]  ;;  %s9303_s28 = smov [#allocation11]  }
  0x6b   :  { %s97_s0 = sshll.u32 %s9303_s28, 4  ;;  %s9304_s13 = smov [#allocation14]   ;;  %s98_s0 = int_to_ptr.vmem [resolvable:$true] %s97_s0 }
  0x6c   :  { %s121_s8 = sshll.u32 %s9304_s13, 4  ;;  %s9165_s25 = scalar_lea.vmem %s98_s0, 16  ;;  %s122_s8 = int_to_ptr.vmem [resolvable:$true] %s121_s8 }
  0x6d   :  { %p9166_p12 = scmp.ne.s32.totalorder %s98_s0, %s9165_s25  ;;  %s9169_s10 = scalar_lea.vmem %s98_s0, 32 }
  0x6e   :  { %p9170_p13 = scmp.lt.s32.totalorder %s98_s0, %s98_s0  ;;  %p9171_p0 = scmp.lt.s32.totalorder %s9169_s10, %s9165_s25 }
  0x70   :  { %78 = dma.hbm_to_vmem [thread:$0]  %s11374_s30, 16, %s76_s6, [#allocation7]  }
  0x71   :  { %p9172_p1 = por %p9171_p0, %p9170_p13 }
  0x73   :  { %p9173_p2 = pnand %p9172_p1, %p9166_p12 }
  0x75   :  { %9176 = shalt.err (!%p9173_p2)
}
  0x76   :  { %s11375_s15 = sld [smem:[#allocation50_spill]]  ;;  %s9185_s2 = scalar_lea.vmem %s122_s8, 16 }
  0x77   :  { %p9186_p3 = scmp.ne.s32.totalorder %s122_s8, %s9185_s2  ;;  %s9189_s6 = scalar_lea.vmem %s122_s8, 32 }
  0x78   :  { %p9190_p4 = scmp.lt.s32.totalorder %s122_s8, %s122_s8  ;;  %p9191_p5 = scmp.lt.s32.totalorder %s9189_s6, %s9185_s2 }
  0x7a   :  { %p9192_p6 = por %p9191_p5, %p9190_p4 }
  0x7c   :  { %100 = dma.hbm_to_vmem [thread:$0]  %s11375_s15, 16, %s98_s0, [#allocation10]  }
  0x7d   :  { %p9193_p7 = pnand %p9192_p6, %p9186_p3 }
  0x7f   :  { %9196 = shalt.err (!%p9193_p7)
}
  0x80   :  { %124 = dma.hbm_to_vmem [thread:$0]  %s11315_s12, 16, %s122_s8, [#allocation13]  }
  0x81   :  { %s9305_s19 = smov [#allocation17]   ;;  %s9306_s9 = smov [#allocation20]  }
  0x82   :  { %s142_s7 = sshll.u32 %s9305_s19, 4  ;;  %s169_s30 = sshll.u32 %s9306_s9, 4  ;;  %s143_s7 = int_to_ptr.vmem [resolvable:$true] %s142_s7  ;;  %s170_s30 = int_to_ptr.vmem [resolvable:$true] %s169_s30 }
  0x83   :  { %s9205_s28 = scalar_lea.vmem %s143_s7, 256  ;;  %p9210_p9 = scmp.lt.s32.totalorder %s143_s7, %s143_s7 }
  0x84   :  { %p9206_p8 = scmp.ne.s32.totalorder %s143_s7, %s9205_s28  ;;  %p9211_p10 = scmp.lt.s32.totalorder %s9205_s28, %s9205_s28 }
  0x86   :  { %p9212_p11 = por %p9211_p10, %p9210_p9 }
  0x88   :  { %p9213_p12 = pnand %p9212_p11, %p9206_p8 }
  0x8a   :  { %9216 = shalt.err (!%p9213_p12)
}
  0x8b   :  { %148 = dma.hbm_to_vmem [thread:$0]  %s11317_s14, 256, %s143_s7, [#allocation16], %s9297_s5, %s9297_s5, %s9298_s29  }
  0x8c   :  { %s9225_s12 = scalar_lea.vmem %s170_s30, 32  ;;  %p9230_p0 = scmp.lt.s32.totalorder %s170_s30, %s170_s30 }
  0x8d   :  { %p9226_p13 = scmp.ne.s32.totalorder %s170_s30, %s9225_s12  ;;  %p9231_p1 = scmp.lt.s32.totalorder %s9225_s12, %s9225_s12 }
  0x8f   :  { %p9232_p2 = por %p9231_p1, %p9230_p0 }
  0x91   :  { %p9233_p3 = pnand %p9232_p2, %p9226_p13 }
  0x93   :  { %9236 = shalt.err (!%p9233_p3)
}
  0x94   :  { %172 = dma.hbm_to_vmem [thread:$0]  %s11321_s18, 32, %s170_s30, [#allocation19]  }
  0x95   :  { %s9307_s10 = smov [#allocation23]  }
  0x96   :  { %s193_s1 = sshll.u32 %s9307_s10, 4  ;;  %s194_s1 = int_to_ptr.vmem [resolvable:$true] %s193_s1 }
  0x97   :  { %s9245_s11 = scalar_lea.vmem %s194_s1, 16  ;;  %s9249_s15 = scalar_lea.vmem %s194_s1, 32 }
  0x98   :  { %p9246_p4 = scmp.ne.s32.totalorder %s194_s1, %s9245_s11  ;;  %p9250_p5 = scmp.lt.s32.totalorder %s194_s1, %s194_s1 }
  0x99   :  { %p9251_p6 = scmp.lt.s32.totalorder %s9249_s15, %s9245_s11 }
  0x9b   :  { %p9252_p7 = por %p9251_p6, %p9250_p5 }
  0x9d   :  { %p9253_p8 = pnand %p9252_p7, %p9246_p4 }
  0x9f   :  { %9256 = shalt.err (!%p9253_p8)
}
  0xa0   :  { %196 = dma.hbm_to_vmem [thread:$0]  %s11325_s22, 16, %s194_s1, [#allocation22]  }
  0xa1   :  { %9277 = dma.done.wait [#allocation4], 64  }
  0xa2   :  { %9278 = vsyncadd [#allocation4], 4294967232 }
  0xa3   :  { %9279 = dma.done.wait [#allocation7], 32  }
  0xa4   :  { %9280 = vsyncadd [#allocation7], 4294967264 }
  0xa5   :  { %9281 = dma.done.wait [#allocation10], 80  }
  0xa6   :  { %9282 = vsyncadd [#allocation10], 4294967216 }
  0xa7   :  { %9283 = dma.done.wait [#allocation13], 32  }
  0xa8   :  { %9284 = vsyncadd [#allocation13], 4294967264 }
  0xa9   :  { %9285 = dma.done.wait [#allocation16], 512  }
  0xaa   :  { %9286 = vsyncadd [#allocation16], 4294966784 }
  0xab   :  { %9287 = dma.done.wait [#allocation19], 48  }
  0xac   :  { %9288 = vsyncadd [#allocation19], 4294967248 }
  0xad   :  { %9289 = dma.done.wait [#allocation22], 48  }
  0xae   :  { %9290 = vsyncadd [#allocation22], 4294967248  ;;  %vm259_vm0 = vcmask 1043456   ;;  %vm252_vm1 = vcmask 31744   ;;  %v338_v1 = vld [vmem:[#allocation9] sm:$0xf] }
  0xaf   :  { %s11376_s22 = sld [smem:[#allocation42_spill]]  ;;  %8100 = vmatprep.subr.msk.mxu1 %vm259_vm0, %v338_v1  ;;  %v244_v4 = vld [vmem:[#allocation3] sm:$0xf]  ;;  %v11337_v6 = vmov 0.0   ;;  %vm9309_vm2 = vmmov 0   ;;  %s9310_s30 = smov 96  }
  0xb0   :  { %s11377_s19 = sld [smem:[#allocation45_spill]]  ;;  %8101 = vmatpush3.msk.msra.mxu1 %vm259_vm0, %v338_v1  ;;  %8095 = vmatprep.subr.msk.mxu0 %vm259_vm0, %v244_v4  ;;  %v9545_v9 = vld [vmem:[#allocation11] ss:$0 sm:$0xff]  ;;  %v7753_v13 = vld [vmem:[#allocation6] ss:$0 sm:$0xff]  ;;  %s9311_s28 = smov 32  }
  0xb1   :  { %8105 = vmatprep.subr.mxu1 %v11337_v6  ;;  %8096 = vmatpush3.msk.msra.mxu0 %vm259_vm0, %v244_v4  ;;  %v9550_v14 = vld [vmem:[#allocation8] ss:$0 sm:$0xff]  ;;  %s9312_s0 = smov 112   ;;  %vm524_vm3 = vcmask 130048   ;;  %v427_v50 = vld [vmem:[%s11319_s16 + $0x8] sm:$0xff]  ;;  %s11378_s11 = sld [smem:[#allocation43_spill]] }
  0xb2   :  { %v426_v51 = vld [vmem:[%s11319_s16] sm:$0xff]  ;;  %vm428_vm4 = vcmask 64512   ;;  %465 = vmatprep.subr.mxu0 %v427_v50  ;;  %s11383_s18 = sld [smem:[#allocation49_spill]]  ;;  %vm3534_vm5 = vcmask 523264   ;;  %vm3609_vm6 = vcmask 123904   ;;  %vm4061_vm7 = vcmask 58368  }
  0xb3   :  { %s11384_s3 = sld [smem:[#allocation52_spill]]  ;;  %s9314_s1 = smov [#allocation24]  }
  0xb5   :  { %v242_v2 = vld [vmem:[%s11376_s22] sm:$0xff]  ;;  %v243_v3 = vld [vmem:[%s11376_s22 + $0x8] sm:$0xff]  ;;  %s9313_s22 = smov 64  }
  0xb6   :  { %8102 = vmatprep.mubr.msk.f32.mxu1 %vm252_vm1, %v242_v2  ;;  %v9515_v5 = vld [vmem:[%s11377_s19 + $0x8] sm:$0xff]  ;;  %v9524_v7 = vld [vmem:[%s11377_s19] sm:$0xff]  ;;  %8097 = vmatprep.mubr.msk.f32.mxu0 %vm252_vm1, %v242_v2 }
  0xb7   :  { %8103 = vmatmul.mubr.msk.f32.vlgmr.msra.gmra.mxu1 %vm252_vm1, %v243_v3  ;;  %8098 = vmatmul.mubr.msk.f32.vlgmr.msra.gmra.mxu0 %vm252_vm1, %v243_v3  ;;  %v424_v52 = vld [vmem:[%s11378_s11] sm:$0xff]  ;;  %v425_v53 = vld [vmem:[%s11378_s11 + $0x8] sm:$0xff]  ;;  %s7733_s11 = sshll.u32 %s9314_s1, 4  ;;  %s7734_s11 = int_to_ptr.vmem [resolvable:$true] %s7733_s11 }
  0xb8   :  { %8106 = vmatpush3.msra.mxu1 %v9515_v5  ;;  %8109 = vmatprep.mubr.msk.f32.mxu1 %vm9309_vm2, %v11337_v6  ;;  %s9257_s15 = scalar_lea.vmem %s7734_s11, 256  ;;  %p9262_p10 = scmp.lt.s32.totalorder %s7734_s11, %s7734_s11 }
  0xb9   :  { %8107 = vmatprep.subr.mxu1 %v11337_v6  ;;  %499 = vmatprep.mubr.f32.mxu0 %v11337_v6  ;;  %p9258_p9 = scmp.ne.s32.totalorder %s7734_s11, %s9257_s15  ;;  %p9263_p11 = scmp.lt.s32.totalorder %s9257_s15, %s9257_s15 }
  0xba   :  { %8108 = vmatpush3.msra.mxu1 %v9524_v7  ;;  %466 = vmatpush1.msra.mxu0 %v426_v51 }
  0xbb   :  { %8112 = vmatprep.subr.mxu1 %v11337_v6  ;;  %8110 = vmatmul.mubr.f32.vlgmr.msra.gmra.mxu1 %v11337_v6  ;;  %p9264_p12 = por %p9263_p11, %p9262_p10 }
  0xbc   :  { %8113 = vmatpush3.msra.mxu1 %v9515_v5  ;;  %8116 = vmatprep.mubr.msk.f32.mxu1 %vm9309_vm2, %v11337_v6 }
  0xbd   :  { %8114 = vmatprep.subr.mxu1 %v11337_v6  ;;  %7761 = vmatmul.mubr.msk.f32.vlgmr.msra.gmra.mxu0 %vm428_vm4, %v424_v52  ;;  %p9265_p13 = pnand %p9264_p12, %p9258_p9 }
  0xbe   :  { %8115 = vmatpush3.msra.mxu1 %v9524_v7  ;;  %8119 = vmatprep.subr.mxu0 %v11337_v6 }
  0xbf   :  { %8126 = vmatprep.subr.mxu1 %v11337_v6  ;;  %8120 = vmatpush3.msra.mxu0 %v9515_v5 }
  0xc0   :  { %505 = vmatprep.mubr.f32.mxu0 %v11337_v6  ;;  %8121 = vmatprep.subr.mxu0 %v11337_v6 }
  0xc1   :  { %8122 = vmatpush3.msra.mxu0 %v9524_v7 }
  0xc2   :  { %7762 = vmatmul.mubr.msk.f32.gmra.mxu0 %vm428_vm4, %v425_v53  ;;  %8133 = vmatprep.subr.mxu0 %v11337_v6 }
  0xc3   :  { %8123 = vmatprep.mubr.msk.f32.mxu0 %vm9309_vm2, %v11337_v6 }
 0x177   :  { %v9543_v8 = vpop.f32.mrf.mxu1  ;;  %v8099_v12 = vpop.f32.mrf.mxu0 }
 0x178   :  { %v9552_v15 = vadd.f32 %v8099_v12, %v7753_v13 }
 0x179   :  { %v415_v10 = vpop.f32.mrf.mxu1  ;;  %v329_v19 = vpop.f32.mrf.mxu0 }
 0x17a   :  { %v9548_v11 = vadd.f32 %v9545_v9, %v415_v10  ;;  %v9556_v20 = vadd.f32 %v7753_v13, %v329_v19 }
 0x17b   :  { %v594_v16 = vpop.f32.mrf.mxu1 }
 0x17c   :  { %v595_v17 = vadd.f32 %v9550_v14, %v594_v16 }
 0x17d   :  { %v8111_v18 = vpop.f32.mrf.mxu1  ;;  %v9612_v63 = vpop.f32.mrf.mxu0 }
 0x17e   :  { %606 = vrot.lane.b32.xlu0 %v595_v17, %s9310_s30  ;;  %v598_v21 = vadd.f32 %v595_v17, %v9556_v20  ;;  %11379 = vst [vmem:[#allocation33_spill] sm:$0xff] %v9612_v63 }
 0x17f   :  { %v9614_v0 = vpop.f32.mrf.mxu0 }
 0x180   :  { %v7764_v22 = vmul.f32 -1.442695, %v598_v21  ;;  %11380 = vst [vmem:[#allocation34_spill] sm:$0xff] %v9614_v0 }
 0x182   :  { %8633 = vpow2.f32 %v7764_v22  ;;  %v9616_v1 = vpop.f32.mrf.mxu0 }
 0x183   :  { %11381 = vst [vmem:[#allocation35_spill] sm:$0xff] %v9616_v1 }
 0x184   :  { %v9618_v2 = vpop.f32.mrf.mxu0 }
 0x185   :  { %11382 = vst [vmem:[#allocation36_spill] sm:$0xff] %v9618_v2 }
 0x18f   :  { %v8634_v23 = vpop.eup %8633 }
 0x190   :  { %v602_v24 = vadd.f32 1.0, %v8634_v23 }
 0x192   :  { %8635 = vrcp.f32 %v602_v24 }
 0x19f   :  { %v8636_v25 = vpop.eup %8635 }
 0x1a0   :  { %v616_v31 = vsub.f32 1.0, %v8636_v25  ;;  %v622_v33 = vmul.f32 0.0, %v8636_v25 }
 0x1f0   :  { %v607_v26 = vpop.permute.xlu0 %606 }
 0x1f1   :  { %v609_v27 = vmul.f32 %v8636_v25, %v607_v26 }
 0x1f3   :  { %611 = vrot.lane.b32.xlu0 %v609_v27, %s9311_s28 }
 0x265   :  { %v612_v28 = vpop.permute.xlu0 %611 }
 0x266   :  { %v614_v29 = vadd.f32 %v612_v28, %v9556_v20 }
 0x268   :  { %8637 = vtanh.f32 %v614_v29 }
 0x275   :  { %v8638_v30 = vpop.eup %8637 }
 0x276   :  { %618 = vrot.lane.b32.xlu1 %v8638_v30, %s9312_s0 }
 0x2e8   :  { %v619_v32 = vpop.permute.xlu1 %618 }
 0x2e9   :  { %v621_v34 = vmul.f32 %v619_v32, %v616_v31 }
 0x2eb   :  { %v623_v35 = vadd.f32 %v622_v33, %v621_v34 }
 0x2ed   :  { %625 = vrot.lane.b32.xlu1 %v623_v35, %s9312_s0  ;;  %v725_v55 = vrot.slane %v623_v35, 6 }
 0x35f   :  { %v9563_v36 = vpop.permute.xlu1 %625 }
 0x360   :  { %8117 = vmatmul.mubr.msk.f32.vlgmr.msra.gmra.mxu1 %vm524_vm3, %v9563_v36 }
 0x361   :  { %8127 = vmatpush3.msra.mxu1 %v9515_v5  ;;  %8130 = vmatprep.mubr.msk.f32.mxu1 %vm9309_vm2, %v11337_v6 }
 0x362   :  { %8128 = vmatprep.subr.mxu1 %v11337_v6 }
 0x363   :  { %8129 = vmatpush3.msra.mxu1 %v9524_v7 }
 0x364   :  { %8140 = vmatprep.subr.mxu1 %v11337_v6 }
 0x420   :  { %v695_v37 = vpop.f32.mrf.mxu1 }
 0x421   :  { %v696_v38 = vadd.f32 %v9550_v14, %v695_v37 }
 0x422   :  { %v8118_v39 = vpop.f32.mrf.mxu1 }
 0x423   :  { %v700_v40 = vrot.slane %v696_v38, 6 }
 0x425   :  { %709 = vrot.lane.b32.xlu0 %v700_v40, %s9310_s30  ;;  %v702_v41 = vadd.f32 %v700_v40, %v9556_v20 }
 0x427   :  { %v7766_v42 = vmul.f32 -1.442695, %v702_v41 }
 0x429   :  { %8639 = vpow2.f32 %v7766_v42 }
 0x436   :  { %v8640_v43 = vpop.eup %8639 }
 0x437   :  { %v706_v44 = vadd.f32 1.0, %v8640_v43 }
 0x439   :  { %8641 = vrcp.f32 %v706_v44 }
 0x446   :  { %v8642_v45 = vpop.eup %8641 }
 0x447   :  { %v719_v56 = vsub.f32 1.0, %v8642_v45  ;;  %v727_v59 = vmul.f32 %v8642_v45, %v725_v55 }
 0x497   :  { %v710_v46 = vpop.permute.xlu0 %709 }
 0x498   :  { %v712_v47 = vmul.f32 %v8642_v45, %v710_v46 }
 0x49a   :  { %714 = vrot.lane.b32.xlu1 %v712_v47, %s9311_s28 }
 0x50c   :  { %v715_v48 = vpop.permute.xlu1 %714 }
 0x50d   :  { %v717_v49 = vadd.f32 %v715_v48, %v9556_v20 }
 0x50f   :  { %8643 = vtanh.f32 %v717_v49 }
 0x51c   :  { %v8644_v54 = vpop.eup %8643 }
 0x51d   :  { %721 = vrot.lane.b32.xlu0 %v8644_v54, %s9312_s0 }
 0x58f   :  { %v722_v57 = vpop.permute.xlu0 %721 }
 0x590   :  { %v724_v58 = vmul.f32 %v722_v57, %v719_v56 }
 0x592   :  { %v728_v60 = vadd.f32 %v727_v59, %v724_v58 }
 0x594   :  { %v730_v61 = vrot.slane %v728_v60, 2  ;;  %v831_v26 = vrot.slane %v728_v60, 6 }
 0x596   :  { %731 = vrot.lane.b32.xlu1 %v730_v61, %s9312_s0 }
 0x608   :  { %v9602_v62 = vpop.permute.xlu1 %731 }
 0x609   :  { %8124 = vmatmul.mubr.msk.f32.vlgmr.msra.gmra.mxu0 %vm524_vm3, %v9602_v62 }
 0x60a   :  { %8134 = vmatpush3.msra.mxu0 %v9515_v5  ;;  %8137 = vmatprep.mubr.msk.f32.mxu0 %vm9309_vm2, %v11337_v6 }
 0x60b   :  { %8135 = vmatprep.subr.mxu0 %v11337_v6 }
 0x60c   :  { %8136 = vmatpush3.msra.mxu0 %v9524_v7 }
 0x60d   :  { %8147 = vmatprep.subr.mxu0 %v11337_v6 }
 0x6c9   :  { %v801_v3 = vpop.f32.mrf.mxu0 }
 0x6ca   :  { %v802_v4 = vadd.f32 %v9550_v14, %v801_v3 }
 0x6cb   :  { %v8125_v10 = vpop.f32.mrf.mxu0 }
 0x6cc   :  { %v806_v12 = vrot.slane %v802_v4, 4 }
 0x6ce   :  { %815 = vrot.lane.b32.xlu0 %v806_v12, %s9310_s30  ;;  %v808_v13 = vadd.f32 %v806_v12, %v9556_v20 }
 0x6d0   :  { %v7768_v16 = vmul.f32 -1.442695, %v808_v13 }
 0x6d2   :  { %8645 = vpow2.f32 %v7768_v16 }
 0x6df   :  { %v8646_v17 = vpop.eup %8645 }
 0x6e0   :  { %v812_v18 = vadd.f32 1.0, %v8646_v17 }
 0x6e2   :  { %8647 = vrcp.f32 %v812_v18 }
 0x6ef   :  { %v8648_v19 = vpop.eup %8647 }
 0x6f0   :  { %v825_v27 = vsub.f32 1.0, %v8648_v19  ;;  %v833_v29 = vmul.f32 %v8648_v19, %v831_v26 }
 0x740   :  { %v816_v21 = vpop.permute.xlu0 %815 }
 0x741   :  { %v818_v22 = vmul.f32 %v8648_v19, %v816_v21 }
 0x743   :  { %820 = vrot.lane.b32.xlu1 %v818_v22, %s9311_s28 }
 0x7b5   :  { %v821_v23 = vpop.permute.xlu1 %820 }
 0x7b6   :  { %v823_v24 = vadd.f32 %v821_v23, %v9556_v20 }
 0x7b8   :  { %8649 = vtanh.f32 %v823_v24 }
 0x7c5   :  { %v8650_v25 = vpop.eup %8649 }
 0x7c6   :  { %827 = vrot.lane.b32.xlu0 %v8650_v25, %s9312_s0 }
 0x838   :  { %v828_v28 = vpop.permute.xlu0 %827 }
 0x839   :  { %v830_v30 = vmul.f32 %v828_v28, %v825_v27 }
 0x83b   :  { %v834_v31 = vadd.f32 %v833_v29, %v830_v30 }
 0x83d   :  { %v836_v32 = vrot.slane %v834_v31, 4  ;;  %v937_v49 = vrot.slane %v834_v31, 6 }
 0x83f   :  { %837 = vrot.lane.b32.xlu1 %v836_v32, %s9312_s0 }
 0x8b1   :  { %v9627_v33 = vpop.permute.xlu1 %837 }
 0x8b2   :  { %8131 = vmatmul.mubr.msk.f32.vlgmr.msra.gmra.mxu1 %vm524_vm3, %v9627_v33 }
 0x8b3   :  { %8141 = vmatpush3.msra.mxu1 %v9515_v5  ;;  %8144 = vmatprep.mubr.msk.f32.mxu1 %vm9309_vm2, %v11337_v6 }
 0x8b4   :  { %8142 = vmatprep.subr.mxu1 %v11337_v6 }
 0x8b5   :  { %8143 = vmatpush3.msra.mxu1 %v9524_v7 }
 0x8b6   :  { %8154 = vmatprep.subr.mxu1 %v11337_v6 }
 0x972   :  { %v907_v34 = vpop.f32.mrf.mxu1 }
 0x973   :  { %v908_v35 = vadd.f32 %v9550_v14, %v907_v34 }
 0x974   :  { %v8132_v37 = vpop.f32.mrf.mxu1 }
 0x975   :  { %v912_v38 = vrot.slane %v908_v35, 2 }
 0x977   :  { %921 = vrot.lane.b32.xlu0 %v912_v38, %s9310_s30  ;;  %v914_v39 = vadd.f32 %v912_v38, %v9556_v20 }
 0x979   :  { %v7770_v40 = vmul.f32 -1.442695, %v914_v39 }
 0x97b   :  { %8651 = vpow2.f32 %v7770_v40 }
 0x988   :  { %v8652_v41 = vpop.eup %8651 }
 0x989   :  { %v918_v42 = vadd.f32 1.0, %v8652_v41 }
 0x98b   :  { %8653 = vrcp.f32 %v918_v42 }
 0x998   :  { %v8654_v43 = vpop.eup %8653 }
 0x999   :  { %v931_v50 = vsub.f32 1.0, %v8654_v43  ;;  %v939_v52 = vmul.f32 %v8654_v43, %v937_v49 }
 0x9e9   :  { %v922_v44 = vpop.permute.xlu0 %921 }
 0x9ea   :  { %v924_v45 = vmul.f32 %v8654_v43, %v922_v44 }
 0x9ec   :  { %926 = vrot.lane.b32.xlu1 %v924_v45, %s9311_s28 }
 0xa5e   :  { %v927_v46 = vpop.permute.xlu1 %926 }
 0xa5f   :  { %v929_v47 = vadd.f32 %v927_v46, %v9556_v20  ;;  %v9684_v46 = vld [vmem:[%s11383_s18 + $0x8] sm:$0xff] }
 0xa61   :  { %8655 = vtanh.f32 %v929_v47 }
 0xa6e   :  { %v8656_v48 = vpop.eup %8655 }
 0xa6f   :  { %933 = vrot.lane.b32.xlu0 %v8656_v48, %s9312_s0  ;;  %v9693_v48 = vld [vmem:[%s11383_s18] sm:$0xff] }
 0xae1   :  { %v934_v51 = vpop.permute.xlu0 %933 }
 0xae2   :  { %v936_v53 = vmul.f32 %v934_v51, %v931_v50 }
 0xae4   :  { %v940_v54 = vadd.f32 %v939_v52, %v936_v53  ;;  %v9709_v52 = vld [vmem:[#allocation12] ss:$0 sm:$0xff] }
 0xae6   :  { %v942_v55 = vrot.slane %v940_v54, 6 }
 0xae8   :  { %943 = vrot.lane.b32.xlu1 %v942_v55, %s9312_s0 }
 0xb5a   :  { %v9644_v56 = vpop.permute.xlu1 %943 }
 0xb5b   :  { %8138 = vmatmul.mubr.msk.f32.vlgmr.msra.gmra.mxu0 %vm524_vm3, %v9644_v56 }
 0xb5c   :  { %8148 = vmatpush3.msra.mxu0 %v9515_v5  ;;  %8151 = vmatprep.mubr.msk.f32.mxu0 %vm9309_vm2, %v11337_v6 }
 0xb5d   :  { %8149 = vmatprep.subr.mxu0 %v11337_v6 }
 0xb5e   :  { %8150 = vmatpush3.msra.mxu0 %v9524_v7 }
 0xb5f   :  { %8161 = vmatprep.subr.mxu0 %v11337_v6 }
 0xc1b   :  { %v1013_v20 = vpop.f32.mrf.mxu0 }
 0xc1c   :  { %v1014_v57 = vadd.f32 %v9550_v14, %v1013_v20 }
 0xc1d   :  { %v8139_v58 = vpop.f32.mrf.mxu0 }
 0xc1e   :  { %1025 = vrot.lane.b32.xlu0 %v1014_v57, %s9310_s30  ;;  %v1017_v59 = vadd.f32 %v1014_v57, %v9552_v15 }
 0xc20   :  { %v7772_v60 = vmul.f32 -1.442695, %v1017_v59  ;;  %v9717_v59 = vadd.f32 %v9543_v8, %v9545_v9 }
 0xc22   :  { %8657 = vpow2.f32 %v7772_v60 }
 0xc2f   :  { %v8658_v61 = vpop.eup %8657 }
 0xc30   :  { %v1021_v3 = vadd.f32 1.0, %v8658_v61 }
 0xc32   :  { %8659 = vrcp.f32 %v1021_v3 }
 0xc3f   :  { %v8660_v4 = vpop.eup %8659 }
 0xc40   :  { %v1035_v18 = vsub.f32 1.0, %v8660_v4  ;;  %v1042_v21 = vmul.f32 %v8660_v4, %v942_v55 }
 0xc90   :  { %v1026_v10 = vpop.permute.xlu0 %1025 }
 0xc91   :  { %v1028_v12 = vmul.f32 %v8660_v4, %v1026_v10 }
 0xc93   :  { %1030 = vrot.lane.b32.xlu1 %v1028_v12, %s9311_s28 }
 0xd05   :  { %v1031_v13 = vpop.permute.xlu1 %1030 }
 0xd06   :  { %v1033_v16 = vadd.f32 %v1031_v13, %v9552_v15 }
 0xd08   :  { %8661 = vtanh.f32 %v1033_v16 }
 0xd15   :  { %v8662_v17 = vpop.eup %8661 }
 0xd16   :  { %1037 = vrot.lane.b32.xlu0 %v8662_v17, %s9312_s0 }
 0xd88   :  { %v1038_v19 = vpop.permute.xlu0 %1037 }
 0xd89   :  { %v1040_v22 = vmul.f32 %v1038_v19, %v1035_v18 }
 0xd8b   :  { %v1043_v23 = vadd.f32 %v1042_v21, %v1040_v22 }
 0xd8d   :  { %1045 = vrot.lane.b32.xlu1 %v1043_v23, %s9312_s0  ;;  %v1145_v39 = vrot.slane %v1043_v23, 6 }
 0xdff   :  { %v9661_v24 = vpop.permute.xlu1 %1045 }
 0xe00   :  { %8145 = vmatmul.mubr.msk.f32.vlgmr.msra.gmra.mxu1 %vm524_vm3, %v9661_v24 }
 0xe01   :  { %8155 = vmatpush3.msra.mxu1 %v9515_v5  ;;  %8158 = vmatprep.mubr.msk.f32.mxu1 %vm9309_vm2, %v11337_v6 }
 0xe02   :  { %8156 = vmatprep.subr.mxu1 %v11337_v6 }
 0xe03   :  { %8157 = vmatpush3.msra.mxu1 %v9524_v7 }
 0xe04   :  { %8168 = vmatprep.subr.mxu1 %v11337_v6 }
 0xec0   :  { %v1115_v25 = vpop.f32.mrf.mxu1 }
 0xec1   :  { %v1116_v26 = vadd.f32 %v9550_v14, %v1115_v25 }
 0xec2   :  { %v8146_v27 = vpop.f32.mrf.mxu1 }
 0xec3   :  { %v1120_v28 = vrot.slane %v1116_v26, 6 }
 0xec5   :  { %1129 = vrot.lane.b32.xlu0 %v1120_v28, %s9310_s30  ;;  %v1122_v29 = vadd.f32 %v1120_v28, %v9552_v15 }
 0xec7   :  { %v7774_v30 = vmul.f32 -1.442695, %v1122_v29 }
 0xec9   :  { %8663 = vpow2.f32 %v7774_v30 }
 0xed6   :  { %v8664_v5 = vpop.eup %8663 }
 0xed7   :  { %v1126_v31 = vadd.f32 1.0, %v8664_v5 }
 0xed9   :  { %8665 = vrcp.f32 %v1126_v31 }
 0xee6   :  { %v8666_v32 = vpop.eup %8665 }
 0xee7   :  { %v1139_v40 = vsub.f32 1.0, %v8666_v32  ;;  %v1147_v43 = vmul.f32 %v8666_v32, %v1145_v39 }
 0xf37   :  { %v1130_v34 = vpop.permute.xlu0 %1129 }
 0xf38   :  { %v1132_v35 = vmul.f32 %v8666_v32, %v1130_v34 }
 0xf3a   :  { %1134 = vrot.lane.b32.xlu1 %v1132_v35, %s9311_s28 }
 0xfac   :  { %v1135_v7 = vpop.permute.xlu1 %1134 }
 0xfad   :  { %v1137_v37 = vadd.f32 %v1135_v7, %v9552_v15 }
 0xfaf   :  { %8667 = vtanh.f32 %v1137_v37 }
 0xfbc   :  { %v8668_v38 = vpop.eup %8667 }
 0xfbd   :  { %1141 = vrot.lane.b32.xlu0 %v8668_v38, %s9312_s0 }
0x102f   :  { %v1142_v41 = vpop.permute.xlu0 %1141 }
0x1030   :  { %v1144_v42 = vmul.f32 %v1142_v41, %v1139_v40 }
0x1032   :  { %v9677_v44 = vadd.f32 %v1147_v43, %v1144_v42 }
0x1034   :  { %v1150_v45 = vrot.slane %v9677_v44, 2  ;;  %v1251_v28 = vrot.slane %v9677_v44, 6 }
0x1036   :  { %1151 = vrot.lane.b32.xlu1 %v1150_v45, %s9312_s0 }
0x10a8   :  { %v9686_v47 = vpop.permute.xlu1 %1151 }
0x10a9   :  { %8152 = vmatmul.mubr.msk.f32.vlgmr.msra.gmra.mxu0 %vm524_vm3, %v9686_v47 }
0x10aa   :  { %8162 = vmatpush3.msra.mxu0 %v9684_v46  ;;  %8165 = vmatprep.mubr.msk.f32.mxu0 %vm9309_vm2, %v11337_v6 }
0x10ab   :  { %8163 = vmatprep.subr.mxu0 %v11337_v6 }
0x10ac   :  { %8164 = vmatpush3.msra.mxu0 %v9693_v48 }
0x10ad   :  { %8166 = vmatmul.mubr.f32.vlgmr.msra.gmra.mxu0 %v11337_v6  ;;  %8175 = vmatprep.subr.mxu0 %v11337_v6 }
0x10ae   :  { %8176 = vmatpush3.msra.mxu0 %v9684_v46  ;;  %8179 = vmatprep.mubr.msk.f32.mxu0 %vm9309_vm2, %v11337_v6 }
0x10af   :  { %8177 = vmatprep.subr.mxu0 %v11337_v6 }
0x10b0   :  { %8178 = vmatpush3.msra.mxu0 %v9693_v48 }
0x10b1   :  { %8189 = vmatprep.subr.mxu0 %v11337_v6 }
0x1169   :  { %v1221_v49 = vpop.f32.mrf.mxu0 }
0x116a   :  { %v1222_v50 = vadd.f32 %v9550_v14, %v1221_v49 }
0x116b   :  { %v8153_v51 = vpop.f32.mrf.mxu0 }
0x116c   :  { %v1226_v53 = vrot.slane %v1222_v50, 4 }
0x116d   :  { %v1433_v54 = vpop.f32.mrf.mxu0 }
0x116e   :  { %v1434_v55 = vadd.f32 %v9709_v52, %v1433_v54  ;;  %1235 = vrot.lane.b32.xlu0 %v1226_v53, %s9310_s30  ;;  %v1228_v58 = vadd.f32 %v1226_v53, %v9552_v15 }
0x116f   :  { %v8167_v20 = vpop.f32.mrf.mxu0 }
0x1170   :  { %v1438_v57 = vrot.slane %v1434_v55, 2  ;;  %v7776_v60 = vmul.f32 -1.442695, %v1228_v58 }
0x1172   :  { %1447 = vrot.lane.b32.xlu1 %v1438_v57, %s9310_s30  ;;  %v1440_v61 = vadd.f32 %v1438_v57, %v9717_v59  ;;  %8669 = vpow2.f32 %v7776_v60 }
0x1174   :  { %v7780_v3 = vmul.f32 -1.442695, %v1440_v61 }
0x1176   :  { %8671 = vpow2.f32 %v7780_v3 }
0x117f   :  { %v8670_v4 = vpop.eup %8669 }
0x1180   :  { %v1232_v10 = vadd.f32 1.0, %v8670_v4 }
0x1182   :  { %8673 = vrcp.f32 %v1232_v10 }
0x1183   :  { %v8672_v12 = vpop.eup %8671 }
0x1184   :  { %v1444_v13 = vadd.f32 1.0, %v8672_v12 }
0x1186   :  { %8675 = vrcp.f32 %v1444_v13 }
0x118f   :  { %v8674_v16 = vpop.eup %8673 }
0x1190   :  { %v1245_v29 = vsub.f32 1.0, %v8674_v16  ;;  %v1253_v5 = vmul.f32 %v8674_v16, %v1251_v28 }
0x1193   :  { %v8676_v19 = vpop.eup %8675 }
0x1194   :  { %v1457_v34 = vsub.f32 1.0, %v8676_v19  ;;  %v1463_v7 = vmul.f32 0.0, %v8676_v19 }
0x11e0   :  { %v1236_v17 = vpop.permute.xlu0 %1235 }
0x11e1   :  { %v1238_v18 = vmul.f32 %v8674_v16, %v1236_v17 }
0x11e3   :  { %1240 = vrot.lane.b32.xlu0 %v1238_v18, %s9311_s28 }
0x11e4   :  { %v1448_v8 = vpop.permute.xlu1 %1447 }
0x11e5   :  { %v1450_v9 = vmul.f32 %v8676_v19, %v1448_v8 }
0x11e7   :  { %1452 = vrot.lane.b32.xlu1 %v1450_v9, %s9311_s28 }
0x1255   :  { %v1241_v21 = vpop.permute.xlu0 %1240 }
0x1256   :  { %v1243_v22 = vadd.f32 %v1241_v21, %v9552_v15 }
0x1258   :  { %8677 = vtanh.f32 %v1243_v22 }
0x1259   :  { %v1453_v23 = vpop.permute.xlu1 %1452 }
0x125a   :  { %v1455_v25 = vadd.f32 %v1453_v23, %v9717_v59 }
0x125c   :  { %8679 = vtanh.f32 %v1455_v25 }
0x1265   :  { %v8678_v26 = vpop.eup %8677 }
0x1266   :  { %1247 = vrot.lane.b32.xlu0 %v8678_v26, %s9312_s0 }
0x1269   :  { %v8680_v27 = vpop.eup %8679 }
0x126a   :  { %1459 = vrot.lane.b32.xlu1 %v8680_v27, %s9312_s0 }
0x12d8   :  { %v1248_v30 = vpop.permute.xlu0 %1247 }
0x12d9   :  { %v1250_v31 = vmul.f32 %v1248_v30, %v1245_v29 }
0x12db   :  { %v9727_v32 = vadd.f32 %v1253_v5, %v1250_v31 }
0x12dc   :  { %v1460_v35 = vpop.permute.xlu1 %1459 }
0x12dd   :  { %v1462_v37 = vmul.f32 %v1460_v35, %v1457_v34  ;;  %v1256_v38 = vrot.slane %v9727_v32, 4 }
0x12df   :  { %v1464_v39 = vadd.f32 %v1463_v7, %v1462_v37  ;;  %1257 = vrot.lane.b32.xlu0 %v1256_v38, %s9312_s0 }
0x12e1   :  { %v1466_v40 = vrot.slane %v1464_v39, 6  ;;  %v1567_v10 = vrot.slane %v1464_v39, 2 }
0x12e3   :  { %1467 = vrot.lane.b32.xlu1 %v1466_v40, %s9312_s0 }
0x1351   :  { %v9732_v41 = vpop.permute.xlu0 %1257 }
0x1352   :  { %8159 = vmatmul.mubr.msk.f32.vlgmr.msra.gmra.mxu1 %vm524_vm3, %v9732_v41 }
0x1353   :  { %8169 = vmatpush3.msra.mxu1 %v9684_v46  ;;  %8172 = vmatprep.mubr.msk.f32.mxu1 %vm9309_vm2, %v11337_v6 }
0x1354   :  { %8170 = vmatprep.subr.mxu1 %v11337_v6 }
0x1355   :  { %8171 = vmatpush3.msra.mxu1 %v9693_v48  ;;  %v9741_v42 = vpop.permute.xlu1 %1467 }
0x1356   :  { %8173 = vmatmul.mubr.msk.f32.vlgmr.msra.gmra.mxu1 %vm524_vm3, %v9741_v42  ;;  %8182 = vmatprep.subr.mxu1 %v11337_v6 }
0x1357   :  { %8183 = vmatpush3.msra.mxu1 %v9684_v46  ;;  %8186 = vmatprep.mubr.msk.f32.mxu1 %vm9309_vm2, %v11337_v6 }
0x1358   :  { %8184 = vmatprep.subr.mxu1 %v11337_v6 }
0x1359   :  { %8185 = vmatpush3.msra.mxu1 %v9693_v48 }
0x135a   :  { %8196 = vmatprep.subr.mxu1 %v11337_v6 }
0x1412   :  { %v9752_v43 = vpop.f32.mrf.mxu1 }
0x1414   :  { %v8160_v44 = vpop.f32.mrf.mxu1 }
0x1416   :  { %v1537_v45 = vpop.f32.mrf.mxu1 }
0x1417   :  { %v1538_v49 = vadd.f32 %v9709_v52, %v1537_v45 }
0x1418   :  { %v8174_v50 = vpop.f32.mrf.mxu1 }
0x1419   :  { %v1542_v51 = vrot.slane %v1538_v49, 4 }
0x141b   :  { %1551 = vrot.lane.b32.xlu0 %v1542_v51, %s9310_s30  ;;  %v1544_v53 = vadd.f32 %v1542_v51, %v9717_v59 }
0x141d   :  { %v7782_v54 = vmul.f32 -1.442695, %v1544_v53 }
0x141f   :  { %8681 = vpow2.f32 %v7782_v54 }
0x142c   :  { %v8682_v55 = vpop.eup %8681 }
0x142d   :  { %v1548_v20 = vadd.f32 1.0, %v8682_v55 }
0x142f   :  { %8683 = vrcp.f32 %v1548_v20 }
0x143c   :  { %v8684_v57 = vpop.eup %8683 }
0x143d   :  { %v1561_v12 = vsub.f32 1.0, %v8684_v57  ;;  %v1569_v16 = vmul.f32 %v8684_v57, %v1567_v10 }
0x148d   :  { %v1552_v58 = vpop.permute.xlu0 %1551 }
0x148e   :  { %v1554_v60 = vmul.f32 %v8684_v57, %v1552_v58 }
0x1490   :  { %1556 = vrot.lane.b32.xlu1 %v1554_v60, %s9311_s28 }
0x1502   :  { %v1557_v61 = vpop.permute.xlu1 %1556 }
0x1503   :  { %v1559_v3 = vadd.f32 %v1557_v61, %v9717_v59 }
0x1505   :  { %8685 = vtanh.f32 %v1559_v3 }
0x1512   :  { %v8686_v4 = vpop.eup %8685 }
0x1513   :  { %1563 = vrot.lane.b32.xlu0 %v8686_v4, %s9312_s0 }
0x1585   :  { %v1564_v13 = vpop.permute.xlu0 %1563 }
0x1586   :  { %v1566_v17 = vmul.f32 %v1564_v13, %v1561_v12 }
0x1588   :  { %v1570_v18 = vadd.f32 %v1569_v16, %v1566_v17 }
0x158a   :  { %v1572_v19 = vrot.slane %v1570_v18, 4  ;;  %v1673_v7 = vrot.slane %v1570_v18, 2 }
0x158c   :  { %1573 = vrot.lane.b32.xlu1 %v1572_v19, %s9312_s0 }
0x15fe   :  { %v9761_v8 = vpop.permute.xlu1 %1573 }
0x15ff   :  { %8180 = vmatmul.mubr.msk.f32.vlgmr.msra.gmra.mxu0 %vm524_vm3, %v9761_v8 }
0x1600   :  { %8190 = vmatpush3.msra.mxu0 %v9684_v46  ;;  %8193 = vmatprep.mubr.msk.f32.mxu0 %vm9309_vm2, %v11337_v6 }
0x1601   :  { %8191 = vmatprep.subr.mxu0 %v11337_v6 }
0x1602   :  { %8192 = vmatpush3.msra.mxu0 %v9693_v48 }
0x1603   :  { %8203 = vmatprep.subr.mxu0 %v11337_v6 }
0x16bf   :  { %v1643_v9 = vpop.f32.mrf.mxu0 }
0x16c0   :  { %v1644_v21 = vadd.f32 %v9709_v52, %v1643_v9 }
0x16c1   :  { %v8181_v22 = vpop.f32.mrf.mxu0 }
0x16c2   :  { %v1648_v23 = vrot.slane %v1644_v21, 6 }
0x16c4   :  { %1657 = vrot.lane.b32.xlu0 %v1648_v23, %s9310_s30  ;;  %v1650_v25 = vadd.f32 %v1648_v23, %v9717_v59 }
0x16c6   :  { %v7784_v26 = vmul.f32 -1.442695, %v1650_v25 }
0x16c8   :  { %8687 = vpow2.f32 %v7784_v26 }
0x16d5   :  { %v8688_v27 = vpop.eup %8687 }
0x16d6   :  { %v1654_v28 = vadd.f32 1.0, %v8688_v27 }
0x16d8   :  { %8689 = vrcp.f32 %v1654_v28 }
0x16e5   :  { %v8690_v29 = vpop.eup %8689 }
0x16e6   :  { %v1667_v37 = vsub.f32 1.0, %v8690_v29  ;;  %v1675_v39 = vmul.f32 %v8690_v29, %v1673_v7 }
0x1736   :  { %v1658_v30 = vpop.permute.xlu0 %1657 }
0x1737   :  { %v1660_v5 = vmul.f32 %v8690_v29, %v1658_v30 }
0x1739   :  { %1662 = vrot.lane.b32.xlu1 %v1660_v5, %s9311_s28 }
0x17ab   :  { %v1663_v31 = vpop.permute.xlu1 %1662 }
0x17ac   :  { %v1665_v34 = vadd.f32 %v1663_v31, %v9717_v59 }
0x17ae   :  { %8691 = vtanh.f32 %v1665_v34 }
0x17bb   :  { %v8692_v35 = vpop.eup %8691 }
0x17bc   :  { %1669 = vrot.lane.b32.xlu0 %v8692_v35, %s9312_s0 }
0x182e   :  { %v1670_v38 = vpop.permute.xlu0 %1669 }
0x182f   :  { %v1672_v40 = vmul.f32 %v1670_v38, %v1667_v37 }
0x1831   :  { %v1676_v44 = vadd.f32 %v1675_v39, %v1672_v40 }
0x1833   :  { %v1678_v45 = vrot.slane %v1676_v44, 2 }
0x1835   :  { %1679 = vrot.lane.b32.xlu1 %v1678_v45, %s9312_s0 }
0x18a7   :  { %v9778_v49 = vpop.permute.xlu1 %1679 }
0x18a8   :  { %8187 = vmatmul.mubr.msk.f32.vlgmr.msra.gmra.mxu1 %vm524_vm3, %v9778_v49 }
0x18a9   :  { %8197 = vmatpush3.msra.mxu1 %v9684_v46  ;;  %8200 = vmatprep.mubr.msk.f32.mxu1 %vm9309_vm2, %v11337_v6 }
0x18aa   :  { %8198 = vmatprep.subr.mxu1 %v11337_v6 }
0x18ab   :  { %8199 = vmatpush3.msra.mxu1 %v9693_v48 }
0x18ac   :  { %8210 = vmatprep.subr.mxu1 %v11337_v6 }
0x1968   :  { %v1749_v50 = vpop.f32.mrf.mxu1 }
0x1969   :  { %v1750_v51 = vadd.f32 %v9709_v52, %v1749_v50 }
0x196a   :  { %v8188_v53 = vpop.f32.mrf.mxu1 }
0x196b   :  { %1761 = vrot.lane.b32.xlu0 %v1750_v51, %s9310_s30  ;;  %v1753_v54 = vadd.f32 %v1750_v51, %v9717_v59 }
0x196d   :  { %v7786_v55 = vmul.f32 -1.442695, %v1753_v54 }
0x196f   :  { %8693 = vpow2.f32 %v7786_v55 }
0x197c   :  { %v8694_v20 = vpop.eup %8693 }
0x197d   :  { %v1757_v57 = vadd.f32 1.0, %v8694_v20 }
0x197f   :  { %8695 = vrcp.f32 %v1757_v57 }
0x198c   :  { %v8696_v58 = vpop.eup %8695 }
0x198d   :  { %v1771_v12 = vsub.f32 1.0, %v8696_v58  ;;  %v1778_v16 = vmul.f32 %v8696_v58, %v1678_v45 }
0x19dd   :  { %v1762_v60 = vpop.permute.xlu0 %1761 }
0x19de   :  { %v1764_v61 = vmul.f32 %v8696_v58, %v1762_v60 }
0x19e0   :  { %1766 = vrot.lane.b32.xlu1 %v1764_v61, %s9311_s28 }
0x1a52   :  { %v1767_v3 = vpop.permute.xlu1 %1766 }
0x1a53   :  { %v1769_v4 = vadd.f32 %v1767_v3, %v9717_v59 }
0x1a55   :  { %8697 = vtanh.f32 %v1769_v4 }
0x1a62   :  { %v8698_v10 = vpop.eup %8697 }
0x1a63   :  { %1773 = vrot.lane.b32.xlu0 %v8698_v10, %s9312_s0 }
0x1ad5   :  { %v1774_v13 = vpop.permute.xlu0 %1773 }
0x1ad6   :  { %v1776_v17 = vmul.f32 %v1774_v13, %v1771_v12 }
0x1ad8   :  { %v1779_v18 = vadd.f32 %v1778_v16, %v1776_v17 }
0x1ada   :  { %1781 = vrot.lane.b32.xlu1 %v1779_v18, %s9312_s0  ;;  %v1881_v35 = vrot.slane %v1779_v18, 2 }
0x1b4c   :  { %v9795_v19 = vpop.permute.xlu1 %1781 }
0x1b4d   :  { %8194 = vmatmul.mubr.msk.f32.vlgmr.msra.gmra.mxu0 %vm524_vm3, %v9795_v19 }
0x1b4e   :  { %8204 = vmatpush3.msra.mxu0 %v9684_v46  ;;  %8207 = vmatprep.mubr.msk.f32.mxu0 %vm9309_vm2, %v11337_v6 }
0x1b4f   :  { %8205 = vmatprep.subr.mxu0 %v11337_v6 }
0x1b50   :  { %8206 = vmatpush3.msra.mxu0 %v9693_v48 }
0x1b51   :  { %8217 = vmatprep.subr.mxu0 %v11337_v6 }
0x1c0d   :  { %v1851_v59 = vpop.f32.mrf.mxu0 }
0x1c0e   :  { %v1852_v9 = vadd.f32 %v9709_v52, %v1851_v59 }
0x1c0f   :  { %v8195_v21 = vpop.f32.mrf.mxu0 }
0x1c10   :  { %v1856_v22 = vrot.slane %v1852_v9, 2 }
0x1c12   :  { %1865 = vrot.lane.b32.xlu0 %v1856_v22, %s9310_s30  ;;  %v1858_v23 = vadd.f32 %v1856_v22, %v9548_v11 }
0x1c14   :  { %v7788_v25 = vmul.f32 -1.442695, %v1858_v23 }
0x1c16   :  { %8699 = vpow2.f32 %v7788_v25 }
0x1c23   :  { %v8700_v26 = vpop.eup %8699 }
0x1c24   :  { %v1862_v27 = vadd.f32 1.0, %v8700_v26 }
0x1c26   :  { %8701 = vrcp.f32 %v1862_v27 }
0x1c33   :  { %v8702_v28 = vpop.eup %8701 }
0x1c34   :  { %v1875_v7 = vsub.f32 1.0, %v8702_v28  ;;  %v1883_v38 = vmul.f32 %v8702_v28, %v1881_v35 }
0x1c84   :  { %v1866_v29 = vpop.permute.xlu0 %1865 }
0x1c85   :  { %v1868_v30 = vmul.f32 %v8702_v28, %v1866_v29 }
0x1c87   :  { %1870 = vrot.lane.b32.xlu1 %v1868_v30, %s9311_s28 }
0x1cf9   :  { %v1871_v5 = vpop.permute.xlu1 %1870 }
0x1cfa   :  { %v1873_v31 = vadd.f32 %v1871_v5, %v9548_v11 }
0x1cfc   :  { %8703 = vtanh.f32 %v1873_v31 }
0x1d09   :  { %v8704_v34 = vpop.eup %8703 }
0x1d0a   :  { %1877 = vrot.lane.b32.xlu0 %v8704_v34, %s9312_s0 }
0x1d7c   :  { %v1878_v37 = vpop.permute.xlu0 %1877 }
0x1d7d   :  { %v1880_v39 = vmul.f32 %v1878_v37, %v1875_v7 }
0x1d7f   :  { %v1884_v40 = vadd.f32 %v1883_v38, %v1880_v39 }
0x1d81   :  { %v1886_v44 = vrot.slane %v1884_v40, 6  ;;  %v1987_v10 = vrot.slane %v1884_v40, 2 }
0x1d83   :  { %1887 = vrot.lane.b32.xlu1 %v1886_v44, %s9312_s0 }
0x1df5   :  { %v9812_v45 = vpop.permute.xlu1 %1887 }
0x1df6   :  { %8201 = vmatmul.mubr.msk.f32.vlgmr.msra.gmra.mxu1 %vm524_vm3, %v9812_v45 }
0x1df7   :  { %8211 = vmatpush3.msra.mxu1 %v9684_v46  ;;  %8214 = vmatprep.mubr.msk.f32.mxu1 %vm9309_vm2, %v11337_v6 }
0x1df8   :  { %8212 = vmatprep.subr.mxu1 %v11337_v6 }
0x1df9   :  { %8213 = vmatpush3.msra.mxu1 %v9693_v48 }
0x1dfa   :  { %8224 = vmatprep.subr.mxu1 %v11337_v6 }
0x1eb6   :  { %v1957_v50 = vpop.f32.mrf.mxu1 }
0x1eb7   :  { %v1958_v51 = vadd.f32 %v9709_v52, %v1957_v50 }
0x1eb8   :  { %v8202_v53 = vpop.f32.mrf.mxu1 }
0x1eb9   :  { %v1962_v54 = vrot.slane %v1958_v51, 4  ;;  %v1328_v51 = vadd.f32 %v9550_v14, %v9752_v43  ;;  %v2202_v14 = vld [vmem:[%s11384_s3 + $0x8] sm:$0xff] }
0x1ebb   :  { %1971 = vrot.lane.b32.xlu0 %v1962_v54, %s9310_s30  ;;  %v1964_v55 = vadd.f32 %v1962_v54, %v9548_v11  ;;  %v1332_v54 = vrot.slane %v1328_v51, 2 }
0x1ebd   :  { %v7790_v20 = vmul.f32 -1.442695, %v1964_v55  ;;  %v1334_v55 = vadd.f32 %v1332_v54, %v9552_v15 }
0x1ebf   :  { %8705 = vpow2.f32 %v7790_v20  ;;  %v7778_v20 = vmul.f32 -1.442695, %v1334_v55 }
0x1ecc   :  { %v8706_v46 = vpop.eup %8705 }
0x1ecd   :  { %v1968_v57 = vadd.f32 1.0, %v8706_v46 }
0x1ecf   :  { %8707 = vrcp.f32 %v1968_v57 }
0x1edc   :  { %v8708_v58 = vpop.eup %8707 }
0x1edd   :  { %v1981_v12 = vsub.f32 1.0, %v8708_v58  ;;  %v1989_v16 = vmul.f32 %v8708_v58, %v1987_v10 }
0x1f2d   :  { %v1972_v60 = vpop.permute.xlu0 %1971 }
0x1f2e   :  { %v1974_v61 = vmul.f32 %v8708_v58, %v1972_v60  ;;  %v2201_v58 = vld [vmem:[%s11384_s3] sm:$0xff] }
0x1f30   :  { %1976 = vrot.lane.b32.xlu1 %v1974_v61, %s9311_s28 }
0x1fa2   :  { %v1977_v48 = vpop.permute.xlu1 %1976 }
0x1fa3   :  { %v1979_v3 = vadd.f32 %v1977_v48, %v9548_v11 }
0x1fa5   :  { %8709 = vtanh.f32 %v1979_v3 }
0x1fb2   :  { %v8710_v4 = vpop.eup %8709 }
0x1fb3   :  { %1983 = vrot.lane.b32.xlu0 %v8710_v4, %s9312_s0 }
0x2025   :  { %v1984_v13 = vpop.permute.xlu0 %1983 }
0x2026   :  { %v1986_v17 = vmul.f32 %v1984_v13, %v1981_v12 }
0x2028   :  { %v1990_v18 = vadd.f32 %v1989_v16, %v1986_v17 }
0x202a   :  { %v1992_v59 = vrot.slane %v1990_v18, 4  ;;  %v2093_v37 = vrot.slane %v1990_v18, 2 }
0x202c   :  { %1993 = vrot.lane.b32.xlu1 %v1992_v59, %s9312_s0 }
0x209e   :  { %v9829_v9 = vpop.permute.xlu1 %1993 }
0x209f   :  { %8208 = vmatmul.mubr.msk.f32.vlgmr.msra.gmra.mxu0 %vm524_vm3, %v9829_v9 }
0x20a0   :  { %8221 = vmatprep.mubr.msk.f32.mxu0 %vm9309_vm2, %v11337_v6 }
0x215f   :  { %v2063_v21 = vpop.f32.mrf.mxu0 }
0x2160   :  { %v2064_v22 = vadd.f32 %v9709_v52, %v2063_v21 }
0x2161   :  { %v8209_v23 = vpop.f32.mrf.mxu0 }
0x2162   :  { %v2068_v25 = vrot.slane %v2064_v22, 6  ;;  %v1357_v23 = vrot.slane %v9727_v32, 6 }
0x2164   :  { %2077 = vrot.lane.b32.xlu0 %v2068_v25, %s9310_s30  ;;  %v2070_v26 = vadd.f32 %v2068_v25, %v9548_v11 }
0x2166   :  { %v7792_v27 = vmul.f32 -1.442695, %v2070_v26 }
0x2168   :  { %8711 = vpow2.f32 %v7792_v27 }
0x2175   :  { %v8712_v28 = vpop.eup %8711 }
0x2176   :  { %v2074_v29 = vadd.f32 1.0, %v8712_v28 }
0x2178   :  { %8713 = vrcp.f32 %v2074_v29 }
0x2185   :  { %v8714_v30 = vpop.eup %8713 }
0x2186   :  { %v2087_v38 = vsub.f32 1.0, %v8714_v30  ;;  %v2095_v40 = vmul.f32 %v8714_v30, %v2093_v37 }
0x21d6   :  { %v2078_v5 = vpop.permute.xlu0 %2077 }
0x21d7   :  { %v2080_v31 = vmul.f32 %v8714_v30, %v2078_v5 }
0x21d9   :  { %2082 = vrot.lane.b32.xlu1 %v2080_v31, %s9311_s28 }
0x224b   :  { %v2083_v34 = vpop.permute.xlu1 %2082 }
0x224c   :  { %v2085_v35 = vadd.f32 %v2083_v34, %v9548_v11 }
0x224e   :  { %8715 = vtanh.f32 %v2085_v35 }
0x224f   :  { %8717 = vpow2.f32 %v7778_v20 }
0x225b   :  { %v8716_v7 = vpop.eup %8715 }
0x225c   :  { %2089 = vrot.lane.b32.xlu0 %v8716_v7, %s9312_s0  ;;  %v8718_v46 = vpop.eup %8717 }
0x225d   :  { %v1338_v57 = vadd.f32 1.0, %v8718_v46 }
0x225f   :  { %8719 = vrcp.f32 %v1338_v57 }
0x226c   :  { %v9864_v60 = vpop.eup %8719 }
0x226d   :  { %v1351_v25 = vsub.f32 1.0, %v9864_v60  ;;  %v1359_v27 = vmul.f32 %v9864_v60, %v1357_v23 }
0x22ce   :  { %v2090_v39 = vpop.permute.xlu0 %2089 }
0x22cf   :  { %v2092_v44 = vmul.f32 %v2090_v39, %v2087_v38  ;;  %v3351_v38 = vld [vmem:[#allocation15 + $0x8] sm:$0xff] }
0x22d1   :  { %v9841_v50 = vadd.f32 %v2095_v40, %v2092_v44  ;;  %v3350_v40 = vld [vmem:[#allocation15] sm:$0xff] }
0x22d3   :  { %v2098_v53 = vrot.slane %v9841_v50, 2  ;;  %v10041_v50 = vld [vmem:[%s11323_s20 + $0x18] sm:$0xff] }
0x22d5   :  { %2099 = vrot.lane.b32.xlu1 %v2098_v53, %s9312_s0 }
0x22d9   :  { %1341 = vrot.lane.b32.xlu1 %v1332_v54, %s9310_s30 }
0x2347   :  { %v9854_v43 = vpop.permute.xlu1 %2099 }
0x2348   :  { %8215 = vmatmul.mubr.msk.f32.vlgmr.msra.gmra.mxu1 %vm524_vm3, %v9854_v43 }
0x2349   :  { %8225 = vmatpush3.msra.mxu1 %v2202_v14  ;;  %8228 = vmatprep.mubr.msk.f32.mxu1 %vm9309_vm2, %v11337_v6 }
0x234a   :  { %8226 = vmatprep.subr.mxu1 %v11337_v6 }
0x234b   :  { %8227 = vmatpush3.msra.mxu1 %v2201_v58  ;;  %v1342_v61 = vpop.permute.xlu1 %1341 }
0x234c   :  { %v1344_v48 = vmul.f32 %v9864_v60, %v1342_v61  ;;  %8229 = vmatmul.mubr.msk.f32.vlgmr.msra.gmra.mxu1 %vm524_vm3, %v9563_v36  ;;  %8238 = vmatprep.subr.mxu1 %v11337_v6 }
0x234d   :  { %8239 = vmatpush3.msra.mxu1 %v2202_v14  ;;  %8242 = vmatprep.mubr.msk.f32.mxu1 %vm9309_vm2, %v11337_v6 }
0x234e   :  { %8240 = vmatprep.subr.mxu1 %v11337_v6  ;;  %1346 = vrot.lane.b32.xlu1 %v1344_v48, %s9311_s28 }
0x234f   :  { %8241 = vmatpush3.msra.mxu1 %v2201_v58 }
0x2350   :  { %8243 = vmatmul.mubr.msk.f32.vlgmr.msra.gmra.mxu1 %vm524_vm3, %v9602_v62  ;;  %8252 = vmatprep.subr.mxu1 %v11337_v6 }
0x2351   :  { %8253 = vmatpush3.msra.mxu1 %v2202_v14  ;;  %8256 = vmatprep.mubr.msk.f32.mxu1 %vm9309_vm2, %v11337_v6 }
0x2352   :  { %8254 = vmatprep.subr.mxu1 %v11337_v6 }
0x2353   :  { %8255 = vmatpush3.msra.mxu1 %v2201_v58 }
0x2354   :  { %8257 = vmatmul.mubr.msk.f32.vlgmr.msra.gmra.mxu1 %vm524_vm3, %v9627_v33  ;;  %8266 = vmatprep.subr.mxu1 %v11337_v6 }
0x2355   :  { %8267 = vmatpush3.msra.mxu1 %v2202_v14  ;;  %8270 = vmatprep.mubr.msk.f32.mxu1 %vm9309_vm2, %v11337_v6 }
0x2356   :  { %8268 = vmatprep.subr.mxu1 %v11337_v6 }
0x2357   :  { %8269 = vmatpush3.msra.mxu1 %v2201_v58 }
0x2358   :  { %8271 = vmatmul.mubr.msk.f32.vlgmr.msra.gmra.mxu1 %vm524_vm3, %v9644_v56  ;;  %8280 = vmatprep.subr.mxu1 %v11337_v6 }
0x2359   :  { %8281 = vmatpush3.msra.mxu1 %v2202_v14  ;;  %8284 = vmatprep.mubr.msk.f32.mxu1 %vm9309_vm2, %v11337_v6 }
0x235a   :  { %8282 = vmatprep.subr.mxu1 %v11337_v6 }
0x235b   :  { %8283 = vmatpush3.msra.mxu1 %v2201_v58 }
0x235c   :  { %8285 = vmatmul.mubr.msk.f32.vlgmr.msra.gmra.mxu1 %vm524_vm3, %v9661_v24  ;;  %8294 = vmatprep.subr.mxu1 %v11337_v6 }
0x235d   :  { %8295 = vmatpush3.msra.mxu1 %v2202_v14  ;;  %8298 = vmatprep.mubr.msk.f32.mxu1 %vm9309_vm2, %v11337_v6 }
0x235e   :  { %8296 = vmatprep.subr.mxu1 %v11337_v6 }
0x235f   :  { %8297 = vmatpush3.msra.mxu1 %v2201_v58 }
0x2360   :  { %8299 = vmatmul.mubr.msk.f32.vlgmr.msra.gmra.mxu1 %vm524_vm3, %v9686_v47  ;;  %8308 = vmatprep.subr.mxu1 %v11337_v6 }
0x2361   :  { %8309 = vmatpush3.msra.mxu1 %v2202_v14  ;;  %8312 = vmatprep.mubr.msk.f32.mxu1 %vm9309_vm2, %v11337_v6 }
0x2362   :  { %8310 = vmatprep.subr.mxu1 %v11337_v6 }
0x2363   :  { %8311 = vmatpush3.msra.mxu1 %v2201_v58 }
0x2364   :  { %8313 = vmatmul.mubr.msk.f32.vlgmr.msra.gmra.mxu1 %vm524_vm3, %v9732_v41  ;;  %8322 = vmatprep.subr.mxu1 %v11337_v6 }
0x2365   :  { %8323 = vmatpush3.msra.mxu1 %v2202_v14  ;;  %8326 = vmatprep.mubr.msk.f32.mxu1 %vm9309_vm2, %v11337_v6 }
0x2366   :  { %8324 = vmatprep.subr.mxu1 %v11337_v6 }
0x2367   :  { %8325 = vmatpush3.msra.mxu1 %v2201_v58 }
0x2368   :  { %8336 = vmatprep.subr.mxu1 %v11337_v6 }
0x23c0   :  { %v1347_v36 = vpop.permute.xlu1 %1346 }
0x23c1   :  { %v1349_v62 = vadd.f32 %v1347_v36, %v9552_v15 }
0x23c3   :  { %8721 = vtanh.f32 %v1349_v62 }
0x23d0   :  { %v8722_v33 = vpop.eup %8721 }
0x23d1   :  { %1353 = vrot.lane.b32.xlu1 %v8722_v33, %s9312_s0  ;;  %v10062_v33 = vld [vmem:[%s11323_s20] sm:$0xff] }
0x2408   :  { %v2169_v56 = vpop.f32.mrf.mxu1 }
0x2409   :  { %v2170_v24 = vadd.f32 %v9709_v52, %v2169_v56 }
0x240a   :  { %v8216_v47 = vpop.f32.mrf.mxu1 }
0x240b   :  { %2181 = vrot.lane.b32.xlu0 %v2170_v24, %s9310_s30  ;;  %v2173_v5 = vadd.f32 %v2170_v24, %v9548_v11  ;;  %s11385_s30 = sld [smem:[#allocation53_spill]] }
0x240c   :  { %v9915_v41 = vpop.f32.mrf.mxu1 }
0x240d   :  { %v7794_v31 = vmul.f32 -1.442695, %v2173_v5  ;;  %v7814_v5 = vld [vmem:[#allocation18] ss:$0 sm:$0xff] }
0x240e   :  { %v8230_v3 = vpop.f32.mrf.mxu1 }
0x240f   :  { %8723 = vpow2.f32 %v7794_v31 }
0x2410   :  { %v9917_v4 = vpop.f32.mrf.mxu1 }
0x2411   :  { %v2204_v55 = vld [vmem:[%s11385_s30 + $0x8] sm:$0xff]  ;;  %v2203_v20 = vld [vmem:[%s11385_s30] sm:$0xff] }
0x2412   :  { %v8244_v10 = vpop.f32.mrf.mxu1  ;;  %8218 = vmatpush3.msra.mxu0 %v2204_v55 }
0x2413   :  { %8219 = vmatprep.subr.mxu0 %v11337_v6 }
0x2414   :  { %v9919_v12 = vpop.f32.mrf.mxu1  ;;  %8220 = vmatpush3.msra.mxu0 %v2203_v20 }
0x2415   :  { %8231 = vmatprep.subr.mxu0 %v11337_v6 }
0x2416   :  { %v8258_v13 = vpop.f32.mrf.mxu1 }
0x2418   :  { %v9921_v15 = vpop.f32.mrf.mxu1 }
0x241a   :  { %v8272_v16 = vpop.f32.mrf.mxu1 }
0x241c   :  { %v9923_v17 = vpop.f32.mrf.mxu1  ;;  %v8724_v34 = vpop.eup %8723 }
0x241d   :  { %v2177_v35 = vadd.f32 1.0, %v8724_v34 }
0x241e   :  { %v8286_v18 = vpop.f32.mrf.mxu1 }
0x241f   :  { %8725 = vrcp.f32 %v2177_v35 }
0x2420   :  { %v9925_v59 = vpop.f32.mrf.mxu1 }
0x2422   :  { %v8300_v52 = vpop.f32.mrf.mxu1 }
0x2424   :  { %v9927_v21 = vpop.f32.mrf.mxu1 }
0x2426   :  { %v8314_v22 = vpop.f32.mrf.mxu1 }
0x242c   :  { %v8726_v7 = vpop.eup %8725 }
0x242d   :  { %v2191_v46 = vsub.f32 1.0, %v8726_v7  ;;  %v2198_v57 = vmul.f32 %v8726_v7, %v2098_v53  ;;  %v10048_v53 = vld [vmem:[%s11323_s20 + $0x10] sm:$0xff] }
0x2443   :  { %v1354_v26 = vpop.permute.xlu1 %1353 }
0x2444   :  { %v1356_v28 = vmul.f32 %v1354_v26, %v1351_v25 }
0x2446   :  { %v1360_v29 = vadd.f32 %v1359_v27, %v1356_v28 }
0x2448   :  { %v3274_v30 = vrot.slane %v1360_v29, 6 }
0x244a   :  { %3275 = vrot.lane.b32.xlu1 %v3274_v30, %s9312_s0 }
0x247d   :  { %v2182_v37 = vpop.permute.xlu0 %2181 }
0x247e   :  { %v2184_v32 = vmul.f32 %v8726_v7, %v2182_v37 }
0x2480   :  { %2186 = vrot.lane.b32.xlu0 %v2184_v32, %s9311_s28  ;;  %v7797_v32 = vld [vmem:[#allocation14] ss:$0 sm:$0xff] }
0x24bc   :  { %v3276_v39 = vpop.permute.xlu1 %3275 }
0x24bd   :  { %8327 = vmatmul.mubr.msk.f32.vlgmr.msra.gmra.mxu1 %vm524_vm3, %v3276_v39 }
0x24be   :  { %8337 = vmatpush3.msra.mxu1 %v3351_v38  ;;  %8340 = vmatprep.mubr.msk.f32.mxu1 %vm9309_vm2, %v11337_v6 }
0x24bf   :  { %8338 = vmatprep.subr.mxu1 %v11337_v6 }
0x24c0   :  { %8339 = vmatpush3.msra.mxu1 %v3350_v40 }
0x24c1   :  { %8341 = vmatmul.mubr.msk.f32.vlgmr.msra.gmra.mxu1 %vm524_vm3, %v3276_v39  ;;  %8362 = vmatprep.subr.mxu1 %v11337_v6 }
0x24c2   :  { %8366 = vmatprep.mubr.msk.f32.mxu1 %vm9309_vm2, %v11337_v6 }
0x24f2   :  { %v2187_v44 = vpop.permute.xlu0 %2186 }
0x24f3   :  { %v2189_v51 = vadd.f32 %v2187_v44, %v9548_v11 }
0x24f5   :  { %8727 = vtanh.f32 %v2189_v51 }
0x2502   :  { %v8728_v54 = vpop.eup %8727 }
0x2503   :  { %2193 = vrot.lane.b32.xlu0 %v8728_v54, %s9312_s0 }
0x2575   :  { %v2194_v11 = vpop.permute.xlu0 %2193 }
0x2576   :  { %v2196_v14 = vmul.f32 %v2194_v11, %v2191_v46 }
0x2578   :  { %v2199_v58 = vadd.f32 %v2198_v57, %v2196_v14 }
0x257a   :  { %2206 = vrot.lane.b32.xlu0 %v2199_v58, %s9312_s0 }
0x257d   :  { %v9956_v60 = vpop.f32.mrf.mxu1 }
0x257f   :  { %v8328_v61 = vpop.f32.mrf.mxu1 }
0x2581   :  { %v9958_v48 = vpop.f32.mrf.mxu1 }
0x2583   :  { %v8342_v36 = vpop.f32.mrf.mxu1 }
0x25ec   :  { %v2207_v62 = vpop.permute.xlu0 %2206 }
0x25ed   :  { %8222 = vmatmul.mubr.msk.f32.vlgmr.msra.gmra.mxu0 %vm524_vm3, %v2207_v62 }
0x25ee   :  { %8232 = vmatpush3.msra.mxu0 %v2204_v55  ;;  %8235 = vmatprep.mubr.msk.f32.mxu0 %vm9309_vm2, %v11337_v6 }
0x25ef   :  { %8233 = vmatprep.subr.mxu0 %v11337_v6 }
0x25f0   :  { %8234 = vmatpush3.msra.mxu0 %v2203_v20 }
0x25f1   :  { %8236 = vmatmul.mubr.msk.f32.vlgmr.msra.gmra.mxu0 %vm524_vm3, %v9854_v43  ;;  %8245 = vmatprep.subr.mxu0 %v11337_v6  ;;  %v10055_v43 = vld [vmem:[%s11323_s20 + $0x8] sm:$0xff] }
0x25f2   :  { %8246 = vmatpush3.msra.mxu0 %v2204_v55  ;;  %8249 = vmatprep.mubr.msk.f32.mxu0 %vm9309_vm2, %v11337_v6 }
0x25f3   :  { %8247 = vmatprep.subr.mxu0 %v11337_v6 }
0x25f4   :  { %8248 = vmatpush3.msra.mxu0 %v2203_v20 }
0x25f5   :  { %8250 = vmatmul.mubr.msk.f32.vlgmr.msra.gmra.mxu0 %vm524_vm3, %v9829_v9  ;;  %8259 = vmatprep.subr.mxu0 %v11337_v6  ;;  %v10034_v9 = vld [vmem:[%s11323_s20 + $0x20] sm:$0xff] }
0x25f6   :  { %8260 = vmatpush3.msra.mxu0 %v2204_v55  ;;  %8263 = vmatprep.mubr.msk.f32.mxu0 %vm9309_vm2, %v11337_v6 }
0x25f7   :  { %8261 = vmatprep.subr.mxu0 %v11337_v6 }
0x25f8   :  { %8262 = vmatpush3.msra.mxu0 %v2203_v20 }
0x25f9   :  { %8264 = vmatmul.mubr.msk.f32.vlgmr.msra.gmra.mxu0 %vm524_vm3, %v9812_v45  ;;  %8273 = vmatprep.subr.mxu0 %v11337_v6  ;;  %v10027_v45 = vld [vmem:[%s11323_s20 + $0x28] sm:$0xff] }
0x25fa   :  { %8274 = vmatpush3.msra.mxu0 %v2204_v55  ;;  %8277 = vmatprep.mubr.msk.f32.mxu0 %vm9309_vm2, %v11337_v6 }
0x25fb   :  { %8275 = vmatprep.subr.mxu0 %v11337_v6 }
0x25fc   :  { %8276 = vmatpush3.msra.mxu0 %v2203_v20 }
0x25fd   :  { %8278 = vmatmul.mubr.msk.f32.vlgmr.msra.gmra.mxu0 %vm524_vm3, %v9795_v19  ;;  %8287 = vmatprep.subr.mxu0 %v11337_v6  ;;  %v3352_v19 = vld [vmem:[#allocation17] sm:$0xff] }
0x25fe   :  { %8288 = vmatpush3.msra.mxu0 %v2204_v55  ;;  %8291 = vmatprep.mubr.msk.f32.mxu0 %vm9309_vm2, %v11337_v6 }
0x25ff   :  { %8289 = vmatprep.subr.mxu0 %v11337_v6 }
0x2600   :  { %8290 = vmatpush3.msra.mxu0 %v2203_v20 }
0x2601   :  { %8292 = vmatmul.mubr.msk.f32.vlgmr.msra.gmra.mxu0 %vm524_vm3, %v9778_v49  ;;  %8301 = vmatprep.subr.mxu0 %v11337_v6  ;;  %v3353_v49 = vld [vmem:[#allocation17 + $0x8] sm:$0xff] }
0x2602   :  { %8302 = vmatpush3.msra.mxu0 %v2204_v55  ;;  %8305 = vmatprep.mubr.msk.f32.mxu0 %vm9309_vm2, %v11337_v6 }
0x2603   :  { %8303 = vmatprep.subr.mxu0 %v11337_v6 }
0x2604   :  { %8304 = vmatpush3.msra.mxu0 %v2203_v20 }
0x2605   :  { %8306 = vmatmul.mubr.msk.f32.vlgmr.msra.gmra.mxu0 %vm524_vm3, %v9761_v8  ;;  %8315 = vmatprep.subr.mxu0 %v11337_v6  ;;  %v10020_v8 = vld [vmem:[%s11323_s20 + $0x30] sm:$0xff] }
0x2606   :  { %8316 = vmatpush3.msra.mxu0 %v2204_v55  ;;  %8319 = vmatprep.mubr.msk.f32.mxu0 %vm9309_vm2, %v11337_v6 }
0x2607   :  { %8317 = vmatprep.subr.mxu0 %v11337_v6 }
0x2608   :  { %8318 = vmatpush3.msra.mxu0 %v2203_v20 }
0x2609   :  { %8320 = vmatmul.mubr.msk.f32.vlgmr.msra.gmra.mxu0 %vm524_vm3, %v9741_v42  ;;  %8329 = vmatprep.subr.mxu0 %v11337_v6  ;;  %v10013_v42 = vld [vmem:[%s11323_s20 + $0x38] sm:$0xff] }
0x260a   :  { %8330 = vmatpush3.msra.mxu0 %v3353_v49  ;;  %8333 = vmatprep.mubr.msk.f32.mxu0 %vm9309_vm2, %v11337_v6 }
0x260b   :  { %8331 = vmatprep.subr.mxu0 %v11337_v6 }
0x260c   :  { %8332 = vmatpush3.msra.mxu0 %v3352_v19 }
0x260d   :  { %8334 = vmatmul.mubr.msk.f32.vlgmr.msra.gmra.mxu0 %vm524_vm3, %v2207_v62  ;;  %8343 = vmatprep.subr.mxu0 %v11337_v6 }
0x260e   :  { %8359 = vmatprep.mubr.msk.f32.mxu0 %vm9309_vm2, %v11337_v6  ;;  %8344 = vmatpush3.msra.mxu0 %v10013_v42 }
0x260f   :  { %8345 = vmatprep.subr.mxu0 %v11337_v6 }
0x2610   :  { %8346 = vmatpush3.msra.mxu0 %v10020_v8 }
0x2611   :  { %8347 = vmatprep.subr.mxu0 %v11337_v6 }
0x2612   :  { %8348 = vmatpush3.msra.mxu0 %v10027_v45 }
0x2613   :  { %8349 = vmatprep.subr.mxu0 %v11337_v6 }
0x2614   :  { %8350 = vmatpush3.msra.mxu0 %v10034_v9 }
0x2615   :  { %8351 = vmatprep.subr.mxu0 %v11337_v6 }
0x2616   :  { %8352 = vmatpush3.msra.mxu0 %v10041_v50 }
0x2617   :  { %8353 = vmatprep.subr.mxu0 %v11337_v6 }
0x2618   :  { %8354 = vmatpush3.msra.mxu0 %v10048_v53 }
0x2619   :  { %8355 = vmatprep.subr.mxu0 %v11337_v6 }
0x261a   :  { %8356 = vmatpush3.msra.mxu0 %v10055_v43 }
0x261b   :  { %8357 = vmatprep.subr.mxu0 %v11337_v6 }
0x261c   :  { %8358 = vmatpush3.msra.mxu0 %v10062_v33 }
0x261d   :  { %8374 = vmatprep.subr.mxu0 %v11337_v6 }
0x26ad   :  { %v2276_v56 = vpop.f32.mrf.mxu0 }
0x26ae   :  { %v2347_v7 = vadd.f32 %v9915_v41, %v2276_v56 }
0x26af   :  { %v8223_v24 = vpop.f32.mrf.mxu0 }
0x26b0   :  { %v10092_v40 = vadd.f32 %v7797_v32, %v2347_v7 }
0x26b1   :  { %v2423_v47 = vpop.f32.mrf.mxu0 }
0x26b2   :  { %v2494_v37 = vadd.f32 %v9917_v4, %v2423_v47 }
0x26b3   :  { %v8237_v3 = vpop.f32.mrf.mxu0 }
0x26b4   :  { %v10094_v44 = vadd.f32 %v7797_v32, %v2494_v37 }
0x26b5   :  { %v2564_v10 = vpop.f32.mrf.mxu0 }
0x26b6   :  { %v2635_v38 = vadd.f32 %v9919_v12, %v2564_v10 }
0x26b7   :  { %v8251_v13 = vpop.f32.mrf.mxu0 }
0x26b8   :  { %v10096_v51 = vadd.f32 %v7797_v32, %v2635_v38 }
0x26b9   :  { %v2705_v16 = vpop.f32.mrf.mxu0 }
0x26ba   :  { %v2776_v54 = vadd.f32 %v9921_v15, %v2705_v16  ;;  %v10136_v16 = vld [vmem:[%s11324_s21] sm:$0xff] }
0x26bb   :  { %v8265_v18 = vpop.f32.mrf.mxu0 }
0x26bc   :  { %v10108_v15 = vadd.f32 %v7797_v32, %v2776_v54 }
0x26bd   :  { %v2846_v52 = vpop.f32.mrf.mxu0 }
0x26be   :  { %v2917_v39 = vadd.f32 %v9923_v17, %v2846_v52 }
0x26bf   :  { %v8279_v22 = vpop.f32.mrf.mxu0 }
0x26c0   :  { %v10099_v20 = vadd.f32 %v7797_v32, %v2917_v39 }
0x26c1   :  { %v2987_v23 = vpop.f32.mrf.mxu0 }
0x26c2   :  { %v3058_v58 = vadd.f32 %v9925_v59, %v2987_v23 }
0x26c3   :  { %v8293_v25 = vpop.f32.mrf.mxu0 }
0x26c4   :  { %v10117_v49 = vadd.f32 %v7797_v32, %v3058_v58 }
0x26c5   :  { %v3128_v26 = vpop.f32.mrf.mxu0 }
0x26c6   :  { %v3199_v41 = vadd.f32 %v9927_v21, %v3128_v26 }
0x26c7   :  { %v8307_v27 = vpop.f32.mrf.mxu0 }
0x26c8   :  { %v10111_v21 = vadd.f32 %v7797_v32, %v3199_v41 }
0x26c9   :  { %v3269_v28 = vpop.f32.mrf.mxu0 }
0x26ca   :  { %v3346_v19 = vadd.f32 %v9956_v60, %v3269_v28  ;;  %v10131_v60 = vld [vmem:[%s11324_s21 + $0x8] sm:$0xff] }
0x26cb   :  { %v8321_v29 = vpop.f32.mrf.mxu0  ;;  %8363 = vmatpush3.msra.mxu1 %v10131_v60 }
0x26cc   :  { %v10123_v47 = vadd.f32 %v7797_v32, %v3346_v19  ;;  %8364 = vmatprep.subr.mxu1 %v11337_v6 }
0x26cd   :  { %v3420_v30 = vpop.f32.mrf.mxu0  ;;  %8365 = vmatpush3.msra.mxu1 %v10136_v16 }
0x26ce   :  { %v3491_v31 = vadd.f32 %v9958_v48, %v3420_v30 }
0x26cf   :  { %v8335_v34 = vpop.f32.mrf.mxu0 }
0x26d0   :  { %v10067_v35 = vadd.f32 %v7814_v5, %v3491_v31 }
0x26d2   :  { %8360 = vmatmul.mubr.msk.f32.vlgmr.msra.gmra.mxu0 %vm3534_vm5, %v10067_v35 }
0x26d3   :  { %8375 = vmatpush3.msra.mxu0 %v10013_v42  ;;  %8390 = vmatprep.mubr.msk.f32.mxu0 %vm9309_vm2, %v11337_v6 }
0x26d4   :  { %8376 = vmatprep.subr.mxu0 %v11337_v6 }
0x26d5   :  { %8377 = vmatpush3.msra.mxu0 %v10020_v8 }
0x26d6   :  { %8378 = vmatprep.subr.mxu0 %v11337_v6 }
0x26d7   :  { %8379 = vmatpush3.msra.mxu0 %v10027_v45 }
0x26d8   :  { %8380 = vmatprep.subr.mxu0 %v11337_v6 }
0x26d9   :  { %8381 = vmatpush3.msra.mxu0 %v10034_v9 }
0x26da   :  { %8382 = vmatprep.subr.mxu0 %v11337_v6 }
0x26db   :  { %8383 = vmatpush3.msra.mxu0 %v10041_v50 }
0x26dc   :  { %8384 = vmatprep.subr.mxu0 %v11337_v6 }
0x26dd   :  { %8385 = vmatpush3.msra.mxu0 %v10048_v53 }
0x26de   :  { %8386 = vmatprep.subr.mxu0 %v11337_v6 }
0x26df   :  { %8387 = vmatpush3.msra.mxu0 %v10055_v43 }
0x26e0   :  { %8388 = vmatprep.subr.mxu0 %v11337_v6 }
0x26e1   :  { %8389 = vmatpush3.msra.mxu0 %v10062_v33 }
0x2792   :  { %v3604_v55 = vpop.f32.mrf.mxu0 }
0x2793   :  { %v3613_v4 = vmul.f32 %v3604_v55, %v10094_v44  ;;  %v3608_v12 = vmul.f32 %v3604_v55, %v10092_v40  ;;  %v3625_v57 = vmul.f32 %v3604_v55, %v10099_v20  ;;  %v3617_v14 = vmul.f32 %v3604_v55, %v10096_v51 }
0x2794   :  { %v8361_v46 = vpop.f32.mrf.mxu0  ;;  %v3633_v36 = vmul.f32 %v3604_v55, %v10111_v21  ;;  %v3621_v62 = vmul.f32 %v3604_v55, %v10108_v15  ;;  %v3629_v24 = vmul.f32 %v3604_v55, %v10117_v49  ;;  %v3637_v10 = vmul.f32 %v3604_v55, %v10123_v47 }
0x2795   :  { %v3614_v17 = vsel %vm3609_vm6, %v3613_v4, 0.0  ;;  %v3610_v11 = vsel %vm3609_vm6, %v3608_v12, 0.0  ;;  %v3626_v61 = vsel %vm3609_vm6, %v3625_v57, 0.0  ;;  %v3618_v48 = vsel %vm3609_vm6, %v3617_v14, 0.0 }
0x2796   :  { %3615 = vadd.xlane.f32.xlu1 %v3614_v17  ;;  %3611 = vadd.xlane.f32.xlu0 %v3610_v11  ;;  %v3634_v56 = vsel %vm3609_vm6, %v3633_v36, 0.0  ;;  %v3622_v59 = vsel %vm3609_vm6, %v3621_v62, 0.0  ;;  %v3630_v3 = vsel %vm3609_vm6, %v3629_v24, 0.0  ;;  %v3638_v13 = vsel %vm3609_vm6, %v3637_v10, 0.0 }
0x279a   :  { %3627 = vadd.xlane.f32.xlu1 %v3626_v61  ;;  %3619 = vadd.xlane.f32.xlu0 %v3618_v48 }
0x279e   :  { %3635 = vadd.xlane.f32.xlu1 %v3634_v56  ;;  %3623 = vadd.xlane.f32.xlu0 %v3622_v59 }
0x27a2   :  { %3631 = vadd.xlane.f32.xlu0 %v3630_v3 }
0x27a6   :  { %3639 = vadd.xlane.f32.xlu0 %v3638_v13 }
0x281f   :  { %v3612_v18 = vpop.xlane.xlu0 %3611  ;;  %v3616_v52 = vpop.xlane.xlu1 %3615 }
0x2820   :  { %v3641_v23 = vmax.f32 %v3612_v18, %v3616_v52 }
0x2823   :  { %v3620_v22 = vpop.xlane.xlu0 %3619  ;;  %v3628_v26 = vpop.xlane.xlu1 %3627 }
0x2824   :  { %v3642_v25 = vmax.f32 %v3641_v23, %v3620_v22 }
0x2827   :  { %v3624_v27 = vpop.xlane.xlu0 %3623  ;;  %v3636_v31 = vpop.xlane.xlu1 %3635 }
0x2828   :  { %v3643_v28 = vmax.f32 %v3642_v25, %v3624_v27 }
0x282a   :  { %v3644_v29 = vmax.f32 %v3643_v28, %v3628_v26 }
0x282b   :  { %v3632_v30 = vpop.xlane.xlu0 %3631 }
0x282c   :  { %v3645_v5 = vmax.f32 %v3644_v29, %v3632_v30 }
0x282e   :  { %v3646_v34 = vmax.f32 %v3645_v5, %v3636_v31 }
0x282f   :  { %v3640_v7 = vpop.xlane.xlu0 %3639 }
0x2830   :  { %v3647_v37 = vmax.f32 %v3646_v34, %v3640_v7 }
0x2832   :  { %v3648_v32 = vsub.f32 %v3612_v18, %v3647_v37  ;;  %v3651_v38 = vsub.f32 %v3616_v52, %v3647_v37  ;;  %v3654_v39 = vsub.f32 %v3620_v22, %v3647_v37  ;;  %v3657_v54 = vsub.f32 %v3624_v27, %v3647_v37 }
0x2833   :  { %v3660_v12 = vsub.f32 %v3628_v26, %v3647_v37  ;;  %v3663_v17 = vsub.f32 %v3632_v30, %v3647_v37  ;;  %v3666_v57 = vsub.f32 %v3636_v31, %v3647_v37  ;;  %v3669_v58 = vsub.f32 %v3640_v7, %v3647_v37 }
0x2834   :  { %v3649_v55 = vmul.f32 1.442695, %v3648_v32  ;;  %v3652_v41 = vmul.f32 1.442695, %v3651_v38  ;;  %v3655_v4 = vmul.f32 1.442695, %v3654_v39 }
0x2835   :  { %v3658_v46 = vmul.f32 1.442695, %v3657_v54  ;;  %v3661_v11 = vmul.f32 1.442695, %v3660_v12  ;;  %v3664_v14 = vmul.f32 1.442695, %v3663_v17 }
0x2836   :  { %8729 = vpow2.f32 %v3649_v55  ;;  %v3667_v61 = vmul.f32 1.442695, %v3666_v57  ;;  %v3670_v48 = vmul.f32 1.442695, %v3669_v58 }
0x2837   :  { %8731 = vpow2.f32 %v3652_v41 }
0x2838   :  { %8733 = vpow2.f32 %v3655_v4 }
0x2839   :  { %8735 = vpow2.f32 %v3658_v46 }
0x283a   :  { %8737 = vpow2.f32 %v3661_v11 }
0x283b   :  { %8739 = vpow2.f32 %v3664_v14 }
0x283c   :  { %8741 = vpow2.f32 %v3667_v61 }
0x283d   :  { %8743 = vpow2.f32 %v3670_v48  ;;  %v10154_v48 = vld [vmem:[%s11326_s23 + $0x8] sm:$0xff] }
0x283e   :  { %3816 = vmatprep.subr.mxu1 %v10154_v48  ;;  %4339 = vmatprep.subr.mxu0 %v10154_v48 }
0x2843   :  { %v8730_v36 = vpop.eup %8729 }
0x2844   :  { %v8732_v62 = vpop.eup %8731 }
0x2845   :  { %v3672_v19 = vadd.f32 %v8732_v62, %v8730_v36  ;;  %v8734_v56 = vpop.eup %8733 }
0x2846   :  { %v8736_v24 = vpop.eup %8735 }
0x2847   :  { %v3673_v59 = vadd.f32 %v8734_v56, %v3672_v19  ;;  %v8738_v10 = vpop.eup %8737 }
0x2848   :  { %v8740_v18 = vpop.eup %8739 }
0x2849   :  { %v3674_v3 = vadd.f32 %v8736_v24, %v3673_v59  ;;  %v8742_v22 = vpop.eup %8741 }
0x284a   :  { %v8744_v25 = vpop.eup %8743 }
0x284b   :  { %v3675_v13 = vadd.f32 %v8738_v10, %v3674_v3 }
0x284d   :  { %v3676_v52 = vadd.f32 %v8740_v18, %v3675_v13  ;;  %v10187_v13 = vld [vmem:[%s11320_s17 + $0x70] sm:$0xff] }
0x284f   :  { %v3677_v23 = vadd.f32 %v8742_v22, %v3676_v52  ;;  %v10198_v52 = vld [vmem:[%s11320_s17 + $0x60] sm:$0xff] }
0x2851   :  { %v3678_v26 = vadd.f32 %v8744_v25, %v3677_v23  ;;  %v10211_v23 = vld [vmem:[%s11320_s17 + $0x50] sm:$0xff] }
0x2853   :  { %8745 = vrcp.f32 %v3678_v26  ;;  %v10223_v26 = vld [vmem:[%s11320_s17 + $0x40] sm:$0xff] }
0x2860   :  { %v8746_v27 = vpop.eup %8745 }
0x2861   :  { %v3680_v28 = vmul.f32 %v8746_v27, %v8730_v36  ;;  %v3682_v29 = vmul.f32 %v8746_v27, %v8732_v62  ;;  %v3685_v30 = vmul.f32 %v8746_v27, %v8734_v56  ;;  %v3688_v34 = vmul.f32 %v8746_v27, %v8736_v24  ;;  %v10159_v36 = vld [vmem:[%s11326_s23] sm:$0xff]  ;;  %v10165_v62 = vld [vmem:[#allocation23] ss:$0 sm:$0xff]  ;;  %v10171_v24 = vld [vmem:[%s11326_s23 + $0x10] sm:$0xff] }
0x2862   :  { %v3691_v32 = vmul.f32 %v8746_v27, %v8738_v10  ;;  %v3694_v54 = vmul.f32 %v8746_v27, %v8740_v18  ;;  %v3697_v4 = vmul.f32 %v8746_v27, %v8742_v22  ;;  %v3700_v17 = vmul.f32 %v8746_v27, %v8744_v25  ;;  %11386 = vst [vmem:[#allocation37_spill] sm:$0xff] %v10159_v36  ;;  %v10176_v10 = vld [vmem:[%s11320_s17 + $0x78] sm:$0xff]  ;;  %v10192_v18 = vld [vmem:[%s11320_s17 + $0x68] sm:$0xff] }
0x2863   :  { %v3681_v5 = vmul.f32 %v3680_v28, %v10092_v40  ;;  %v3683_v31 = vmul.f32 %v3682_v29, %v10094_v44  ;;  %v3686_v37 = vmul.f32 %v3685_v30, %v10096_v51  ;;  %v3689_v39 = vmul.f32 %v3688_v34, %v10108_v15  ;;  %11387 = vst [vmem:[#allocation38_spill] sm:$0xff] %v10176_v10  ;;  %v10204_v22 = vld [vmem:[%s11320_s17 + $0x58] sm:$0xff]  ;;  %v10217_v25 = vld [vmem:[%s11320_s17 + $0x48] sm:$0xff]  ;;  %v10235_v28 = vld [vmem:[%s11320_s17 + $0x30] sm:$0xff] }
0x2864   :  { %v3692_v41 = vmul.f32 %v3691_v32, %v10099_v20  ;;  %v3695_v46 = vmul.f32 %v3694_v54, %v10117_v49  ;;  %v3698_v57 = vmul.f32 %v3697_v4, %v10111_v21  ;;  %v3701_v58 = vmul.f32 %v3700_v17, %v10123_v47  ;;  %v10229_v27 = vld [vmem:[%s11320_s17 + $0x38] sm:$0xff]  ;;  %v10241_v29 = vld [vmem:[%s11320_s17 + $0x28] sm:$0xff]  ;;  %v10247_v30 = vld [vmem:[%s11320_s17 + $0x20] sm:$0xff] }
0x2865   :  { %v3684_v7 = vadd.f32 %v3683_v31, %v3681_v5  ;;  %v10253_v5 = vld [vmem:[%s11320_s17 + $0x18] sm:$0xff]  ;;  %v10259_v31 = vld [vmem:[%s11320_s17 + $0x10] sm:$0xff]  ;;  %v10265_v34 = vld [vmem:[%s11320_s17 + $0x8] sm:$0xff] }
0x2866   :  { %v3518_v17 = vld [vmem:[#allocation20] sm:$0x3] }
0x2867   :  { %v3687_v38 = vadd.f32 %v3686_v37, %v3684_v7  ;;  %v10271_v7 = vld [vmem:[%s11320_s17] sm:$0xff] }
0x2869   :  { %v3690_v55 = vadd.f32 %v3689_v39, %v3687_v38 }
0x286b   :  { %v3693_v12 = vadd.f32 %v3692_v41, %v3690_v55  ;;  %v3932_v41 = vlaneseq }
0x286d   :  { %v3696_v11 = vadd.f32 %v3695_v46, %v3693_v12  ;;  %v3933_v4 = vshrl.u32 %v3932_v41, 7 }
0x286f   :  { %v3699_v14 = vadd.f32 %v3698_v57, %v3696_v11  ;;  %v3934_v46 = vsub.s32 0, %v3933_v4  ;;  %v3519_v11 = vld [vmem:[#allocation21] sm:$0x3] }
0x2871   :  { %v3702_v61 = vadd.f32 %v3701_v58, %v3699_v14  ;;  %v10288_v14 = vrot.slane %v3518_v17, %v3934_v46 }
0x2873   :  { %8367 = vmatmul.mubr.msk.f32.vlgmr.msra.gmra.mxu1 %vm524_vm3, %v3702_v61  ;;  %v10290_v61 = vrot.slane %v3519_v11, %v3934_v46 }
0x2874   :  { %3850 = vmatprep.mubr.f32.mxu1 %v11337_v6  ;;  %3817 = vmatpush1.msra.mxu1 %v10159_v36 }
0x2875   :  { %8369 = vmatprep.subr.mxu1 %v11337_v6 }
0x2933   :  { %v3778_v19 = vpop.f32.mrf.mxu1 }
0x2934   :  { %v3779_v56 = vadd.f32 %v10165_v62, %v3778_v19 }
0x2935   :  { %v8368_v59 = vpop.f32.mrf.mxu1 }
0x2936   :  { %8747 = vtanh.f32 %v3779_v56 }
0x2943   :  { %v8748_v3 = vpop.eup %8747 }
0x2944   :  { %4062 = vst.msk [vmem:[#allocation24] sm:$0x3] %vm4061_vm7, %v8748_v3  ;;  %7818 = vmatmul.mubr.msk.f32.vlgmr.msra.gmra.mxu1 %vm428_vm4, %v8748_v3 }
0x2945   :  { %8370 = vmatpush3.msra.mxu1 %v10171_v24  ;;  %8371 = vmatprep.mubr.msk.f32.mxu1 %vm9309_vm2, %v11337_v6 }
0x2946   :  { %3960 = vmatprep.subr.mxu1 %v10176_v10 }
0x2948   :  { %8372 = vmatmul.mubr.msk.f32.vlgmr.msra.gmra.mxu1 %vm428_vm4, %v8748_v3 }
0x2949   :  { %3961 = vmatpush1.msra.mxu1 %v10187_v13  ;;  %4008 = vmatprep.mubr.f32.mxu1 %v11337_v6 }
0x294a   :  { %3962 = vmatprep.subr.mxu1 %v10192_v18 }
0x294b   :  { %3963 = vmatpush1.msra.mxu1 %v10198_v52 }
0x294c   :  { %3964 = vmatprep.subr.mxu1 %v10204_v22 }
0x294d   :  { %3965 = vmatpush1.msra.mxu1 %v10211_v23 }
0x294e   :  { %3966 = vmatprep.subr.mxu1 %v10217_v25 }
0x294f   :  { %3967 = vmatpush1.msra.mxu1 %v10223_v26 }
0x2950   :  { %3968 = vmatprep.subr.mxu1 %v10229_v27 }
0x2951   :  { %3969 = vmatpush1.msra.mxu1 %v10235_v28 }
0x2952   :  { %3970 = vmatprep.subr.mxu1 %v10241_v29 }
0x2953   :  { %3971 = vmatpush1.msra.mxu1 %v10247_v30 }
0x2954   :  { %3972 = vmatprep.subr.mxu1 %v10253_v5 }
0x2955   :  { %3973 = vmatpush1.msra.mxu1 %v10259_v31 }
0x2956   :  { %3974 = vmatprep.subr.mxu1 %v10265_v34 }
0x2957   :  { %3975 = vmatpush1.msra.mxu1 %v10271_v7 }
0x2958   :  { %7820 = vmatmul.mubr.msk.f32.vlgmr.msra.gmra.mxu1 %vm3534_vm5, %v10067_v35  ;;  %8393 = vmatprep.subr.mxu1 %v11337_v6 }
0x2959   :  { %8394 = vmatpush3.msra.mxu1 %v10131_v60  ;;  %8397 = vmatprep.mubr.msk.f32.mxu1 %vm9309_vm2, %v11337_v6 }
0x295a   :  { %8395 = vmatprep.subr.mxu1 %v11337_v6 }
0x295b   :  { %8396 = vmatpush3.msra.mxu1 %v10136_v16 }
0x295c   :  { %8400 = vmatprep.subr.mxu1 %v11337_v6 }
0x2a04   :  { %v3852_v37 = vpop.f32.mrf.mxu1 }
0x2a05   :  { %v3927_v12 = vadd.f32 1.0, %v3852_v37 }
0x2a06   :  { %v3854_v32 = vpop.f32.mrf.mxu1 }
0x2a07   :  { %v3928_v38 = vadd.f32 1.0, %v3854_v32  ;;  %v3929_v57 = vmul.f32 %v3927_v12, %v9612_v63  ;;  %v3938_v12 = vsub.s32 1, %v3933_v4 }
0x2a08   :  { %v3923_v39 = vpop.f32.mrf.mxu1 }
0x2a09   :  { %v4015_v54 = vadd.f32 1.0, %v3923_v39  ;;  %4018 = vrot.lane.b32.xlu1 %v3928_v38, %s9313_s22  ;;  %v3942_v32 = vadd.f32 %v10288_v14, %v3929_v57  ;;  %v10295_v2 = vrot.slane %v3519_v11, %v3938_v12  ;;  %v3930_v1 = vmul.f32 %v3928_v38, %v9614_v0 }
0x2a0a   :  { %v8373_v55 = vpop.f32.mrf.mxu1  ;;  %v10298_v63 = vrot.slane %v3518_v17, %v3938_v12 }
0x2a0b   :  { %4020 = vrot.lane.b32.xlu0 %v4015_v54, %s9313_s22  ;;  %11388 = vst [vmem:[#allocation39_spill] sm:$0xff] %v10295_v2 }
0x2a0c   :  { %11389 = vst [vmem:[#allocation40_spill] sm:$0xff] %v10298_v63 }
0x2a18   :  { %v4010_v56 = vpop.f32.mrf.mxu1 }
0x2a1a   :  { %v4012_v6 = vpop.f32.mrf.mxu1 }
0x2a7b   :  { %v4019_v58 = vpop.permute.xlu1 %4018 }
0x2a7d   :  { %v4021_v19 = vpop.permute.xlu0 %4020 }
0x2a7e   :  { %v4022_v59 = vsel %vm3534_vm5, %v4019_v58, %v4021_v19  ;;  %v4026_v46 = vmul.f32 %v4021_v19, %v4012_v6 }
0x2a7f   :  { %v4025_v3 = vmul.f32 %v4022_v59, %v4010_v56  ;;  %v3943_v56 = vadd.f32 %v10298_v63, %v3930_v1 }
0x2a80   :  { %v4039_v58 = vadd.f32 %v10295_v2, %v4026_v46 }
0x2a81   :  { %v4038_v39 = vadd.f32 %v10290_v61, %v4025_v3 }
0x2a83   :  { %v4040_v37 = vadd.f32 %v4038_v39, %v3942_v32  ;;  %v11391_v39 = vmov 0.0  }
0x2a85   :  { %v7821_v54 = vmul.f32 -1.442695, %v4040_v37 }
0x2a87   :  { %8749 = vpow2.f32 %v7821_v54 }
0x2a94   :  { %v8750_v55 = vpop.eup %8749 }
0x2a95   :  { %v4044_v41 = vadd.f32 1.0, %v8750_v55 }
0x2a97   :  { %8751 = vrcp.f32 %v4044_v41 }
0x2aa4   :  { %v8752_v57 = vpop.eup %8751 }
0x2aa5   :  { %v4047_v59 = vmul.f32 %v8752_v57, %v4039_v58  ;;  %v4050_v6 = vsub.f32 1.0, %v8752_v57 }
0x2aa7   :  { %v4048_v3 = vadd.f32 %v4047_v59, %v3943_v56 }
0x2aa9   :  { %8753 = vtanh.f32 %v4048_v3 }
0x2ab6   :  { %v8754_v32 = vpop.eup %8753 }
0x2ab7   :  { %4052 = vrot.lane.b32.xlu1 %v8754_v32, %s9313_s22 }
0x2abb   :  { %4056 = vrot.lane.b32.xlu1 %v10067_v35, %s9313_s22 }
0x2b29   :  { %v4053_v4 = vpop.permute.xlu1 %4052 }
0x2b2a   :  { %v4055_v38 = vmul.f32 %v4053_v4, %v4050_v6 }
0x2b2d   :  { %v4057_v11 = vpop.permute.xlu1 %4056 }
0x2b2e   :  { %v4059_v17 = vmul.f32 %v8752_v57, %v4057_v11 }
0x2b30   :  { %v10305_v19 = vadd.f32 %v4059_v17, %v4055_v38 }
0x2b32   :  { %11390 = vst [vmem:[#allocation41_spill] sm:$0xff] %v10305_v19  ;;  %4064 = vrot.lane.b32.xlu0 %v10305_v19, %s9313_s22 }
0x2ba4   :  { %v10309_v1 = vpop.permute.xlu0 %4064 }
0x2ba5   :  { %8391 = vmatmul.mubr.msk.f32.vlgmr.msra.gmra.mxu0 %vm3534_vm5, %v10309_v1 }
0x2ba6   :  { %4340 = vmatpush1.msra.mxu0 %v10159_v36  ;;  %4373 = vmatprep.mubr.f32.mxu0 %v11391_v39 }
0x2ba7   :  { %4478 = vmatprep.subr.mxu0 %v10176_v10 }
0x2c65   :  { %v4134_v35 = vpop.f32.mrf.mxu0 }
0x2c66   :  { %v4142_v37 = vmul.f32 %v4134_v35, %v10094_v44  ;;  %v4138_v54 = vmul.f32 %v4134_v35, %v10092_v40  ;;  %v4146_v46 = vmul.f32 %v4134_v35, %v10096_v51  ;;  %v4150_v58 = vmul.f32 %v4134_v35, %v10108_v15 }
0x2c67   :  { %v8392_v55 = vpop.f32.mrf.mxu0  ;;  %v4154_v59 = vmul.f32 %v4134_v35, %v10099_v20  ;;  %v4158_v3 = vmul.f32 %v4134_v35, %v10117_v49  ;;  %v4162_v6 = vmul.f32 %v4134_v35, %v10111_v21  ;;  %v4166_v11 = vmul.f32 %v4134_v35, %v10123_v47 }
0x2c68   :  { %v4143_v41 = vsel %vm3609_vm6, %v4142_v37, 0.0  ;;  %v4139_v12 = vsel %vm3609_vm6, %v4138_v54, 0.0  ;;  %v4147_v57 = vsel %vm3609_vm6, %v4146_v46, 0.0  ;;  %v4151_v56 = vsel %vm3609_vm6, %v4150_v58, 0.0 }
0x2c69   :  { %4144 = vadd.xlane.f32.xlu0 %v4143_v41  ;;  %4140 = vadd.xlane.f32.xlu1 %v4139_v12  ;;  %v4155_v32 = vsel %vm3609_vm6, %v4154_v59, 0.0  ;;  %v4159_v4 = vsel %vm3609_vm6, %v4158_v3, 0.0  ;;  %v4163_v38 = vsel %vm3609_vm6, %v4162_v6, 0.0  ;;  %v4167_v17 = vsel %vm3609_vm6, %v4166_v11, 0.0 }
0x2c6d   :  { %4148 = vadd.xlane.f32.xlu0 %v4147_v57  ;;  %4152 = vadd.xlane.f32.xlu1 %v4151_v56 }
0x2c71   :  { %4156 = vadd.xlane.f32.xlu0 %v4155_v32  ;;  %4160 = vadd.xlane.f32.xlu1 %v4159_v4 }
0x2c75   :  { %4164 = vadd.xlane.f32.xlu0 %v4163_v38  ;;  %4168 = vadd.xlane.f32.xlu1 %v4167_v17 }
0x2cf2   :  { %v4145_v37 = vpop.xlane.xlu0 %4144  ;;  %v4141_v54 = vpop.xlane.xlu1 %4140 }
0x2cf3   :  { %v4170_v55 = vmax.f32 %v4141_v54, %v4145_v37 }
0x2cf6   :  { %v4149_v41 = vpop.xlane.xlu0 %4148  ;;  %v4153_v12 = vpop.xlane.xlu1 %4152 }
0x2cf7   :  { %v4171_v46 = vmax.f32 %v4170_v55, %v4149_v41 }
0x2cf9   :  { %v4172_v58 = vmax.f32 %v4171_v46, %v4153_v12 }
0x2cfa   :  { %v4157_v57 = vpop.xlane.xlu0 %4156  ;;  %v4161_v56 = vpop.xlane.xlu1 %4160 }
0x2cfb   :  { %v4173_v59 = vmax.f32 %v4172_v58, %v4157_v57 }
0x2cfd   :  { %v4174_v3 = vmax.f32 %v4173_v59, %v4161_v56 }
0x2cfe   :  { %v4165_v35 = vpop.xlane.xlu0 %4164  ;;  %v4169_v4 = vpop.xlane.xlu1 %4168 }
0x2cff   :  { %v4175_v32 = vmax.f32 %v4174_v3, %v4165_v35 }
0x2d01   :  { %v4176_v10 = vmax.f32 %v4175_v32, %v4169_v4 }
0x2d03   :  { %v4177_v6 = vsub.f32 %v4141_v54, %v4176_v10  ;;  %v4180_v36 = vsub.f32 %v4145_v37, %v4176_v10  ;;  %v4183_v11 = vsub.f32 %v4149_v41, %v4176_v10  ;;  %v4186_v38 = vsub.f32 %v4153_v12, %v4176_v10 }
0x2d04   :  { %v4189_v0 = vsub.f32 %v4157_v57, %v4176_v10  ;;  %v4192_v46 = vsub.f32 %v4161_v56, %v4176_v10  ;;  %v4195_v58 = vsub.f32 %v4165_v35, %v4176_v10  ;;  %v4198_v3 = vsub.f32 %v4169_v4, %v4176_v10 }
0x2d05   :  { %v4178_v17 = vmul.f32 1.442695, %v4177_v6  ;;  %v4181_v63 = vmul.f32 1.442695, %v4180_v36  ;;  %v4184_v19 = vmul.f32 1.442695, %v4183_v11 }
0x2d06   :  { %v4187_v55 = vmul.f32 1.442695, %v4186_v38  ;;  %v4190_v2 = vmul.f32 1.442695, %v4189_v0  ;;  %v4193_v59 = vmul.f32 1.442695, %v4192_v46 }
0x2d07   :  { %8755 = vpow2.f32 %v4178_v17  ;;  %v4196_v32 = vmul.f32 1.442695, %v4195_v58  ;;  %v4199_v37 = vmul.f32 1.442695, %v4198_v3 }
0x2d08   :  { %8757 = vpow2.f32 %v4181_v63 }
0x2d09   :  { %8759 = vpow2.f32 %v4184_v19 }
0x2d0a   :  { %8761 = vpow2.f32 %v4187_v55 }
0x2d0b   :  { %8763 = vpow2.f32 %v4190_v2 }
0x2d0c   :  { %8765 = vpow2.f32 %v4193_v59 }
0x2d0d   :  { %8767 = vpow2.f32 %v4196_v32 }
0x2d0e   :  { %8769 = vpow2.f32 %v4199_v37 }
0x2d14   :  { %v8756_v54 = vpop.eup %8755 }
0x2d15   :  { %v8758_v36 = vpop.eup %8757 }
0x2d16   :  { %v4201_v41 = vadd.f32 %v8758_v36, %v8756_v54  ;;  %v8760_v12 = vpop.eup %8759 }
0x2d17   :  { %v8762_v63 = vpop.eup %8761 }
0x2d18   :  { %v4202_v57 = vadd.f32 %v8760_v12, %v4201_v41  ;;  %v8764_v56 = vpop.eup %8763 }
0x2d19   :  { %v8766_v0 = vpop.eup %8765 }
0x2d1a   :  { %v4203_v6 = vadd.f32 %v8762_v63, %v4202_v57  ;;  %v8768_v11 = vpop.eup %8767 }
0x2d1b   :  { %v8770_v10 = vpop.eup %8769 }
0x2d1c   :  { %v4204_v19 = vadd.f32 %v8764_v56, %v4203_v6 }
0x2d1e   :  { %v4205_v35 = vadd.f32 %v8766_v0, %v4204_v19 }
0x2d20   :  { %v4206_v38 = vadd.f32 %v8768_v11, %v4205_v35 }
0x2d22   :  { %v4207_v2 = vadd.f32 %v8770_v10, %v4206_v38 }
0x2d24   :  { %8771 = vrcp.f32 %v4207_v2 }
0x2d31   :  { %v8772_v4 = vpop.eup %8771 }
0x2d32   :  { %v4209_v17 = vmul.f32 %v8772_v4, %v8756_v54  ;;  %v4211_v55 = vmul.f32 %v8772_v4, %v8758_v36  ;;  %v4214_v46 = vmul.f32 %v8772_v4, %v8760_v12  ;;  %v4217_v3 = vmul.f32 %v8772_v4, %v8762_v63 }
0x2d33   :  { %v4220_v41 = vmul.f32 %v8772_v4, %v8764_v56  ;;  %v4223_v19 = vmul.f32 %v8772_v4, %v8766_v0  ;;  %v4226_v2 = vmul.f32 %v8772_v4, %v8768_v11  ;;  %v4229_v12 = vmul.f32 %v8772_v4, %v8770_v10 }
0x2d34   :  { %v4210_v58 = vmul.f32 %v4209_v17, %v10092_v40  ;;  %v4212_v59 = vmul.f32 %v4211_v55, %v10094_v44  ;;  %v4215_v37 = vmul.f32 %v4214_v46, %v10096_v51  ;;  %v4218_v6 = vmul.f32 %v4217_v3, %v10108_v15 }
0x2d35   :  { %v4221_v38 = vmul.f32 %v4220_v41, %v10099_v20  ;;  %v4224_v36 = vmul.f32 %v4223_v19, %v10117_v49  ;;  %v4227_v55 = vmul.f32 %v4226_v2, %v10111_v21 }
0x2d36   :  { %v4213_v32 = vadd.f32 %v4212_v59, %v4210_v58  ;;  %v4230_v58 = vmul.f32 %v4229_v12, %v10123_v47  ;;  %v11393_v12 = vld [vmem:[#allocation39_spill] sm:$0xff] }
0x2d38   :  { %v4216_v57 = vadd.f32 %v4215_v37, %v4213_v32 }
0x2d3a   :  { %v4219_v35 = vadd.f32 %v4218_v6, %v4216_v57 }
0x2d3c   :  { %v4222_v54 = vadd.f32 %v4221_v38, %v4219_v35 }
0x2d3e   :  { %v4225_v17 = vadd.f32 %v4224_v36, %v4222_v54 }
0x2d40   :  { %v4228_v63 = vadd.f32 %v4227_v55, %v4225_v17  ;;  %v11394_v55 = vld [vmem:[#allocation34_spill] sm:$0xff] }
0x2d42   :  { %v4231_v46 = vadd.f32 %v4230_v58, %v4228_v63  ;;  %v11395_v58 = vld [vmem:[#allocation41_spill] sm:$0xff] }
0x2d44   :  { %8398 = vmatmul.mubr.msk.f32.vlgmr.msra.gmra.mxu1 %vm524_vm3, %v4231_v46  ;;  %v4568_v46 = vrot.slane %v11395_v58, 6 }
0x2d45   :  { %8401 = vmatpush3.msra.mxu1 %v10171_v24  ;;  %8402 = vmatprep.mubr.msk.f32.mxu1 %vm9309_vm2, %v11391_v39 }
0x2d46   :  { %8405 = vmatprep.subr.mxu1 %v11391_v39 }
0x2e04   :  { %v4301_v56 = vpop.f32.mrf.mxu1 }
0x2e05   :  { %v4302_v0 = vadd.f32 %v10165_v62, %v4301_v56 }
0x2e06   :  { %v8399_v11 = vpop.f32.mrf.mxu1 }
0x2e07   :  { %8773 = vtanh.f32 %v4302_v0  ;;  %v11396_v11 = vld [vmem:[#allocation40_spill] sm:$0xff] }
0x2e14   :  { %v8774_v10 = vpop.eup %8773 }
0x2e15   :  { %4573 = vst.msk [vmem:[#allocation24 + $0x2] sm:$0x3] %vm4061_vm7, %v8774_v10  ;;  %7824 = vmatmul.mubr.msk.f32.vlgmr.msra.gmra.mxu0 %vm428_vm4, %v8774_v10  ;;  %8403 = vmatmul.mubr.msk.f32.vlgmr.msra.gmra.mxu1 %vm428_vm4, %v8774_v10 }
0x2e16   :  { %4479 = vmatpush1.msra.mxu0 %v10187_v13  ;;  %4526 = vmatprep.mubr.f32.mxu0 %v11391_v39 }
0x2e17   :  { %4480 = vmatprep.subr.mxu0 %v10192_v18  ;;  %8406 = vmatpush3.msra.mxu1 %v10013_v42 }
0x2e18   :  { %4481 = vmatpush1.msra.mxu0 %v10198_v52  ;;  %8407 = vmatprep.subr.mxu1 %v11391_v39 }
0x2e19   :  { %4482 = vmatprep.subr.mxu0 %v10204_v22  ;;  %8408 = vmatpush3.msra.mxu1 %v10020_v8 }
0x2e1a   :  { %4483 = vmatpush1.msra.mxu0 %v10211_v23  ;;  %8409 = vmatprep.subr.mxu1 %v11391_v39 }
0x2e1b   :  { %4484 = vmatprep.subr.mxu0 %v10217_v25  ;;  %8410 = vmatpush3.msra.mxu1 %v10027_v45 }
0x2e1c   :  { %4485 = vmatpush1.msra.mxu0 %v10223_v26  ;;  %8411 = vmatprep.subr.mxu1 %v11391_v39 }
0x2e1d   :  { %4486 = vmatprep.subr.mxu0 %v10229_v27  ;;  %8412 = vmatpush3.msra.mxu1 %v10034_v9 }
0x2e1e   :  { %4487 = vmatpush1.msra.mxu0 %v10235_v28  ;;  %8413 = vmatprep.subr.mxu1 %v11391_v39 }
0x2e1f   :  { %4488 = vmatprep.subr.mxu0 %v10241_v29  ;;  %8414 = vmatpush3.msra.mxu1 %v10041_v50 }
0x2e20   :  { %4489 = vmatpush1.msra.mxu0 %v10247_v30  ;;  %8415 = vmatprep.subr.mxu1 %v11391_v39 }
0x2e21   :  { %4490 = vmatprep.subr.mxu0 %v10253_v5  ;;  %8416 = vmatpush3.msra.mxu1 %v10048_v53 }
0x2e22   :  { %4491 = vmatpush1.msra.mxu0 %v10259_v31  ;;  %8417 = vmatprep.subr.mxu1 %v11391_v39 }
0x2e23   :  { %4492 = vmatprep.subr.mxu0 %v10265_v34  ;;  %8418 = vmatpush3.msra.mxu1 %v10055_v43 }
0x2e24   :  { %4493 = vmatpush1.msra.mxu0 %v10271_v7  ;;  %8419 = vmatprep.subr.mxu1 %v11391_v39 }
0x2e25   :  { %7826 = vmatmul.mubr.msk.f32.vlgmr.msra.gmra.mxu0 %vm3534_vm5, %v10309_v1  ;;  %8420 = vmatpush3.msra.mxu1 %v10062_v33 }
0x2e26   :  { %8421 = vmatprep.mubr.msk.f32.mxu1 %vm9309_vm2, %v11391_v39  ;;  %8424 = vmatprep.subr.mxu0 %v11391_v39 }
0x2e27   :  { %8425 = vmatpush3.msra.mxu0 %v10131_v60  ;;  %8428 = vmatprep.mubr.msk.f32.mxu0 %vm9309_vm2, %v11391_v39 }
0x2e28   :  { %8426 = vmatprep.subr.mxu0 %v11391_v39  ;;  %4851 = vmatprep.subr.mxu1 %v10154_v48 }
0x2e29   :  { %8427 = vmatpush3.msra.mxu0 %v10136_v16  ;;  %v11392_v16 = vld [vmem:[#allocation33_spill] sm:$0xff] }
0x2e2a   :  { %8431 = vmatprep.subr.mxu0 %v11391_v39 }
0x2ed5   :  { %v4375_v42 = vpop.f32.mrf.mxu0  ;;  %v4446_v8 = vpop.f32.mrf.mxu1 }
0x2ed6   :  { %v4533_v45 = vadd.f32 1.0, %v4446_v8  ;;  %v4450_v43 = vadd.f32 1.0, %v4375_v42 }
0x2ed7   :  { %v4377_v9 = vpop.f32.mrf.mxu0  ;;  %v8404_v50 = vpop.f32.mrf.mxu1 }
0x2ed8   :  { %v4451_v53 = vadd.f32 1.0, %v4377_v9  ;;  %4537 = vrot.lane.b32.xlu1 %v4533_v45, %s9313_s22  ;;  %v4454_v33 = vrot.slane %v4450_v43, 6 }
0x2eda   :  { %4535 = vrot.lane.b32.xlu0 %v4451_v53, %s9313_s22  ;;  %v4458_v3 = vmul.f32 %v4454_v33, %v11392_v16  ;;  %v4455_v36 = vrot.slane %v4451_v53, 6 }
0x2edc   :  { %v4460_v41 = vadd.f32 %v4458_v3, %v10288_v14  ;;  %v4459_v63 = vmul.f32 %v4455_v36, %v11394_v55 }
0x2ede   :  { %v4461_v10 = vadd.f32 %v4459_v63, %v11396_v11 }
0x2ee5   :  { %v4528_v4 = vpop.f32.mrf.mxu0 }
0x2ee7   :  { %v4530_v2 = vpop.f32.mrf.mxu0 }
0x2f4a   :  { %v4538_v60 = vpop.permute.xlu1 %4537 }
0x2f4b   :  { %v4543_v54 = vmul.f32 %v4538_v60, %v4530_v2 }
0x2f4c   :  { %v4536_v1 = vpop.permute.xlu0 %4535 }
0x2f4d   :  { %v4539_v59 = vsel %vm3534_vm5, %v4536_v1, %v4538_v60  ;;  %v4545_v17 = vadd.f32 %v4543_v54, %v11393_v12 }
0x2f4e   :  { %v4542_v32 = vmul.f32 %v4539_v59, %v4528_v4  ;;  %v11397_v4 = vld [vmem:[#allocation37_spill] sm:$0xff]  ;;  %v11398_v59 = vld [vmem:[#allocation38_spill] sm:$0xff] }
0x2f4f   :  { %v4557_v56 = vrot.slane %v4545_v17, 6 }
0x2f50   :  { %v4544_v37 = vadd.f32 %v4542_v32, %v10290_v61 }
0x2f52   :  { %v4547_v57 = vrot.slane %v4544_v37, 6 }
0x2f54   :  { %v4549_v6 = vadd.f32 %v4547_v57, %v4460_v41 }
0x2f56   :  { %v7827_v19 = vmul.f32 -1.442695, %v4549_v6 }
0x2f58   :  { %8775 = vpow2.f32 %v7827_v19 }
0x2f65   :  { %v8776_v35 = vpop.eup %8775 }
0x2f66   :  { %v4553_v38 = vadd.f32 1.0, %v8776_v35 }
0x2f68   :  { %8777 = vrcp.f32 %v4553_v38 }
0x2f75   :  { %v8778_v0 = vpop.eup %8777 }
0x2f76   :  { %v4559_v42 = vmul.f32 %v8778_v0, %v4557_v56  ;;  %v4570_v8 = vmul.f32 %v8778_v0, %v4568_v46  ;;  %v4562_v50 = vsub.f32 1.0, %v8778_v0 }
0x2f78   :  { %v4560_v45 = vadd.f32 %v4559_v42, %v4461_v10 }
0x2f7a   :  { %8779 = vtanh.f32 %v4560_v45 }
0x2f87   :  { %v8780_v9 = vpop.eup %8779 }
0x2f88   :  { %4564 = vrot.lane.b32.xlu1 %v8780_v9, %s9313_s22 }
0x2ffa   :  { %v4565_v43 = vpop.permute.xlu1 %4564 }
0x2ffb   :  { %v4567_v53 = vmul.f32 %v4565_v43, %v4562_v50 }
0x2ffd   :  { %v10403_v33 = vadd.f32 %v4570_v8, %v4567_v53 }
0x2fff   :  { %v4575_v60 = vrot.slane %v10403_v33, 2 }
0x3001   :  { %4576 = vrot.lane.b32.xlu0 %v4575_v60, %s9313_s22 }
0x3073   :  { %v10407_v1 = vpop.permute.xlu0 %4576 }
0x3074   :  { %8422 = vmatmul.mubr.msk.f32.vlgmr.msra.gmra.mxu1 %vm3534_vm5, %v10407_v1 }
0x3075   :  { %4852 = vmatpush1.msra.mxu1 %v11397_v4  ;;  %4885 = vmatprep.mubr.f32.mxu1 %v11391_v39 }
0x3076   :  { %4990 = vmatprep.subr.mxu1 %v11398_v59 }
0x3134   :  { %v4646_v3 = vpop.f32.mrf.mxu1 }
0x3135   :  { %v4654_v32 = vmul.f32 %v4646_v3, %v10094_v44  ;;  %v4650_v37 = vmul.f32 %v4646_v3, %v10092_v40  ;;  %v4658_v19 = vmul.f32 %v4646_v3, %v10096_v51  ;;  %v4662_v35 = vmul.f32 %v4646_v3, %v10108_v15 }
0x3136   :  { %v8423_v41 = vpop.f32.mrf.mxu1  ;;  %v4666_v54 = vmul.f32 %v4646_v3, %v10099_v20  ;;  %v4670_v36 = vmul.f32 %v4646_v3, %v10117_v49  ;;  %v4674_v58 = vmul.f32 %v4646_v3, %v10111_v21  ;;  %v4678_v46 = vmul.f32 %v4646_v3, %v10123_v47 }
0x3137   :  { %v4655_v57 = vsel %vm3609_vm6, %v4654_v32, 0.0  ;;  %v4651_v6 = vsel %vm3609_vm6, %v4650_v37, 0.0  ;;  %v4659_v38 = vsel %vm3609_vm6, %v4658_v19, 0.0  ;;  %v4663_v2 = vsel %vm3609_vm6, %v4662_v35, 0.0 }
0x3138   :  { %4656 = vadd.xlane.f32.xlu0 %v4655_v57  ;;  %4652 = vadd.xlane.f32.xlu1 %v4651_v6  ;;  %v4667_v17 = vsel %vm3609_vm6, %v4666_v54, 0.0  ;;  %v4671_v63 = vsel %vm3609_vm6, %v4670_v36, 0.0  ;;  %v4675_v56 = vsel %vm3609_vm6, %v4674_v58, 0.0  ;;  %v4679_v0 = vsel %vm3609_vm6, %v4678_v46, 0.0 }
0x313c   :  { %4660 = vadd.xlane.f32.xlu0 %v4659_v38  ;;  %4664 = vadd.xlane.f32.xlu1 %v4663_v2 }
0x3140   :  { %4668 = vadd.xlane.f32.xlu0 %v4667_v17  ;;  %4672 = vadd.xlane.f32.xlu1 %v4671_v63 }
0x3144   :  { %4676 = vadd.xlane.f32.xlu0 %v4675_v56  ;;  %4680 = vadd.xlane.f32.xlu1 %v4679_v0 }
0x31c1   :  { %v4657_v10 = vpop.xlane.xlu0 %4656  ;;  %v4653_v42 = vpop.xlane.xlu1 %4652 }
0x31c2   :  { %v4682_v8 = vmax.f32 %v4653_v42, %v4657_v10 }
0x31c5   :  { %v4661_v45 = vpop.xlane.xlu0 %4660  ;;  %v4665_v9 = vpop.xlane.xlu1 %4664 }
0x31c6   :  { %v4683_v50 = vmax.f32 %v4682_v8, %v4661_v45 }
0x31c8   :  { %v4684_v43 = vmax.f32 %v4683_v50, %v4665_v9 }
0x31c9   :  { %v4669_v53 = vpop.xlane.xlu0 %4668  ;;  %v4673_v60 = vpop.xlane.xlu1 %4672 }
0x31ca   :  { %v4685_v4 = vmax.f32 %v4684_v43, %v4669_v53 }
0x31cc   :  { %v4686_v59 = vmax.f32 %v4685_v4, %v4673_v60 }
0x31cd   :  { %v4677_v3 = vpop.xlane.xlu0 %4676  ;;  %v4681_v37 = vpop.xlane.xlu1 %4680 }
0x31ce   :  { %v4687_v32 = vmax.f32 %v4686_v59, %v4677_v3 }
0x31d0   :  { %v4688_v41 = vmax.f32 %v4687_v32, %v4681_v37 }
0x31d2   :  { %v4689_v57 = vsub.f32 %v4653_v42, %v4688_v41  ;;  %v4692_v6 = vsub.f32 %v4657_v10, %v4688_v41  ;;  %v4695_v19 = vsub.f32 %v4661_v45, %v4688_v41  ;;  %v4698_v35 = vsub.f32 %v4665_v9, %v4688_v41 }
0x31d3   :  { %v4701_v36 = vsub.f32 %v4669_v53, %v4688_v41  ;;  %v4704_v63 = vsub.f32 %v4673_v60, %v4688_v41  ;;  %v4707_v46 = vsub.f32 %v4677_v3, %v4688_v41  ;;  %v4710_v0 = vsub.f32 %v4681_v37, %v4688_v41 }
0x31d4   :  { %v4690_v38 = vmul.f32 1.442695, %v4689_v57  ;;  %v4693_v2 = vmul.f32 1.442695, %v4692_v6  ;;  %v4696_v54 = vmul.f32 1.442695, %v4695_v19 }
0x31d5   :  { %v4699_v17 = vmul.f32 1.442695, %v4698_v35  ;;  %v4702_v58 = vmul.f32 1.442695, %v4701_v36  ;;  %v4705_v56 = vmul.f32 1.442695, %v4704_v63 }
0x31d6   :  { %8781 = vpow2.f32 %v4690_v38  ;;  %v4708_v8 = vmul.f32 1.442695, %v4707_v46  ;;  %v4711_v10 = vmul.f32 1.442695, %v4710_v0 }
0x31d7   :  { %8783 = vpow2.f32 %v4693_v2 }
0x31d8   :  { %8785 = vpow2.f32 %v4696_v54 }
0x31d9   :  { %8787 = vpow2.f32 %v4699_v17 }
0x31da   :  { %8789 = vpow2.f32 %v4702_v58 }
0x31db   :  { %8791 = vpow2.f32 %v4705_v56 }
0x31dc   :  { %8793 = vpow2.f32 %v4708_v8 }
0x31dd   :  { %8795 = vpow2.f32 %v4711_v10 }
0x31e3   :  { %v8782_v42 = vpop.eup %8781 }
0x31e4   :  { %v8784_v45 = vpop.eup %8783 }
0x31e5   :  { %v4713_v9 = vadd.f32 %v8784_v45, %v8782_v42  ;;  %v8786_v50 = vpop.eup %8785 }
0x31e6   :  { %v8788_v53 = vpop.eup %8787 }
0x31e7   :  { %v4714_v43 = vadd.f32 %v8786_v50, %v4713_v9  ;;  %v8790_v60 = vpop.eup %8789 }
0x31e8   :  { %v8792_v32 = vpop.eup %8791 }
0x31e9   :  { %v4715_v4 = vadd.f32 %v8788_v53, %v4714_v43  ;;  %v8794_v57 = vpop.eup %8793 }
0x31ea   :  { %v8796_v37 = vpop.eup %8795 }
0x31eb   :  { %v4716_v59 = vadd.f32 %v8790_v60, %v4715_v4 }
0x31ed   :  { %v4717_v3 = vadd.f32 %v8792_v32, %v4716_v59 }
0x31ef   :  { %v4718_v6 = vadd.f32 %v8794_v57, %v4717_v3 }
0x31f1   :  { %v4719_v41 = vadd.f32 %v8796_v37, %v4718_v6 }
0x31f3   :  { %8797 = vrcp.f32 %v4719_v41 }
0x3200   :  { %v8798_v19 = vpop.eup %8797 }
0x3201   :  { %v4721_v35 = vmul.f32 %v8798_v19, %v8782_v42  ;;  %v4723_v38 = vmul.f32 %v8798_v19, %v8784_v45  ;;  %v4726_v2 = vmul.f32 %v8798_v19, %v8786_v50  ;;  %v4729_v17 = vmul.f32 %v8798_v19, %v8788_v53 }
0x3202   :  { %v4732_v46 = vmul.f32 %v8798_v19, %v8790_v60  ;;  %v4735_v8 = vmul.f32 %v8798_v19, %v8792_v32  ;;  %v4738_v43 = vmul.f32 %v8798_v19, %v8794_v57  ;;  %v4741_v50 = vmul.f32 %v8798_v19, %v8796_v37 }
0x3203   :  { %v4722_v54 = vmul.f32 %v4721_v35, %v10092_v40  ;;  %v4724_v36 = vmul.f32 %v4723_v38, %v10094_v44  ;;  %v4727_v58 = vmul.f32 %v4726_v2, %v10096_v51  ;;  %v4730_v0 = vmul.f32 %v4729_v17, %v10108_v15 }
0x3204   :  { %v4733_v9 = vmul.f32 %v4732_v46, %v10099_v20  ;;  %v4736_v45 = vmul.f32 %v4735_v8, %v10117_v49  ;;  %v4739_v59 = vmul.f32 %v4738_v43, %v10111_v21  ;;  %v4742_v3 = vmul.f32 %v4741_v50, %v10123_v47 }
0x3205   :  { %v4725_v63 = vadd.f32 %v4724_v36, %v4722_v54 }
0x3207   :  { %v4728_v56 = vadd.f32 %v4727_v58, %v4725_v63 }
0x3209   :  { %v4731_v10 = vadd.f32 %v4730_v0, %v4728_v56 }
0x320b   :  { %v4734_v42 = vadd.f32 %v4733_v9, %v4731_v10 }
0x320d   :  { %v4737_v4 = vadd.f32 %v4736_v45, %v4734_v42  ;;  %v5080_v42 = vrot.slane %v10403_v33, 6 }
0x320f   :  { %v4740_v53 = vadd.f32 %v4739_v59, %v4737_v4 }
0x3211   :  { %v4743_v6 = vadd.f32 %v4742_v3, %v4740_v53 }
0x3213   :  { %8429 = vmatmul.mubr.msk.f32.vlgmr.msra.gmra.mxu0 %vm524_vm3, %v4743_v6 }
0x3214   :  { %8432 = vmatpush3.msra.mxu0 %v10171_v24  ;;  %8433 = vmatprep.mubr.msk.f32.mxu0 %vm9309_vm2, %v11391_v39  ;;  %v10453_v24 = vld [vmem:[%s11323_s20 + $0x38] sm:$0xff] }
0x3215   :  { %8436 = vmatprep.subr.mxu0 %v11391_v39 }
0x32d3   :  { %v4813_v60 = vpop.f32.mrf.mxu0 }
0x32d4   :  { %v4814_v32 = vadd.f32 %v10165_v62, %v4813_v60  ;;  %v10462_v62 = vld [vmem:[%s11323_s20 + $0x30] sm:$0xff] }
0x32d5   :  { %v8430_v57 = vpop.f32.mrf.mxu0 }
0x32d6   :  { %8799 = vtanh.f32 %v4814_v32 }
0x32e3   :  { %v8800_v37 = vpop.eup %8799 }
0x32e4   :  { %5085 = vst.msk [vmem:[#allocation24 + $0x4] sm:$0x3] %vm4061_vm7, %v8800_v37  ;;  %7830 = vmatmul.mubr.msk.f32.vlgmr.msra.gmra.mxu1 %vm428_vm4, %v8800_v37  ;;  %8434 = vmatmul.mubr.msk.f32.vlgmr.msra.gmra.mxu0 %vm428_vm4, %v8800_v37 }
0x32e5   :  { %4991 = vmatpush1.msra.mxu1 %v10187_v13  ;;  %5038 = vmatprep.mubr.f32.mxu1 %v11391_v39  ;;  %v10471_v13 = vld [vmem:[%s11323_s20 + $0x28] sm:$0xff] }
0x32e6   :  { %4992 = vmatprep.subr.mxu1 %v10192_v18  ;;  %8437 = vmatpush3.msra.mxu0 %v10453_v24  ;;  %v10480_v18 = vld [vmem:[%s11323_s20 + $0x20] sm:$0xff] }
0x32e7   :  { %4993 = vmatpush1.msra.mxu1 %v10198_v52  ;;  %8438 = vmatprep.subr.mxu0 %v11391_v39  ;;  %v10489_v52 = vld [vmem:[%s11323_s20 + $0x18] sm:$0xff] }
0x32e8   :  { %4994 = vmatprep.subr.mxu1 %v10204_v22  ;;  %8439 = vmatpush3.msra.mxu0 %v10462_v62  ;;  %v10498_v22 = vld [vmem:[%s11323_s20 + $0x10] sm:$0xff] }
0x32e9   :  { %4995 = vmatpush1.msra.mxu1 %v10211_v23  ;;  %8440 = vmatprep.subr.mxu0 %v11391_v39  ;;  %v10507_v23 = vld [vmem:[%s11323_s20 + $0x8] sm:$0xff] }
0x32ea   :  { %4996 = vmatprep.subr.mxu1 %v10217_v25  ;;  %8441 = vmatpush3.msra.mxu0 %v10471_v13  ;;  %v10517_v25 = vld [vmem:[%s11323_s20] sm:$0xff] }
0x32eb   :  { %4997 = vmatpush1.msra.mxu1 %v10223_v26  ;;  %8442 = vmatprep.subr.mxu0 %v11391_v39  ;;  %v10526_v26 = vld [vmem:[%s11324_s21 + $0x8] sm:$0xff] }
0x32ec   :  { %4998 = vmatprep.subr.mxu1 %v10229_v27  ;;  %8443 = vmatpush3.msra.mxu0 %v10480_v18  ;;  %v10536_v27 = vld [vmem:[%s11324_s21] sm:$0xff] }
0x32ed   :  { %4999 = vmatpush1.msra.mxu1 %v10235_v28  ;;  %8444 = vmatprep.subr.mxu0 %v11391_v39  ;;  %11399 = vst [vmem:[#allocation33_spill] sm:$0xff] %v10536_v27 }
0x32ee   :  { %5000 = vmatprep.subr.mxu1 %v10241_v29  ;;  %8445 = vmatpush3.msra.mxu0 %v10489_v52 }
0x32ef   :  { %5001 = vmatpush1.msra.mxu1 %v10247_v30  ;;  %8446 = vmatprep.subr.mxu0 %v11391_v39 }
0x32f0   :  { %5002 = vmatprep.subr.mxu1 %v10253_v5  ;;  %8447 = vmatpush3.msra.mxu0 %v10498_v22 }
0x32f1   :  { %5003 = vmatpush1.msra.mxu1 %v10259_v31  ;;  %8448 = vmatprep.subr.mxu0 %v11391_v39 }
0x32f2   :  { %5004 = vmatprep.subr.mxu1 %v10265_v34  ;;  %8449 = vmatpush3.msra.mxu0 %v10507_v23 }
0x32f3   :  { %5005 = vmatpush1.msra.mxu1 %v10271_v7  ;;  %8450 = vmatprep.subr.mxu0 %v11391_v39 }
0x32f4   :  { %7832 = vmatmul.mubr.msk.f32.vlgmr.msra.gmra.mxu1 %vm3534_vm5, %v10407_v1  ;;  %8451 = vmatpush3.msra.mxu0 %v10517_v25 }
0x32f5   :  { %8452 = vmatprep.mubr.msk.f32.mxu0 %vm9309_vm2, %v11391_v39  ;;  %8455 = vmatprep.subr.mxu1 %v11391_v39 }
0x32f6   :  { %8456 = vmatpush3.msra.mxu1 %v10526_v26  ;;  %8459 = vmatprep.mubr.msk.f32.mxu1 %vm9309_vm2, %v11391_v39 }
0x32f7   :  { %8457 = vmatprep.subr.mxu1 %v11391_v39  ;;  %5363 = vmatprep.subr.mxu0 %v10154_v48 }
0x32f8   :  { %8458 = vmatpush3.msra.mxu1 %v10536_v27 }
0x32f9   :  { %8462 = vmatprep.subr.mxu1 %v11391_v39 }
0x33a4   :  { %v4887_v28 = vpop.f32.mrf.mxu1  ;;  %v4958_v29 = vpop.f32.mrf.mxu0 }
0x33a5   :  { %v5045_v30 = vadd.f32 1.0, %v4958_v29  ;;  %v4962_v48 = vadd.f32 1.0, %v4887_v28  ;;  %v10562_v29 = vld [vmem:[%s11326_s23] sm:$0xff] }
0x33a6   :  { %v4889_v5 = vpop.f32.mrf.mxu1  ;;  %v8435_v31 = vpop.f32.mrf.mxu0  ;;  %11400 = vst [vmem:[#allocation39_spill] sm:$0xff] %v10562_v29 }
0x33a7   :  { %v4963_v34 = vadd.f32 1.0, %v4889_v5  ;;  %5049 = vrot.lane.b32.xlu1 %v5045_v30, %s9313_s22  ;;  %v4966_v7 = vrot.slane %v4962_v48, 4  ;;  %v10569_v30 = vld [vmem:[%s11320_s17 + $0x78] sm:$0xff] }
0x33a8   :  { %11401 = vst [vmem:[#allocation34_spill] sm:$0xff] %v10569_v30 }
0x33a9   :  { %5047 = vrot.lane.b32.xlu0 %v4963_v34, %s9313_s22  ;;  %v4970_v38 = vmul.f32 %v4966_v7, %v11392_v16  ;;  %v4967_v10 = vrot.slane %v4963_v34, 4 }
0x33ab   :  { %v4972_v36 = vadd.f32 %v4970_v38, %v10288_v14  ;;  %v4971_v43 = vmul.f32 %v4967_v10, %v11394_v55 }
0x33ad   :  { %v4973_v4 = vadd.f32 %v4971_v43, %v11396_v11 }
0x33b4   :  { %v5040_v19 = vpop.f32.mrf.mxu1 }
0x33b6   :  { %v5042_v0 = vpop.f32.mrf.mxu1 }
0x3419   :  { %v5050_v1 = vpop.permute.xlu1 %5049 }
0x341a   :  { %v5055_v8 = vmul.f32 %v5050_v1, %v5042_v0 }
0x341b   :  { %v5048_v41 = vpop.permute.xlu0 %5047 }
0x341c   :  { %v5051_v35 = vsel %vm3534_vm5, %v5048_v41, %v5050_v1  ;;  %v5057_v9 = vadd.f32 %v5055_v8, %v11393_v12 }
0x341d   :  { %v5054_v2 = vmul.f32 %v5051_v35, %v5040_v19 }
0x341e   :  { %v5069_v45 = vrot.slane %v5057_v9, 4 }
0x341f   :  { %v5056_v54 = vadd.f32 %v5054_v2, %v10290_v61 }
0x3421   :  { %v5059_v17 = vrot.slane %v5056_v54, 4 }
0x3423   :  { %v5061_v63 = vadd.f32 %v5059_v17, %v4972_v36 }
0x3425   :  { %v7833_v58 = vmul.f32 -1.442695, %v5061_v63 }
0x3427   :  { %8801 = vpow2.f32 %v7833_v58 }
0x3434   :  { %v8802_v46 = vpop.eup %8801 }
0x3435   :  { %v5065_v56 = vadd.f32 1.0, %v8802_v46 }
0x3437   :  { %8803 = vrcp.f32 %v5065_v56 }
0x3444   :  { %v8804_v50 = vpop.eup %8803 }
0x3445   :  { %v5071_v59 = vmul.f32 %v8804_v50, %v5069_v45  ;;  %v5082_v53 = vmul.f32 %v8804_v50, %v5080_v42  ;;  %v5074_v60 = vsub.f32 1.0, %v8804_v50 }
0x3447   :  { %v5072_v3 = vadd.f32 %v5071_v59, %v4973_v4 }
0x3449   :  { %8805 = vtanh.f32 %v5072_v3 }
0x3456   :  { %v8806_v6 = vpop.eup %8805 }
0x3457   :  { %5076 = vrot.lane.b32.xlu1 %v8806_v6, %s9313_s22 }
0x34c9   :  { %v5077_v32 = vpop.permute.xlu1 %5076 }
0x34ca   :  { %v5079_v57 = vmul.f32 %v5077_v32, %v5074_v60 }
0x34cc   :  { %v10551_v37 = vadd.f32 %v5082_v53, %v5079_v57 }
0x34ce   :  { %v5087_v28 = vrot.slane %v10551_v37, 4 }
0x34d0   :  { %5088 = vrot.lane.b32.xlu0 %v5087_v28, %s9313_s22 }
0x3542   :  { %v10555_v33 = vpop.permute.xlu0 %5088 }
0x3543   :  { %8453 = vmatmul.mubr.msk.f32.vlgmr.msra.gmra.mxu0 %vm3534_vm5, %v10555_v33 }
0x3544   :  { %5364 = vmatpush1.msra.mxu0 %v10562_v29  ;;  %5397 = vmatprep.mubr.f32.mxu0 %v11391_v39 }
0x3545   :  { %5502 = vmatprep.subr.mxu0 %v10569_v30 }
0x3603   :  { %v5158_v5 = vpop.f32.mrf.mxu0 }
0x3604   :  { %v5166_v31 = vmul.f32 %v5158_v5, %v10094_v44  ;;  %v5162_v34 = vmul.f32 %v5158_v5, %v10092_v40  ;;  %v5170_v41 = vmul.f32 %v5158_v5, %v10096_v51  ;;  %v5174_v19 = vmul.f32 %v5158_v5, %v10108_v15 }
0x3605   :  { %v8454_v48 = vpop.f32.mrf.mxu0  ;;  %v5178_v2 = vmul.f32 %v5158_v5, %v10099_v20  ;;  %v5182_v54 = vmul.f32 %v5158_v5, %v10117_v49  ;;  %v5186_v63 = vmul.f32 %v5158_v5, %v10111_v21  ;;  %v5190_v58 = vmul.f32 %v5158_v5, %v10123_v47 }
0x3606   :  { %v5167_v7 = vsel %vm3609_vm6, %v5166_v31, 0.0  ;;  %v5163_v1 = vsel %vm3609_vm6, %v5162_v34, 0.0  ;;  %v5171_v35 = vsel %vm3609_vm6, %v5170_v41, 0.0  ;;  %v5175_v38 = vsel %vm3609_vm6, %v5174_v19, 0.0 }
0x3607   :  { %5168 = vadd.xlane.f32.xlu0 %v5167_v7  ;;  %5164 = vadd.xlane.f32.xlu1 %v5163_v1  ;;  %v5179_v36 = vsel %vm3609_vm6, %v5178_v2, 0.0  ;;  %v5183_v17 = vsel %vm3609_vm6, %v5182_v54, 0.0  ;;  %v5187_v46 = vsel %vm3609_vm6, %v5186_v63, 0.0  ;;  %v5191_v56 = vsel %vm3609_vm6, %v5190_v58, 0.0 }
0x360b   :  { %5172 = vadd.xlane.f32.xlu0 %v5171_v35  ;;  %5176 = vadd.xlane.f32.xlu1 %v5175_v38 }
0x360f   :  { %5180 = vadd.xlane.f32.xlu0 %v5179_v36  ;;  %5184 = vadd.xlane.f32.xlu1 %v5183_v17 }
0x3613   :  { %5188 = vadd.xlane.f32.xlu0 %v5187_v46  ;;  %5192 = vadd.xlane.f32.xlu1 %v5191_v56 }
0x3690   :  { %v5169_v0 = vpop.xlane.xlu0 %5168  ;;  %v5165_v8 = vpop.xlane.xlu1 %5164 }
0x3691   :  { %v5194_v10 = vmax.f32 %v5165_v8, %v5169_v0 }
0x3694   :  { %v5173_v9 = vpop.xlane.xlu0 %5172  ;;  %v5177_v43 = vpop.xlane.xlu1 %5176 }
0x3695   :  { %v5195_v42 = vmax.f32 %v5194_v10, %v5173_v9 }
0x3697   :  { %v5196_v45 = vmax.f32 %v5195_v42, %v5177_v43 }
0x3698   :  { %v5181_v50 = vpop.xlane.xlu0 %5180  ;;  %v5185_v4 = vpop.xlane.xlu1 %5184 }
0x3699   :  { %v5197_v59 = vmax.f32 %v5196_v45, %v5181_v50 }
0x369b   :  { %v5198_v53 = vmax.f32 %v5197_v59, %v5185_v4 }
0x369c   :  { %v5189_v3 = vpop.xlane.xlu0 %5188  ;;  %v5193_v60 = vpop.xlane.xlu1 %5192 }
0x369d   :  { %v5199_v6 = vmax.f32 %v5198_v53, %v5189_v3 }
0x369f   :  { %v5200_v32 = vmax.f32 %v5199_v6, %v5193_v60 }
0x36a1   :  { %v5201_v57 = vsub.f32 %v5165_v8, %v5200_v32  ;;  %v5204_v28 = vsub.f32 %v5169_v0, %v5200_v32  ;;  %v5207_v5 = vsub.f32 %v5173_v9, %v5200_v32  ;;  %v5210_v31 = vsub.f32 %v5177_v43, %v5200_v32 }
0x36a2   :  { %v5213_v1 = vsub.f32 %v5181_v50, %v5200_v32  ;;  %v5216_v19 = vsub.f32 %v5185_v4, %v5200_v32  ;;  %v5219_v38 = vsub.f32 %v5189_v3, %v5200_v32  ;;  %v5222_v54 = vsub.f32 %v5193_v60, %v5200_v32 }
0x36a3   :  { %v5202_v34 = vmul.f32 1.442695, %v5201_v57  ;;  %v5205_v48 = vmul.f32 1.442695, %v5204_v28  ;;  %v5208_v7 = vmul.f32 1.442695, %v5207_v5 }
0x36a4   :  { %v5211_v41 = vmul.f32 1.442695, %v5210_v31  ;;  %v5214_v35 = vmul.f32 1.442695, %v5213_v1  ;;  %v5217_v2 = vmul.f32 1.442695, %v5216_v19 }
0x36a5   :  { %8807 = vpow2.f32 %v5202_v34  ;;  %v5220_v36 = vmul.f32 1.442695, %v5219_v38  ;;  %v5223_v17 = vmul.f32 1.442695, %v5222_v54 }
0x36a6   :  { %8809 = vpow2.f32 %v5205_v48 }
0x36a7   :  { %8811 = vpow2.f32 %v5208_v7 }
0x36a8   :  { %8813 = vpow2.f32 %v5211_v41 }
0x36a9   :  { %8815 = vpow2.f32 %v5214_v35 }
0x36aa   :  { %8817 = vpow2.f32 %v5217_v2 }
0x36ab   :  { %8819 = vpow2.f32 %v5220_v36 }
0x36ac   :  { %8821 = vpow2.f32 %v5223_v17 }
0x36b2   :  { %v8808_v63 = vpop.eup %8807 }
0x36b3   :  { %v8810_v58 = vpop.eup %8809 }
0x36b4   :  { %v5225_v46 = vadd.f32 %v8810_v58, %v8808_v63  ;;  %v8812_v56 = vpop.eup %8811 }
0x36b5   :  { %v8814_v8 = vpop.eup %8813 }
0x36b6   :  { %v5226_v0 = vadd.f32 %v8812_v56, %v5225_v46  ;;  %v8816_v9 = vpop.eup %8815 }
0x36b7   :  { %v8818_v42 = vpop.eup %8817 }
0x36b8   :  { %v5227_v10 = vadd.f32 %v8814_v8, %v5226_v0  ;;  %v8820_v50 = vpop.eup %8819  ;;  %v10600_v0 = vld [vmem:[%s11326_s23 + $0x10] sm:$0xff] }
0x36b9   :  { %v8822_v59 = vpop.eup %8821 }
0x36ba   :  { %v5228_v43 = vadd.f32 %v8816_v9, %v5227_v10  ;;  %v10606_v10 = vld [vmem:[#allocation23] ss:$0 sm:$0xff] }
0x36bc   :  { %v5229_v45 = vadd.f32 %v8818_v42, %v5228_v43 }
0x36be   :  { %v5230_v4 = vadd.f32 %v8820_v50, %v5229_v45  ;;  %v10615_v45 = vld [vmem:[%s11320_s17 + $0x70] sm:$0xff] }
0x36c0   :  { %v5231_v53 = vadd.f32 %v8822_v59, %v5230_v4  ;;  %v10629_v4 = vld [vmem:[%s11320_s17 + $0x60] sm:$0xff] }
0x36c2   :  { %8823 = vrcp.f32 %v5231_v53  ;;  %v10643_v53 = vld [vmem:[%s11320_s17 + $0x50] sm:$0xff] }
0x36cf   :  { %v8824_v3 = vpop.eup %8823 }
0x36d0   :  { %v5233_v6 = vmul.f32 %v8824_v3, %v8808_v63  ;;  %v5235_v60 = vmul.f32 %v8824_v3, %v8810_v58  ;;  %v5238_v32 = vmul.f32 %v8824_v3, %v8812_v56  ;;  %v5241_v5 = vmul.f32 %v8824_v3, %v8814_v8 }
0x36d1   :  { %v5244_v48 = vmul.f32 %v8824_v3, %v8816_v9  ;;  %v5247_v41 = vmul.f32 %v8824_v3, %v8818_v42  ;;  %v5250_v38 = vmul.f32 %v8824_v3, %v8820_v50  ;;  %v5253_v36 = vmul.f32 %v8824_v3, %v8822_v59  ;;  %v10622_v50 = vld [vmem:[%s11320_s17 + $0x68] sm:$0xff]  ;;  %v10636_v59 = vld [vmem:[%s11320_s17 + $0x58] sm:$0xff] }
0x36d2   :  { %v5234_v57 = vmul.f32 %v5233_v6, %v10092_v40  ;;  %v5236_v28 = vmul.f32 %v5235_v60, %v10094_v44  ;;  %v5239_v34 = vmul.f32 %v5238_v32, %v10096_v51  ;;  %v5242_v1 = vmul.f32 %v5241_v5, %v10108_v15  ;;  %v10650_v3 = vld [vmem:[%s11320_s17 + $0x48] sm:$0xff]  ;;  %v10657_v6 = vld [vmem:[%s11320_s17 + $0x40] sm:$0xff]  ;;  %v10664_v60 = vld [vmem:[%s11320_s17 + $0x38] sm:$0xff] }
0x36d3   :  { %v5245_v35 = vmul.f32 %v5244_v48, %v10099_v20  ;;  %v5248_v54 = vmul.f32 %v5247_v41, %v10117_v49  ;;  %v5251_v63 = vmul.f32 %v5250_v38, %v10111_v21  ;;  %v5254_v46 = vmul.f32 %v5253_v36, %v10123_v47  ;;  %v10671_v32 = vld [vmem:[%s11320_s17 + $0x30] sm:$0xff]  ;;  %v10692_v5 = vld [vmem:[%s11320_s17 + $0x18] sm:$0xff]  ;;  %v10713_v48 = vld [vmem:[%s11320_s17] sm:$0xff] }
0x36d4   :  { %v5237_v31 = vadd.f32 %v5236_v28, %v5234_v57  ;;  %v10678_v57 = vld [vmem:[%s11320_s17 + $0x28] sm:$0xff]  ;;  %v10685_v28 = vld [vmem:[%s11320_s17 + $0x20] sm:$0xff] }
0x36d6   :  { %v5240_v7 = vadd.f32 %v5239_v34, %v5237_v31  ;;  %v10699_v31 = vld [vmem:[%s11320_s17 + $0x10] sm:$0xff]  ;;  %v10706_v34 = vld [vmem:[%s11320_s17 + $0x8] sm:$0xff] }
0x36d8   :  { %v5243_v19 = vadd.f32 %v5242_v1, %v5240_v7  ;;  %v10730_v7 = vld [vmem:[%s11326_s23 + $0x8] sm:$0xff] }
0x36da   :  { %v5246_v2 = vadd.f32 %v5245_v35, %v5243_v19 }
0x36dc   :  { %v5249_v17 = vadd.f32 %v5248_v54, %v5246_v2 }
0x36de   :  { %v5252_v58 = vadd.f32 %v5251_v63, %v5249_v17 }
0x36e0   :  { %v5255_v56 = vadd.f32 %v5254_v46, %v5252_v58 }
0x36e2   :  { %8460 = vmatmul.mubr.msk.f32.vlgmr.msra.gmra.mxu1 %vm524_vm3, %v5255_v56 }
0x36e3   :  { %8463 = vmatpush3.msra.mxu1 %v10600_v0  ;;  %8464 = vmatprep.mubr.msk.f32.mxu1 %vm9309_vm2, %v11391_v39 }
0x36e4   :  { %8467 = vmatprep.subr.mxu1 %v11391_v39 }
0x37a2   :  { %v5325_v8 = vpop.f32.mrf.mxu1 }
0x37a3   :  { %v5326_v9 = vadd.f32 %v10606_v10, %v5325_v8 }
0x37a4   :  { %v8461_v43 = vpop.f32.mrf.mxu1 }
0x37a5   :  { %8825 = vtanh.f32 %v5326_v9 }
0x37b2   :  { %v8826_v42 = vpop.eup %8825 }
0x37b3   :  { %5597 = vst.msk [vmem:[#allocation24 + $0x6] sm:$0x3] %vm4061_vm7, %v8826_v42  ;;  %7836 = vmatmul.mubr.msk.f32.vlgmr.msra.gmra.mxu0 %vm428_vm4, %v8826_v42  ;;  %8465 = vmatmul.mubr.msk.f32.vlgmr.msra.gmra.mxu1 %vm428_vm4, %v8826_v42 }
0x37b4   :  { %5503 = vmatpush1.msra.mxu0 %v10615_v45  ;;  %5550 = vmatprep.mubr.f32.mxu0 %v11391_v39 }
0x37b5   :  { %5504 = vmatprep.subr.mxu0 %v10622_v50  ;;  %8468 = vmatpush3.msra.mxu1 %v10453_v24 }
0x37b6   :  { %5505 = vmatpush1.msra.mxu0 %v10629_v4  ;;  %8469 = vmatprep.subr.mxu1 %v11391_v39 }
0x37b7   :  { %5506 = vmatprep.subr.mxu0 %v10636_v59  ;;  %8470 = vmatpush3.msra.mxu1 %v10462_v62 }
0x37b8   :  { %5507 = vmatpush1.msra.mxu0 %v10643_v53  ;;  %8471 = vmatprep.subr.mxu1 %v11391_v39 }
0x37b9   :  { %5508 = vmatprep.subr.mxu0 %v10650_v3  ;;  %8472 = vmatpush3.msra.mxu1 %v10471_v13 }
0x37ba   :  { %5509 = vmatpush1.msra.mxu0 %v10657_v6  ;;  %8473 = vmatprep.subr.mxu1 %v11391_v39 }
0x37bb   :  { %5510 = vmatprep.subr.mxu0 %v10664_v60  ;;  %8474 = vmatpush3.msra.mxu1 %v10480_v18 }
0x37bc   :  { %5511 = vmatpush1.msra.mxu0 %v10671_v32  ;;  %8475 = vmatprep.subr.mxu1 %v11391_v39 }
0x37bd   :  { %5512 = vmatprep.subr.mxu0 %v10678_v57  ;;  %8476 = vmatpush3.msra.mxu1 %v10489_v52 }
0x37be   :  { %5513 = vmatpush1.msra.mxu0 %v10685_v28  ;;  %8477 = vmatprep.subr.mxu1 %v11391_v39 }
0x37bf   :  { %5514 = vmatprep.subr.mxu0 %v10692_v5  ;;  %8478 = vmatpush3.msra.mxu1 %v10498_v22 }
0x37c0   :  { %5515 = vmatpush1.msra.mxu0 %v10699_v31  ;;  %8479 = vmatprep.subr.mxu1 %v11391_v39 }
0x37c1   :  { %5516 = vmatprep.subr.mxu0 %v10706_v34  ;;  %8480 = vmatpush3.msra.mxu1 %v10507_v23 }
0x37c2   :  { %5517 = vmatpush1.msra.mxu0 %v10713_v48  ;;  %8481 = vmatprep.subr.mxu1 %v11391_v39 }
0x37c3   :  { %7838 = vmatmul.mubr.msk.f32.vlgmr.msra.gmra.mxu0 %vm3534_vm5, %v10555_v33  ;;  %8482 = vmatpush3.msra.mxu1 %v10517_v25 }
0x37c4   :  { %8483 = vmatprep.mubr.msk.f32.mxu1 %vm9309_vm2, %v11391_v39  ;;  %8486 = vmatprep.subr.mxu0 %v11391_v39 }
0x37c5   :  { %8487 = vmatpush3.msra.mxu0 %v10526_v26  ;;  %8490 = vmatprep.mubr.msk.f32.mxu0 %vm9309_vm2, %v11391_v39 }
0x37c6   :  { %8488 = vmatprep.subr.mxu0 %v11391_v39  ;;  %5875 = vmatprep.subr.mxu1 %v10730_v7 }
0x37c7   :  { %8489 = vmatpush3.msra.mxu0 %v10536_v27 }
0x37c8   :  { %8493 = vmatprep.subr.mxu0 %v11391_v39 }
0x3873   :  { %v5399_v33 = vpop.f32.mrf.mxu0  ;;  %v5470_v1 = vpop.f32.mrf.mxu1 }
0x3874   :  { %v5557_v41 = vadd.f32 1.0, %v5470_v1  ;;  %v5474_v2 = vadd.f32 1.0, %v5399_v33 }
0x3875   :  { %v5401_v19 = vpop.f32.mrf.mxu0  ;;  %v8466_v35 = vpop.f32.mrf.mxu1 }
0x3876   :  { %v5475_v38 = vadd.f32 1.0, %v5401_v19  ;;  %5561 = vrot.lane.b32.xlu1 %v5557_v41, %s9313_s22  ;;  %v5478_v54 = vrot.slane %v5474_v2, 2 }
0x3878   :  { %5559 = vrot.lane.b32.xlu0 %v5475_v38, %s9313_s22  ;;  %v5482_v46 = vmul.f32 %v5478_v54, %v11392_v16  ;;  %v5479_v2 = vrot.slane %v5475_v38, 2  ;;  %v5592_v16 = vrot.slane %v10551_v37, 6 }
0x387a   :  { %v5484_v9 = vadd.f32 %v5482_v46, %v10288_v14 }
0x3883   :  { %v5552_v63 = vpop.f32.mrf.mxu0 }
0x3885   :  { %v5554_v33 = vpop.f32.mrf.mxu0 }
0x38e8   :  { %v5562_v36 = vpop.permute.xlu1 %5561 }
0x38e9   :  { %v5567_v35 = vmul.f32 %v5562_v36, %v5554_v33 }
0x38ea   :  { %v5560_v17 = vpop.permute.xlu0 %5559 }
0x38eb   :  { %v5563_v58 = vsel %vm3534_vm5, %v5560_v17, %v5562_v36  ;;  %v5569_v27 = vadd.f32 %v5567_v35, %v11393_v12  ;;  %v5483_v17 = vmul.f32 %v5479_v2, %v11394_v55 }
0x38ec   :  { %v5566_v56 = vmul.f32 %v5563_v58, %v5552_v63 }
0x38ed   :  { %v5581_v54 = vrot.slane %v5569_v27, 2  ;;  %v5485_v58 = vadd.f32 %v5483_v17, %v11396_v11 }
0x38ee   :  { %v5568_v8 = vadd.f32 %v5566_v56, %v10290_v61 }
0x38f0   :  { %v5571_v43 = vrot.slane %v5568_v8, 2 }
0x38f2   :  { %v5573_v42 = vadd.f32 %v5571_v43, %v5484_v9 }
0x38f4   :  { %v7839_v1 = vmul.f32 -1.442695, %v5573_v42 }
0x38f6   :  { %8827 = vpow2.f32 %v7839_v1 }
0x3903   :  { %v8828_v41 = vpop.eup %8827 }
0x3904   :  { %v5577_v19 = vadd.f32 1.0, %v8828_v41 }
0x3906   :  { %8829 = vrcp.f32 %v5577_v19 }
0x3913   :  { %v8830_v63 = vpop.eup %8829 }
0x3914   :  { %v5583_v46 = vmul.f32 %v8830_v63, %v5581_v54  ;;  %v5594_v56 = vmul.f32 %v8830_v63, %v5592_v16  ;;  %v5586_v43 = vsub.f32 1.0, %v8830_v63 }
0x3916   :  { %v5584_v8 = vadd.f32 %v5583_v46, %v5485_v58 }
0x3918   :  { %8831 = vtanh.f32 %v5584_v8 }
0x3925   :  { %v8832_v9 = vpop.eup %8831 }
0x3926   :  { %5588 = vrot.lane.b32.xlu1 %v8832_v9, %s9313_s22 }
0x3998   :  { %v5589_v36 = vpop.permute.xlu1 %5588 }
0x3999   :  { %v5591_v38 = vmul.f32 %v5589_v36, %v5586_v43 }
0x399b   :  { %v10746_v42 = vadd.f32 %v5594_v56, %v5591_v38 }
0x399d   :  { %11402 = vst [vmem:[#allocation41_spill] sm:$0xff] %v10746_v42  ;;  %v11353_v55 = vrot.slane %v10746_v42, 6 }
0x399f   :  { %5600 = vrot.lane.b32.xlu0 %v11353_v55, %s9313_s22 }
0x3a11   :  { %v10752_v27 = vpop.permute.xlu0 %5600 }
0x3a12   :  { %8484 = vmatmul.mubr.msk.f32.vlgmr.msra.gmra.mxu1 %vm3534_vm5, %v10752_v27 }
0x3a13   :  { %5876 = vmatpush1.msra.mxu1 %v10562_v29  ;;  %5909 = vmatprep.mubr.f32.mxu1 %v11391_v39 }
0x3a14   :  { %6008 = vmatprep.subr.mxu1 %v10569_v30 }
0x3ad2   :  { %v5670_v37 = vpop.f32.mrf.mxu1 }
0x3ad3   :  { %v5678_v1 = vmul.f32 %v5670_v37, %v10094_v44  ;;  %v5674_v41 = vmul.f32 %v5670_v37, %v10092_v40  ;;  %v5682_v2 = vmul.f32 %v5670_v37, %v10096_v51  ;;  %v5686_v17 = vmul.f32 %v5670_v37, %v10108_v15 }
0x3ad4   :  { %v8485_v19 = vpop.f32.mrf.mxu1  ;;  %v5690_v63 = vmul.f32 %v5670_v37, %v10099_v20  ;;  %v5694_v58 = vmul.f32 %v5670_v37, %v10117_v49  ;;  %v5698_v8 = vmul.f32 %v5670_v37, %v10111_v21  ;;  %v5702_v9 = vmul.f32 %v5670_v37, %v10123_v47 }
0x3ad5   :  { %v5679_v33 = vsel %vm3609_vm6, %v5678_v1, 0.0  ;;  %v5675_v35 = vsel %vm3609_vm6, %v5674_v41, 0.0  ;;  %v5683_v16 = vsel %vm3609_vm6, %v5682_v2, 0.0  ;;  %v5687_v54 = vsel %vm3609_vm6, %v5686_v17, 0.0 }
0x3ad6   :  { %5680 = vadd.xlane.f32.xlu0 %v5679_v33  ;;  %5676 = vadd.xlane.f32.xlu1 %v5675_v35  ;;  %v5691_v46 = vsel %vm3609_vm6, %v5690_v63, 0.0  ;;  %v5695_v56 = vsel %vm3609_vm6, %v5694_v58, 0.0  ;;  %v5699_v43 = vsel %vm3609_vm6, %v5698_v8, 0.0  ;;  %v5703_v36 = vsel %vm3609_vm6, %v5702_v9, 0.0 }
0x3ada   :  { %5684 = vadd.xlane.f32.xlu0 %v5683_v16  ;;  %5688 = vadd.xlane.f32.xlu1 %v5687_v54 }
0x3ade   :  { %5692 = vadd.xlane.f32.xlu0 %v5691_v46  ;;  %5696 = vadd.xlane.f32.xlu1 %v5695_v56 }
0x3ae2   :  { %5700 = vadd.xlane.f32.xlu0 %v5699_v43  ;;  %5704 = vadd.xlane.f32.xlu1 %v5703_v36 }
0x3b5f   :  { %v5681_v38 = vpop.xlane.xlu0 %5680  ;;  %v5677_v1 = vpop.xlane.xlu1 %5676 }
0x3b60   :  { %v5706_v41 = vmax.f32 %v5677_v1, %v5681_v38 }
0x3b63   :  { %v5685_v19 = vpop.xlane.xlu0 %5684  ;;  %v5689_v33 = vpop.xlane.xlu1 %5688 }
0x3b64   :  { %v5707_v35 = vmax.f32 %v5706_v41, %v5685_v19 }
0x3b66   :  { %v5708_v2 = vmax.f32 %v5707_v35, %v5689_v33 }
0x3b67   :  { %v5693_v17 = vpop.xlane.xlu0 %5692  ;;  %v5697_v16 = vpop.xlane.xlu1 %5696 }
0x3b68   :  { %v5709_v54 = vmax.f32 %v5708_v2, %v5693_v17 }
0x3b6a   :  { %v5710_v63 = vmax.f32 %v5709_v54, %v5697_v16 }
0x3b6b   :  { %v5701_v37 = vpop.xlane.xlu0 %5700  ;;  %v5705_v46 = vpop.xlane.xlu1 %5704 }
0x3b6c   :  { %v5711_v58 = vmax.f32 %v5710_v63, %v5701_v37 }
0x3b6e   :  { %v5712_v56 = vmax.f32 %v5711_v58, %v5705_v46 }
0x3b70   :  { %v5713_v8 = vsub.f32 %v5677_v1, %v5712_v56  ;;  %v5716_v55 = vsub.f32 %v5681_v38, %v5712_v56  ;;  %v5719_v9 = vsub.f32 %v5685_v19, %v5712_v56  ;;  %v5722_v43 = vsub.f32 %v5689_v33, %v5712_v56 }
0x3b71   :  { %v5725_v42 = vsub.f32 %v5693_v17, %v5712_v56  ;;  %v5728_v35 = vsub.f32 %v5697_v16, %v5712_v56  ;;  %v5731_v2 = vsub.f32 %v5701_v37, %v5712_v56  ;;  %v5734_v63 = vsub.f32 %v5705_v46, %v5712_v56 }
0x3b72   :  { %v5714_v36 = vmul.f32 1.442695, %v5713_v8  ;;  %v5717_v30 = vmul.f32 1.442695, %v5716_v55  ;;  %v5720_v29 = vmul.f32 1.442695, %v5719_v9 }
0x3b73   :  { %v5723_v41 = vmul.f32 1.442695, %v5722_v43  ;;  %v5726_v11 = vmul.f32 1.442695, %v5725_v42  ;;  %v5729_v54 = vmul.f32 1.442695, %v5728_v35 }
0x3b74   :  { %8833 = vpow2.f32 %v5714_v36  ;;  %v5732_v58 = vmul.f32 1.442695, %v5731_v2  ;;  %v5735_v38 = vmul.f32 1.442695, %v5734_v63 }
0x3b75   :  { %8835 = vpow2.f32 %v5717_v30 }
0x3b76   :  { %8837 = vpow2.f32 %v5720_v29 }
0x3b77   :  { %8839 = vpow2.f32 %v5723_v41 }
0x3b78   :  { %8841 = vpow2.f32 %v5726_v11 }
0x3b79   :  { %8843 = vpow2.f32 %v5729_v54 }
0x3b7a   :  { %8845 = vpow2.f32 %v5732_v58 }
0x3b7b   :  { %8847 = vpow2.f32 %v5735_v38 }
0x3b81   :  { %v8834_v1 = vpop.eup %8833 }
0x3b82   :  { %v8836_v55 = vpop.eup %8835 }
0x3b83   :  { %v5737_v19 = vadd.f32 %v8836_v55, %v8834_v1  ;;  %v8838_v33 = vpop.eup %8837 }
0x3b84   :  { %v8840_v30 = vpop.eup %8839 }
0x3b85   :  { %v5738_v17 = vadd.f32 %v8838_v33, %v5737_v19  ;;  %v8842_v16 = vpop.eup %8841 }
0x3b86   :  { %v8844_v42 = vpop.eup %8843 }
0x3b87   :  { %v5739_v8 = vadd.f32 %v8840_v30, %v5738_v17  ;;  %v8846_v9 = vpop.eup %8845 }
0x3b88   :  { %v8848_v46 = vpop.eup %8847 }
0x3b89   :  { %v5740_v29 = vadd.f32 %v8842_v16, %v5739_v8 }
0x3b8b   :  { %v5741_v37 = vadd.f32 %v8844_v42, %v5740_v29 }
0x3b8d   :  { %v5742_v43 = vadd.f32 %v8846_v9, %v5741_v37 }
0x3b8f   :  { %v5743_v11 = vadd.f32 %v8848_v46, %v5742_v43 }
0x3b91   :  { %8849 = vrcp.f32 %v5743_v11 }
0x3b9e   :  { %v8850_v56 = vpop.eup %8849 }
0x3b9f   :  { %v5745_v36 = vmul.f32 %v8850_v56, %v8834_v1  ;;  %v5747_v41 = vmul.f32 %v8850_v56, %v8836_v55  ;;  %v5750_v35 = vmul.f32 %v8850_v56, %v8838_v33  ;;  %v5753_v63 = vmul.f32 %v8850_v56, %v8840_v30 }
0x3ba0   :  { %v5756_v19 = vmul.f32 %v8850_v56, %v8842_v16  ;;  %v5759_v29 = vmul.f32 %v8850_v56, %v8844_v42  ;;  %v5762_v11 = vmul.f32 %v8850_v56, %v8846_v9  ;;  %v5765_v33 = vmul.f32 %v8850_v56, %v8848_v46 }
0x3ba1   :  { %v5746_v2 = vmul.f32 %v5745_v36, %v10092_v40  ;;  %v5748_v54 = vmul.f32 %v5747_v41, %v10094_v44  ;;  %v5751_v38 = vmul.f32 %v5750_v35, %v10096_v51  ;;  %v5754_v8 = vmul.f32 %v5753_v63, %v10108_v15 }
0x3ba2   :  { %v5757_v43 = vmul.f32 %v5756_v19, %v10099_v20  ;;  %v5760_v55 = vmul.f32 %v5759_v29, %v10117_v49  ;;  %v5763_v41 = vmul.f32 %v5762_v11, %v10111_v21 }
0x3ba3   :  { %v5749_v58 = vadd.f32 %v5748_v54, %v5746_v2  ;;  %v5766_v2 = vmul.f32 %v5765_v33, %v10123_v47 }
0x3ba5   :  { %v5752_v17 = vadd.f32 %v5751_v38, %v5749_v58 }
0x3ba7   :  { %v5755_v37 = vadd.f32 %v5754_v8, %v5752_v17 }
0x3ba9   :  { %v5758_v1 = vadd.f32 %v5757_v43, %v5755_v37 }
0x3bab   :  { %v5761_v36 = vadd.f32 %v5760_v55, %v5758_v1  ;;  %v11405_v55 = vld [vmem:[#allocation36_spill] sm:$0xff] }
0x3bad   :  { %v5764_v30 = vadd.f32 %v5763_v41, %v5761_v36 }
0x3baf   :  { %v5767_v35 = vadd.f32 %v5766_v2, %v5764_v30  ;;  %v11406_v30 = vld [vmem:[#allocation40_spill] sm:$0xff] }
0x3bb1   :  { %8491 = vmatmul.mubr.msk.f32.vlgmr.msra.gmra.mxu0 %vm524_vm3, %v5767_v35 }
0x3bb2   :  { %8494 = vmatpush3.msra.mxu0 %v10600_v0  ;;  %8495 = vmatprep.mubr.msk.f32.mxu0 %vm9309_vm2, %v11391_v39 }
0x3bb3   :  { %8498 = vmatprep.subr.mxu0 %v11391_v39 }
0x3c71   :  { %v5837_v16 = vpop.f32.mrf.mxu0 }
0x3c72   :  { %v5838_v42 = vadd.f32 %v10606_v10, %v5837_v16 }
0x3c73   :  { %v8492_v9 = vpop.f32.mrf.mxu0 }
0x3c74   :  { %8851 = vtanh.f32 %v5838_v42 }
0x3c81   :  { %v8852_v46 = vpop.eup %8851 }
0x3c82   :  { %6097 = vst.msk [vmem:[#allocation24 + $0x8] sm:$0x3] %vm4061_vm7, %v8852_v46  ;;  %7842 = vmatmul.mubr.msk.f32.vlgmr.msra.gmra.mxu1 %vm428_vm4, %v8852_v46  ;;  %8496 = vmatmul.mubr.msk.f32.vlgmr.msra.gmra.mxu0 %vm428_vm4, %v8852_v46 }
0x3c83   :  { %6009 = vmatpush1.msra.mxu1 %v10615_v45  ;;  %6056 = vmatprep.mubr.f32.mxu1 %v11391_v39 }
0x3c84   :  { %6010 = vmatprep.subr.mxu1 %v10622_v50  ;;  %8499 = vmatpush3.msra.mxu0 %v10453_v24  ;;  %v11403_v24 = vld [vmem:[#allocation33_spill] sm:$0xff] }
0x3c85   :  { %6011 = vmatpush1.msra.mxu1 %v10629_v4  ;;  %8500 = vmatprep.subr.mxu0 %v11391_v39 }
0x3c86   :  { %6012 = vmatprep.subr.mxu1 %v10636_v59  ;;  %8501 = vmatpush3.msra.mxu0 %v10462_v62 }
0x3c87   :  { %6013 = vmatpush1.msra.mxu1 %v10643_v53  ;;  %8502 = vmatprep.subr.mxu0 %v11391_v39 }
0x3c88   :  { %6014 = vmatprep.subr.mxu1 %v10650_v3  ;;  %8503 = vmatpush3.msra.mxu0 %v10471_v13 }
0x3c89   :  { %6015 = vmatpush1.msra.mxu1 %v10657_v6  ;;  %8504 = vmatprep.subr.mxu0 %v11391_v39 }
0x3c8a   :  { %6016 = vmatprep.subr.mxu1 %v10664_v60  ;;  %8505 = vmatpush3.msra.mxu0 %v10480_v18 }
0x3c8b   :  { %6017 = vmatpush1.msra.mxu1 %v10671_v32  ;;  %8506 = vmatprep.subr.mxu0 %v11391_v39 }
0x3c8c   :  { %6018 = vmatprep.subr.mxu1 %v10678_v57  ;;  %8507 = vmatpush3.msra.mxu0 %v10489_v52 }
0x3c8d   :  { %6019 = vmatpush1.msra.mxu1 %v10685_v28  ;;  %8508 = vmatprep.subr.mxu0 %v11391_v39 }
0x3c8e   :  { %6020 = vmatprep.subr.mxu1 %v10692_v5  ;;  %8509 = vmatpush3.msra.mxu0 %v10498_v22 }
0x3c8f   :  { %6021 = vmatpush1.msra.mxu1 %v10699_v31  ;;  %8510 = vmatprep.subr.mxu0 %v11391_v39 }
0x3c90   :  { %6022 = vmatprep.subr.mxu1 %v10706_v34  ;;  %8511 = vmatpush3.msra.mxu0 %v10507_v23 }
0x3c91   :  { %6023 = vmatpush1.msra.mxu1 %v10713_v48  ;;  %8512 = vmatprep.subr.mxu0 %v11391_v39 }
0x3c92   :  { %7844 = vmatmul.mubr.msk.f32.vlgmr.msra.gmra.mxu1 %vm3534_vm5, %v10752_v27  ;;  %8513 = vmatpush3.msra.mxu0 %v10517_v25 }
0x3c93   :  { %8514 = vmatprep.mubr.msk.f32.mxu0 %vm9309_vm2, %v11391_v39  ;;  %8517 = vmatprep.subr.mxu1 %v11391_v39 }
0x3c94   :  { %8518 = vmatpush3.msra.mxu1 %v10526_v26  ;;  %8521 = vmatprep.mubr.msk.f32.mxu1 %vm9309_vm2, %v11391_v39  ;;  %v11404_v26 = vld [vmem:[#allocation35_spill] sm:$0xff] }
0x3c95   :  { %8519 = vmatprep.subr.mxu1 %v11391_v39  ;;  %6374 = vmatprep.subr.mxu0 %v10730_v7 }
0x3c96   :  { %8520 = vmatpush3.msra.mxu1 %v11403_v24  ;;  %v11407_v24 = vld [vmem:[#allocation41_spill] sm:$0xff] }
0x3c97   :  { %8524 = vmatprep.subr.mxu1 %v11391_v39 }
0x3d42   :  { %v5911_v62 = vpop.f32.mrf.mxu1  ;;  %v5982_v13 = vpop.f32.mrf.mxu0 }
0x3d43   :  { %v6063_v18 = vadd.f32 1.0, %v5982_v13  ;;  %v5986_v25 = vadd.f32 1.0, %v5911_v62  ;;  %v11408_v62 = vrot.slane %v11407_v24, 6 }
0x3d44   :  { %v5913_v52 = vpop.f32.mrf.mxu1  ;;  %v8497_v22 = vpop.f32.mrf.mxu0 }
0x3d45   :  { %v5987_v23 = vadd.f32 1.0, %v5913_v52  ;;  %6068 = vrot.lane.b32.xlu1 %v6063_v18, %s9313_s22  ;;  %v5988_v27 = vmul.f32 %v5986_v25, %v11404_v26  ;;  %v11410_v25 = vld [vmem:[#allocation34_spill] sm:$0xff] }
0x3d47   :  { %6066 = vrot.lane.b32.xlu0 %v5987_v23, %s9313_s22  ;;  %v5990_v19 = vadd.f32 %v5988_v27, %v10288_v14  ;;  %v5989_v33 = vmul.f32 %v5987_v23, %v11405_v55  ;;  %v11409_v23 = vld [vmem:[#allocation39_spill] sm:$0xff] }
0x3d49   :  { %v5991_v2 = vadd.f32 %v5989_v33, %v11406_v30 }
0x3d52   :  { %v6058_v63 = vpop.f32.mrf.mxu1 }
0x3d54   :  { %v6060_v11 = vpop.f32.mrf.mxu1 }
0x3db7   :  { %v6069_v56 = vpop.permute.xlu1 %6068 }
0x3db8   :  { %v6074_v1 = vmul.f32 %v6069_v56, %v6060_v11 }
0x3db9   :  { %v6067_v54 = vpop.permute.xlu0 %6066 }
0x3dba   :  { %v6070_v58 = vsel %vm3534_vm5, %v6067_v54, %v6069_v56  ;;  %v6076_v36 = vadd.f32 %v6074_v1, %v11393_v12 }
0x3dbb   :  { %v6073_v38 = vmul.f32 %v6070_v58, %v6058_v63 }
0x3dbd   :  { %v6075_v17 = vadd.f32 %v6073_v38, %v10290_v61 }
0x3dbf   :  { %v6077_v8 = vadd.f32 %v6075_v17, %v5990_v19 }
0x3dc1   :  { %v7845_v29 = vmul.f32 -1.442695, %v6077_v8 }
0x3dc3   :  { %8853 = vpow2.f32 %v7845_v29 }
0x3dd0   :  { %v8854_v37 = vpop.eup %8853 }
0x3dd1   :  { %v6081_v43 = vadd.f32 1.0, %v8854_v37 }
0x3dd3   :  { %8855 = vrcp.f32 %v6081_v43 }
0x3de0   :  { %v8856_v41 = vpop.eup %8855 }
0x3de1   :  { %v6084_v35 = vmul.f32 %v8856_v41, %v6076_v36  ;;  %v6087_v9 = vsub.f32 1.0, %v8856_v41  ;;  %v6094_v13 = vmul.f32 %v8856_v41, %v11408_v62 }
0x3de3   :  { %v6085_v16 = vadd.f32 %v6084_v35, %v5991_v2 }
0x3de5   :  { %8857 = vtanh.f32 %v6085_v16 }
0x3df2   :  { %v8858_v42 = vpop.eup %8857 }
0x3df3   :  { %6089 = vrot.lane.b32.xlu1 %v8858_v42, %s9313_s22 }
0x3e65   :  { %v6090_v46 = vpop.permute.xlu1 %6089 }
0x3e66   :  { %v6092_v18 = vmul.f32 %v6090_v46, %v6087_v9 }
0x3e68   :  { %v10847_v52 = vadd.f32 %v6094_v13, %v6092_v18 }
0x3e6a   :  { %6099 = vrot.lane.b32.xlu0 %v10847_v52, %s9313_s22 }
0x3edc   :  { %v10851_v22 = vpop.permute.xlu0 %6099 }
0x3edd   :  { %8515 = vmatmul.mubr.msk.f32.vlgmr.msra.gmra.mxu0 %vm3534_vm5, %v10851_v22 }
0x3ede   :  { %6375 = vmatpush1.msra.mxu0 %v11409_v23  ;;  %6408 = vmatprep.mubr.f32.mxu0 %v11391_v39 }
0x3edf   :  { %6513 = vmatprep.subr.mxu0 %v11410_v25 }
0x3f9d   :  { %v6169_v27 = vpop.f32.mrf.mxu0 }
0x3f9e   :  { %v6177_v56 = vmul.f32 %v6169_v27, %v10094_v44  ;;  %v6173_v54 = vmul.f32 %v6169_v27, %v10092_v40  ;;  %v6181_v19 = vmul.f32 %v6169_v27, %v10096_v51  ;;  %v6185_v17 = vmul.f32 %v6169_v27, %v10108_v15 }
0x3f9f   :  { %v8516_v63 = vpop.f32.mrf.mxu0  ;;  %v6189_v37 = vmul.f32 %v6169_v27, %v10099_v20  ;;  %v6193_v43 = vmul.f32 %v6169_v27, %v10117_v49  ;;  %v6197_v33 = vmul.f32 %v6169_v27, %v10111_v21  ;;  %v6201_v36 = vmul.f32 %v6169_v27, %v10123_v47 }
0x3fa0   :  { %v6178_v58 = vsel %vm3609_vm6, %v6177_v56, 0.0  ;;  %v6174_v38 = vsel %vm3609_vm6, %v6173_v54, 0.0  ;;  %v6182_v8 = vsel %vm3609_vm6, %v6181_v19, 0.0  ;;  %v6186_v29 = vsel %vm3609_vm6, %v6185_v17, 0.0 }
0x3fa1   :  { %6179 = vadd.xlane.f32.xlu0 %v6178_v58  ;;  %6175 = vadd.xlane.f32.xlu1 %v6174_v38  ;;  %v6190_v11 = vsel %vm3609_vm6, %v6189_v37, 0.0  ;;  %v6194_v1 = vsel %vm3609_vm6, %v6193_v43, 0.0  ;;  %v6198_v41 = vsel %vm3609_vm6, %v6197_v33, 0.0  ;;  %v6202_v2 = vsel %vm3609_vm6, %v6201_v36, 0.0 }
0x3fa5   :  { %6183 = vadd.xlane.f32.xlu0 %v6182_v8  ;;  %6187 = vadd.xlane.f32.xlu1 %v6186_v29 }
0x3fa9   :  { %6191 = vadd.xlane.f32.xlu0 %v6190_v11  ;;  %6195 = vadd.xlane.f32.xlu1 %v6194_v1 }
0x3fad   :  { %6199 = vadd.xlane.f32.xlu0 %v6198_v41  ;;  %6203 = vadd.xlane.f32.xlu1 %v6202_v2 }
0x402a   :  { %v6180_v35 = vpop.xlane.xlu0 %6179  ;;  %v6176_v16 = vpop.xlane.xlu1 %6175 }
0x402b   :  { %v6205_v42 = vmax.f32 %v6176_v16, %v6180_v35 }
0x402e   :  { %v6184_v9 = vpop.xlane.xlu0 %6183  ;;  %v6188_v46 = vpop.xlane.xlu1 %6187 }
0x402f   :  { %v6206_v24 = vmax.f32 %v6205_v42, %v6184_v9 }
0x4031   :  { %v6207_v62 = vmax.f32 %v6206_v24, %v6188_v46 }
0x4032   :  { %v6192_v13 = vpop.xlane.xlu0 %6191  ;;  %v6196_v18 = vpop.xlane.xlu1 %6195 }
0x4033   :  { %v6208_v23 = vmax.f32 %v6207_v62, %v6192_v13 }
0x4035   :  { %v6209_v25 = vmax.f32 %v6208_v23, %v6196_v18 }
0x4036   :  { %v6200_v27 = vpop.xlane.xlu0 %6199  ;;  %v6204_v54 = vpop.xlane.xlu1 %6203 }
0x4037   :  { %v6210_v56 = vmax.f32 %v6209_v25, %v6200_v27 }
0x4039   :  { %v6211_v63 = vmax.f32 %v6210_v56, %v6204_v54 }
0x403b   :  { %v6212_v58 = vsub.f32 %v6176_v16, %v6211_v63  ;;  %v6215_v38 = vsub.f32 %v6180_v35, %v6211_v63  ;;  %v6218_v19 = vsub.f32 %v6184_v9, %v6211_v63  ;;  %v6221_v17 = vsub.f32 %v6188_v46, %v6211_v63 }
0x403c   :  { %v6224_v43 = vsub.f32 %v6192_v13, %v6211_v63  ;;  %v6227_v1 = vsub.f32 %v6196_v18, %v6211_v63  ;;  %v6230_v36 = vsub.f32 %v6200_v27, %v6211_v63  ;;  %v6233_v2 = vsub.f32 %v6204_v54, %v6211_v63 }
0x403d   :  { %v6213_v8 = vmul.f32 1.442695, %v6212_v58  ;;  %v6216_v29 = vmul.f32 1.442695, %v6215_v38  ;;  %v6219_v37 = vmul.f32 1.442695, %v6218_v19 }
0x403e   :  { %v6222_v11 = vmul.f32 1.442695, %v6221_v17  ;;  %v6225_v33 = vmul.f32 1.442695, %v6224_v43  ;;  %v6228_v41 = vmul.f32 1.442695, %v6227_v1 }
0x403f   :  { %8859 = vpow2.f32 %v6213_v8  ;;  %v6231_v42 = vmul.f32 1.442695, %v6230_v36  ;;  %v6234_v35 = vmul.f32 1.442695, %v6233_v2 }
0x4040   :  { %8861 = vpow2.f32 %v6216_v29 }
0x4041   :  { %8863 = vpow2.f32 %v6219_v37 }
0x4042   :  { %8865 = vpow2.f32 %v6222_v11 }
0x4043   :  { %8867 = vpow2.f32 %v6225_v33 }
0x4044   :  { %8869 = vpow2.f32 %v6228_v41 }
0x4045   :  { %8871 = vpow2.f32 %v6231_v42 }
0x4046   :  { %8873 = vpow2.f32 %v6234_v35 }
0x404c   :  { %v8860_v16 = vpop.eup %8859 }
0x404d   :  { %v8862_v9 = vpop.eup %8861 }
0x404e   :  { %v6236_v46 = vadd.f32 %v8862_v9, %v8860_v16  ;;  %v8864_v24 = vpop.eup %8863 }
0x404f   :  { %v8866_v13 = vpop.eup %8865 }
0x4050   :  { %v6237_v62 = vadd.f32 %v8864_v24, %v6236_v46  ;;  %v8868_v18 = vpop.eup %8867 }
0x4051   :  { %v8870_v56 = vpop.eup %8869 }
0x4052   :  { %v6238_v23 = vadd.f32 %v8866_v13, %v6237_v62  ;;  %v8872_v58 = vpop.eup %8871 }
0x4053   :  { %v8874_v54 = vpop.eup %8873 }
0x4054   :  { %v6239_v25 = vadd.f32 %v8868_v18, %v6238_v23 }
0x4056   :  { %v6240_v27 = vadd.f32 %v8870_v56, %v6239_v25 }
0x4058   :  { %v6241_v38 = vadd.f32 %v8872_v58, %v6240_v27 }
0x405a   :  { %v6242_v63 = vadd.f32 %v8874_v54, %v6241_v38 }
0x405c   :  { %8875 = vrcp.f32 %v6242_v63 }
0x4069   :  { %v8876_v19 = vpop.eup %8875 }
0x406a   :  { %v6244_v17 = vmul.f32 %v8876_v19, %v8860_v16  ;;  %v6246_v8 = vmul.f32 %v8876_v19, %v8862_v9  ;;  %v6249_v29 = vmul.f32 %v8876_v19, %v8864_v24  ;;  %v6252_v11 = vmul.f32 %v8876_v19, %v8866_v13 }
0x406b   :  { %v6255_v36 = vmul.f32 %v8876_v19, %v8868_v18  ;;  %v6258_v42 = vmul.f32 %v8876_v19, %v8870_v56  ;;  %v6261_v62 = vmul.f32 %v8876_v19, %v8872_v58  ;;  %v6264_v24 = vmul.f32 %v8876_v19, %v8874_v54 }
0x406c   :  { %v6245_v37 = vmul.f32 %v6244_v17, %v10092_v40  ;;  %v6247_v43 = vmul.f32 %v6246_v8, %v10094_v44  ;;  %v6250_v33 = vmul.f32 %v6249_v29, %v10096_v51  ;;  %v6253_v2 = vmul.f32 %v6252_v11, %v10108_v15 }
0x406d   :  { %v6256_v46 = vmul.f32 %v6255_v36, %v10099_v20  ;;  %v6259_v9 = vmul.f32 %v6258_v42, %v10117_v49  ;;  %v6262_v25 = vmul.f32 %v6261_v62, %v10111_v21  ;;  %v6265_v27 = vmul.f32 %v6264_v24, %v10123_v47 }
0x406e   :  { %v6248_v1 = vadd.f32 %v6247_v43, %v6245_v37 }
0x4070   :  { %v6251_v41 = vadd.f32 %v6250_v33, %v6248_v1 }
0x4072   :  { %v6254_v35 = vadd.f32 %v6253_v2, %v6251_v41 }
0x4074   :  { %v6257_v16 = vadd.f32 %v6256_v46, %v6254_v35 }
0x4076   :  { %v6260_v23 = vadd.f32 %v6259_v9, %v6257_v16  ;;  %v6603_v16 = vrot.slane %v10847_v52, 6 }
0x4078   :  { %v6263_v13 = vadd.f32 %v6262_v25, %v6260_v23 }
0x407a   :  { %v6266_v38 = vadd.f32 %v6265_v27, %v6263_v13 }
0x407c   :  { %8522 = vmatmul.mubr.msk.f32.vlgmr.msra.gmra.mxu1 %vm524_vm3, %v6266_v38 }
0x407d   :  { %8525 = vmatpush3.msra.mxu1 %v10600_v0  ;;  %8526 = vmatprep.mubr.msk.f32.mxu1 %vm9309_vm2, %v11391_v39  ;;  %v10897_v0 = vld [vmem:[%s11323_s20 + $0x38] sm:$0xff] }
0x407e   :  { %8529 = vmatprep.subr.mxu1 %v11391_v39 }
0x413c   :  { %v6336_v18 = vpop.f32.mrf.mxu1 }
0x413d   :  { %v6337_v56 = vadd.f32 %v10606_v10, %v6336_v18  ;;  %v10906_v10 = vld [vmem:[%s11323_s20 + $0x30] sm:$0xff] }
0x413e   :  { %v8523_v58 = vpop.f32.mrf.mxu1 }
0x413f   :  { %8877 = vtanh.f32 %v6337_v56 }
0x414c   :  { %v8878_v54 = vpop.eup %8877 }
0x414d   :  { %6608 = vst.msk [vmem:[#allocation24 + $0xa] sm:$0x3] %vm4061_vm7, %v8878_v54  ;;  %7848 = vmatmul.mubr.msk.f32.vlgmr.msra.gmra.mxu0 %vm428_vm4, %v8878_v54  ;;  %8527 = vmatmul.mubr.msk.f32.vlgmr.msra.gmra.mxu1 %vm428_vm4, %v8878_v54 }
0x414e   :  { %6514 = vmatpush1.msra.mxu0 %v10615_v45  ;;  %6561 = vmatprep.mubr.f32.mxu0 %v11391_v39  ;;  %v10915_v45 = vld [vmem:[%s11323_s20 + $0x28] sm:$0xff] }
0x414f   :  { %6515 = vmatprep.subr.mxu0 %v10622_v50  ;;  %8530 = vmatpush3.msra.mxu1 %v10897_v0  ;;  %v10924_v50 = vld [vmem:[%s11323_s20 + $0x20] sm:$0xff] }
0x4150   :  { %6516 = vmatpush1.msra.mxu0 %v10629_v4  ;;  %8531 = vmatprep.subr.mxu1 %v11391_v39  ;;  %v10933_v4 = vld [vmem:[%s11323_s20 + $0x18] sm:$0xff] }
0x4151   :  { %6517 = vmatprep.subr.mxu0 %v10636_v59  ;;  %8532 = vmatpush3.msra.mxu1 %v10906_v10  ;;  %v10942_v59 = vld [vmem:[%s11323_s20 + $0x10] sm:$0xff] }
0x4152   :  { %6518 = vmatpush1.msra.mxu0 %v10643_v53  ;;  %8533 = vmatprep.subr.mxu1 %v11391_v39  ;;  %v10951_v53 = vld [vmem:[%s11323_s20 + $0x8] sm:$0xff] }
0x4153   :  { %6519 = vmatprep.subr.mxu0 %v10650_v3  ;;  %8534 = vmatpush3.msra.mxu1 %v10915_v45  ;;  %v10961_v3 = vld [vmem:[%s11323_s20] sm:$0xff] }
0x4154   :  { %6520 = vmatpush1.msra.mxu0 %v10657_v6  ;;  %8535 = vmatprep.subr.mxu1 %v11391_v39  ;;  %v10970_v6 = vld [vmem:[%s11324_s21 + $0x8] sm:$0xff] }
0x4155   :  { %6521 = vmatprep.subr.mxu0 %v10664_v60  ;;  %8536 = vmatpush3.msra.mxu1 %v10924_v50  ;;  %v10980_v60 = vld [vmem:[%s11324_s21] sm:$0xff] }
0x4156   :  { %6522 = vmatpush1.msra.mxu0 %v10671_v32  ;;  %8537 = vmatprep.subr.mxu1 %v11391_v39 }
0x4157   :  { %6523 = vmatprep.subr.mxu0 %v10678_v57  ;;  %8538 = vmatpush3.msra.mxu1 %v10933_v4 }
0x4158   :  { %6524 = vmatpush1.msra.mxu0 %v10685_v28  ;;  %8539 = vmatprep.subr.mxu1 %v11391_v39 }
0x4159   :  { %6525 = vmatprep.subr.mxu0 %v10692_v5  ;;  %8540 = vmatpush3.msra.mxu1 %v10942_v59 }
0x415a   :  { %6526 = vmatpush1.msra.mxu0 %v10699_v31  ;;  %8541 = vmatprep.subr.mxu1 %v11391_v39 }
0x415b   :  { %6527 = vmatprep.subr.mxu0 %v10706_v34  ;;  %8542 = vmatpush3.msra.mxu1 %v10951_v53 }
0x415c   :  { %6528 = vmatpush1.msra.mxu0 %v10713_v48  ;;  %8543 = vmatprep.subr.mxu1 %v11391_v39 }
0x415d   :  { %7850 = vmatmul.mubr.msk.f32.vlgmr.msra.gmra.mxu0 %vm3534_vm5, %v10851_v22  ;;  %8544 = vmatpush3.msra.mxu1 %v10961_v3 }
0x415e   :  { %8545 = vmatprep.mubr.msk.f32.mxu1 %vm9309_vm2, %v11391_v39  ;;  %8548 = vmatprep.subr.mxu0 %v11391_v39 }
0x415f   :  { %8549 = vmatpush3.msra.mxu0 %v10970_v6  ;;  %8552 = vmatprep.mubr.msk.f32.mxu0 %vm9309_vm2, %v11391_v39 }
0x4160   :  { %8550 = vmatprep.subr.mxu0 %v11391_v39  ;;  %6886 = vmatprep.subr.mxu1 %v10730_v7 }
0x4161   :  { %8551 = vmatpush3.msra.mxu0 %v10980_v60 }
0x4162   :  { %8555 = vmatprep.subr.mxu0 %v11391_v39 }
0x420d   :  { %v6410_v32 = vpop.f32.mrf.mxu0  ;;  %v6481_v57 = vpop.f32.mrf.mxu1 }
0x420e   :  { %v6568_v28 = vadd.f32 1.0, %v6481_v57  ;;  %v6485_v48 = vadd.f32 1.0, %v6410_v32  ;;  %v11006_v57 = vld [vmem:[%s11326_s23] sm:$0xff] }
0x420f   :  { %v6412_v5 = vpop.f32.mrf.mxu0  ;;  %v8528_v31 = vpop.f32.mrf.mxu1 }
0x4210   :  { %v6486_v34 = vadd.f32 1.0, %v6412_v5  ;;  %6572 = vrot.lane.b32.xlu1 %v6568_v28, %s9313_s22  ;;  %v6489_v7 = vrot.slane %v6485_v48, 6  ;;  %v11013_v28 = vld [vmem:[%s11320_s17 + $0x78] sm:$0xff] }
0x4212   :  { %6570 = vrot.lane.b32.xlu0 %v6486_v34, %s9313_s22  ;;  %v6493_v8 = vmul.f32 %v6489_v7, %v11404_v26  ;;  %v6490_v35 = vrot.slane %v6486_v34, 6 }
0x4214   :  { %v6495_v43 = vadd.f32 %v6493_v8, %v10288_v14  ;;  %v6494_v62 = vmul.f32 %v6490_v35, %v11405_v55 }
0x4216   :  { %v6496_v23 = vadd.f32 %v6494_v62, %v11406_v30 }
0x421d   :  { %v6563_v19 = vpop.f32.mrf.mxu0 }
0x421f   :  { %v6565_v2 = vpop.f32.mrf.mxu0 }
0x4282   :  { %v6573_v22 = vpop.permute.xlu1 %6572 }
0x4283   :  { %v6578_v42 = vmul.f32 %v6573_v22, %v6565_v2 }
0x4284   :  { %v6571_v63 = vpop.permute.xlu0 %6570 }
0x4285   :  { %v6574_v17 = vsel %vm3534_vm5, %v6571_v63, %v6573_v22  ;;  %v6580_v46 = vadd.f32 %v6578_v42, %v11393_v12 }
0x4286   :  { %v6577_v29 = vmul.f32 %v6574_v17, %v6563_v19 }
0x4287   :  { %v6592_v9 = vrot.slane %v6580_v46, 6 }
0x4288   :  { %v6579_v37 = vadd.f32 %v6577_v29, %v10290_v61 }
0x428a   :  { %v6582_v11 = vrot.slane %v6579_v37, 6 }
0x428c   :  { %v6584_v1 = vadd.f32 %v6582_v11, %v6495_v43 }
0x428e   :  { %v7851_v33 = vmul.f32 -1.442695, %v6584_v1 }
0x4290   :  { %8879 = vpow2.f32 %v7851_v33 }
0x429d   :  { %v8880_v36 = vpop.eup %8879 }
0x429e   :  { %v6588_v41 = vadd.f32 1.0, %v8880_v36 }
0x42a0   :  { %8881 = vrcp.f32 %v6588_v41 }
0x42ad   :  { %v8882_v24 = vpop.eup %8881 }
0x42ae   :  { %v6594_v25 = vmul.f32 %v8882_v24, %v6592_v9  ;;  %v6605_v13 = vmul.f32 %v8882_v24, %v6603_v16  ;;  %v6597_v18 = vsub.f32 1.0, %v8882_v24 }
0x42b0   :  { %v6595_v27 = vadd.f32 %v6594_v25, %v6496_v23 }
0x42b2   :  { %8883 = vtanh.f32 %v6595_v27 }
0x42bf   :  { %v8884_v38 = vpop.eup %8883 }
0x42c0   :  { %6599 = vrot.lane.b32.xlu1 %v8884_v38, %s9313_s22 }
0x4332   :  { %v6600_v56 = vpop.permute.xlu1 %6599 }
0x4333   :  { %v6602_v58 = vmul.f32 %v6600_v56, %v6597_v18 }
0x4335   :  { %v10995_v54 = vadd.f32 %v6605_v13, %v6602_v58 }
0x4337   :  { %v6610_v32 = vrot.slane %v10995_v54, 2 }
0x4339   :  { %6611 = vrot.lane.b32.xlu0 %v6610_v32, %s9313_s22 }
0x43ab   :  { %v10999_v52 = vpop.permute.xlu0 %6611 }
0x43ac   :  { %8546 = vmatmul.mubr.msk.f32.vlgmr.msra.gmra.mxu1 %vm3534_vm5, %v10999_v52 }
0x43ad   :  { %6887 = vmatpush1.msra.mxu1 %v11006_v57  ;;  %6920 = vmatprep.mubr.f32.mxu1 %v11391_v39 }
0x43ae   :  { %7025 = vmatprep.subr.mxu1 %v11013_v28 }
0x446c   :  { %v6681_v5 = vpop.f32.mrf.mxu1 }
0x446d   :  { %v6689_v31 = vmul.f32 %v6681_v5, %v10094_v44  ;;  %v6685_v34 = vmul.f32 %v6681_v5, %v10092_v40  ;;  %v6693_v63 = vmul.f32 %v6681_v5, %v10096_v51  ;;  %v6697_v19 = vmul.f32 %v6681_v5, %v10108_v15 }
0x446e   :  { %v8547_v48 = vpop.f32.mrf.mxu1  ;;  %v6701_v29 = vmul.f32 %v6681_v5, %v10099_v20  ;;  %v6705_v37 = vmul.f32 %v6681_v5, %v10117_v49  ;;  %v6709_v1 = vmul.f32 %v6681_v5, %v10111_v21  ;;  %v6713_v33 = vmul.f32 %v6681_v5, %v10123_v47 }
0x446f   :  { %v6690_v7 = vsel %vm3609_vm6, %v6689_v31, 0.0  ;;  %v6686_v22 = vsel %vm3609_vm6, %v6685_v34, 0.0  ;;  %v6694_v17 = vsel %vm3609_vm6, %v6693_v63, 0.0  ;;  %v6698_v8 = vsel %vm3609_vm6, %v6697_v19, 0.0 }
0x4470   :  { %6691 = vadd.xlane.f32.xlu0 %v6690_v7  ;;  %6687 = vadd.xlane.f32.xlu1 %v6686_v22  ;;  %v6702_v43 = vsel %vm3609_vm6, %v6701_v29, 0.0  ;;  %v6706_v11 = vsel %vm3609_vm6, %v6705_v37, 0.0  ;;  %v6710_v36 = vsel %vm3609_vm6, %v6709_v1, 0.0  ;;  %v6714_v41 = vsel %vm3609_vm6, %v6713_v33, 0.0 }
0x4474   :  { %6695 = vadd.xlane.f32.xlu0 %v6694_v17  ;;  %6699 = vadd.xlane.f32.xlu1 %v6698_v8 }
0x4478   :  { %6703 = vadd.xlane.f32.xlu0 %v6702_v43  ;;  %6707 = vadd.xlane.f32.xlu1 %v6706_v11 }
0x447c   :  { %6711 = vadd.xlane.f32.xlu0 %v6710_v36  ;;  %6715 = vadd.xlane.f32.xlu1 %v6714_v41 }
0x44f9   :  { %v6692_v2 = vpop.xlane.xlu0 %6691  ;;  %v6688_v42 = vpop.xlane.xlu1 %6687 }
0x44fa   :  { %v6717_v35 = vmax.f32 %v6688_v42, %v6692_v2 }
0x44fd   :  { %v6696_v46 = vpop.xlane.xlu0 %6695  ;;  %v6700_v62 = vpop.xlane.xlu1 %6699 }
0x44fe   :  { %v6718_v16 = vmax.f32 %v6717_v35, %v6696_v46 }
0x4500   :  { %v6719_v9 = vmax.f32 %v6718_v16, %v6700_v62 }
0x4501   :  { %v6704_v24 = vpop.xlane.xlu0 %6703  ;;  %v6708_v23 = vpop.xlane.xlu1 %6707 }
0x4502   :  { %v6720_v25 = vmax.f32 %v6719_v9, %v6704_v24 }
0x4504   :  { %v6721_v13 = vmax.f32 %v6720_v25, %v6708_v23 }
0x4505   :  { %v6712_v27 = vpop.xlane.xlu0 %6711  ;;  %v6716_v18 = vpop.xlane.xlu1 %6715 }
0x4506   :  { %v6722_v38 = vmax.f32 %v6721_v13, %v6712_v27 }
0x4508   :  { %v6723_v56 = vmax.f32 %v6722_v38, %v6716_v18 }
0x450a   :  { %v6724_v58 = vsub.f32 %v6688_v42, %v6723_v56  ;;  %v6727_v32 = vsub.f32 %v6692_v2, %v6723_v56  ;;  %v6730_v5 = vsub.f32 %v6696_v46, %v6723_v56  ;;  %v6733_v31 = vsub.f32 %v6700_v62, %v6723_v56 }
0x450b   :  { %v6736_v22 = vsub.f32 %v6704_v24, %v6723_v56  ;;  %v6739_v19 = vsub.f32 %v6708_v23, %v6723_v56  ;;  %v6742_v8 = vsub.f32 %v6712_v27, %v6723_v56  ;;  %v6745_v37 = vsub.f32 %v6716_v18, %v6723_v56 }
0x450c   :  { %v6725_v34 = vmul.f32 1.442695, %v6724_v58  ;;  %v6728_v48 = vmul.f32 1.442695, %v6727_v32  ;;  %v6731_v7 = vmul.f32 1.442695, %v6730_v5 }
0x450d   :  { %v6734_v63 = vmul.f32 1.442695, %v6733_v31  ;;  %v6737_v17 = vmul.f32 1.442695, %v6736_v22  ;;  %v6740_v29 = vmul.f32 1.442695, %v6739_v19 }
0x450e   :  { %8885 = vpow2.f32 %v6725_v34  ;;  %v6743_v43 = vmul.f32 1.442695, %v6742_v8  ;;  %v6746_v11 = vmul.f32 1.442695, %v6745_v37 }
0x450f   :  { %8887 = vpow2.f32 %v6728_v48 }
0x4510   :  { %8889 = vpow2.f32 %v6731_v7 }
0x4511   :  { %8891 = vpow2.f32 %v6734_v63 }
0x4512   :  { %8893 = vpow2.f32 %v6737_v17 }
0x4513   :  { %8895 = vpow2.f32 %v6740_v29 }
0x4514   :  { %8897 = vpow2.f32 %v6743_v43 }
0x4515   :  { %8899 = vpow2.f32 %v6746_v11 }
0x451b   :  { %v8886_v1 = vpop.eup %8885 }
0x451c   :  { %v8888_v33 = vpop.eup %8887 }
0x451d   :  { %v6748_v36 = vadd.f32 %v8888_v33, %v8886_v1  ;;  %v8890_v41 = vpop.eup %8889 }
0x451e   :  { %v8892_v42 = vpop.eup %8891 }
0x451f   :  { %v6749_v2 = vadd.f32 %v8890_v41, %v6748_v36  ;;  %v8894_v46 = vpop.eup %8893 }
0x4520   :  { %v8896_v16 = vpop.eup %8895 }
0x4521   :  { %v6750_v35 = vadd.f32 %v8892_v42, %v6749_v2  ;;  %v8898_v24 = vpop.eup %8897  ;;  %v11044_v2 = vld [vmem:[%s11326_s23 + $0x10] sm:$0xff] }
0x4522   :  { %v8900_v25 = vpop.eup %8899 }
0x4523   :  { %v6751_v62 = vadd.f32 %v8894_v46, %v6750_v35  ;;  %v11050_v35 = vld [vmem:[#allocation23] ss:$0 sm:$0xff] }
0x4525   :  { %v6752_v9 = vadd.f32 %v8896_v16, %v6751_v62 }
0x4527   :  { %v6753_v23 = vadd.f32 %v8898_v24, %v6752_v9  ;;  %v11059_v9 = vld [vmem:[%s11320_s17 + $0x70] sm:$0xff] }
0x4529   :  { %v6754_v13 = vadd.f32 %v8900_v25, %v6753_v23  ;;  %v11073_v23 = vld [vmem:[%s11320_s17 + $0x60] sm:$0xff] }
0x452b   :  { %8901 = vrcp.f32 %v6754_v13  ;;  %v11094_v13 = vld [vmem:[%s11320_s17 + $0x48] sm:$0xff] }
0x4538   :  { %v8902_v27 = vpop.eup %8901 }
0x4539   :  { %v6756_v38 = vmul.f32 %v8902_v27, %v8886_v1  ;;  %v6758_v18 = vmul.f32 %v8902_v27, %v8888_v33  ;;  %v6761_v56 = vmul.f32 %v8902_v27, %v8890_v41  ;;  %v6764_v5 = vmul.f32 %v8902_v27, %v8892_v42 }
0x453a   :  { %v6767_v48 = vmul.f32 %v8902_v27, %v8894_v46  ;;  %v6770_v63 = vmul.f32 %v8902_v27, %v8896_v16  ;;  %v6773_v8 = vmul.f32 %v8902_v27, %v8898_v24  ;;  %v6776_v43 = vmul.f32 %v8902_v27, %v8900_v25  ;;  %v11066_v24 = vld [vmem:[%s11320_s17 + $0x68] sm:$0xff]  ;;  %v11080_v25 = vld [vmem:[%s11320_s17 + $0x58] sm:$0xff] }
0x453b   :  { %v6757_v58 = vmul.f32 %v6756_v38, %v10092_v40  ;;  %v6759_v32 = vmul.f32 %v6758_v18, %v10094_v44  ;;  %v6762_v34 = vmul.f32 %v6761_v56, %v10096_v51  ;;  %v6765_v22 = vmul.f32 %v6764_v5, %v10108_v15  ;;  %v11108_v27 = vld [vmem:[%s11320_s17 + $0x38] sm:$0xff]  ;;  %v11122_v38 = vld [vmem:[%s11320_s17 + $0x28] sm:$0xff] }
0x453c   :  { %v6768_v17 = vmul.f32 %v6767_v48, %v10099_v20  ;;  %v6771_v37 = vmul.f32 %v6770_v63, %v10117_v49  ;;  %v6774_v1 = vmul.f32 %v6773_v8, %v10111_v21  ;;  %v6777_v36 = vmul.f32 %v6776_v43, %v10123_v47  ;;  %v11136_v18 = vld [vmem:[%s11320_s17 + $0x18] sm:$0xff]  ;;  %v11150_v56 = vld [vmem:[%s11320_s17 + $0x8] sm:$0xff] }
0x453d   :  { %v6760_v31 = vadd.f32 %v6759_v32, %v6757_v58 }
0x453f   :  { %v6763_v7 = vadd.f32 %v6762_v34, %v6760_v31 }
0x4541   :  { %v6766_v19 = vadd.f32 %v6765_v22, %v6763_v7 }
0x4543   :  { %v6769_v29 = vadd.f32 %v6768_v17, %v6766_v19 }
0x4545   :  { %v6772_v11 = vadd.f32 %v6771_v37, %v6769_v29 }
0x4547   :  { %v6775_v33 = vadd.f32 %v6774_v1, %v6772_v11 }
0x4549   :  { %v6778_v41 = vadd.f32 %v6777_v36, %v6775_v33 }
0x454b   :  { %8553 = vmatmul.mubr.msk.f32.vlgmr.msra.gmra.mxu0 %vm524_vm3, %v6778_v41 }
0x454c   :  { %8556 = vmatpush3.msra.mxu0 %v11044_v2  ;;  %8557 = vmatprep.mubr.msk.f32.mxu0 %vm9309_vm2, %v11391_v39 }
0x454d   :  { %8560 = vmatprep.subr.mxu0 %v11391_v39 }
0x460b   :  { %v6848_v42 = vpop.f32.mrf.mxu0 }
0x460c   :  { %v6849_v46 = vadd.f32 %v11050_v35, %v6848_v42 }
0x460d   :  { %v8554_v62 = vpop.f32.mrf.mxu0 }
0x460e   :  { %8903 = vtanh.f32 %v6849_v46  ;;  %v7115_v62 = vrot.slane %v10995_v54, 6 }
0x461b   :  { %v8904_v16 = vpop.eup %8903 }
0x461c   :  { %7120 = vst.msk [vmem:[#allocation24 + $0xc] sm:$0x3] %vm4061_vm7, %v8904_v16  ;;  %7854 = vmatmul.mubr.msk.f32.vlgmr.msra.gmra.mxu1 %vm428_vm4, %v8904_v16  ;;  %8558 = vmatmul.mubr.msk.f32.vlgmr.msra.gmra.mxu0 %vm428_vm4, %v8904_v16 }
0x461d   :  { %7026 = vmatpush1.msra.mxu1 %v11059_v9  ;;  %7073 = vmatprep.mubr.f32.mxu1 %v11391_v39 }
0x461e   :  { %7027 = vmatprep.subr.mxu1 %v11066_v24  ;;  %8561 = vmatpush3.msra.mxu0 %v10897_v0  ;;  %v11087_v0 = vld [vmem:[%s11320_s17 + $0x50] sm:$0xff] }
0x461f   :  { %7028 = vmatpush1.msra.mxu1 %v11073_v23  ;;  %8562 = vmatprep.subr.mxu0 %v11391_v39 }
0x4620   :  { %7029 = vmatprep.subr.mxu1 %v11080_v25  ;;  %8563 = vmatpush3.msra.mxu0 %v10906_v10  ;;  %v11101_v10 = vld [vmem:[%s11320_s17 + $0x40] sm:$0xff] }
0x4621   :  { %7030 = vmatpush1.msra.mxu1 %v11087_v0  ;;  %8564 = vmatprep.subr.mxu0 %v11391_v39 }
0x4622   :  { %7031 = vmatprep.subr.mxu1 %v11094_v13  ;;  %8565 = vmatpush3.msra.mxu0 %v10915_v45  ;;  %v11115_v45 = vld [vmem:[%s11320_s17 + $0x30] sm:$0xff] }
0x4623   :  { %7032 = vmatpush1.msra.mxu1 %v11101_v10  ;;  %8566 = vmatprep.subr.mxu0 %v11391_v39 }
0x4624   :  { %7033 = vmatprep.subr.mxu1 %v11108_v27  ;;  %8567 = vmatpush3.msra.mxu0 %v10924_v50  ;;  %v11129_v50 = vld [vmem:[%s11320_s17 + $0x20] sm:$0xff] }
0x4625   :  { %7034 = vmatpush1.msra.mxu1 %v11115_v45  ;;  %8568 = vmatprep.subr.mxu0 %v11391_v39 }
0x4626   :  { %7035 = vmatprep.subr.mxu1 %v11122_v38  ;;  %8569 = vmatpush3.msra.mxu0 %v10933_v4  ;;  %v11143_v4 = vld [vmem:[%s11320_s17 + $0x10] sm:$0xff] }
0x4627   :  { %7036 = vmatpush1.msra.mxu1 %v11129_v50  ;;  %8570 = vmatprep.subr.mxu0 %v11391_v39 }
0x4628   :  { %7037 = vmatprep.subr.mxu1 %v11136_v18  ;;  %8571 = vmatpush3.msra.mxu0 %v10942_v59  ;;  %v11157_v59 = vld [vmem:[%s11320_s17] sm:$0xff] }
0x4629   :  { %7038 = vmatpush1.msra.mxu1 %v11143_v4  ;;  %8572 = vmatprep.subr.mxu0 %v11391_v39 }
0x462a   :  { %7039 = vmatprep.subr.mxu1 %v11150_v56  ;;  %8573 = vmatpush3.msra.mxu0 %v10951_v53  ;;  %v8996_v53 = vld [vmem:[%s11326_s23 + $0x8] sm:$0xff] }
0x462b   :  { %7040 = vmatpush1.msra.mxu1 %v11157_v59  ;;  %8574 = vmatprep.subr.mxu0 %v11391_v39 }
0x462c   :  { %7856 = vmatmul.mubr.msk.f32.vlgmr.msra.gmra.mxu1 %vm3534_vm5, %v10999_v52  ;;  %8575 = vmatpush3.msra.mxu0 %v10961_v3 }
0x462d   :  { %8576 = vmatprep.mubr.msk.f32.mxu0 %vm9309_vm2, %v11391_v39  ;;  %8579 = vmatprep.subr.mxu1 %v11391_v39 }
0x462e   :  { %8580 = vmatpush3.msra.mxu1 %v10970_v6  ;;  %8583 = vmatprep.mubr.msk.f32.mxu1 %vm9309_vm2, %v11391_v39 }
0x462f   :  { %8581 = vmatprep.subr.mxu1 %v11391_v39  ;;  %7398 = vmatprep.subr.mxu0 %v8996_v53 }
0x4630   :  { %8582 = vmatpush3.msra.mxu1 %v10980_v60 }
0x4631   :  { %8586 = vmatprep.subr.mxu1 %v11391_v39 }
0x46dc   :  { %v6922_v3 = vpop.f32.mrf.mxu1  ;;  %v6993_v52 = vpop.f32.mrf.mxu0 }
0x46dd   :  { %v7080_v58 = vadd.f32 1.0, %v6993_v52  ;;  %v6997_v31 = vadd.f32 1.0, %v6922_v3 }
0x46de   :  { %v6924_v32 = vpop.f32.mrf.mxu1  ;;  %v8559_v5 = vpop.f32.mrf.mxu0 }
0x46df   :  { %v6998_v6 = vadd.f32 1.0, %v6924_v32  ;;  %7084 = vrot.lane.b32.xlu1 %v7080_v58, %s9313_s22  ;;  %v7001_v34 = vrot.slane %v6997_v31, 4 }
0x46e1   :  { %7082 = vrot.lane.b32.xlu0 %v6998_v6, %s9313_s22  ;;  %v7005_v60 = vmul.f32 %v7001_v34, %v11404_v26  ;;  %v7002_v41 = vrot.slane %v6998_v6, 4 }
0x46e3   :  { %v7007_v8 = vadd.f32 %v7005_v60, %v10288_v14  ;;  %v7006_v46 = vmul.f32 %v7002_v41, %v11405_v55 }
0x46e5   :  { %v7008_v3 = vadd.f32 %v7006_v46, %v11406_v30 }
0x46ec   :  { %v7075_v22 = vpop.f32.mrf.mxu1 }
0x46ee   :  { %v7077_v33 = vpop.f32.mrf.mxu1 }
0x4751   :  { %v7085_v48 = vpop.permute.xlu1 %7084 }
0x4752   :  { %v7090_v36 = vmul.f32 %v7085_v48, %v7077_v33 }
0x4753   :  { %v7083_v7 = vpop.permute.xlu0 %7082 }
0x4754   :  { %v7086_v63 = vsel %vm3534_vm5, %v7083_v7, %v7085_v48  ;;  %v7092_v42 = vadd.f32 %v7090_v36, %v11393_v12 }
0x4755   :  { %v7089_v19 = vmul.f32 %v7086_v63, %v7075_v22 }
0x4756   :  { %v7104_v16 = vrot.slane %v7092_v42, 4 }
0x4757   :  { %v7091_v17 = vadd.f32 %v7089_v19, %v10290_v61 }
0x4759   :  { %v7094_v29 = vrot.slane %v7091_v17, 4 }
0x475b   :  { %v7096_v37 = vadd.f32 %v7094_v29, %v7007_v8 }
0x475d   :  { %v7857_v43 = vmul.f32 -1.442695, %v7096_v37 }
0x475f   :  { %8905 = vpow2.f32 %v7857_v43 }
0x476c   :  { %v8906_v11 = vpop.eup %8905 }
0x476d   :  { %v7100_v1 = vadd.f32 1.0, %v8906_v11 }
0x476f   :  { %8907 = vrcp.f32 %v7100_v1 }
0x477c   :  { %v8908_v53 = vpop.eup %8907 }
0x477d   :  { %v7106_v52 = vmul.f32 %v8908_v53, %v7104_v16  ;;  %v7117_v58 = vmul.f32 %v8908_v53, %v7115_v62  ;;  %v7109_v31 = vsub.f32 1.0, %v8908_v53 }
0x477f   :  { %v7107_v32 = vadd.f32 %v7106_v52, %v7008_v3 }
0x4781   :  { %8909 = vtanh.f32 %v7107_v32 }
0x478e   :  { %v8910_v5 = vpop.eup %8909 }
0x478f   :  { %7111 = vrot.lane.b32.xlu1 %v8910_v5, %s9313_s22 }
0x4801   :  { %v7112_v34 = vpop.permute.xlu1 %7111 }
0x4802   :  { %v7114_v6 = vmul.f32 %v7112_v34, %v7109_v31 }
0x4804   :  { %v11187_v48 = vadd.f32 %v7117_v58, %v7114_v6 }
0x4806   :  { %v7122_v7 = vrot.slane %v11187_v48, 4 }
0x4808   :  { %7123 = vrot.lane.b32.xlu0 %v7122_v7, %s9313_s22 }
0x487a   :  { %v11191_v54 = vpop.permute.xlu0 %7123 }
0x487b   :  { %8577 = vmatmul.mubr.msk.f32.vlgmr.msra.gmra.mxu0 %vm3534_vm5, %v11191_v54 }
0x487c   :  { %7399 = vmatpush1.msra.mxu0 %v11006_v57  ;;  %7432 = vmatprep.mubr.f32.mxu0 %v11391_v39 }
0x487d   :  { %7537 = vmatprep.subr.mxu0 %v11013_v28 }
0x493b   :  { %v7193_v22 = vpop.f32.mrf.mxu0 }
0x493c   :  { %v7201_v63 = vmul.f32 %v7193_v22, %v10094_v44  ;;  %v7197_v60 = vmul.f32 %v7193_v22, %v10092_v40  ;;  %v7205_v29 = vmul.f32 %v7193_v22, %v10096_v51  ;;  %v7209_v37 = vmul.f32 %v7193_v22, %v10108_v15 }
0x493d   :  { %v8578_v19 = vpop.f32.mrf.mxu0  ;;  %v7213_v43 = vmul.f32 %v7193_v22, %v10099_v20  ;;  %v7217_v11 = vmul.f32 %v7193_v22, %v10117_v49  ;;  %v7221_v36 = vmul.f32 %v7193_v22, %v10111_v21  ;;  %v7225_v41 = vmul.f32 %v7193_v22, %v10123_v47 }
0x493e   :  { %v7202_v17 = vsel %vm3609_vm6, %v7201_v63, 0.0  ;;  %v7198_v8 = vsel %vm3609_vm6, %v7197_v60, 0.0  ;;  %v7206_v57 = vsel %vm3609_vm6, %v7205_v29, 0.0  ;;  %v7210_v28 = vsel %vm3609_vm6, %v7209_v37, 0.0 }
0x493f   :  { %7203 = vadd.xlane.f32.xlu0 %v7202_v17  ;;  %7199 = vadd.xlane.f32.xlu1 %v7198_v8  ;;  %v7214_v1 = vsel %vm3609_vm6, %v7213_v43, 0.0  ;;  %v7218_v33 = vsel %vm3609_vm6, %v7217_v11, 0.0  ;;  %v7222_v42 = vsel %vm3609_vm6, %v7221_v36, 0.0  ;;  %v7226_v46 = vsel %vm3609_vm6, %v7225_v41, 0.0 }
0x4943   :  { %7207 = vadd.xlane.f32.xlu0 %v7206_v57  ;;  %7211 = vadd.xlane.f32.xlu1 %v7210_v28 }
0x4947   :  { %7215 = vadd.xlane.f32.xlu0 %v7214_v1  ;;  %7219 = vadd.xlane.f32.xlu1 %v7218_v33 }
0x494b   :  { %7223 = vadd.xlane.f32.xlu0 %v7222_v42  ;;  %7227 = vadd.xlane.f32.xlu1 %v7226_v46 }
0x49c8   :  { %v7204_v62 = vpop.xlane.xlu0 %7203  ;;  %v7200_v16 = vpop.xlane.xlu1 %7199 }
0x49c9   :  { %v7229_v53 = vmax.f32 %v7200_v16, %v7204_v62 }
0x49cc   :  { %v7208_v3 = vpop.xlane.xlu0 %7207  ;;  %v7212_v52 = vpop.xlane.xlu1 %7211 }
0x49cd   :  { %v7230_v58 = vmax.f32 %v7229_v53, %v7208_v3 }
0x49cf   :  { %v7231_v32 = vmax.f32 %v7230_v58, %v7212_v52 }
0x49d0   :  { %v7216_v5 = vpop.xlane.xlu0 %7215  ;;  %v7220_v31 = vpop.xlane.xlu1 %7219 }
0x49d1   :  { %v7232_v34 = vmax.f32 %v7231_v32, %v7216_v5 }
0x49d3   :  { %v7233_v6 = vmax.f32 %v7232_v34, %v7220_v31 }
0x49d4   :  { %v7224_v7 = vpop.xlane.xlu0 %7223  ;;  %v7228_v63 = vpop.xlane.xlu1 %7227 }
0x49d5   :  { %v7234_v22 = vmax.f32 %v7233_v6, %v7224_v7 }
0x49d7   :  { %v7235_v60 = vmax.f32 %v7234_v22, %v7228_v63 }
0x49d9   :  { %v7236_v19 = vsub.f32 %v7200_v16, %v7235_v60  ;;  %v7239_v17 = vsub.f32 %v7204_v62, %v7235_v60  ;;  %v7242_v8 = vsub.f32 %v7208_v3, %v7235_v60  ;;  %v7245_v29 = vsub.f32 %v7212_v52, %v7235_v60 }
0x49da   :  { %v7248_v43 = vsub.f32 %v7216_v5, %v7235_v60  ;;  %v7251_v1 = vsub.f32 %v7220_v31, %v7235_v60  ;;  %v7254_v36 = vsub.f32 %v7224_v7, %v7235_v60  ;;  %v7257_v42 = vsub.f32 %v7228_v63, %v7235_v60 }
0x49db   :  { %v7237_v37 = vmul.f32 1.442695, %v7236_v19  ;;  %v7240_v57 = vmul.f32 1.442695, %v7239_v17  ;;  %v7243_v28 = vmul.f32 1.442695, %v7242_v8 }
0x49dc   :  { %v7246_v11 = vmul.f32 1.442695, %v7245_v29  ;;  %v7249_v33 = vmul.f32 1.442695, %v7248_v43  ;;  %v7252_v41 = vmul.f32 1.442695, %v7251_v1 }
0x49dd   :  { %8911 = vpow2.f32 %v7237_v37  ;;  %v7255_v46 = vmul.f32 1.442695, %v7254_v36  ;;  %v7258_v62 = vmul.f32 1.442695, %v7257_v42 }
0x49de   :  { %8913 = vpow2.f32 %v7240_v57 }
0x49df   :  { %8915 = vpow2.f32 %v7243_v28 }
0x49e0   :  { %8917 = vpow2.f32 %v7246_v11 }
0x49e1   :  { %8919 = vpow2.f32 %v7249_v33 }
0x49e2   :  { %8921 = vpow2.f32 %v7252_v41 }
0x49e3   :  { %8923 = vpow2.f32 %v7255_v46 }
0x49e4   :  { %8925 = vpow2.f32 %v7258_v62 }
0x49ea   :  { %v8912_v16 = vpop.eup %8911 }
0x49eb   :  { %v8914_v53 = vpop.eup %8913 }
0x49ec   :  { %v7260_v3 = vadd.f32 %v8914_v53, %v8912_v16  ;;  %v8916_v52 = vpop.eup %8915 }
0x49ed   :  { %v8918_v32 = vpop.eup %8917 }
0x49ee   :  { %v7261_v58 = vadd.f32 %v8916_v52, %v7260_v3  ;;  %v8920_v31 = vpop.eup %8919 }
0x49ef   :  { %v8922_v6 = vpop.eup %8921 }
0x49f0   :  { %v7262_v5 = vadd.f32 %v8918_v32, %v7261_v58  ;;  %v8924_v22 = vpop.eup %8923 }
0x49f1   :  { %v8926_v63 = vpop.eup %8925 }
0x49f2   :  { %v7263_v34 = vadd.f32 %v8920_v31, %v7262_v5 }
0x49f4   :  { %v7264_v7 = vadd.f32 %v8922_v6, %v7263_v34 }
0x49f6   :  { %v7265_v19 = vadd.f32 %v8924_v22, %v7264_v7 }
0x49f8   :  { %v7266_v60 = vadd.f32 %v8926_v63, %v7265_v19 }
0x49fa   :  { %8927 = vrcp.f32 %v7266_v60 }
0x4a07   :  { %v8928_v17 = vpop.eup %8927 }
0x4a08   :  { %v7268_v8 = vmul.f32 %v8928_v17, %v8912_v16  ;;  %v7270_v29 = vmul.f32 %v8928_v17, %v8914_v53  ;;  %v7273_v37 = vmul.f32 %v8928_v17, %v8916_v52  ;;  %v7276_v43 = vmul.f32 %v8928_v17, %v8918_v32 }
0x4a09   :  { %v7279_v33 = vmul.f32 %v8928_v17, %v8920_v31  ;;  %v7282_v42 = vmul.f32 %v8928_v17, %v8922_v6  ;;  %v7285_v3 = vmul.f32 %v8928_v17, %v8924_v22  ;;  %v7288_v52 = vmul.f32 %v8928_v17, %v8926_v63 }
0x4a0a   :  { %v7269_v57 = vmul.f32 %v7268_v8, %v10092_v40  ;;  %v7271_v28 = vmul.f32 %v7270_v29, %v10094_v44  ;;  %v7274_v1 = vmul.f32 %v7273_v37, %v10096_v51  ;;  %v7277_v41 = vmul.f32 %v7276_v43, %v10108_v15  ;;  %v7640_v29 = vld [vmem:[%s11327_s24 + $0x38] sm:$0xff]  ;;  %v7633_v43 = vld [vmem:[%s11327_s24] sm:$0xff] }
0x4a0b   :  { %v7280_v62 = vmul.f32 %v7279_v33, %v10099_v20  ;;  %v7283_v53 = vmul.f32 %v7282_v42, %v10117_v49  ;;  %v7286_v44 = vmul.f32 %v7285_v3, %v10111_v21  ;;  %v7289_v32 = vmul.f32 %v7288_v52, %v10123_v47  ;;  %v7636_v37 = vld [vmem:[%s11327_s24 + $0x18] sm:$0xff] }
0x4a0c   :  { %v7272_v11 = vadd.f32 %v7271_v28, %v7269_v57  ;;  %v7635_v57 = vld [vmem:[%s11327_s24 + $0x10] sm:$0xff]  ;;  %v7634_v28 = vld [vmem:[%s11327_s24 + $0x8] sm:$0xff] }
0x4a0e   :  { %v7275_v36 = vadd.f32 %v7274_v1, %v7272_v11 }
0x4a10   :  { %v7278_v46 = vadd.f32 %v7277_v41, %v7275_v36 }
0x4a12   :  { %v7281_v16 = vadd.f32 %v7280_v62, %v7278_v46 }
0x4a14   :  { %v7284_v40 = vadd.f32 %v7283_v53, %v7281_v16 }
0x4a16   :  { %v7287_v58 = vadd.f32 %v7286_v44, %v7284_v40 }
0x4a18   :  { %v7290_v51 = vadd.f32 %v7289_v32, %v7287_v58 }
0x4a1a   :  { %8584 = vmatmul.mubr.msk.f32.vlgmr.msra.gmra.mxu1 %vm524_vm3, %v7290_v51 }
0x4a1b   :  { %8587 = vmatpush3.msra.mxu1 %v11044_v2  ;;  %8588 = vmatprep.mubr.msk.f32.mxu1 %vm9309_vm2, %v11391_v39 }
0x4a1c   :  { %8591 = vmatprep.subr.mxu1 %v11391_v39 }
0x4ada   :  { %v7360_v20 = vpop.f32.mrf.mxu1 }
0x4adb   :  { %v7361_v15 = vadd.f32 %v11050_v35, %v7360_v20 }
0x4adc   :  { %v8585_v49 = vpop.f32.mrf.mxu1 }
0x4add   :  { %8929 = vtanh.f32 %v7361_v15 }
0x4aea   :  { %v8930_v5 = vpop.eup %8929 }
0x4aeb   :  { %7632 = vst.msk [vmem:[#allocation24 + $0xe] sm:$0x3] %vm4061_vm7, %v8930_v5  ;;  %7860 = vmatmul.mubr.msk.f32.vlgmr.msra.gmra.mxu0 %vm428_vm4, %v8930_v5  ;;  %8589 = vmatmul.mubr.msk.f32.vlgmr.msra.gmra.mxu1 %vm428_vm4, %v8930_v5 }
0x4aec   :  { %7538 = vmatpush1.msra.mxu0 %v11059_v9  ;;  %7585 = vmatprep.mubr.f32.mxu0 %v11391_v39 }
0x4aed   :  { %7539 = vmatprep.subr.mxu0 %v11066_v24  ;;  %8607 = vmatprep.mubr.msk.f32.mxu1 %vm9309_vm2, %v11391_v39 }
0x4aee   :  { %7540 = vmatpush1.msra.mxu0 %v11073_v23  ;;  %8592 = vmatpush3.msra.mxu1 %v7640_v29 }
0x4aef   :  { %7541 = vmatprep.subr.mxu0 %v11080_v25  ;;  %8593 = vmatprep.subr.mxu1 %v11391_v39 }
0x4af0   :  { %7542 = vmatpush1.msra.mxu0 %v11087_v0 }
0x4af1   :  { %7543 = vmatprep.subr.mxu0 %v11094_v13 }
0x4af2   :  { %7544 = vmatpush1.msra.mxu0 %v11101_v10 }
0x4af3   :  { %7545 = vmatprep.subr.mxu0 %v11108_v27 }
0x4af4   :  { %7546 = vmatpush1.msra.mxu0 %v11115_v45 }
0x4af5   :  { %7547 = vmatprep.subr.mxu0 %v11122_v38 }
0x4af6   :  { %7548 = vmatpush1.msra.mxu0 %v11129_v50 }
0x4af7   :  { %7549 = vmatprep.subr.mxu0 %v11136_v18 }
0x4af8   :  { %7550 = vmatpush1.msra.mxu0 %v11143_v4 }
0x4af9   :  { %7551 = vmatprep.subr.mxu0 %v11150_v56 }
0x4afa   :  { %7552 = vmatpush1.msra.mxu0 %v11157_v59 }
0x4afb   :  { %7862 = vmatmul.mubr.msk.f32.vlgmr.msra.gmra.mxu0 %vm3534_vm5, %v11191_v54 }
0x4bab   :  { %v7434_v21 = vpop.f32.mrf.mxu0  ;;  %v7505_v47 = vpop.f32.mrf.mxu1 }
0x4bac   :  { %v7592_v2 = vadd.f32 1.0, %v7505_v47  ;;  %v7509_v23 = vadd.f32 1.0, %v7434_v21 }
0x4bad   :  { %v7436_v35 = vpop.f32.mrf.mxu0  ;;  %v8590_v9 = vpop.f32.mrf.mxu1 }
0x4bae   :  { %v7510_v24 = vadd.f32 1.0, %v7436_v35  ;;  %7596 = vrot.lane.b32.xlu1 %v7592_v2, %s9313_s22  ;;  %v7513_v25 = vrot.slane %v7509_v23, 2 }
0x4bb0   :  { %7594 = vrot.lane.b32.xlu0 %v7510_v24, %s9313_s22  ;;  %v7517_v45 = vmul.f32 %v7513_v25, %v11404_v26  ;;  %v7514_v7 = vrot.slane %v7510_v24, 2  ;;  %v7627_v26 = vrot.slane %v11187_v48, 6 }
0x4bb2   :  { %v7519_v18 = vadd.f32 %v7517_v45, %v10288_v14  ;;  %v7518_v19 = vmul.f32 %v7514_v7, %v11405_v55  ;;  %v7638_v55 = vld [vmem:[%s11327_s24 + $0x28] sm:$0xff] }
0x4bb4   :  { %v7520_v14 = vadd.f32 %v7518_v19, %v11406_v30  ;;  %v7637_v30 = vld [vmem:[%s11327_s24 + $0x20] sm:$0xff] }
0x4bbb   :  { %v7587_v10 = vpop.f32.mrf.mxu0 }
0x4bbd   :  { %v7589_v34 = vpop.f32.mrf.mxu0 }
0x4c20   :  { %v7597_v0 = vpop.permute.xlu1 %7596 }
0x4c21   :  { %v7602_v6 = vmul.f32 %v7597_v0, %v7589_v34 }
0x4c22   :  { %v7595_v13 = vpop.permute.xlu0 %7594 }
0x4c23   :  { %v7598_v27 = vsel %vm3534_vm5, %v7595_v13, %v7597_v0  ;;  %v7604_v22 = vadd.f32 %v7602_v6, %v11393_v12  ;;  %v7639_v12 = vld [vmem:[%s11327_s24 + $0x30] sm:$0xff] }
0x4c24   :  { %v7601_v38 = vmul.f32 %v7598_v27, %v7587_v10  ;;  %8594 = vmatpush3.msra.mxu1 %v7639_v12 }
0x4c25   :  { %v7616_v63 = vrot.slane %v7604_v22, 2  ;;  %8595 = vmatprep.subr.mxu1 %v11391_v39 }
0x4c26   :  { %v7603_v50 = vadd.f32 %v7601_v38, %v10290_v61  ;;  %8596 = vmatpush3.msra.mxu1 %v7638_v55 }
0x4c27   :  { %8597 = vmatprep.subr.mxu1 %v11391_v39 }
0x4c28   :  { %v7606_v4 = vrot.slane %v7603_v50, 2  ;;  %8598 = vmatpush3.msra.mxu1 %v7637_v30 }
0x4c29   :  { %8599 = vmatprep.subr.mxu1 %v11391_v39 }
0x4c2a   :  { %v7608_v56 = vadd.f32 %v7606_v4, %v7519_v18  ;;  %8600 = vmatpush3.msra.mxu1 %v7636_v37 }
0x4c2b   :  { %8601 = vmatprep.subr.mxu1 %v11391_v39 }
0x4c2c   :  { %v7863_v59 = vmul.f32 -1.442695, %v7608_v56  ;;  %8602 = vmatpush3.msra.mxu1 %v7635_v57 }
0x4c2d   :  { %8603 = vmatprep.subr.mxu1 %v11391_v39 }
0x4c2e   :  { %8931 = vpow2.f32 %v7863_v59  ;;  %8604 = vmatpush3.msra.mxu1 %v7634_v28 }
0x4c2f   :  { %8605 = vmatprep.subr.mxu1 %v11391_v39 }
0x4c30   :  { %8606 = vmatpush3.msra.mxu1 %v7633_v43 }
0x4c3b   :  { %v8932_v54 = vpop.eup %8931 }
0x4c3c   :  { %v7612_v31 = vadd.f32 1.0, %v8932_v54 }
0x4c3e   :  { %8933 = vrcp.f32 %v7612_v31 }
0x4c4b   :  { %v8934_v61 = vpop.eup %8933 }
0x4c4c   :  { %v7618_v60 = vmul.f32 %v8934_v61, %v7616_v63  ;;  %v7629_v17 = vmul.f32 %v8934_v61, %v7627_v26  ;;  %v7621_v11 = vsub.f32 1.0, %v8934_v61 }
0x4c4e   :  { %v7619_v8 = vadd.f32 %v7618_v60, %v7520_v14 }
0x4c50   :  { %8935 = vtanh.f32 %v7619_v8 }
0x4c5d   :  { %v8936_v48 = vpop.eup %8935 }
0x4c5e   :  { %7623 = vrot.lane.b32.xlu1 %v8936_v48, %s9313_s22 }
0x4cd0   :  { %v7624_v1 = vpop.permute.xlu1 %7623 }
0x4cd1   :  { %v7626_v33 = vmul.f32 %v7624_v1, %v7621_v11 }
0x4cd3   :  { %v7630_v36 = vadd.f32 %v7629_v17, %v7626_v33 }
0x4cd5   :  { %v7649_v41 = vrot.slane %v7630_v36, 6 }
0x4cd7   :  { %7650 = vrot.lane.b32.xlu0 %v7649_v41, %s9313_s22 }
0x4d49   :  { %v7651_v42 = vpop.permute.xlu0 %7650 }
0x4d4a   :  { %8608 = vmatmul.mubr.msk.f32.vlgmr.msra.gmra.mxu1 %vm3534_vm5, %v7651_v42 }
0x4d4b   :  { %9268 = shalt.err (!%p9265_p13)
}
0x4d4c   :  { %s9315_s24 = smov 2   ;;  %v7864_v39 = vld [vmem:[#allocation2] ss:$0 sm:$0xff]  ;;  %vm7724_vm8 = vcmask 1024  }
0x4d4d   :  { %7739 = dma.vmem_to_hbm [thread:$0]  %s7734_s11, 256, %s11330_s27, [#allocation5], %s9311_s28, %s9311_s28, %s9315_s24  }
0x4e0a   :  { %v7720_v46 = vpop.f32.mrf.mxu1 }
0x4e0b   :  { %v7721_v62 = vadd.f32 %v7864_v39, %v7720_v46 }
0x4e0c   :  { %v8609_v3 = vpop.f32.mrf.mxu1 }
0x4e0d   :  { %7725 = vst.msk [vmem:[%s11329_s26] sm:$0x3] %vm7724_vm8, %v7721_v62 }
0x4e0e   :  { %9291 = dma.done.wait [#allocation5], 256  }
0x4e0f   :  { %9292 = vsyncadd [#allocation5], 4294967040 }
0x4e10   :  { %7745 = vsyncpa [#allocation4], 1 }
0x4e11   :  { %7746 = vsyncpa [#allocation7], 1 }
0x4e12   :  { %7747 = vsyncpa [#allocation10], 1 }
0x4e13   :  { %7748 = vsyncpa [#allocation13], 1 }
0x4e14   :  { %7749 = vsyncpa [#allocation16], 1 }
0x4e15   :  { %7750 = vsyncpa [#allocation19], 1 }
0x4e16   :  { %7751 = vsyncpa [#allocation22], 1 }
0x4e17   :  { %7752 = vsyncpa [#allocation5], 1 }

</bundles_post_ra>
